<compile_context>
chip_gen: v7x
topology: tpu7x:2x2x1
jax: 0.10.0
libtpu: 0.0.40
codegen_flags: <defaults>
</compile_context>

<pallas_src>
import jax
import jax.numpy as jnp
from jax.experimental import pallas as pl
from jax.experimental.pallas import tpu as pltpu

# --------------------------- model hyperparameters ---------------------------
VOCAB_SIZE = 32
EMBED_SIZE = 32
HIDDEN_SIZE = 140      # model3: 140 hidden cells
NUM_LAYERS = 2         # model3: 2 layers
BATCH = 2
SEQ = 8


# ------------------------------ fused forward kernel -------------------------
def fused_forward_kernel(tok_ref, emb_ref, h0_ref, c0_ref,
                         wih0_ref, whh0_ref, b0_ref,
                         wih1_ref, whh1_ref, b1_ref,
                         linw_ref, linb_ref,
                         logits_ref, hN_ref, cN_ref,
                         out_sc):
    """Embedding -> 2-layer LSTM -> Linear, all in VMEM, one invocation."""
    TB = tok_ref.shape[0]          # T * B (time-major, b minor)
    V, E = emb_ref.shape
    L, B, H = h0_ref.shape
    T = TB // B
    f32 = jnp.float32

    # ---------------- embedding: one-hot gather via the MXU ----------------
    tok = tok_ref[...]                                               # (T*B, 1) int32
    onehot = (tok == jax.lax.broadcasted_iota(jnp.int32, (TB, V), 1)).astype(f32)
    x_all = jnp.dot(onehot, emb_ref[...], preferred_element_type=f32)  # (T*B, E)

    # ---- layer-0 input projection (+ combined bias), hoisted out of loop ----
    g0_all = jnp.dot(x_all, wih0_ref[...], preferred_element_type=f32) + b0_ref[...]

    h1 = h0_ref[0]
    c1 = c0_ref[0]
    h2 = h0_ref[1]
    c2 = c0_ref[1]

    def lstm_update(gates, c_prev):
        # PyTorch gate order along the fused 4H axis: i, f, g, o.
        i_g = jax.nn.sigmoid(gates[:, 0:H])
        f_g = jax.nn.sigmoid(gates[:, H:2 * H])
        g_g = jnp.tanh(gates[:, 2 * H:3 * H])
        o_g = jax.nn.sigmoid(gates[:, 3 * H:4 * H])
        c_new = f_g * c_prev + i_g * g_g
        h_new = o_g * jnp.tanh(c_new)
        return h_new, c_new

    for t in range(T):             # T is static -> fully unrolled for the scheduler
        # ---- layer 0: hoisted input term + recurrent matmul (one fused 4H dot)
        gates0 = (g0_all[t * B:(t + 1) * B, :]
                  + jnp.dot(h1, whh0_ref[...], preferred_element_type=f32))
        h1, c1 = lstm_update(gates0, c1)

        # ---- layer 1: two fused 4H dots (input h1 is time-dependent)
        gates1 = (jnp.dot(h1, wih1_ref[...], preferred_element_type=f32)
                  + jnp.dot(h2, whh1_ref[...], preferred_element_type=f32)
                  + b1_ref[...])
        h2, c2 = lstm_update(gates1, c2)

        # batch_first flatten order (PyTorch out.view(B*T, H)): row = b*T + t
        for b in range(B):
            out_sc[b * T + t:b * T + t + 1, :] = h2[b:b + 1, :]

    # ------------- final Linear on the VMEM-resident (B*T, H) slab -----------
    logits_ref[...] = (jnp.dot(out_sc[...], linw_ref[...],
                               preferred_element_type=f32) + linb_ref[...])

    # ------------------------------ final states -----------------------------
    hN_ref[0] = h1
    hN_ref[1] = h2
    cN_ref[0] = c1
    cN_ref[1] = c2


def fused_forward(tok_tm, embed, h0, c0, wih0, whh0, b0, wih1, whh1, b1,
                  lin_w, lin_b):
    """tok_tm: (T*B, 1) int32 time-major tokens.  Returns (logits, h_n, c_n)."""
    TB = tok_tm.shape[0]
    L, B, H = h0.shape
    V = lin_w.shape[1]
    vm = pl.BlockSpec(memory_space=pltpu.MemorySpace.VMEM)
    return pl.pallas_call(
        fused_forward_kernel,
        out_shape=(jax.ShapeDtypeStruct((TB, V), jnp.float32),
                   jax.ShapeDtypeStruct((L, B, H), jnp.float32),
                   jax.ShapeDtypeStruct((L, B, H), jnp.float32)),
        in_specs=[vm] * 12,
        out_specs=(vm, vm, vm),
        scratch_shapes=[pltpu.VMEM((TB, H), jnp.float32)],   # (B*T, H) hidden slab
    )(tok_tm, embed, h0, c0, wih0, whh0, b0, wih1, whh1, b1, lin_w, lin_b)


# --------------------------- parameter initialization --------------------------
def init_params(key):
    keys = jax.random.split(key, 2 + 4 * NUM_LAYERS)
    k = iter(keys)

    params = {}
    # Embedding: uniform(-0.1, 0.1)  (matches init_weights)
    params["embed"] = jax.random.uniform(
        next(k), (VOCAB_SIZE, EMBED_SIZE), jnp.float32, -0.1, 0.1)

    # LSTM: PyTorch default uniform(-1/sqrt(H), 1/sqrt(H)); fused (In,4H)/(H,4H)
    # layouts with gate order i,f,g,o along the 4H axis; combined bias b_ih+b_hh.
    bound = 1.0 / float(jnp.sqrt(jnp.float32(HIDDEN_SIZE)))
    wih, whh, bias = [], [], []
    for layer in range(NUM_LAYERS):
        in_sz = EMBED_SIZE if layer == 0 else HIDDEN_SIZE
        wih.append(jax.random.uniform(
            next(k), (in_sz, 4 * HIDDEN_SIZE), jnp.float32, -bound, bound))
        whh.append(jax.random.uniform(
            next(k), (HIDDEN_SIZE, 4 * HIDDEN_SIZE), jnp.float32, -bound, bound))
        b_ih = jax.random.uniform(
            next(k), (1, 4 * HIDDEN_SIZE), jnp.float32, -bound, bound)
        b_hh = jax.random.uniform(
            next(k), (1, 4 * HIDDEN_SIZE), jnp.float32, -bound, bound)
        bias.append(b_ih + b_hh)
    params["wih"] = wih
    params["whh"] = whh
    params["b"] = bias

    # Linear: weight uniform(-0.1, 0.1), bias zero (matches init_weights)
    params["lin_w"] = jax.random.uniform(
        next(k), (HIDDEN_SIZE, VOCAB_SIZE), jnp.float32, -0.1, 0.1)
    params["lin_b"] = jnp.zeros((1, VOCAB_SIZE), jnp.float32)
    return params


# --------------------------------- forward ------------------------------------
@jax.jit
def model3_forward(params, x_tokens, h):
    """x_tokens: (B, T) int32; h = (h0, c0), each (NUM_LAYERS, B, H).

    Returns (logits (B*T, VOCAB), (h_n, c_n)) — same semantics as the PyTorch forward.
    """
    h0, c0 = h
    B, T = x_tokens.shape
    # Time-major (t-major, b-minor) flat token ids; everything else runs in-kernel.
    tok_tm = jnp.transpose(x_tokens, (1, 0)).reshape(T * B, 1).astype(jnp.int32)
    logits, h_n, c_n = fused_forward(
        tok_tm, params["embed"], h0, c0,
        params["wih"][0], params["whh"][0], params["b"][0],
        params["wih"][1], params["whh"][1], params["b"][1],
        params["lin_w"], params["lin_b"])
    return logits, (h_n, c_n)


# --------------------------- pure-JAX reference (check) -------------------------
def reference_forward(params, x_tokens, h):
    h0, c0 = h
    H = HIDDEN_SIZE
    emb = jnp.take(params["embed"], x_tokens, axis=0)        # (B, T, E)
    x = jnp.transpose(emb, (1, 0, 2))                         # (T, B, E)
    h_fin, c_fin = [], []
    for layer in range(NUM_LAYERS):
        wih, whh, b = params["wih"][layer], params["whh"][layer], params["b"][layer]

        def step(carry, x_t, wih=wih, whh=whh, b=b):
            h_p, c_p = carry
            g = x_t @ wih + h_p @ whh + b
            i = jax.nn.sigmoid(g[:, 0:H])
            f = jax.nn.sigmoid(g[:, H:2 * H])
            gg = jnp.tanh(g[:, 2 * H:3 * H])
            o = jax.nn.sigmoid(g[:, 3 * H:4 * H])
            c_n = f * c_p + i * gg
            h_n = o * jnp.tanh(c_n)
            return (h_n, c_n), h_n

        (h_l, c_l), x = jax.lax.scan(step, (h0[layer], c0[layer]), x)
        h_fin.append(h_l)
        c_fin.append(c_l)
    out = jnp.transpose(x, (1, 0, 2)).reshape(-1, H)          # (B*T, H) batch-major
    logits = out @ params["lin_w"] + params["lin_b"]
    return logits, (jnp.stack(h_fin), jnp.stack(c_fin))


# ----------------------------------- main --------------------------------------
if __name__ == "__main__":
    key = jax.random.PRNGKey(0)
    k_param, k_tok, k_h, k_c = jax.random.split(key, 4)

    params = init_params(k_param)
    x_tokens = jax.random.randint(k_tok, (BATCH, SEQ), 0, VOCAB_SIZE, dtype=jnp.int32)
    h0 = 0.1 * jax.random.normal(k_h, (NUM_LAYERS, BATCH, HIDDEN_SIZE), jnp.float32)
    c0 = 0.1 * jax.random.normal(k_c, (NUM_LAYERS, BATCH, HIDDEN_SIZE), jnp.float32)

    logits, (h_n, c_n) = model3_forward(params, x_tokens, (h0, c0))
    jax.block_until_ready((logits, h_n, c_n))

    assert logits.shape == (BATCH * SEQ, VOCAB_SIZE)
    assert h_n.shape == (NUM_LAYERS, BATCH, HIDDEN_SIZE)
    assert c_n.shape == (NUM_LAYERS, BATCH, HIDDEN_SIZE)

    # Correctness check against a pure-JAX reference of the same math.
    ref_logits, (ref_h, ref_c) = reference_forward(params, x_tokens, (h0, c0))
    assert bool(jnp.allclose(logits, ref_logits, atol=1e-4, rtol=1e-4))
    assert bool(jnp.allclose(h_n, ref_h, atol=1e-4, rtol=1e-4))
    assert bool(jnp.allclose(c_n, ref_c, atol=1e-4, rtol=1e-4))

    print("KERNEL_OK")
</pallas_src>

<mosaic_0001>
module attributes {stable_mosaic.version = 11 : i64} {
  func.func @fused_forward_kernel(%arg0: memref<16x1xi32, #tpu.memory_space<vmem>>, %arg1: memref<32x32xf32, #tpu.memory_space<vmem>>, %arg2: memref<2x2x140xf32, #tpu.memory_space<vmem>>, %arg3: memref<2x2x140xf32, #tpu.memory_space<vmem>>, %arg4: memref<32x560xf32, #tpu.memory_space<vmem>>, %arg5: memref<140x560xf32, #tpu.memory_space<vmem>>, %arg6: memref<1x560xf32, #tpu.memory_space<vmem>>, %arg7: memref<140x560xf32, #tpu.memory_space<vmem>>, %arg8: memref<140x560xf32, #tpu.memory_space<vmem>>, %arg9: memref<1x560xf32, #tpu.memory_space<vmem>>, %arg10: memref<140x32xf32, #tpu.memory_space<vmem>>, %arg11: memref<1x32xf32, #tpu.memory_space<vmem>>, %arg12: memref<16x32xf32, #tpu.memory_space<vmem>>, %arg13: memref<2x2x140xf32, #tpu.memory_space<vmem>>, %arg14: memref<2x2x140xf32, #tpu.memory_space<vmem>>, %arg15: memref<16x140xf32, #tpu.memory_space<vmem>>) attributes {dimension_semantics = [], scalar_prefetch = 0 : i64, scratch_operands = 1 : i64, tpu.core_type = #tpu.core_type<tc>} {
    %c0 = arith.constant 0 : index
    %c0_0 = arith.constant 0 : index
    %0 = vector.load %arg0[%c0, %c0_0] : memref<16x1xi32, #tpu.memory_space<vmem>>, vector<16x1xi32>
    %1 = tpu.iota {dimensions = array<i32: 1>} : vector<16x32xi32>
    %2 = vector.broadcast %0 : vector<16x1xi32> to vector<16x32xi32>
    %3 = arith.cmpi eq, %2, %1 : vector<16x32xi32>
    %4 = arith.extui %3 : vector<16x32xi1> to vector<16x32xi32>
    %5 = arith.sitofp %4 : vector<16x32xi32> to vector<16x32xf32>
    %c0_1 = arith.constant 0 : index
    %c0_2 = arith.constant 0 : index
    %6 = vector.load %arg1[%c0_1, %c0_2] : memref<32x32xf32, #tpu.memory_space<vmem>>, vector<32x32xf32>
    %cst = arith.constant dense<0.000000e+00> : vector<16x32xf32>
    %7 = tpu.matmul %5, %6, %cst {dimension_numbers = #tpu.dot_dimension_numbers<[1], [0], [0], [1], [0, 0, 1, 1], [], []>} : vector<16x32xf32>, vector<32x32xf32>, vector<16x32xf32> -> vector<16x32xf32>
    %c0_3 = arith.constant 0 : index
    %c0_4 = arith.constant 0 : index
    %8 = vector.load %arg4[%c0_3, %c0_4] : memref<32x560xf32, #tpu.memory_space<vmem>>, vector<32x560xf32>
    %cst_5 = arith.constant dense<0.000000e+00> : vector<16x560xf32>
    %9 = tpu.matmul %7, %8, %cst_5 {dimension_numbers = #tpu.dot_dimension_numbers<[1], [0], [0], [1], [0, 0, 1, 1], [], []>} : vector<16x32xf32>, vector<32x560xf32>, vector<16x560xf32> -> vector<16x560xf32>
    %c0_6 = arith.constant 0 : index
    %c0_7 = arith.constant 0 : index
    %10 = vector.load %arg6[%c0_6, %c0_7] : memref<1x560xf32, #tpu.memory_space<vmem>>, vector<1x560xf32>
    %11 = vector.broadcast %10 : vector<1x560xf32> to vector<16x560xf32>
    %12 = arith.addf %9, %11 : vector<16x560xf32>
    %c0_8 = arith.constant 0 : index
    %c0_9 = arith.constant 0 : index
    %c0_10 = arith.constant 0 : index
    %13 = vector.load %arg2[%c0_8, %c0_9, %c0_10] : memref<2x2x140xf32, #tpu.memory_space<vmem>>, vector<1x2x140xf32>
    %14 = vector.shape_cast %13 : vector<1x2x140xf32> to vector<2x140xf32>
    %c0_11 = arith.constant 0 : index
    %c0_12 = arith.constant 0 : index
    %c0_13 = arith.constant 0 : index
    %15 = vector.load %arg3[%c0_11, %c0_12, %c0_13] : memref<2x2x140xf32, #tpu.memory_space<vmem>>, vector<1x2x140xf32>
    %16 = vector.shape_cast %15 : vector<1x2x140xf32> to vector<2x140xf32>
    %c1 = arith.constant 1 : index
    %c0_14 = arith.constant 0 : index
    %c0_15 = arith.constant 0 : index
    %17 = vector.load %arg2[%c1, %c0_14, %c0_15] : memref<2x2x140xf32, #tpu.memory_space<vmem>>, vector<1x2x140xf32>
    %18 = vector.shape_cast %17 : vector<1x2x140xf32> to vector<2x140xf32>
    %c1_16 = arith.constant 1 : index
    %c0_17 = arith.constant 0 : index
    %c0_18 = arith.constant 0 : index
    %19 = vector.load %arg3[%c1_16, %c0_17, %c0_18] : memref<2x2x140xf32, #tpu.memory_space<vmem>>, vector<1x2x140xf32>
    %20 = vector.shape_cast %19 : vector<1x2x140xf32> to vector<2x140xf32>
    %21 = vector.extract_strided_slice %12 {offsets = [0, 0], sizes = [2, 560], strides = [1, 1]} : vector<16x560xf32> to vector<2x560xf32>
    %c0_19 = arith.constant 0 : index
    %c0_20 = arith.constant 0 : index
    %22 = vector.load %arg5[%c0_19, %c0_20] : memref<140x560xf32, #tpu.memory_space<vmem>>, vector<140x560xf32>
    %cst_21 = arith.constant dense<0.000000e+00> : vector<2x560xf32>
    %23 = tpu.matmul %14, %22, %cst_21 {dimension_numbers = #tpu.dot_dimension_numbers<[1], [0], [0], [1], [0, 0, 1, 1], [], []>} : vector<2x140xf32>, vector<140x560xf32>, vector<2x560xf32> -> vector<2x560xf32>
    %24 = arith.addf %21, %23 : vector<2x560xf32>
    %25 = vector.extract_strided_slice %24 {offsets = [0, 0], sizes = [2, 140], strides = [1, 1]} : vector<2x560xf32> to vector<2x140xf32>
    %26 = arith.negf %25 : vector<2x140xf32>
    %27 = math.exp %26 : vector<2x140xf32>
    %cst_22 = arith.constant 1.000000e+00 : f32
    %28 = vector.broadcast %cst_22 : f32 to vector<2x140xf32>
    %29 = arith.addf %28, %27 : vector<2x140xf32>
    %30 = arith.divf %28, %29 : vector<2x140xf32>
    %31 = vector.extract_strided_slice %24 {offsets = [0, 140], sizes = [2, 140], strides = [1, 1]} : vector<2x560xf32> to vector<2x140xf32>
    %32 = arith.negf %31 : vector<2x140xf32>
    %33 = math.exp %32 : vector<2x140xf32>
    %cst_23 = arith.constant 1.000000e+00 : f32
    %34 = vector.broadcast %cst_23 : f32 to vector<2x140xf32>
    %35 = arith.addf %34, %33 : vector<2x140xf32>
    %36 = arith.divf %34, %35 : vector<2x140xf32>
    %37 = vector.extract_strided_slice %24 {offsets = [0, 280], sizes = [2, 140], strides = [1, 1]} : vector<2x560xf32> to vector<2x140xf32>
    %38 = math.tanh %37 : vector<2x140xf32>
    %39 = vector.extract_strided_slice %24 {offsets = [0, 420], sizes = [2, 140], strides = [1, 1]} : vector<2x560xf32> to vector<2x140xf32>
    %40 = arith.negf %39 : vector<2x140xf32>
    %41 = math.exp %40 : vector<2x140xf32>
    %cst_24 = arith.constant 1.000000e+00 : f32
    %42 = vector.broadcast %cst_24 : f32 to vector<2x140xf32>
    %43 = arith.addf %42, %41 : vector<2x140xf32>
    %44 = arith.divf %42, %43 : vector<2x140xf32>
    %45 = arith.mulf %36, %16 : vector<2x140xf32>
    %46 = arith.mulf %30, %38 : vector<2x140xf32>
    %47 = arith.addf %45, %46 : vector<2x140xf32>
    %48 = math.tanh %47 : vector<2x140xf32>
    %49 = arith.mulf %44, %48 : vector<2x140xf32>
    %c0_25 = arith.constant 0 : index
    %c0_26 = arith.constant 0 : index
    %50 = vector.load %arg7[%c0_25, %c0_26] : memref<140x560xf32, #tpu.memory_space<vmem>>, vector<140x560xf32>
    %cst_27 = arith.constant dense<0.000000e+00> : vector<2x560xf32>
    %51 = tpu.matmul %49, %50, %cst_27 {dimension_numbers = #tpu.dot_dimension_numbers<[1], [0], [0], [1], [0, 0, 1, 1], [], []>} : vector<2x140xf32>, vector<140x560xf32>, vector<2x560xf32> -> vector<2x560xf32>
    %c0_28 = arith.constant 0 : index
    %c0_29 = arith.constant 0 : index
    %52 = vector.load %arg8[%c0_28, %c0_29] : memref<140x560xf32, #tpu.memory_space<vmem>>, vector<140x560xf32>
    %cst_30 = arith.constant dense<0.000000e+00> : vector<2x560xf32>
    %53 = tpu.matmul %18, %52, %cst_30 {dimension_numbers = #tpu.dot_dimension_numbers<[1], [0], [0], [1], [0, 0, 1, 1], [], []>} : vector<2x140xf32>, vector<140x560xf32>, vector<2x560xf32> -> vector<2x560xf32>
    %54 = arith.addf %51, %53 : vector<2x560xf32>
    %c0_31 = arith.constant 0 : index
    %c0_32 = arith.constant 0 : index
    %55 = vector.load %arg9[%c0_31, %c0_32] : memref<1x560xf32, #tpu.memory_space<vmem>>, vector<1x560xf32>
    %56 = vector.broadcast %55 : vector<1x560xf32> to vector<2x560xf32>
    %57 = arith.addf %54, %56 : vector<2x560xf32>
    %58 = vector.extract_strided_slice %57 {offsets = [0, 0], sizes = [2, 140], strides = [1, 1]} : vector<2x560xf32> to vector<2x140xf32>
    %59 = arith.negf %58 : vector<2x140xf32>
    %60 = math.exp %59 : vector<2x140xf32>
    %cst_33 = arith.constant 1.000000e+00 : f32
    %61 = vector.broadcast %cst_33 : f32 to vector<2x140xf32>
    %62 = arith.addf %61, %60 : vector<2x140xf32>
    %63 = arith.divf %61, %62 : vector<2x140xf32>
    %64 = vector.extract_strided_slice %57 {offsets = [0, 140], sizes = [2, 140], strides = [1, 1]} : vector<2x560xf32> to vector<2x140xf32>
    %65 = arith.negf %64 : vector<2x140xf32>
    %66 = math.exp %65 : vector<2x140xf32>
    %cst_34 = arith.constant 1.000000e+00 : f32
    %67 = vector.broadcast %cst_34 : f32 to vector<2x140xf32>
    %68 = arith.addf %67, %66 : vector<2x140xf32>
    %69 = arith.divf %67, %68 : vector<2x140xf32>
    %70 = vector.extract_strided_slice %57 {offsets = [0, 280], sizes = [2, 140], strides = [1, 1]} : vector<2x560xf32> to vector<2x140xf32>
    %71 = math.tanh %70 : vector<2x140xf32>
    %72 = vector.extract_strided_slice %57 {offsets = [0, 420], sizes = [2, 140], strides = [1, 1]} : vector<2x560xf32> to vector<2x140xf32>
    %73 = arith.negf %72 : vector<2x140xf32>
    %74 = math.exp %73 : vector<2x140xf32>
    %cst_35 = arith.constant 1.000000e+00 : f32
    %75 = vector.broadcast %cst_35 : f32 to vector<2x140xf32>
    %76 = arith.addf %75, %74 : vector<2x140xf32>
    %77 = arith.divf %75, %76 : vector<2x140xf32>
    %78 = arith.mulf %69, %20 : vector<2x140xf32>
    %79 = arith.mulf %63, %71 : vector<2x140xf32>
    %80 = arith.addf %78, %79 : vector<2x140xf32>
    %81 = math.tanh %80 : vector<2x140xf32>
    %82 = arith.mulf %77, %81 : vector<2x140xf32>
    %83 = vector.extract_strided_slice %82 {offsets = [0, 0], sizes = [1, 140], strides = [1, 1]} : vector<2x140xf32> to vector<1x140xf32>
    %c0_36 = arith.constant 0 : index
    %c0_37 = arith.constant 0 : index
    %84 = vector.load %arg15[%c0_36, %c0_37] : memref<16x140xf32, #tpu.memory_space<vmem>>, vector<1x140xf32>
    tpu.vector_store %arg15[%c0_36, %c0_37], %83 {strides = array<i32>} : memref<16x140xf32, #tpu.memory_space<vmem>>, vector<1x140xf32>,
    %85 = vector.extract_strided_slice %82 {offsets = [1, 0], sizes = [1, 140], strides = [1, 1]} : vector<2x140xf32> to vector<1x140xf32>
    %c8 = arith.constant 8 : index
    %c0_38 = arith.constant 0 : index
    %86 = vector.load %arg15[%c8, %c0_38] : memref<16x140xf32, #tpu.memory_space<vmem>>, vector<1x140xf32>
    tpu.vector_store %arg15[%c8, %c0_38], %85 {strides = array<i32>} : memref<16x140xf32, #tpu.memory_space<vmem>>, vector<1x140xf32>,
    %87 = vector.extract_strided_slice %12 {offsets = [2, 0], sizes = [2, 560], strides = [1, 1]} : vector<16x560xf32> to vector<2x560xf32>
    %c0_39 = arith.constant 0 : index
    %c0_40 = arith.constant 0 : index
    %88 = vector.load %arg5[%c0_39, %c0_40] : memref<140x560xf32, #tpu.memory_space<vmem>>, vector<140x560xf32>
    %cst_41 = arith.constant dense<0.000000e+00> : vector<2x560xf32>
    %89 = tpu.matmul %49, %88, %cst_41 {dimension_numbers = #tpu.dot_dimension_numbers<[1], [0], [0], [1], [0, 0, 1, 1], [], []>} : vector<2x140xf32>, vector<140x560xf32>, vector<2x560xf32> -> vector<2x560xf32>
    %90 = arith.addf %87, %89 : vector<2x560xf32>
    %91 = vector.extract_strided_slice %90 {offsets = [0, 0], sizes = [2, 140], strides = [1, 1]} : vector<2x560xf32> to vector<2x140xf32>
    %92 = arith.negf %91 : vector<2x140xf32>
    %93 = math.exp %92 : vector<2x140xf32>
    %cst_42 = arith.constant 1.000000e+00 : f32
    %94 = vector.broadcast %cst_42 : f32 to vector<2x140xf32>
    %95 = arith.addf %94, %93 : vector<2x140xf32>
    %96 = arith.divf %94, %95 : vector<2x140xf32>
    %97 = vector.extract_strided_slice %90 {offsets = [0, 140], sizes = [2, 140], strides = [1, 1]} : vector<2x560xf32> to vector<2x140xf32>
    %98 = arith.negf %97 : vector<2x140xf32>
    %99 = math.exp %98 : vector<2x140xf32>
    %cst_43 = arith.constant 1.000000e+00 : f32
    %100 = vector.broadcast %cst_43 : f32 to vector<2x140xf32>
    %101 = arith.addf %100, %99 : vector<2x140xf32>
    %102 = arith.divf %100, %101 : vector<2x140xf32>
    %103 = vector.extract_strided_slice %90 {offsets = [0, 280], sizes = [2, 140], strides = [1, 1]} : vector<2x560xf32> to vector<2x140xf32>
    %104 = math.tanh %103 : vector<2x140xf32>
    %105 = vector.extract_strided_slice %90 {offsets = [0, 420], sizes = [2, 140], strides = [1, 1]} : vector<2x560xf32> to vector<2x140xf32>
    %106 = arith.negf %105 : vector<2x140xf32>
    %107 = math.exp %106 : vector<2x140xf32>
    %cst_44 = arith.constant 1.000000e+00 : f32
    %108 = vector.broadcast %cst_44 : f32 to vector<2x140xf32>
    %109 = arith.addf %108, %107 : vector<2x140xf32>
    %110 = arith.divf %108, %109 : vector<2x140xf32>
    %111 = arith.mulf %102, %47 : vector<2x140xf32>
    %112 = arith.mulf %96, %104 : vector<2x140xf32>
    %113 = arith.addf %111, %112 : vector<2x140xf32>
    %114 = math.tanh %113 : vector<2x140xf32>
    %115 = arith.mulf %110, %114 : vector<2x140xf32>
    %c0_45 = arith.constant 0 : index
    %c0_46 = arith.constant 0 : index
    %116 = vector.load %arg7[%c0_45, %c0_46] : memref<140x560xf32, #tpu.memory_space<vmem>>, vector<140x560xf32>
    %cst_47 = arith.constant dense<0.000000e+00> : vector<2x560xf32>
    %117 = tpu.matmul %115, %116, %cst_47 {dimension_numbers = #tpu.dot_dimension_numbers<[1], [0], [0], [1], [0, 0, 1, 1], [], []>} : vector<2x140xf32>, vector<140x560xf32>, vector<2x560xf32> -> vector<2x560xf32>
    %c0_48 = arith.constant 0 : index
    %c0_49 = arith.constant 0 : index
    %118 = vector.load %arg8[%c0_48, %c0_49] : memref<140x560xf32, #tpu.memory_space<vmem>>, vector<140x560xf32>
    %cst_50 = arith.constant dense<0.000000e+00> : vector<2x560xf32>
    %119 = tpu.matmul %82, %118, %cst_50 {dimension_numbers = #tpu.dot_dimension_numbers<[1], [0], [0], [1], [0, 0, 1, 1], [], []>} : vector<2x140xf32>, vector<140x560xf32>, vector<2x560xf32> -> vector<2x560xf32>
    %120 = arith.addf %117, %119 : vector<2x560xf32>
    %c0_51 = arith.constant 0 : index
    %c0_52 = arith.constant 0 : index
    %121 = vector.load %arg9[%c0_51, %c0_52] : memref<1x560xf32, #tpu.memory_space<vmem>>, vector<1x560xf32>
    %122 = vector.broadcast %121 : vector<1x560xf32> to vector<2x560xf32>
    %123 = arith.addf %120, %122 : vector<2x560xf32>
    %124 = vector.extract_strided_slice %123 {offsets = [0, 0], sizes = [2, 140], strides = [1, 1]} : vector<2x560xf32> to vector<2x140xf32>
    %125 = arith.negf %124 : vector<2x140xf32>
    %126 = math.exp %125 : vector<2x140xf32>
    %cst_53 = arith.constant 1.000000e+00 : f32
    %127 = vector.broadcast %cst_53 : f32 to vector<2x140xf32>
    %128 = arith.addf %127, %126 : vector<2x140xf32>
    %129 = arith.divf %127, %128 : vector<2x140xf32>
    %130 = vector.extract_strided_slice %123 {offsets = [0, 140], sizes = [2, 140], strides = [1, 1]} : vector<2x560xf32> to vector<2x140xf32>
    %131 = arith.negf %130 : vector<2x140xf32>
    %132 = math.exp %131 : vector<2x140xf32>
    %cst_54 = arith.constant 1.000000e+00 : f32
    %133 = vector.broadcast %cst_54 : f32 to vector<2x140xf32>
    %134 = arith.addf %133, %132 : vector<2x140xf32>
    %135 = arith.divf %133, %134 : vector<2x140xf32>
    %136 = vector.extract_strided_slice %123 {offsets = [0, 280], sizes = [2, 140], strides = [1, 1]} : vector<2x560xf32> to vector<2x140xf32>
    %137 = math.tanh %136 : vector<2x140xf32>
    %138 = vector.extract_strided_slice %123 {offsets = [0, 420], sizes = [2, 140], strides = [1, 1]} : vector<2x560xf32> to vector<2x140xf32>
    %139 = arith.negf %138 : vector<2x140xf32>
    %140 = math.exp %139 : vector<2x140xf32>
    %cst_55 = arith.constant 1.000000e+00 : f32
    %141 = vector.broadcast %cst_55 : f32 to vector<2x140xf32>
    %142 = arith.addf %141, %140 : vector<2x140xf32>
    %143 = arith.divf %141, %142 : vector<2x140xf32>
    %144 = arith.mulf %135, %80 : vector<2x140xf32>
    %145 = arith.mulf %129, %137 : vector<2x140xf32>
    %146 = arith.addf %144, %145 : vector<2x140xf32>
    %147 = math.tanh %146 : vector<2x140xf32>
    %148 = arith.mulf %143, %147 : vector<2x140xf32>
    %149 = vector.extract_strided_slice %148 {offsets = [0, 0], sizes = [1, 140], strides = [1, 1]} : vector<2x140xf32> to vector<1x140xf32>
    %c1_56 = arith.constant 1 : index
    %c0_57 = arith.constant 0 : index
    %150 = vector.load %arg15[%c1_56, %c0_57] : memref<16x140xf32, #tpu.memory_space<vmem>>, vector<1x140xf32>
    tpu.vector_store %arg15[%c1_56, %c0_57], %149 {strides = array<i32>} : memref<16x140xf32, #tpu.memory_space<vmem>>, vector<1x140xf32>,
    %151 = vector.extract_strided_slice %148 {offsets = [1, 0], sizes = [1, 140], strides = [1, 1]} : vector<2x140xf32> to vector<1x140xf32>
    %c9 = arith.constant 9 : index
    %c0_58 = arith.constant 0 : index
    %152 = vector.load %arg15[%c9, %c0_58] : memref<16x140xf32, #tpu.memory_space<vmem>>, vector<1x140xf32>
    tpu.vector_store %arg15[%c9, %c0_58], %151 {strides = array<i32>} : memref<16x140xf32, #tpu.memory_space<vmem>>, vector<1x140xf32>,
    %153 = vector.extract_strided_slice %12 {offsets = [4, 0], sizes = [2, 560], strides = [1, 1]} : vector<16x560xf32> to vector<2x560xf32>
    %c0_59 = arith.constant 0 : index
    %c0_60 = arith.constant 0 : index
    %154 = vector.load %arg5[%c0_59, %c0_60] : memref<140x560xf32, #tpu.memory_space<vmem>>, vector<140x560xf32>
    %cst_61 = arith.constant dense<0.000000e+00> : vector<2x560xf32>
    %155 = tpu.matmul %115, %154, %cst_61 {dimension_numbers = #tpu.dot_dimension_numbers<[1], [0], [0], [1], [0, 0, 1, 1], [], []>} : vector<2x140xf32>, vector<140x560xf32>, vector<2x560xf32> -> vector<2x560xf32>
    %156 = arith.addf %153, %155 : vector<2x560xf32>
    %157 = vector.extract_strided_slice %156 {offsets = [0, 0], sizes = [2, 140], strides = [1, 1]} : vector<2x560xf32> to vector<2x140xf32>
    %158 = arith.negf %157 : vector<2x140xf32>
    %159 = math.exp %158 : vector<2x140xf32>
    %cst_62 = arith.constant 1.000000e+00 : f32
    %160 = vector.broadcast %cst_62 : f32 to vector<2x140xf32>
    %161 = arith.addf %160, %159 : vector<2x140xf32>
    %162 = arith.divf %160, %161 : vector<2x140xf32>
    %163 = vector.extract_strided_slice %156 {offsets = [0, 140], sizes = [2, 140], strides = [1, 1]} : vector<2x560xf32> to vector<2x140xf32>
    %164 = arith.negf %163 : vector<2x140xf32>
    %165 = math.exp %164 : vector<2x140xf32>
    %cst_63 = arith.constant 1.000000e+00 : f32
    %166 = vector.broadcast %cst_63 : f32 to vector<2x140xf32>
    %167 = arith.addf %166, %165 : vector<2x140xf32>
    %168 = arith.divf %166, %167 : vector<2x140xf32>
    %169 = vector.extract_strided_slice %156 {offsets = [0, 280], sizes = [2, 140], strides = [1, 1]} : vector<2x560xf32> to vector<2x140xf32>
    %170 = math.tanh %169 : vector<2x140xf32>
    %171 = vector.extract_strided_slice %156 {offsets = [0, 420], sizes = [2, 140], strides = [1, 1]} : vector<2x560xf32> to vector<2x140xf32>
    %172 = arith.negf %171 : vector<2x140xf32>
    %173 = math.exp %172 : vector<2x140xf32>
    %cst_64 = arith.constant 1.000000e+00 : f32
    %174 = vector.broadcast %cst_64 : f32 to vector<2x140xf32>
    %175 = arith.addf %174, %173 : vector<2x140xf32>
    %176 = arith.divf %174, %175 : vector<2x140xf32>
    %177 = arith.mulf %168, %113 : vector<2x140xf32>
    %178 = arith.mulf %162, %170 : vector<2x140xf32>
    %179 = arith.addf %177, %178 : vector<2x140xf32>
    %180 = math.tanh %179 : vector<2x140xf32>
    %181 = arith.mulf %176, %180 : vector<2x140xf32>
    %c0_65 = arith.constant 0 : index
    %c0_66 = arith.constant 0 : index
    %182 = vector.load %arg7[%c0_65, %c0_66] : memref<140x560xf32, #tpu.memory_space<vmem>>, vector<140x560xf32>
    %cst_67 = arith.constant dense<0.000000e+00> : vector<2x560xf32>
    %183 = tpu.matmul %181, %182, %cst_67 {dimension_numbers = #tpu.dot_dimension_numbers<[1], [0], [0], [1], [0, 0, 1, 1], [], []>} : vector<2x140xf32>, vector<140x560xf32>, vector<2x560xf32> -> vector<2x560xf32>
    %c0_68 = arith.constant 0 : index
    %c0_69 = arith.constant 0 : index
    %184 = vector.load %arg8[%c0_68, %c0_69] : memref<140x560xf32, #tpu.memory_space<vmem>>, vector<140x560xf32>
    %cst_70 = arith.constant dense<0.000000e+00> : vector<2x560xf32>
    %185 = tpu.matmul %148, %184, %cst_70 {dimension_numbers = #tpu.dot_dimension_numbers<[1], [0], [0], [1], [0, 0, 1, 1], [], []>} : vector<2x140xf32>, vector<140x560xf32>, vector<2x560xf32> -> vector<2x560xf32>
    %186 = arith.addf %183, %185 : vector<2x560xf32>
    %c0_71 = arith.constant 0 : index
    %c0_72 = arith.constant 0 : index
    %187 = vector.load %arg9[%c0_71, %c0_72] : memref<1x560xf32, #tpu.memory_space<vmem>>, vector<1x560xf32>
    %188 = vector.broadcast %187 : vector<1x560xf32> to vector<2x560xf32>
    %189 = arith.addf %186, %188 : vector<2x560xf32>
    %190 = vector.extract_strided_slice %189 {offsets = [0, 0], sizes = [2, 140], strides = [1, 1]} : vector<2x560xf32> to vector<2x140xf32>
    %191 = arith.negf %190 : vector<2x140xf32>
    %192 = math.exp %191 : vector<2x140xf32>
    %cst_73 = arith.constant 1.000000e+00 : f32
    %193 = vector.broadcast %cst_73 : f32 to vector<2x140xf32>
    %194 = arith.addf %193, %192 : vector<2x140xf32>
    %195 = arith.divf %193, %194 : vector<2x140xf32>
    %196 = vector.extract_strided_slice %189 {offsets = [0, 140], sizes = [2, 140], strides = [1, 1]} : vector<2x560xf32> to vector<2x140xf32>
    %197 = arith.negf %196 : vector<2x140xf32>
    %198 = math.exp %197 : vector<2x140xf32>
    %cst_74 = arith.constant 1.000000e+00 : f32
    %199 = vector.broadcast %cst_74 : f32 to vector<2x140xf32>
    %200 = arith.addf %199, %198 : vector<2x140xf32>
    %201 = arith.divf %199, %200 : vector<2x140xf32>
    %202 = vector.extract_strided_slice %189 {offsets = [0, 280], sizes = [2, 140], strides = [1, 1]} : vector<2x560xf32> to vector<2x140xf32>
    %203 = math.tanh %202 : vector<2x140xf32>
    %204 = vector.extract_strided_slice %189 {offsets = [0, 420], sizes = [2, 140], strides = [1, 1]} : vector<2x560xf32> to vector<2x140xf32>
    %205 = arith.negf %204 : vector<2x140xf32>
    %206 = math.exp %205 : vector<2x140xf32>
    %cst_75 = arith.constant 1.000000e+00 : f32
    %207 = vector.broadcast %cst_75 : f32 to vector<2x140xf32>
    %208 = arith.addf %207, %206 : vector<2x140xf32>
    %209 = arith.divf %207, %208 : vector<2x140xf32>
    %210 = arith.mulf %201, %146 : vector<2x140xf32>
    %211 = arith.mulf %195, %203 : vector<2x140xf32>
    %212 = arith.addf %210, %211 : vector<2x140xf32>
    %213 = math.tanh %212 : vector<2x140xf32>
    %214 = arith.mulf %209, %213 : vector<2x140xf32>
    %215 = vector.extract_strided_slice %214 {offsets = [0, 0], sizes = [1, 140], strides = [1, 1]} : vector<2x140xf32> to vector<1x140xf32>
    %c2 = arith.constant 2 : index
    %c0_76 = arith.constant 0 : index
    %216 = vector.load %arg15[%c2, %c0_76] : memref<16x140xf32, #tpu.memory_space<vmem>>, vector<1x140xf32>
    tpu.vector_store %arg15[%c2, %c0_76], %215 {strides = array<i32>} : memref<16x140xf32, #tpu.memory_space<vmem>>, vector<1x140xf32>,
    %217 = vector.extract_strided_slice %214 {offsets = [1, 0], sizes = [1, 140], strides = [1, 1]} : vector<2x140xf32> to vector<1x140xf32>
    %c10 = arith.constant 10 : index
    %c0_77 = arith.constant 0 : index
    %218 = vector.load %arg15[%c10, %c0_77] : memref<16x140xf32, #tpu.memory_space<vmem>>, vector<1x140xf32>
    tpu.vector_store %arg15[%c10, %c0_77], %217 {strides = array<i32>} : memref<16x140xf32, #tpu.memory_space<vmem>>, vector<1x140xf32>,
    %219 = vector.extract_strided_slice %12 {offsets = [6, 0], sizes = [2, 560], strides = [1, 1]} : vector<16x560xf32> to vector<2x560xf32>
    %c0_78 = arith.constant 0 : index
    %c0_79 = arith.constant 0 : index
    %220 = vector.load %arg5[%c0_78, %c0_79] : memref<140x560xf32, #tpu.memory_space<vmem>>, vector<140x560xf32>
    %cst_80 = arith.constant dense<0.000000e+00> : vector<2x560xf32>
    %221 = tpu.matmul %181, %220, %cst_80 {dimension_numbers = #tpu.dot_dimension_numbers<[1], [0], [0], [1], [0, 0, 1, 1], [], []>} : vector<2x140xf32>, vector<140x560xf32>, vector<2x560xf32> -> vector<2x560xf32>
    %222 = arith.addf %219, %221 : vector<2x560xf32>
    %223 = vector.extract_strided_slice %222 {offsets = [0, 0], sizes = [2, 140], strides = [1, 1]} : vector<2x560xf32> to vector<2x140xf32>
    %224 = arith.negf %223 : vector<2x140xf32>
    %225 = math.exp %224 : vector<2x140xf32>
    %cst_81 = arith.constant 1.000000e+00 : f32
    %226 = vector.broadcast %cst_81 : f32 to vector<2x140xf32>
    %227 = arith.addf %226, %225 : vector<2x140xf32>
    %228 = arith.divf %226, %227 : vector<2x140xf32>
    %229 = vector.extract_strided_slice %222 {offsets = [0, 140], sizes = [2, 140], strides = [1, 1]} : vector<2x560xf32> to vector<2x140xf32>
    %230 = arith.negf %229 : vector<2x140xf32>
    %231 = math.exp %230 : vector<2x140xf32>
    %cst_82 = arith.constant 1.000000e+00 : f32
    %232 = vector.broadcast %cst_82 : f32 to vector<2x140xf32>
    %233 = arith.addf %232, %231 : vector<2x140xf32>
    %234 = arith.divf %232, %233 : vector<2x140xf32>
    %235 = vector.extract_strided_slice %222 {offsets = [0, 280], sizes = [2, 140], strides = [1, 1]} : vector<2x560xf32> to vector<2x140xf32>
    %236 = math.tanh %235 : vector<2x140xf32>
    %237 = vector.extract_strided_slice %222 {offsets = [0, 420], sizes = [2, 140], strides = [1, 1]} : vector<2x560xf32> to vector<2x140xf32>
    %238 = arith.negf %237 : vector<2x140xf32>
    %239 = math.exp %238 : vector<2x140xf32>
    %cst_83 = arith.constant 1.000000e+00 : f32
    %240 = vector.broadcast %cst_83 : f32 to vector<2x140xf32>
    %241 = arith.addf %240, %239 : vector<2x140xf32>
    %242 = arith.divf %240, %241 : vector<2x140xf32>
    %243 = arith.mulf %234, %179 : vector<2x140xf32>
    %244 = arith.mulf %228, %236 : vector<2x140xf32>
    %245 = arith.addf %243, %244 : vector<2x140xf32>
    %246 = math.tanh %245 : vector<2x140xf32>
    %247 = arith.mulf %242, %246 : vector<2x140xf32>
    %c0_84 = arith.constant 0 : index
    %c0_85 = arith.constant 0 : index
    %248 = vector.load %arg7[%c0_84, %c0_85] : memref<140x560xf32, #tpu.memory_space<vmem>>, vector<140x560xf32>
    %cst_86 = arith.constant dense<0.000000e+00> : vector<2x560xf32>
    %249 = tpu.matmul %247, %248, %cst_86 {dimension_numbers = #tpu.dot_dimension_numbers<[1], [0], [0], [1], [0, 0, 1, 1], [], []>} : vector<2x140xf32>, vector<140x560xf32>, vector<2x560xf32> -> vector<2x560xf32>
    %c0_87 = arith.constant 0 : index
    %c0_88 = arith.constant 0 : index
    %250 = vector.load %arg8[%c0_87, %c0_88] : memref<140x560xf32, #tpu.memory_space<vmem>>, vector<140x560xf32>
    %cst_89 = arith.constant dense<0.000000e+00> : vector<2x560xf32>
    %251 = tpu.matmul %214, %250, %cst_89 {dimension_numbers = #tpu.dot_dimension_numbers<[1], [0], [0], [1], [0, 0, 1, 1], [], []>} : vector<2x140xf32>, vector<140x560xf32>, vector<2x560xf32> -> vector<2x560xf32>
    %252 = arith.addf %249, %251 : vector<2x560xf32>
    %c0_90 = arith.constant 0 : index
    %c0_91 = arith.constant 0 : index
    %253 = vector.load %arg9[%c0_90, %c0_91] : memref<1x560xf32, #tpu.memory_space<vmem>>, vector<1x560xf32>
    %254 = vector.broadcast %253 : vector<1x560xf32> to vector<2x560xf32>
    %255 = arith.addf %252, %254 : vector<2x560xf32>
    %256 = vector.extract_strided_slice %255 {offsets = [0, 0], sizes = [2, 140], strides = [1, 1]} : vector<2x560xf32> to vector<2x140xf32>
    %257 = arith.negf %256 : vector<2x140xf32>
    %258 = math.exp %257 : vector<2x140xf32>
    %cst_92 = arith.constant 1.000000e+00 : f32
    %259 = vector.broadcast %cst_92 : f32 to vector<2x140xf32>
    %260 = arith.addf %259, %258 : vector<2x140xf32>
    %261 = arith.divf %259, %260 : vector<2x140xf32>
    %262 = vector.extract_strided_slice %255 {offsets = [0, 140], sizes = [2, 140], strides = [1, 1]} : vector<2x560xf32> to vector<2x140xf32>
    %263 = arith.negf %262 : vector<2x140xf32>
    %264 = math.exp %263 : vector<2x140xf32>
    %cst_93 = arith.constant 1.000000e+00 : f32
    %265 = vector.broadcast %cst_93 : f32 to vector<2x140xf32>
    %266 = arith.addf %265, %264 : vector<2x140xf32>
    %267 = arith.divf %265, %266 : vector<2x140xf32>
    %268 = vector.extract_strided_slice %255 {offsets = [0, 280], sizes = [2, 140], strides = [1, 1]} : vector<2x560xf32> to vector<2x140xf32>
    %269 = math.tanh %268 : vector<2x140xf32>
    %270 = vector.extract_strided_slice %255 {offsets = [0, 420], sizes = [2, 140], strides = [1, 1]} : vector<2x560xf32> to vector<2x140xf32>
    %271 = arith.negf %270 : vector<2x140xf32>
    %272 = math.exp %271 : vector<2x140xf32>
    %cst_94 = arith.constant 1.000000e+00 : f32
    %273 = vector.broadcast %cst_94 : f32 to vector<2x140xf32>
    %274 = arith.addf %273, %272 : vector<2x140xf32>
    %275 = arith.divf %273, %274 : vector<2x140xf32>
    %276 = arith.mulf %267, %212 : vector<2x140xf32>
    %277 = arith.mulf %261, %269 : vector<2x140xf32>
    %278 = arith.addf %276, %277 : vector<2x140xf32>
    %279 = math.tanh %278 : vector<2x140xf32>
    %280 = arith.mulf %275, %279 : vector<2x140xf32>
    %281 = vector.extract_strided_slice %280 {offsets = [0, 0], sizes = [1, 140], strides = [1, 1]} : vector<2x140xf32> to vector<1x140xf32>
    %c3 = arith.constant 3 : index
    %c0_95 = arith.constant 0 : index
    %282 = vector.load %arg15[%c3, %c0_95] : memref<16x140xf32, #tpu.memory_space<vmem>>, vector<1x140xf32>
    tpu.vector_store %arg15[%c3, %c0_95], %281 {strides = array<i32>} : memref<16x140xf32, #tpu.memory_space<vmem>>, vector<1x140xf32>,
    %283 = vector.extract_strided_slice %280 {offsets = [1, 0], sizes = [1, 140], strides = [1, 1]} : vector<2x140xf32> to vector<1x140xf32>
    %c11 = arith.constant 11 : index
    %c0_96 = arith.constant 0 : index
    %284 = vector.load %arg15[%c11, %c0_96] : memref<16x140xf32, #tpu.memory_space<vmem>>, vector<1x140xf32>
    tpu.vector_store %arg15[%c11, %c0_96], %283 {strides = array<i32>} : memref<16x140xf32, #tpu.memory_space<vmem>>, vector<1x140xf32>,
    %285 = vector.extract_strided_slice %12 {offsets = [8, 0], sizes = [2, 560], strides = [1, 1]} : vector<16x560xf32> to vector<2x560xf32>
    %c0_97 = arith.constant 0 : index
    %c0_98 = arith.constant 0 : index
    %286 = vector.load %arg5[%c0_97, %c0_98] : memref<140x560xf32, #tpu.memory_space<vmem>>, vector<140x560xf32>
    %cst_99 = arith.constant dense<0.000000e+00> : vector<2x560xf32>
    %287 = tpu.matmul %247, %286, %cst_99 {dimension_numbers = #tpu.dot_dimension_numbers<[1], [0], [0], [1], [0, 0, 1, 1], [], []>} : vector<2x140xf32>, vector<140x560xf32>, vector<2x560xf32> -> vector<2x560xf32>
    %288 = arith.addf %285, %287 : vector<2x560xf32>
    %289 = vector.extract_strided_slice %288 {offsets = [0, 0], sizes = [2, 140], strides = [1, 1]} : vector<2x560xf32> to vector<2x140xf32>
    %290 = arith.negf %289 : vector<2x140xf32>
    %291 = math.exp %290 : vector<2x140xf32>
    %cst_100 = arith.constant 1.000000e+00 : f32
    %292 = vector.broadcast %cst_100 : f32 to vector<2x140xf32>
    %293 = arith.addf %292, %291 : vector<2x140xf32>
    %294 = arith.divf %292, %293 : vector<2x140xf32>
    %295 = vector.extract_strided_slice %288 {offsets = [0, 140], sizes = [2, 140], strides = [1, 1]} : vector<2x560xf32> to vector<2x140xf32>
    %296 = arith.negf %295 : vector<2x140xf32>
    %297 = math.exp %296 : vector<2x140xf32>
    %cst_101 = arith.constant 1.000000e+00 : f32
    %298 = vector.broadcast %cst_101 : f32 to vector<2x140xf32>
    %299 = arith.addf %298, %297 : vector<2x140xf32>
    %300 = arith.divf %298, %299 : vector<2x140xf32>
    %301 = vector.extract_strided_slice %288 {offsets = [0, 280], sizes = [2, 140], strides = [1, 1]} : vector<2x560xf32> to vector<2x140xf32>
    %302 = math.tanh %301 : vector<2x140xf32>
    %303 = vector.extract_strided_slice %288 {offsets = [0, 420], sizes = [2, 140], strides = [1, 1]} : vector<2x560xf32> to vector<2x140xf32>
    %304 = arith.negf %303 : vector<2x140xf32>
    %305 = math.exp %304 : vector<2x140xf32>
    %cst_102 = arith.constant 1.000000e+00 : f32
    %306 = vector.broadcast %cst_102 : f32 to vector<2x140xf32>
    %307 = arith.addf %306, %305 : vector<2x140xf32>
    %308 = arith.divf %306, %307 : vector<2x140xf32>
    %309 = arith.mulf %300, %245 : vector<2x140xf32>
    %310 = arith.mulf %294, %302 : vector<2x140xf32>
    %311 = arith.addf %309, %310 : vector<2x140xf32>
    %312 = math.tanh %311 : vector<2x140xf32>
    %313 = arith.mulf %308, %312 : vector<2x140xf32>
    %c0_103 = arith.constant 0 : index
    %c0_104 = arith.constant 0 : index
    %314 = vector.load %arg7[%c0_103, %c0_104] : memref<140x560xf32, #tpu.memory_space<vmem>>, vector<140x560xf32>
    %cst_105 = arith.constant dense<0.000000e+00> : vector<2x560xf32>
    %315 = tpu.matmul %313, %314, %cst_105 {dimension_numbers = #tpu.dot_dimension_numbers<[1], [0], [0], [1], [0, 0, 1, 1], [], []>} : vector<2x140xf32>, vector<140x560xf32>, vector<2x560xf32> -> vector<2x560xf32>
    %c0_106 = arith.constant 0 : index
    %c0_107 = arith.constant 0 : index
    %316 = vector.load %arg8[%c0_106, %c0_107] : memref<140x560xf32, #tpu.memory_space<vmem>>, vector<140x560xf32>
    %cst_108 = arith.constant dense<0.000000e+00> : vector<2x560xf32>
    %317 = tpu.matmul %280, %316, %cst_108 {dimension_numbers = #tpu.dot_dimension_numbers<[1], [0], [0], [1], [0, 0, 1, 1], [], []>} : vector<2x140xf32>, vector<140x560xf32>, vector<2x560xf32> -> vector<2x560xf32>
    %318 = arith.addf %315, %317 : vector<2x560xf32>
    %c0_109 = arith.constant 0 : index
    %c0_110 = arith.constant 0 : index
    %319 = vector.load %arg9[%c0_109, %c0_110] : memref<1x560xf32, #tpu.memory_space<vmem>>, vector<1x560xf32>
    %320 = vector.broadcast %319 : vector<1x560xf32> to vector<2x560xf32>
    %321 = arith.addf %318, %320 : vector<2x560xf32>
    %322 = vector.extract_strided_slice %321 {offsets = [0, 0], sizes = [2, 140], strides = [1, 1]} : vector<2x560xf32> to vector<2x140xf32>
    %323 = arith.negf %322 : vector<2x140xf32>
    %324 = math.exp %323 : vector<2x140xf32>
    %cst_111 = arith.constant 1.000000e+00 : f32
    %325 = vector.broadcast %cst_111 : f32 to vector<2x140xf32>
    %326 = arith.addf %325, %324 : vector<2x140xf32>
    %327 = arith.divf %325, %326 : vector<2x140xf32>
    %328 = vector.extract_strided_slice %321 {offsets = [0, 140], sizes = [2, 140], strides = [1, 1]} : vector<2x560xf32> to vector<2x140xf32>
    %329 = arith.negf %328 : vector<2x140xf32>
    %330 = math.exp %329 : vector<2x140xf32>
    %cst_112 = arith.constant 1.000000e+00 : f32
    %331 = vector.broadcast %cst_112 : f32 to vector<2x140xf32>
    %332 = arith.addf %331, %330 : vector<2x140xf32>
    %333 = arith.divf %331, %332 : vector<2x140xf32>
    %334 = vector.extract_strided_slice %321 {offsets = [0, 280], sizes = [2, 140], strides = [1, 1]} : vector<2x560xf32> to vector<2x140xf32>
    %335 = math.tanh %334 : vector<2x140xf32>
    %336 = vector.extract_strided_slice %321 {offsets = [0, 420], sizes = [2, 140], strides = [1, 1]} : vector<2x560xf32> to vector<2x140xf32>
    %337 = arith.negf %336 : vector<2x140xf32>
    %338 = math.exp %337 : vector<2x140xf32>
    %cst_113 = arith.constant 1.000000e+00 : f32
    %339 = vector.broadcast %cst_113 : f32 to vector<2x140xf32>
    %340 = arith.addf %339, %338 : vector<2x140xf32>
    %341 = arith.divf %339, %340 : vector<2x140xf32>
    %342 = arith.mulf %333, %278 : vector<2x140xf32>
    %343 = arith.mulf %327, %335 : vector<2x140xf32>
    %344 = arith.addf %342, %343 : vector<2x140xf32>
    %345 = math.tanh %344 : vector<2x140xf32>
    %346 = arith.mulf %341, %345 : vector<2x140xf32>
    %347 = vector.extract_strided_slice %346 {offsets = [0, 0], sizes = [1, 140], strides = [1, 1]} : vector<2x140xf32> to vector<1x140xf32>
    %c4 = arith.constant 4 : index
    %c0_114 = arith.constant 0 : index
    %348 = vector.load %arg15[%c4, %c0_114] : memref<16x140xf32, #tpu.memory_space<vmem>>, vector<1x140xf32>
    tpu.vector_store %arg15[%c4, %c0_114], %347 {strides = array<i32>} : memref<16x140xf32, #tpu.memory_space<vmem>>, vector<1x140xf32>,
    %349 = vector.extract_strided_slice %346 {offsets = [1, 0], sizes = [1, 140], strides = [1, 1]} : vector<2x140xf32> to vector<1x140xf32>
    %c12 = arith.constant 12 : index
    %c0_115 = arith.constant 0 : index
    %350 = vector.load %arg15[%c12, %c0_115] : memref<16x140xf32, #tpu.memory_space<vmem>>, vector<1x140xf32>
    tpu.vector_store %arg15[%c12, %c0_115], %349 {strides = array<i32>} : memref<16x140xf32, #tpu.memory_space<vmem>>, vector<1x140xf32>,
    %351 = vector.extract_strided_slice %12 {offsets = [10, 0], sizes = [2, 560], strides = [1, 1]} : vector<16x560xf32> to vector<2x560xf32>
    %c0_116 = arith.constant 0 : index
    %c0_117 = arith.constant 0 : index
    %352 = vector.load %arg5[%c0_116, %c0_117] : memref<140x560xf32, #tpu.memory_space<vmem>>, vector<140x560xf32>
    %cst_118 = arith.constant dense<0.000000e+00> : vector<2x560xf32>
    %353 = tpu.matmul %313, %352, %cst_118 {dimension_numbers = #tpu.dot_dimension_numbers<[1], [0], [0], [1], [0, 0, 1, 1], [], []>} : vector<2x140xf32>, vector<140x560xf32>, vector<2x560xf32> -> vector<2x560xf32>
    %354 = arith.addf %351, %353 : vector<2x560xf32>
    %355 = vector.extract_strided_slice %354 {offsets = [0, 0], sizes = [2, 140], strides = [1, 1]} : vector<2x560xf32> to vector<2x140xf32>
    %356 = arith.negf %355 : vector<2x140xf32>
    %357 = math.exp %356 : vector<2x140xf32>
    %cst_119 = arith.constant 1.000000e+00 : f32
    %358 = vector.broadcast %cst_119 : f32 to vector<2x140xf32>
    %359 = arith.addf %358, %357 : vector<2x140xf32>
    %360 = arith.divf %358, %359 : vector<2x140xf32>
    %361 = vector.extract_strided_slice %354 {offsets = [0, 140], sizes = [2, 140], strides = [1, 1]} : vector<2x560xf32> to vector<2x140xf32>
    %362 = arith.negf %361 : vector<2x140xf32>
    %363 = math.exp %362 : vector<2x140xf32>
    %cst_120 = arith.constant 1.000000e+00 : f32
    %364 = vector.broadcast %cst_120 : f32 to vector<2x140xf32>
    %365 = arith.addf %364, %363 : vector<2x140xf32>
    %366 = arith.divf %364, %365 : vector<2x140xf32>
    %367 = vector.extract_strided_slice %354 {offsets = [0, 280], sizes = [2, 140], strides = [1, 1]} : vector<2x560xf32> to vector<2x140xf32>
    %368 = math.tanh %367 : vector<2x140xf32>
    %369 = vector.extract_strided_slice %354 {offsets = [0, 420], sizes = [2, 140], strides = [1, 1]} : vector<2x560xf32> to vector<2x140xf32>
    %370 = arith.negf %369 : vector<2x140xf32>
    %371 = math.exp %370 : vector<2x140xf32>
    %cst_121 = arith.constant 1.000000e+00 : f32
    %372 = vector.broadcast %cst_121 : f32 to vector<2x140xf32>
    %373 = arith.addf %372, %371 : vector<2x140xf32>
    %374 = arith.divf %372, %373 : vector<2x140xf32>
    %375 = arith.mulf %366, %311 : vector<2x140xf32>
    %376 = arith.mulf %360, %368 : vector<2x140xf32>
    %377 = arith.addf %375, %376 : vector<2x140xf32>
    %378 = math.tanh %377 : vector<2x140xf32>
    %379 = arith.mulf %374, %378 : vector<2x140xf32>
    %c0_122 = arith.constant 0 : index
    %c0_123 = arith.constant 0 : index
    %380 = vector.load %arg7[%c0_122, %c0_123] : memref<140x560xf32, #tpu.memory_space<vmem>>, vector<140x560xf32>
    %cst_124 = arith.constant dense<0.000000e+00> : vector<2x560xf32>
    %381 = tpu.matmul %379, %380, %cst_124 {dimension_numbers = #tpu.dot_dimension_numbers<[1], [0], [0], [1], [0, 0, 1, 1], [], []>} : vector<2x140xf32>, vector<140x560xf32>, vector<2x560xf32> -> vector<2x560xf32>
    %c0_125 = arith.constant 0 : index
    %c0_126 = arith.constant 0 : index
    %382 = vector.load %arg8[%c0_125, %c0_126] : memref<140x560xf32, #tpu.memory_space<vmem>>, vector<140x560xf32>
    %cst_127 = arith.constant dense<0.000000e+00> : vector<2x560xf32>
    %383 = tpu.matmul %346, %382, %cst_127 {dimension_numbers = #tpu.dot_dimension_numbers<[1], [0], [0], [1], [0, 0, 1, 1], [], []>} : vector<2x140xf32>, vector<140x560xf32>, vector<2x560xf32> -> vector<2x560xf32>
    %384 = arith.addf %381, %383 : vector<2x560xf32>
    %c0_128 = arith.constant 0 : index
    %c0_129 = arith.constant 0 : index
    %385 = vector.load %arg9[%c0_128, %c0_129] : memref<1x560xf32, #tpu.memory_space<vmem>>, vector<1x560xf32>
    %386 = vector.broadcast %385 : vector<1x560xf32> to vector<2x560xf32>
    %387 = arith.addf %384, %386 : vector<2x560xf32>
    %388 = vector.extract_strided_slice %387 {offsets = [0, 0], sizes = [2, 140], strides = [1, 1]} : vector<2x560xf32> to vector<2x140xf32>
    %389 = arith.negf %388 : vector<2x140xf32>
    %390 = math.exp %389 : vector<2x140xf32>
    %cst_130 = arith.constant 1.000000e+00 : f32
    %391 = vector.broadcast %cst_130 : f32 to vector<2x140xf32>
    %392 = arith.addf %391, %390 : vector<2x140xf32>
    %393 = arith.divf %391, %392 : vector<2x140xf32>
    %394 = vector.extract_strided_slice %387 {offsets = [0, 140], sizes = [2, 140], strides = [1, 1]} : vector<2x560xf32> to vector<2x140xf32>
    %395 = arith.negf %394 : vector<2x140xf32>
    %396 = math.exp %395 : vector<2x140xf32>
    %cst_131 = arith.constant 1.000000e+00 : f32
    %397 = vector.broadcast %cst_131 : f32 to vector<2x140xf32>
    %398 = arith.addf %397, %396 : vector<2x140xf32>
    %399 = arith.divf %397, %398 : vector<2x140xf32>
    %400 = vector.extract_strided_slice %387 {offsets = [0, 280], sizes = [2, 140], strides = [1, 1]} : vector<2x560xf32> to vector<2x140xf32>
    %401 = math.tanh %400 : vector<2x140xf32>
    %402 = vector.extract_strided_slice %387 {offsets = [0, 420], sizes = [2, 140], strides = [1, 1]} : vector<2x560xf32> to vector<2x140xf32>
    %403 = arith.negf %402 : vector<2x140xf32>
    %404 = math.exp %403 : vector<2x140xf32>
    %cst_132 = arith.constant 1.000000e+00 : f32
    %405 = vector.broadcast %cst_132 : f32 to vector<2x140xf32>
    %406 = arith.addf %405, %404 : vector<2x140xf32>
    %407 = arith.divf %405, %406 : vector<2x140xf32>
    %408 = arith.mulf %399, %344 : vector<2x140xf32>
    %409 = arith.mulf %393, %401 : vector<2x140xf32>
    %410 = arith.addf %408, %409 : vector<2x140xf32>
    %411 = math.tanh %410 : vector<2x140xf32>
    %412 = arith.mulf %407, %411 : vector<2x140xf32>
    %413 = vector.extract_strided_slice %412 {offsets = [0, 0], sizes = [1, 140], strides = [1, 1]} : vector<2x140xf32> to vector<1x140xf32>
    %c5 = arith.constant 5 : index
    %c0_133 = arith.constant 0 : index
    %414 = vector.load %arg15[%c5, %c0_133] : memref<16x140xf32, #tpu.memory_space<vmem>>, vector<1x140xf32>
    tpu.vector_store %arg15[%c5, %c0_133], %413 {strides = array<i32>} : memref<16x140xf32, #tpu.memory_space<vmem>>, vector<1x140xf32>,
    %415 = vector.extract_strided_slice %412 {offsets = [1, 0], sizes = [1, 140], strides = [1, 1]} : vector<2x140xf32> to vector<1x140xf32>
    %c13 = arith.constant 13 : index
    %c0_134 = arith.constant 0 : index
    %416 = vector.load %arg15[%c13, %c0_134] : memref<16x140xf32, #tpu.memory_space<vmem>>, vector<1x140xf32>
    tpu.vector_store %arg15[%c13, %c0_134], %415 {strides = array<i32>} : memref<16x140xf32, #tpu.memory_space<vmem>>, vector<1x140xf32>,
    %417 = vector.extract_strided_slice %12 {offsets = [12, 0], sizes = [2, 560], strides = [1, 1]} : vector<16x560xf32> to vector<2x560xf32>
    %c0_135 = arith.constant 0 : index
    %c0_136 = arith.constant 0 : index
    %418 = vector.load %arg5[%c0_135, %c0_136] : memref<140x560xf32, #tpu.memory_space<vmem>>, vector<140x560xf32>
    %cst_137 = arith.constant dense<0.000000e+00> : vector<2x560xf32>
    %419 = tpu.matmul %379, %418, %cst_137 {dimension_numbers = #tpu.dot_dimension_numbers<[1], [0], [0], [1], [0, 0, 1, 1], [], []>} : vector<2x140xf32>, vector<140x560xf32>, vector<2x560xf32> -> vector<2x560xf32>
    %420 = arith.addf %417, %419 : vector<2x560xf32>
    %421 = vector.extract_strided_slice %420 {offsets = [0, 0], sizes = [2, 140], strides = [1, 1]} : vector<2x560xf32> to vector<2x140xf32>
    %422 = arith.negf %421 : vector<2x140xf32>
    %423 = math.exp %422 : vector<2x140xf32>
    %cst_138 = arith.constant 1.000000e+00 : f32
    %424 = vector.broadcast %cst_138 : f32 to vector<2x140xf32>
    %425 = arith.addf %424, %423 : vector<2x140xf32>
    %426 = arith.divf %424, %425 : vector<2x140xf32>
    %427 = vector.extract_strided_slice %420 {offsets = [0, 140], sizes = [2, 140], strides = [1, 1]} : vector<2x560xf32> to vector<2x140xf32>
    %428 = arith.negf %427 : vector<2x140xf32>
    %429 = math.exp %428 : vector<2x140xf32>
    %cst_139 = arith.constant 1.000000e+00 : f32
    %430 = vector.broadcast %cst_139 : f32 to vector<2x140xf32>
    %431 = arith.addf %430, %429 : vector<2x140xf32>
    %432 = arith.divf %430, %431 : vector<2x140xf32>
    %433 = vector.extract_strided_slice %420 {offsets = [0, 280], sizes = [2, 140], strides = [1, 1]} : vector<2x560xf32> to vector<2x140xf32>
    %434 = math.tanh %433 : vector<2x140xf32>
    %435 = vector.extract_strided_slice %420 {offsets = [0, 420], sizes = [2, 140], strides = [1, 1]} : vector<2x560xf32> to vector<2x140xf32>
    %436 = arith.negf %435 : vector<2x140xf32>
    %437 = math.exp %436 : vector<2x140xf32>
    %cst_140 = arith.constant 1.000000e+00 : f32
    %438 = vector.broadcast %cst_140 : f32 to vector<2x140xf32>
    %439 = arith.addf %438, %437 : vector<2x140xf32>
    %440 = arith.divf %438, %439 : vector<2x140xf32>
    %441 = arith.mulf %432, %377 : vector<2x140xf32>
    %442 = arith.mulf %426, %434 : vector<2x140xf32>
    %443 = arith.addf %441, %442 : vector<2x140xf32>
    %444 = math.tanh %443 : vector<2x140xf32>
    %445 = arith.mulf %440, %444 : vector<2x140xf32>
    %c0_141 = arith.constant 0 : index
    %c0_142 = arith.constant 0 : index
    %446 = vector.load %arg7[%c0_141, %c0_142] : memref<140x560xf32, #tpu.memory_space<vmem>>, vector<140x560xf32>
    %cst_143 = arith.constant dense<0.000000e+00> : vector<2x560xf32>
    %447 = tpu.matmul %445, %446, %cst_143 {dimension_numbers = #tpu.dot_dimension_numbers<[1], [0], [0], [1], [0, 0, 1, 1], [], []>} : vector<2x140xf32>, vector<140x560xf32>, vector<2x560xf32> -> vector<2x560xf32>
    %c0_144 = arith.constant 0 : index
    %c0_145 = arith.constant 0 : index
    %448 = vector.load %arg8[%c0_144, %c0_145] : memref<140x560xf32, #tpu.memory_space<vmem>>, vector<140x560xf32>
    %cst_146 = arith.constant dense<0.000000e+00> : vector<2x560xf32>
    %449 = tpu.matmul %412, %448, %cst_146 {dimension_numbers = #tpu.dot_dimension_numbers<[1], [0], [0], [1], [0, 0, 1, 1], [], []>} : vector<2x140xf32>, vector<140x560xf32>, vector<2x560xf32> -> vector<2x560xf32>
    %450 = arith.addf %447, %449 : vector<2x560xf32>
    %c0_147 = arith.constant 0 : index
    %c0_148 = arith.constant 0 : index
    %451 = vector.load %arg9[%c0_147, %c0_148] : memref<1x560xf32, #tpu.memory_space<vmem>>, vector<1x560xf32>
    %452 = vector.broadcast %451 : vector<1x560xf32> to vector<2x560xf32>
    %453 = arith.addf %450, %452 : vector<2x560xf32>
    %454 = vector.extract_strided_slice %453 {offsets = [0, 0], sizes = [2, 140], strides = [1, 1]} : vector<2x560xf32> to vector<2x140xf32>
    %455 = arith.negf %454 : vector<2x140xf32>
    %456 = math.exp %455 : vector<2x140xf32>
    %cst_149 = arith.constant 1.000000e+00 : f32
    %457 = vector.broadcast %cst_149 : f32 to vector<2x140xf32>
    %458 = arith.addf %457, %456 : vector<2x140xf32>
    %459 = arith.divf %457, %458 : vector<2x140xf32>
    %460 = vector.extract_strided_slice %453 {offsets = [0, 140], sizes = [2, 140], strides = [1, 1]} : vector<2x560xf32> to vector<2x140xf32>
    %461 = arith.negf %460 : vector<2x140xf32>
    %462 = math.exp %461 : vector<2x140xf32>
    %cst_150 = arith.constant 1.000000e+00 : f32
    %463 = vector.broadcast %cst_150 : f32 to vector<2x140xf32>
    %464 = arith.addf %463, %462 : vector<2x140xf32>
    %465 = arith.divf %463, %464 : vector<2x140xf32>
    %466 = vector.extract_strided_slice %453 {offsets = [0, 280], sizes = [2, 140], strides = [1, 1]} : vector<2x560xf32> to vector<2x140xf32>
    %467 = math.tanh %466 : vector<2x140xf32>
    %468 = vector.extract_strided_slice %453 {offsets = [0, 420], sizes = [2, 140], strides = [1, 1]} : vector<2x560xf32> to vector<2x140xf32>
    %469 = arith.negf %468 : vector<2x140xf32>
    %470 = math.exp %469 : vector<2x140xf32>
    %cst_151 = arith.constant 1.000000e+00 : f32
    %471 = vector.broadcast %cst_151 : f32 to vector<2x140xf32>
    %472 = arith.addf %471, %470 : vector<2x140xf32>
    %473 = arith.divf %471, %472 : vector<2x140xf32>
    %474 = arith.mulf %465, %410 : vector<2x140xf32>
    %475 = arith.mulf %459, %467 : vector<2x140xf32>
    %476 = arith.addf %474, %475 : vector<2x140xf32>
    %477 = math.tanh %476 : vector<2x140xf32>
    %478 = arith.mulf %473, %477 : vector<2x140xf32>
    %479 = vector.extract_strided_slice %478 {offsets = [0, 0], sizes = [1, 140], strides = [1, 1]} : vector<2x140xf32> to vector<1x140xf32>
    %c6 = arith.constant 6 : index
    %c0_152 = arith.constant 0 : index
    %480 = vector.load %arg15[%c6, %c0_152] : memref<16x140xf32, #tpu.memory_space<vmem>>, vector<1x140xf32>
    tpu.vector_store %arg15[%c6, %c0_152], %479 {strides = array<i32>} : memref<16x140xf32, #tpu.memory_space<vmem>>, vector<1x140xf32>,
    %481 = vector.extract_strided_slice %478 {offsets = [1, 0], sizes = [1, 140], strides = [1, 1]} : vector<2x140xf32> to vector<1x140xf32>
    %c14 = arith.constant 14 : index
    %c0_153 = arith.constant 0 : index
    %482 = vector.load %arg15[%c14, %c0_153] : memref<16x140xf32, #tpu.memory_space<vmem>>, vector<1x140xf32>
    tpu.vector_store %arg15[%c14, %c0_153], %481 {strides = array<i32>} : memref<16x140xf32, #tpu.memory_space<vmem>>, vector<1x140xf32>,
    %483 = vector.extract_strided_slice %12 {offsets = [14, 0], sizes = [2, 560], strides = [1, 1]} : vector<16x560xf32> to vector<2x560xf32>
    %c0_154 = arith.constant 0 : index
    %c0_155 = arith.constant 0 : index
    %484 = vector.load %arg5[%c0_154, %c0_155] : memref<140x560xf32, #tpu.memory_space<vmem>>, vector<140x560xf32>
    %cst_156 = arith.constant dense<0.000000e+00> : vector<2x560xf32>
    %485 = tpu.matmul %445, %484, %cst_156 {dimension_numbers = #tpu.dot_dimension_numbers<[1], [0], [0], [1], [0, 0, 1, 1], [], []>} : vector<2x140xf32>, vector<140x560xf32>, vector<2x560xf32> -> vector<2x560xf32>
    %486 = arith.addf %483, %485 : vector<2x560xf32>
    %487 = vector.extract_strided_slice %486 {offsets = [0, 0], sizes = [2, 140], strides = [1, 1]} : vector<2x560xf32> to vector<2x140xf32>
    %488 = arith.negf %487 : vector<2x140xf32>
    %489 = math.exp %488 : vector<2x140xf32>
    %cst_157 = arith.constant 1.000000e+00 : f32
    %490 = vector.broadcast %cst_157 : f32 to vector<2x140xf32>
    %491 = arith.addf %490, %489 : vector<2x140xf32>
    %492 = arith.divf %490, %491 : vector<2x140xf32>
    %493 = vector.extract_strided_slice %486 {offsets = [0, 140], sizes = [2, 140], strides = [1, 1]} : vector<2x560xf32> to vector<2x140xf32>
    %494 = arith.negf %493 : vector<2x140xf32>
    %495 = math.exp %494 : vector<2x140xf32>
    %cst_158 = arith.constant 1.000000e+00 : f32
    %496 = vector.broadcast %cst_158 : f32 to vector<2x140xf32>
    %497 = arith.addf %496, %495 : vector<2x140xf32>
    %498 = arith.divf %496, %497 : vector<2x140xf32>
    %499 = vector.extract_strided_slice %486 {offsets = [0, 280], sizes = [2, 140], strides = [1, 1]} : vector<2x560xf32> to vector<2x140xf32>
    %500 = math.tanh %499 : vector<2x140xf32>
    %501 = vector.extract_strided_slice %486 {offsets = [0, 420], sizes = [2, 140], strides = [1, 1]} : vector<2x560xf32> to vector<2x140xf32>
    %502 = arith.negf %501 : vector<2x140xf32>
    %503 = math.exp %502 : vector<2x140xf32>
    %cst_159 = arith.constant 1.000000e+00 : f32
    %504 = vector.broadcast %cst_159 : f32 to vector<2x140xf32>
    %505 = arith.addf %504, %503 : vector<2x140xf32>
    %506 = arith.divf %504, %505 : vector<2x140xf32>
    %507 = arith.mulf %498, %443 : vector<2x140xf32>
    %508 = arith.mulf %492, %500 : vector<2x140xf32>
    %509 = arith.addf %507, %508 : vector<2x140xf32>
    %510 = math.tanh %509 : vector<2x140xf32>
    %511 = arith.mulf %506, %510 : vector<2x140xf32>
    %c0_160 = arith.constant 0 : index
    %c0_161 = arith.constant 0 : index
    %512 = vector.load %arg7[%c0_160, %c0_161] : memref<140x560xf32, #tpu.memory_space<vmem>>, vector<140x560xf32>
    %cst_162 = arith.constant dense<0.000000e+00> : vector<2x560xf32>
    %513 = tpu.matmul %511, %512, %cst_162 {dimension_numbers = #tpu.dot_dimension_numbers<[1], [0], [0], [1], [0, 0, 1, 1], [], []>} : vector<2x140xf32>, vector<140x560xf32>, vector<2x560xf32> -> vector<2x560xf32>
    %c0_163 = arith.constant 0 : index
    %c0_164 = arith.constant 0 : index
    %514 = vector.load %arg8[%c0_163, %c0_164] : memref<140x560xf32, #tpu.memory_space<vmem>>, vector<140x560xf32>
    %cst_165 = arith.constant dense<0.000000e+00> : vector<2x560xf32>
    %515 = tpu.matmul %478, %514, %cst_165 {dimension_numbers = #tpu.dot_dimension_numbers<[1], [0], [0], [1], [0, 0, 1, 1], [], []>} : vector<2x140xf32>, vector<140x560xf32>, vector<2x560xf32> -> vector<2x560xf32>
    %516 = arith.addf %513, %515 : vector<2x560xf32>
    %c0_166 = arith.constant 0 : index
    %c0_167 = arith.constant 0 : index
    %517 = vector.load %arg9[%c0_166, %c0_167] : memref<1x560xf32, #tpu.memory_space<vmem>>, vector<1x560xf32>
    %518 = vector.broadcast %517 : vector<1x560xf32> to vector<2x560xf32>
    %519 = arith.addf %516, %518 : vector<2x560xf32>
    %520 = vector.extract_strided_slice %519 {offsets = [0, 0], sizes = [2, 140], strides = [1, 1]} : vector<2x560xf32> to vector<2x140xf32>
    %521 = arith.negf %520 : vector<2x140xf32>
    %522 = math.exp %521 : vector<2x140xf32>
    %cst_168 = arith.constant 1.000000e+00 : f32
    %523 = vector.broadcast %cst_168 : f32 to vector<2x140xf32>
    %524 = arith.addf %523, %522 : vector<2x140xf32>
    %525 = arith.divf %523, %524 : vector<2x140xf32>
    %526 = vector.extract_strided_slice %519 {offsets = [0, 140], sizes = [2, 140], strides = [1, 1]} : vector<2x560xf32> to vector<2x140xf32>
    %527 = arith.negf %526 : vector<2x140xf32>
    %528 = math.exp %527 : vector<2x140xf32>
    %cst_169 = arith.constant 1.000000e+00 : f32
    %529 = vector.broadcast %cst_169 : f32 to vector<2x140xf32>
    %530 = arith.addf %529, %528 : vector<2x140xf32>
    %531 = arith.divf %529, %530 : vector<2x140xf32>
    %532 = vector.extract_strided_slice %519 {offsets = [0, 280], sizes = [2, 140], strides = [1, 1]} : vector<2x560xf32> to vector<2x140xf32>
    %533 = math.tanh %532 : vector<2x140xf32>
    %534 = vector.extract_strided_slice %519 {offsets = [0, 420], sizes = [2, 140], strides = [1, 1]} : vector<2x560xf32> to vector<2x140xf32>
    %535 = arith.negf %534 : vector<2x140xf32>
    %536 = math.exp %535 : vector<2x140xf32>
    %cst_170 = arith.constant 1.000000e+00 : f32
    %537 = vector.broadcast %cst_170 : f32 to vector<2x140xf32>
    %538 = arith.addf %537, %536 : vector<2x140xf32>
    %539 = arith.divf %537, %538 : vector<2x140xf32>
    %540 = arith.mulf %531, %476 : vector<2x140xf32>
    %541 = arith.mulf %525, %533 : vector<2x140xf32>
    %542 = arith.addf %540, %541 : vector<2x140xf32>
    %543 = math.tanh %542 : vector<2x140xf32>
    %544 = arith.mulf %539, %543 : vector<2x140xf32>
    %545 = vector.extract_strided_slice %544 {offsets = [0, 0], sizes = [1, 140], strides = [1, 1]} : vector<2x140xf32> to vector<1x140xf32>
    %c7 = arith.constant 7 : index
    %c0_171 = arith.constant 0 : index
    %546 = vector.load %arg15[%c7, %c0_171] : memref<16x140xf32, #tpu.memory_space<vmem>>, vector<1x140xf32>
    tpu.vector_store %arg15[%c7, %c0_171], %545 {strides = array<i32>} : memref<16x140xf32, #tpu.memory_space<vmem>>, vector<1x140xf32>,
    %547 = vector.extract_strided_slice %544 {offsets = [1, 0], sizes = [1, 140], strides = [1, 1]} : vector<2x140xf32> to vector<1x140xf32>
    %c15 = arith.constant 15 : index
    %c0_172 = arith.constant 0 : index
    %548 = vector.load %arg15[%c15, %c0_172] : memref<16x140xf32, #tpu.memory_space<vmem>>, vector<1x140xf32>
    tpu.vector_store %arg15[%c15, %c0_172], %547 {strides = array<i32>} : memref<16x140xf32, #tpu.memory_space<vmem>>, vector<1x140xf32>,
    %c0_173 = arith.constant 0 : index
    %c0_174 = arith.constant 0 : index
    %549 = vector.load %arg15[%c0_173, %c0_174] : memref<16x140xf32, #tpu.memory_space<vmem>>, vector<16x140xf32>
    %c0_175 = arith.constant 0 : index
    %c0_176 = arith.constant 0 : index
    %550 = vector.load %arg10[%c0_175, %c0_176] : memref<140x32xf32, #tpu.memory_space<vmem>>, vector<140x32xf32>
    %cst_177 = arith.constant dense<0.000000e+00> : vector<16x32xf32>
    %551 = tpu.matmul %549, %550, %cst_177 {dimension_numbers = #tpu.dot_dimension_numbers<[1], [0], [0], [1], [0, 0, 1, 1], [], []>} : vector<16x140xf32>, vector<140x32xf32>, vector<16x32xf32> -> vector<16x32xf32>
    %c0_178 = arith.constant 0 : index
    %c0_179 = arith.constant 0 : index
    %552 = vector.load %arg11[%c0_178, %c0_179] : memref<1x32xf32, #tpu.memory_space<vmem>>, vector<1x32xf32>
    %553 = vector.broadcast %552 : vector<1x32xf32> to vector<16x32xf32>
    %554 = arith.addf %551, %553 : vector<16x32xf32>
    %c0_180 = arith.constant 0 : index
    %c0_181 = arith.constant 0 : index
    %555 = vector.load %arg12[%c0_180, %c0_181] : memref<16x32xf32, #tpu.memory_space<vmem>>, vector<16x32xf32>
    tpu.vector_store %arg12[%c0_180, %c0_181], %554 {strides = array<i32>} : memref<16x32xf32, #tpu.memory_space<vmem>>, vector<16x32xf32>,
    %c0_182 = arith.constant 0 : index
    %c0_183 = arith.constant 0 : index
    %c0_184 = arith.constant 0 : index
    %556 = vector.load %arg13[%c0_182, %c0_183, %c0_184] : memref<2x2x140xf32, #tpu.memory_space<vmem>>, vector<1x2x140xf32>
    %557 = vector.shape_cast %556 : vector<1x2x140xf32> to vector<2x140xf32>
    %558 = vector.shape_cast %511 : vector<2x140xf32> to vector<1x2x140xf32>
    tpu.vector_store %arg13[%c0_182, %c0_183, %c0_184], %558 {strides = array<i32>} : memref<2x2x140xf32, #tpu.memory_space<vmem>>, vector<1x2x140xf32>,
    %c1_185 = arith.constant 1 : index
    %c0_186 = arith.constant 0 : index
    %c0_187 = arith.constant 0 : index
    %559 = vector.load %arg13[%c1_185, %c0_186, %c0_187] : memref<2x2x140xf32, #tpu.memory_space<vmem>>, vector<1x2x140xf32>
    %560 = vector.shape_cast %559 : vector<1x2x140xf32> to vector<2x140xf32>
    %561 = vector.shape_cast %544 : vector<2x140xf32> to vector<1x2x140xf32>
    tpu.vector_store %arg13[%c1_185, %c0_186, %c0_187], %561 {strides = array<i32>} : memref<2x2x140xf32, #tpu.memory_space<vmem>>, vector<1x2x140xf32>,
    %c0_188 = arith.constant 0 : index
    %c0_189 = arith.constant 0 : index
    %c0_190 = arith.constant 0 : index
    %562 = vector.load %arg14[%c0_188, %c0_189, %c0_190] : memref<2x2x140xf32, #tpu.memory_space<vmem>>, vector<1x2x140xf32>
    %563 = vector.shape_cast %562 : vector<1x2x140xf32> to vector<2x140xf32>
    %564 = vector.shape_cast %509 : vector<2x140xf32> to vector<1x2x140xf32>
    tpu.vector_store %arg14[%c0_188, %c0_189, %c0_190], %564 {strides = array<i32>} : memref<2x2x140xf32, #tpu.memory_space<vmem>>, vector<1x2x140xf32>,
    %c1_191 = arith.constant 1 : index
    %c0_192 = arith.constant 0 : index
    %c0_193 = arith.constant 0 : index
    %565 = vector.load %arg14[%c1_191, %c0_192, %c0_193] : memref<2x2x140xf32, #tpu.memory_space<vmem>>, vector<1x2x140xf32>
    %566 = vector.shape_cast %565 : vector<1x2x140xf32> to vector<2x140xf32>
    %567 = vector.shape_cast %542 : vector<2x140xf32> to vector<1x2x140xf32>
    tpu.vector_store %arg14[%c1_191, %c0_192, %c0_193], %567 {strides = array<i32>} : memref<2x2x140xf32, #tpu.memory_space<vmem>>, vector<1x2x140xf32>,
    return
  }
}

</mosaic_0001>

<bundles_post_ra>
// kernel: model3_forward.1
= control target key start
LH: loop header
LB: loop body
LE: loop exit
PB: predicated region body
PF: predicated region fallthrough
CT: control target
= control target key end

     0   :  { %20 = vsyncpa [#allocation4], 0  ;;  %s15853_s0 = inlined_call_operand.vmem [shape: s32[16,1], index: 0, kind: input, shape index: {}]   ;;  %s15854_s1 = inlined_call_operand.vmem [shape: f32[32,32], index: 1, kind: input, shape index: {}]   ;;  %s15855_s2 = inlined_call_operand.vmem [shape: f32[2,2,140], index: 2, kind: input, shape index: {}]   ;;  %s15856_s3 = inlined_call_operand.vmem [shape: f32[2,2,140], index: 3, kind: input, shape index: {}]   ;;  %s15857_s4 = inlined_call_operand.vmem [shape: f32[32,560], index: 4, kind: input, shape index: {}]   ;;  %s15858_s5 = inlined_call_operand.hbm [shape: f32[140,560], index: 5, kind: input, shape index: {}]   ;;  %s15859_s6 = inlined_call_operand.vmem [shape: f32[1,560], index: 6, kind: input, shape index: {}]   ;;  %s15860_s7 = inlined_call_operand.hbm [shape: f32[140,560], index: 7, kind: input, shape index: {}]   ;;  %s15861_s8 = inlined_call_operand.hbm [shape: f32[140,560], index: 8, kind: input, shape index: {}]   ;;  %s15862_s9 = inlined_call_operand.vmem [shape: f32[1,560], index: 9, kind: input, shape index: {}]   ;;  %s15863_s10 = inlined_call_operand.vmem [shape: f32[140,32], index: 10, kind: input, shape index: {}]   ;;  %s15864_s11 = inlined_call_operand.vmem [shape: f32[1,32], index: 11, kind: input, shape index: {}]   ;;  %s15865_s12 = inlined_call_operand.hbm [shape: f32[16,32], index: 12, kind: output, shape index: {0}]   ;;  %s15866_s13 = inlined_call_operand.hbm [shape: f32[2,2,140], index: 13, kind: output, shape index: {1}]   ;;  %s15867_s14 = inlined_call_operand.hbm [shape: f32[2,2,140], index: 14, kind: output, shape index: {2}]  }
   0x1   :  { %21 = vsyncpa [#allocation7], 0 }
   0x2   :  { %22 = vsyncpa [#allocation5], 0 }
   0x3   :  { %23 = vsyncpa [#allocation11], 0  ;;  %s13914_s29 = smov [#allocation6]   ;;  %s13915_s15 = smov [#allocation3]  }
   0x4   :  { %s53_s30 = sshll.u32 %s13914_s29, 4  ;;  %s39_s16 = sshll.u32 %s13915_s15, 4  ;;  %s54_s30 = int_to_ptr.vmem [resolvable:$true] %s53_s30  ;;  %s14012_s16 = int_to_ptr.vmem [resolvable:$true] %s39_s16 }
   0x5   :  { %s13774_s19 = scalar_lea.hbm %s15860_s7, 11520 }
   0x6   :  { %p13775_p0 = scmp.ne.s32.totalorder %s15860_s7, %s13774_s19  ;;  %p13778_p1 = scmp.lt.u32.totalorder %s13774_s19, %s15860_s7 }
   0x8   :  { %p13780_p2 = pnand %p13778_p1, %p13775_p0 }
   0xa   :  { %13783 = shalt.err (!%p13780_p2)
}
   0xb   :  { %s13784_s24 = scalar_lea.vmem %s54_s30, 11520  ;;  %p13789_p4 = scmp.lt.s32.totalorder %s54_s30, %s54_s30 }
   0xc   :  { %p13785_p3 = scmp.ne.s32.totalorder %s54_s30, %s13784_s24  ;;  %p13790_p5 = scmp.lt.s32.totalorder %s13784_s24, %s13784_s24 }
   0xe   :  { %p13791_p6 = por %p13790_p5, %p13789_p4 }
  0x10   :  { %p13792_p7 = pnand %p13791_p6, %p13785_p3 }
  0x12   :  { %13795 = shalt.err (!%p13792_p7)
}
  0x13   :  { %s13916_s25 = smov 640   ;;  %s13917_s26 = smov 40  }
  0x14   :  { %59 = dma.hbm_to_vmem [thread:$0]  %s15860_s7, 11520, %s54_s30, [#allocation7], %s13916_s25, %s13916_s25, %s13917_s26  }
  0x15   :  { %s13796_s17 = scalar_lea.hbm %s15858_s5, 11520 }
  0x16   :  { %p13797_p8 = scmp.ne.s32.totalorder %s15858_s5, %s13796_s17  ;;  %p13800_p9 = scmp.lt.u32.totalorder %s13796_s17, %s15858_s5 }
  0x18   :  { %p13802_p10 = pnand %p13800_p9, %p13797_p8 }
  0x1a   :  { %13805 = shalt.err (!%p13802_p10)
}
  0x1b   :  { %s13806_s22 = scalar_lea.vmem %s14012_s16, 11520  ;;  %p13811_p12 = scmp.lt.s32.totalorder %s14012_s16, %s14012_s16 }
  0x1c   :  { %p13807_p11 = scmp.ne.s32.totalorder %s14012_s16, %s13806_s22  ;;  %p13812_p13 = scmp.lt.s32.totalorder %s13806_s22, %s13806_s22 }
  0x1e   :  { %p13813_p0 = por %p13812_p13, %p13811_p12 }
  0x20   :  { %p13814_p1 = pnand %p13813_p0, %p13807_p11 }
  0x22   :  { %13817 = shalt.err (!%p13814_p1)
}
  0x23   :  { %45 = dma.hbm_to_vmem [thread:$0]  %s15858_s5, 11520, %s14012_s16, [#allocation4], %s13916_s25, %s13916_s25, %s13917_s26  }
  0x24   :  { %s13918_s23 = smov [#allocation8]   ;;  %s13818_s29 = scalar_lea.hbm %s15861_s8, 11520 }
  0x25   :  { %s65_s24 = sshll.u32 %s13918_s23, 4  ;;  %p13819_p2 = scmp.ne.s32.totalorder %s15861_s8, %s13818_s29  ;;  %s66_s24 = int_to_ptr.vmem [resolvable:$true] %s65_s24 }
  0x26   :  { %p13822_p3 = scmp.lt.u32.totalorder %s13818_s29, %s15861_s8 }
  0x28   :  { %p13824_p4 = pnand %p13822_p3, %p13819_p2 }
  0x2a   :  { %13827 = shalt.err (!%p13824_p4)
}
  0x2b   :  { %s13828_s20 = scalar_lea.vmem %s66_s24, 11520  ;;  %p13833_p6 = scmp.lt.s32.totalorder %s66_s24, %s66_s24 }
  0x2c   :  { %p13829_p5 = scmp.ne.s32.totalorder %s66_s24, %s13828_s20  ;;  %p13834_p7 = scmp.lt.s32.totalorder %s13828_s20, %s13828_s20 }
  0x2e   :  { %p13835_p8 = por %p13834_p7, %p13833_p6 }
  0x30   :  { %p13836_p9 = pnand %p13835_p8, %p13829_p5 }
  0x32   :  { %13839 = shalt.err (!%p13836_p9)
}
  0x33   :  { %71 = dma.hbm_to_vmem [thread:$0]  %s15861_s8, 11520, %s66_s24, [#allocation7], %s13916_s25, %s13916_s25, %s13917_s26  }
  0x34   :  { %13906 = dma.done.wait [#allocation4], 11520  }
  0x35   :  { %13907 = vsyncadd [#allocation4], 4294955776 }
  0x36   :  { %13908 = dma.done.wait [#allocation7], 23040  }
  0x37   :  { %13909 = vsyncadd [#allocation7], 4294944256  ;;  %v13919_v0 = vmov 0   ;;  %v87_v1 = vld [vmem:[%s15853_s0] sm:$0xff]  ;;  %v104_v3 = vld [vmem:[%s15854_s1 + $0x8] sm:$0xff]  ;;  %vm577_vm0 = vcmask 97280  }
  0x38   :  { %13325 = vset.pattern.permute.xlu0 %v13919_v0  ;;  %v103_v2 = vld [vmem:[%s15854_s1] sm:$0xff]  ;;  %v105_v4 = vld [vmem:[%s15854_s1 + $0x10] sm:$0xff]  ;;  %v106_v5 = vld [vmem:[%s15854_s1 + $0x18] sm:$0xff]  ;;  %vm580_vm1 = vcmask 1043456   ;;  %vm13920_vm2 = vmmov 1   ;;  %vm107_vm4 = vcmask 261120  }
  0x39   :  { %92 = vperm.xlu0 %13325, %v87_v1   ;;  %v88_v6 = vld [vmem:[%s15853_s0 + $0x8] sm:$0xff]  ;;  %v10714_v7 = vpack.c.bf16 %v104_v3, %v103_v2  ;;  %v10718_v8 = vpack.c.bf16 %v106_v5, %v105_v4  ;;  %v483_v10 = vld [vmem:[#allocation3 + $0x30] sm:$0xff]  ;;  %v477_v11 = vld [vmem:[#allocation3] sm:$0xff]  ;;  %s13923_s17 = smov 12   ;;  %vm869_vm7 = vcmask 850944   ;;  %s13925_s19 = smov 24  }
  0x3a   :  { %v478_v9 = vld [vmem:[#allocation3 + $0x8] sm:$0xff]  ;;  %v488_v14 = vld [vmem:[#allocation3 + $0x58] sm:$0xff]  ;;  %v493_v15 = vld [vmem:[#allocation3 + $0x80] sm:$0xff]  ;;  %vm894_vm8 = vcmask 195584   ;;  %vm1325_vm9 = vcmask 752640   ;;  %s13929_s25 = smov 116  }
  0x3b   :  { %10715 = vmatprep.subr.bf16.mxu1 %v10714_v7  ;;  %v10746_v12 = vpack.c.bf16 %v483_v10, %v478_v9  ;;  %v482_v13 = vld [vmem:[#allocation3 + $0x28] sm:$0xff]  ;;  %v10750_v17 = vpack.c.bf16 %v493_v15, %v488_v14  ;;  %v487_v18 = vld [vmem:[#allocation3 + $0x50] sm:$0xff]  ;;  %v492_v19 = vld [vmem:[#allocation3 + $0x78] sm:$0xff]  ;;  %vm10286_vm11 = vcmask 1041408   ;;  %vm10287_vm12 = vcmask 93186  }
  0x3c   :  { %10717 = vmatpush3.bf16.msra.mxu1 %v10714_v7  ;;  %v10748_v16 = vpack.c.bf16 %v482_v13, %v477_v11  ;;  %v498_v20 = vld [vmem:[#allocation3 + $0xa8] sm:$0xff]  ;;  %v503_v21 = vld [vmem:[#allocation3 + $0xd0] sm:$0xff]  ;;  %v10752_v22 = vpack.c.bf16 %v492_v19, %v487_v18  ;;  %v497_v24 = vld [vmem:[#allocation3 + $0xa0] sm:$0xff]  ;;  %v89_v18 = vlaneseq  ;;  %vm10318_vm14 = vcmask 949248  }
  0x3d   :  { %95 = vperm.xlu0 %13325, %v88_v6   ;;  %10719 = vmatprep.subr.bf16.mxu1 %v10718_v8  ;;  %v10754_v23 = vpack.c.bf16 %v503_v21, %v498_v20  ;;  %v502_v25 = vld [vmem:[#allocation3 + $0xc8] sm:$0xff]  ;;  %v508_v26 = vld [vmem:[#allocation3 + $0xf8] sm:$0xff]  ;;  %v513_v27 = vld [vmem:[#allocation3 + $0x120] sm:$0xff] }
  0x3e   :  { %10747 = vmatprep.subr.bf16.mxu0 %v10746_v12  ;;  %v10756_v28 = vpack.c.bf16 %v502_v25, %v497_v24  ;;  %v10758_v29 = vpack.c.bf16 %v513_v27, %v508_v26  ;;  %v507_v30 = vld [vmem:[#allocation3 + $0xf0] sm:$0xff]  ;;  %v512_v31 = vld [vmem:[#allocation3 + $0x118] sm:$0xff]  ;;  %v518_v32 = vld [vmem:[#allocation3 + $0x148] sm:$0xff]  ;;  %v90_v19 = vand.u32 127, %v89_v18  ;;  %vm15721_vm10 = vcmp.lt.s32.totalorder %v89_v18, 140 }
  0x3f   :  { %10749 = vmatpush1.bf16.msra.mxu0 %v10748_v16  ;;  %v523_v33 = vld [vmem:[#allocation3 + $0x170] sm:$0xff]  ;;  %v10760_v34 = vpack.c.bf16 %v512_v31, %v507_v30  ;;  %v14085_v35 = vld.sshfl [vmem:[%s15855_s2] sm:$0x33 pattern:$0x76325410]  ;;  %v522_v38 = vld [vmem:[#allocation3 + $0x168] sm:$0xff] }
  0x40   :  { %10721 = vmatpush3.bf16.msra.mxu1 %v10718_v8  ;;  %10751 = vmatprep.subr.bf16.mxu0 %v10750_v17  ;;  %v10762_v36 = vpack.c.bf16 %v523_v33, %v518_v32  ;;  %v517_v37 = vld [vmem:[#allocation3 + $0x140] sm:$0xff]  ;;  %v528_v39 = vld [vmem:[#allocation3 + $0x198] sm:$0xff]  ;;  %v14089_v40 = vcombine.high %v14085_v35, %v14085_v35  ;;  %v190_v42 = vld [vmem:[%s15857_s4 + $0x8] sm:$0xff]  ;;  %v13921_v8 = vmov 0.0|0.0  }
  0x41   :  { %v533_v41 = vld [vmem:[#allocation3 + $0x1c0] sm:$0xff]  ;;  %v195_v43 = vld [vmem:[%s15857_s4 + $0x30] sm:$0xff]  ;;  %v10764_v45 = vpack.c.bf16 %v522_v38, %v517_v37  ;;  %v532_v48 = vld [vmem:[#allocation3 + $0x1b8] sm:$0xff] }
  0x42   :  { %10403 = vmatprep.mubr.msk.f32.mxu0 %vm577_vm0, %v14089_v40  ;;  %v10722_v44 = vpack.c.bf16 %v195_v43, %v190_v42  ;;  %v10766_v46 = vpack.c.bf16 %v533_v41, %v528_v39  ;;  %v527_v47 = vld [vmem:[#allocation3 + $0x190] sm:$0xff]  ;;  %v538_v49 = vld [vmem:[#allocation3 + $0x1e8] sm:$0xff]  ;;  %v537_v53 = vld [vmem:[#allocation3 + $0x1e0] sm:$0xff] }
  0x43   :  { %10753 = vmatpush1.bf16.msra.mxu0 %v10752_v22  ;;  %v543_v50 = vld [vmem:[#allocation3 + $0x210] sm:$0xff]  ;;  %v10768_v51 = vpack.c.bf16 %v532_v48, %v527_v47  ;;  %v542_v54 = vld [vmem:[#allocation3 + $0x208] sm:$0xff]  ;;  %v548_v55 = vld [vmem:[#allocation3 + $0x238] sm:$0xff] }
  0x44   :  { %10755 = vmatprep.subr.bf16.mxu0 %v10754_v23  ;;  %10723 = vmatprep.subr.bf16.mxu1 %v10722_v44  ;;  %v10770_v52 = vpack.c.bf16 %v543_v50, %v538_v49  ;;  %v553_v56 = vld [vmem:[#allocation3 + $0x260] sm:$0xff]  ;;  %v10772_v57 = vpack.c.bf16 %v542_v54, %v537_v53  ;;  %v547_v59 = vld [vmem:[#allocation3 + $0x230] sm:$0xff]  ;;  %v552_v60 = vld [vmem:[#allocation3 + $0x258] sm:$0xff]  ;;  %v13922_v23 = vmov 0.0  }
  0x45   :  { %v10774_v58 = vpack.c.bf16 %v553_v56, %v548_v55  ;;  %v558_v61 = vld [vmem:[#allocation3 + $0x288] sm:$0xff]  ;;  %v563_v62 = vld [vmem:[#allocation3 + $0x2b0] sm:$0xf]  ;;  %v10776_v63 = vpack.c.bf16 %v552_v60, %v547_v59  ;;  %v557_v1 = vld [vmem:[#allocation3 + $0x280] sm:$0xff] }
  0x46   :  { %v10778_v0 = vpack.c.bf16 %v563_v62, %v558_v61  ;;  %v562_v2 = vld [vmem:[#allocation3 + $0x2a8] sm:$0xf]  ;;  %vm14099_vm3 = vmpackc.low %vm580_vm1, %vm13920_vm2  ;;  %v481_v5 = vld [vmem:[#allocation3 + $0x20] sm:$0xff] }
  0x47   :  { %10757 = vmatpush1.bf16.msra.mxu0 %v10756_v28  ;;  %v10781_v4 = vpack.c.bf16 %v562_v2, %v557_v1  ;;  %v486_v6 = vld [vmem:[#allocation3 + $0x48] sm:$0xff]  ;;  %v491_v9 = vld [vmem:[#allocation3 + $0x70] sm:$0xff]  ;;  %v496_v10 = vld [vmem:[#allocation3 + $0x98] sm:$0xff] }
  0x48   :  { %10759 = vmatprep.subr.bf16.mxu0 %v10758_v29  ;;  %v10823_v7 = vpack.c.bf16 %v486_v6, %v481_v5  ;;  %v10826_v11 = vpack.c.bf16 %v496_v10, %v491_v9  ;;  %v501_v12 = vld [vmem:[#allocation3 + $0xc0] sm:$0xff]  ;;  %v506_v13 = vld [vmem:[#allocation3 + $0xe8] sm:$0xff]  ;;  %v511_v15 = vld [vmem:[#allocation3 + $0x110] sm:$0xff] }
  0x49   :  { %v10829_v14 = vpack.c.bf16 %v506_v13, %v501_v12  ;;  %v516_v16 = vld [vmem:[#allocation3 + $0x138] sm:$0xff]  ;;  %v189_v21 = vld [vmem:[%s15857_s4] sm:$0xff]  ;;  %v194_v22 = vld [vmem:[%s15857_s4 + $0x28] sm:$0xff] }
  0x4a   :  { %v10832_v17 = vpack.c.bf16 %v516_v16, %v511_v15  ;;  %v200_v25 = vld [vmem:[%s15857_s4 + $0x58] sm:$0xff]  ;;  %v205_v26 = vld [vmem:[%s15857_s4 + $0x80] sm:$0xff]  ;;  %v10724_v28 = vpack.c.bf16 %v194_v22, %v189_v21  ;;  %v199_v30 = vld [vmem:[%s15857_s4 + $0x50] sm:$0xff] }
  0x4b   :  { %10761 = vmatpush1.bf16.msra.mxu0 %v10760_v34  ;;  %v10726_v29 = vpack.c.bf16 %v205_v26, %v200_v25  ;;  %v204_v31 = vld [vmem:[%s15857_s4 + $0x78] sm:$0xff]  ;;  %v521_v38 = vld [vmem:[#allocation3 + $0x160] sm:$0xff]  ;;  %v526_v39 = vld [vmem:[#allocation3 + $0x188] sm:$0xff] }
  0x4c   :  { %10763 = vmatprep.subr.bf16.mxu0 %v10762_v36  ;;  %v10728_v33 = vpack.c.bf16 %v204_v31, %v199_v30  ;;  %v192_v34 = vld [vmem:[%s15857_s4 + $0x18] sm:$0xff]  ;;  %v197_v36 = vld [vmem:[%s15857_s4 + $0x40] sm:$0xff]  ;;  %v10835_v41 = vpack.c.bf16 %v526_v39, %v521_v38  ;;  %v531_v42 = vld [vmem:[#allocation3 + $0x1b0] sm:$0xff] }
  0x4d   :  { %v10730_v37 = vpack.c.bf16 %v197_v36, %v192_v34  ;;  %v536_v43 = vld [vmem:[#allocation3 + $0x1d8] sm:$0xff]  ;;  %v551_v48 = vld [vmem:[#allocation3 + $0x250] sm:$0xff]  ;;  %v14155_v54 = vld.sshfl [vmem:[%s15856_s3] sm:$0x33 pattern:$0x76325410] }
  0x4e   :  { %v10838_v44 = vpack.c.bf16 %v536_v43, %v531_v42  ;;  %v556_v49 = vld [vmem:[#allocation3 + $0x278] sm:$0xff]  ;;  %854 = vrot.lane.b32.xlu0 %v14155_v54, %s13923_s17  ;;  %v191_v55 = vld [vmem:[%s15857_s4 + $0x10] sm:$0xff]  ;;  %v201_v62 = vld [vmem:[%s15857_s4 + $0x60] sm:$0xff] }
  0x4f   :  { %10765 = vmatpush1.bf16.msra.mxu0 %v10764_v45  ;;  %v541_v45 = vld [vmem:[#allocation3 + $0x200] sm:$0xff]  ;;  %v10844_v50 = vpack.c.bf16 %v556_v49, %v551_v48  ;;  %v196_v56 = vld [vmem:[%s15857_s4 + $0x38] sm:$0xff]  ;;  %v198_v2 = vld [vmem:[%s15857_s4 + $0x48] sm:$0xff] }
  0x50   :  { %10767 = vmatprep.subr.bf16.mxu0 %v10766_v46  ;;  %v546_v46 = vld [vmem:[#allocation3 + $0x228] sm:$0xff]  ;;  %v10732_v59 = vpack.c.bf16 %v196_v56, %v191_v55  ;;  %v193_v1 = vld [vmem:[%s15857_s4 + $0x20] sm:$0xff]  ;;  %v203_v6 = vld [vmem:[%s15857_s4 + $0x70] sm:$0xff] }
  0x51   :  { %v10841_v47 = vpack.c.bf16 %v546_v46, %v541_v45  ;;  %v10738_v5 = vpack.c.bf16 %v198_v2, %v193_v1  ;;  %v480_v10 = vld [vmem:[#allocation3 + $0x18] sm:$0xff]  ;;  %v479_v13 = vld [vmem:[#allocation3 + $0x10] sm:$0xff]  ;;  %v490_v15 = vld [vmem:[#allocation3 + $0x68] sm:$0xff] }
  0x52   :  { %v495_v16 = vld [vmem:[#allocation3 + $0x90] sm:$0xff]  ;;  %v494_v21 = vld [vmem:[#allocation3 + $0x88] sm:$0xff]  ;;  %v500_v22 = vld [vmem:[#allocation3 + $0xb8] sm:$0xff] }
  0x53   :  { %10769 = vmatpush1.bf16.msra.mxu0 %v10768_v51  ;;  %v561_v51 = vld [vmem:[#allocation3 + $0x2a0] sm:$0xff]  ;;  %v499_v26 = vld [vmem:[#allocation3 + $0xb0] sm:$0xff]  ;;  %v520_v34 = vld [vmem:[#allocation3 + $0x158] sm:$0xff] }
  0x54   :  { %10771 = vmatprep.subr.bf16.mxu0 %v10770_v52  ;;  %v566_v52 = vld [vmem:[#allocation3 + $0x2c8] sm:$0xf]  ;;  %v525_v36 = vld [vmem:[#allocation3 + $0x180] sm:$0xff]  ;;  %v519_v39 = vld [vmem:[#allocation3 + $0x150] sm:$0xff] }
  0x55   :  { %v10847_v53 = vpack.c.bf16 %v566_v52, %v561_v51  ;;  %v10800_v38 = vpack.c.bf16 %v525_v36, %v520_v34  ;;  %v535_v42 = vld [vmem:[#allocation3 + $0x1d0] sm:$0xff]  ;;  %v529_v45 = vld [vmem:[#allocation3 + $0x1a0] sm:$0xff]  ;;  %v534_v46 = vld [vmem:[#allocation3 + $0x1c8] sm:$0xff] }
  0x56   :  { %v545_v48 = vld [vmem:[#allocation3 + $0x220] sm:$0xff]  ;;  %v10806_v49 = vpack.c.bf16 %v534_v46, %v529_v45  ;;  %v539_v51 = vld [vmem:[#allocation3 + $0x1f0] sm:$0xff]  ;;  %v544_v52 = vld [vmem:[#allocation3 + $0x218] sm:$0xff]  ;;  %v853_v45 = vcombine.high %v14155_v54, %v14155_v54 }
  0x57   :  { %10773 = vmatpush1.bf16.msra.mxu0 %v10772_v57  ;;  %v202_v57 = vld [vmem:[%s15857_s4 + $0x68] sm:$0xff]  ;;  %v555_v55 = vld [vmem:[#allocation3 + $0x270] sm:$0xff]  ;;  %v10810_v56 = vpack.c.bf16 %v544_v52, %v539_v51  ;;  %v564_v1 = vld [vmem:[#allocation3 + $0x2b8] sm:$0xf] }
  0x58   :  { %10775 = vmatprep.subr.bf16.mxu0 %v10774_v58  ;;  %v207_v58 = vld [vmem:[%s15857_s4 + $0x90] sm:$0xff]  ;;  %vm15788_vm13 = vmor %vm10287_vm12, %vm10286_vm11 }
  0x59   :  { %v10734_v61 = vpack.c.bf16 %v207_v58, %v202_v57  ;;  %v549_v58 = vld [vmem:[#allocation3 + $0x240] sm:$0xff] }
  0x5b   :  { %10777 = vmatpush1.bf16.msra.mxu0 %v10776_v63  ;;  %v206_v63 = vld [vmem:[%s15857_s4 + $0x88] sm:$0xff] }
  0x5c   :  { %10780 = vmatprep.subr.msk.bf16.mxu0 %vm14099_vm3, %v10778_v0 }
  0x5f   :  { %10783 = vmatpush1.bf16.msk.msra.mxu0 %vm14099_vm3, %v10781_v4  ;;  %v10736_v4 = vpack.c.bf16 %v206_v63, %v201_v62 }
  0x60   :  { %10822 = vmatprep.subr.bf16.mxu0 %v13921_v8 }
  0x62   :  { %661 = vmatmul.mubr.f32.vlgmr.msra.gmra.mrb[0].mxu0 %v14085_v35 }
  0x63   :  { %10824 = vmatpush1.bf16.msra.mxu0 %v10823_v7  ;;  %10408 = vmatprep.mubr.msk.f32.mxu0 %vm577_vm0, %v14089_v40  ;;  %v208_v7 = vld [vmem:[%s15857_s4 + $0x98] sm:$0xff] }
  0x64   :  { %10825 = vmatprep.subr.bf16.mxu0 %v13921_v8  ;;  %v10742_v9 = vpack.c.bf16 %v208_v7, %v203_v6 }
  0x67   :  { %10827 = vmatpush1.bf16.msra.mxu0 %v10826_v11  ;;  %v485_v11 = vld [vmem:[#allocation3 + $0x40] sm:$0xff] }
  0x68   :  { %10828 = vmatprep.subr.bf16.mxu0 %v13921_v8  ;;  %v10784_v12 = vpack.c.bf16 %v485_v11, %v480_v10 }
  0x6b   :  { %10830 = vmatpush1.bf16.msra.mxu0 %v10829_v14  ;;  %v484_v14 = vld [vmem:[#allocation3 + $0x38] sm:$0xff] }
  0x6c   :  { %10831 = vmatprep.subr.bf16.mxu0 %v13921_v8 }
  0x6f   :  { %10833 = vmatpush1.bf16.msra.mxu0 %v10832_v17  ;;  %v10786_v17 = vpack.c.bf16 %v484_v14, %v479_v13 }
  0x70   :  { %10834 = vmatprep.subr.bf16.mxu0 %v13921_v8 }
  0x73   :  { %10836 = vmatpush1.bf16.msra.mxu0 %v10835_v41  ;;  %v530_v41 = vld [vmem:[#allocation3 + $0x1a8] sm:$0xff] }
  0x74   :  { %10837 = vmatprep.subr.bf16.mxu0 %v13921_v8 }
  0x77   :  { %10839 = vmatpush1.bf16.msra.mxu0 %v10838_v44  ;;  %v10804_v44 = vpack.c.bf16 %v535_v42, %v530_v41 }
  0x78   :  { %10840 = vmatprep.subr.bf16.mxu0 %v13921_v8 }
  0x7b   :  { %10842 = vmatpush1.bf16.msra.mxu0 %v10841_v47  ;;  %v540_v47 = vld [vmem:[#allocation3 + $0x1f8] sm:$0xff] }
  0x7c   :  { %10843 = vmatprep.subr.bf16.mxu0 %v13921_v8 }
  0x7f   :  { %10845 = vmatpush1.bf16.msra.mxu0 %v10844_v50  ;;  %v10808_v50 = vpack.c.bf16 %v545_v48, %v540_v47 }
  0x80   :  { %10846 = vmatprep.subr.bf16.mxu0 %v13921_v8 }
  0x83   :  { %10849 = vmatpush1.bf16.msk.msra.mxu0 %vm14099_vm3, %v10847_v53  ;;  %v550_v53 = vld [vmem:[#allocation3 + $0x248] sm:$0xff] }
  0x84   :  { %v10812_v57 = vpack.c.bf16 %v555_v55, %v550_v53 }
  0x86   :  { %803 = vmatmul.mubr.f32.vlgmr.msra.gmra.mrb[2].mxu0 %v14085_v35 }
  0xb8   :  { %v93_v20 = vpop.permute.xlu0 %92 }
  0xb9   :  { %vm97_vm5 = vcmp.eq.s32.totalorder %v93_v20, %v90_v19  ;;  %v489_v20 = vld [vmem:[#allocation3 + $0x60] sm:$0xff] }
  0xba   :  { %v10388_v24 = vsel %vm97_vm5, 1.0, %v13922_v23 }
  0xbb   :  { %10700 = vmatprep.mubr.msk.f32.mxu1 %vm107_vm4, %v10388_v24  ;;  %v505_v24 = vld [vmem:[#allocation3 + $0xe0] sm:$0xff] }
  0xbc   :  { %v96_v27 = vpop.permute.xlu0 %95  ;;  %v10792_v25 = vpack.c.bf16 %v505_v24, %v500_v22 }
  0xbd   :  { %vm98_vm6 = vcmp.eq.s32.totalorder %v96_v27, %v90_v19  ;;  %v10788_v19 = vpack.c.bf16 %v495_v16, %v490_v15  ;;  %v504_v27 = vld [vmem:[#allocation3 + $0xd8] sm:$0xff] }
  0xbe   :  { %v10389_v32 = vsel %vm98_vm6, 1.0, %v13922_v23  ;;  %v10794_v30 = vpack.c.bf16 %v504_v27, %v499_v26 }
  0xbf   :  { %10701 = vmatmul.mubr.msk.f32.vlgmr.msra.gmra.mrb[0].mxu1 %vm107_vm4, %v10389_v32  ;;  %v509_v32 = vld [vmem:[#allocation3 + $0x100] sm:$0xff] }
  0xc0   :  { %10725 = vmatpush1.bf16.msra.mxu1 %v10724_v28  ;;  %306 = vmatprep.mubr.f32.mxu1 %v13922_v23  ;;  %v510_v28 = vld [vmem:[#allocation3 + $0x108] sm:$0xff] }
  0xc1   :  { %10727 = vmatprep.subr.bf16.mxu1 %v10726_v29  ;;  %v515_v29 = vld [vmem:[#allocation3 + $0x130] sm:$0xff] }
  0xc2   :  { %v10796_v31 = vpack.c.bf16 %v515_v29, %v510_v28 }
  0xc4   :  { %10729 = vmatpush1.bf16.msra.mxu1 %v10728_v33  ;;  %v514_v33 = vld [vmem:[#allocation3 + $0x128] sm:$0xff] }
  0xc5   :  { %10731 = vmatprep.subr.bf16.mxu1 %v10730_v37  ;;  %v10798_v37 = vpack.c.bf16 %v514_v33, %v509_v32 }
 0x192   :  { %v10702_v60 = vpop.f32.mrb[0].mxu1 }
 0x193   :  { %v180_v0 = vpop.f32.mrb[1].mxu1 }
 0x194   :  { %10392 = vmatmul.mubr.msk.f32.vlgmr.msra.gmra.mrb[2].mxu1 %vm107_vm4, %v180_v0 }
 0x195   :  { %10733 = vmatpush1.bf16.msra.mxu1 %v10732_v59  ;;  %312 = vmatprep.mubr.f32.mxu1 %v13922_v23  ;;  %v554_v59 = vld [vmem:[#allocation3 + $0x268] sm:$0xff] }
 0x196   :  { %10735 = vmatprep.subr.bf16.mxu1 %v10734_v61  ;;  %v565_v61 = vld [vmem:[#allocation3 + $0x2c0] sm:$0xf]  ;;  %v10814_v62 = vpack.c.bf16 %v554_v59, %v549_v58 }
 0x198   :  { %10393 = vmatmul.mubr.msk.f32.gmra.mrb[4].mxu1 %vm107_vm4, %v10702_v60 }
 0x199   :  { %10737 = vmatpush1.bf16.msra.mxu1 %v10736_v4  ;;  %383 = vmatprep.mubr.f32.mxu1 %v13922_v23  ;;  %v662_v4 = vpop.f32.mrb[0].mxu0 }
 0x19a   :  { %10739 = vmatprep.subr.bf16.mxu1 %v10738_v5 }
 0x19c   :  { %10394 = vmatmul.mubr.msk.f32.vlgmr.msra.gmra.mrb[6].mxu1 %vm107_vm4, %v180_v0 }
 0x19d   :  { %10741 = vmatpush3.bf16.msra.mxu1 %v10738_v5  ;;  %389 = vmatprep.mubr.f32.mxu1 %v13922_v23  ;;  %v10790_v23 = vpack.c.bf16 %v494_v21, %v489_v20  ;;  %v664_v5 = vpop.f32.mrb[1].mxu0 }
 0x19e   :  { %10743 = vmatprep.subr.bf16.mxu1 %v10742_v9  ;;  %v14205_v6 = vpop.f32.mrb[2].mxu0 }
 0x19f   :  { %v806_v7 = vpop.f32.mrb[3].mxu0 }
 0x1a0   :  { %10395 = vmatmul.mubr.msk.f32.gmra.mrb[8].mxu1 %vm107_vm4, %v10702_v60 }
 0x1a1   :  { %10745 = vmatpush3.bf16.msra.mxu1 %v10742_v9  ;;  %10711 = vmatprep.mubr.msk.f32.mxu1 %vm107_vm4, %v180_v0  ;;  %v559_v0 = vld [vmem:[#allocation3 + $0x290] sm:$0xff]  ;;  %v14208_v9 = vshrl.u32 %v89_v18, 7 }
 0x1a2   :  { %10785 = vmatprep.subr.bf16.mxu1 %v10784_v12  ;;  %v10819_v2 = vpack.c.bf16 %v564_v1, %v559_v0  ;;  %v209_v12 = vld [vmem:[%s15859_s6] sm:$0x1f]  ;;  %s13924_s6 = smov 104  }
 0x1a3   :  { %v14211_v10 = vsub.s32 0, %v14208_v9  ;;  %v14214_v11 = vsub.s32 1, %v14208_v9  ;;  %v14226_v21 = vsub.s32 2, %v14208_v9  ;;  %v14229_v22 = vsub.s32 3, %v14208_v9 }
 0x1a4   :  { %10712 = vmatmul.mubr.msk.f32.vlgmr.msra.gmra.mrb[10].mxu1 %vm107_vm4, %v10702_v60  ;;  %v560_v60 = vld [vmem:[#allocation3 + $0x298] sm:$0xff] }
 0x1a5   :  { %10787 = vmatpush1.bf16.msra.mxu1 %v10786_v17  ;;  %10406 = vmatprep.mubr.msk.f32.mxu1 %vm577_vm0, %v14089_v40  ;;  %v524_v40 = vld [vmem:[#allocation3 + $0x178] sm:$0xff]  ;;  %v10816_v63 = vpack.c.bf16 %v565_v61, %v560_v60  ;;  %v214_v14 = vrot.slane %v209_v12, %v14211_v10  ;;  %v218_v15 = vrot.slane %v209_v12, %v14214_v11 }
 0x1a6   :  { %10789 = vmatprep.subr.bf16.mxu1 %v10788_v19  ;;  %v10802_v43 = vpack.c.bf16 %v524_v40, %v519_v39  ;;  %v222_v26 = vrot.slane %v209_v12, %v14226_v21  ;;  %v226_v27 = vrot.slane %v209_v12, %v14229_v22 }
 0x1a9   :  { %10791 = vmatpush1.bf16.msra.mxu1 %v10790_v23  ;;  %v14232_v23 = vsub.s32 4, %v14208_v9 }
 0x1aa   :  { %10793 = vmatprep.subr.bf16.mxu1 %v10792_v25 }
 0x1ad   :  { %10795 = vmatpush1.bf16.msra.mxu1 %v10794_v30 }
 0x1ae   :  { %10797 = vmatprep.subr.bf16.mxu1 %v10796_v31  ;;  %v14239_v31 = vrot.slane %v209_v12, %v14232_v23 }
 0x1b1   :  { %10799 = vmatpush1.bf16.msra.mxu1 %v10798_v37 }
 0x1b2   :  { %10801 = vmatprep.subr.bf16.mxu1 %v10800_v38 }
 0x1b5   :  { %10803 = vmatpush1.bf16.msra.mxu1 %v10802_v43 }
 0x1b6   :  { %10805 = vmatprep.subr.bf16.mxu1 %v10804_v44 }
 0x1b9   :  { %10807 = vmatpush1.bf16.msra.mxu1 %v10806_v49 }
 0x1ba   :  { %10809 = vmatprep.subr.bf16.mxu1 %v10808_v50 }
 0x1bd   :  { %10811 = vmatpush1.bf16.msra.mxu1 %v10810_v56 }
 0x1be   :  { %10813 = vmatprep.subr.bf16.mxu1 %v10812_v57 }
 0x1c1   :  { %10815 = vmatpush1.bf16.msra.mxu1 %v10814_v62 }
 0x1c2   :  { %10818 = vmatprep.subr.msk.bf16.mxu1 %vm14099_vm3, %v10816_v63 }
 0x1c5   :  { %10821 = vmatpush1.bf16.msk.msra.mxu1 %vm14099_vm3, %v10819_v2 }
 0x1c8   :  { %732 = vmatmul.mubr.f32.vlgmr.msra.gmra.mrb[12].mxu1 %v14085_v35 }
 0x267   :  { %v308_v13 = vpop.f32.mrb[2].mxu1 }
 0x268   :  { %v310_v35 = vpop.f32.mrb[3].mxu1  ;;  %v14264_v47 = vadd.f32 %v308_v13, %v214_v14 }
 0x269   :  { %v14262_v46 = vadd.f32 %v310_v35, %v218_v15 }
 0x26a   :  { %v808_v49 = vadd.f32 %v662_v4, %v14264_v47  ;;  %v855_v4 = vpop.permute.xlu0 %854 }
 0x26b   :  { %v314_v16 = vpop.f32.mrb[4].mxu1  ;;  %v809_v48 = vadd.f32 %v664_v5, %v14262_v46 }
 0x26c   :  { %v14221_v17 = vadd.f32 %v314_v16, %v214_v14  ;;  %v316_v19 = vpop.f32.mrb[5].mxu1  ;;  %v10409_v51 = vmul.f32 -1.442695, %v808_v49 }
 0x26d   :  { %v14223_v20 = vadd.f32 %v316_v19, %v218_v15  ;;  %v10410_v50 = vmul.f32 -1.442695, %v809_v48 }
 0x26f   :  { %v385_v24 = vpop.f32.mrb[6].mxu1 }
 0x270   :  { %v387_v25 = vpop.f32.mrb[7].mxu1  ;;  %v14248_v37 = vadd.f32 %v385_v24, %v222_v26  ;;  %v991_v24 = vld [vmem:[#allocation8 + $0x8] sm:$0xff] }
 0x271   :  { %v14250_v39 = vadd.f32 %v387_v25, %v226_v27  ;;  %v996_v25 = vld [vmem:[#allocation8 + $0x30] sm:$0xff] }
 0x273   :  { %v391_v28 = vpop.f32.mrb[8].mxu1 }
 0x274   :  { %v14236_v29 = vadd.f32 %v391_v28, %v222_v26  ;;  %v393_v30 = vpop.f32.mrb[9].mxu1  ;;  %v990_v26 = vld [vmem:[#allocation8] sm:$0xff]  ;;  %v995_v28 = vld [vmem:[#allocation8 + $0x28] sm:$0xff] }
 0x275   :  { %v14241_v32 = vadd.f32 %v393_v30, %v226_v27  ;;  %v10850_v27 = vpack.c.bf16 %v996_v25, %v991_v24  ;;  %v1001_v30 = vld [vmem:[#allocation8 + $0x58] sm:$0xff]  ;;  %v1003_v25 = vld [vmem:[#allocation8 + $0x68] sm:$0xff] }
 0x277   :  { %v10713_v33 = vpop.f32.mrb[10].mxu1  ;;  %10851 = vmatprep.subr.bf16.mxu1 %v10850_v27  ;;  %v1040_v27 = vld [vmem:[#allocation8 + $0x190] sm:$0xff] }
 0x278   :  { %v14244_v34 = vadd.f32 %v10713_v33, %v14239_v31  ;;  %v14246_v36 = vpop.f32.mrb[11].mxu1  ;;  %v1006_v33 = vld [vmem:[#allocation8 + $0x80] sm:$0xff] }
 0x29b   :  { %v733_v38 = vpop.f32.mrb[12].mxu1 }
 0x29c   :  { %v810_v40 = vadd.f32 %v733_v38, %v14248_v37  ;;  %v735_v41 = vpop.f32.mrb[13].mxu1  ;;  %v10852_v38 = vpack.c.bf16 %v995_v28, %v990_v26  ;;  %v1008_v26 = vld [vmem:[#allocation8 + $0x90] sm:$0xff] }
 0x29d   :  { %v14254_v42 = vadd.f32 %v735_v41, %v14250_v39  ;;  %v1000_v41 = vld [vmem:[#allocation8 + $0x50] sm:$0xff]  ;;  %v10892_v28 = vpack.c.bf16 %v1008_v26, %v1003_v25  ;;  %v1037_v26 = vld [vmem:[#allocation8 + $0x178] sm:$0xff] }
 0x29e   :  { %13326 = vtanh.f32 %v810_v40  ;;  %v10411_v63 = vmul.f32 -1.442695, %v810_v40  ;;  %v10854_v40 = vpack.c.bf16 %v1006_v33, %v1001_v30  ;;  %10853 = vmatpush1.bf16.msra.mxu1 %v10852_v38  ;;  %v1002_v30 = vld [vmem:[#allocation8 + $0x60] sm:$0xff]  ;;  %v1007_v33 = vld [vmem:[#allocation8 + $0x88] sm:$0xff]  ;;  %v1032_v25 = vld [vmem:[#allocation8 + $0x150] sm:$0xff] }
 0x29f   :  { %13328 = vtanh.f32 %v14254_v42 }
 0x2a0   :  { %13330 = vpow2.f32 %v10410_v50  ;;  %10855 = vmatprep.subr.bf16.mxu1 %v10854_v40  ;;  %v1010_v50 = vld [vmem:[#allocation8 + $0xa0] sm:$0xff]  ;;  %v1045_v40 = vld [vmem:[#allocation8 + $0x1b8] sm:$0xff] }
 0x2a1   :  { %13332 = vpow2.f32 %v10409_v51  ;;  %v1015_v51 = vld [vmem:[#allocation8 + $0xc8] sm:$0xff] }
 0x2a8   :  { %v13327_v43 = vpop.eup %13326 }
 0x2a9   :  { %865 = vrot.lane.b32.xlu1 %v13327_v43, %s13924_s6  ;;  %v13329_v44 = vpop.eup %13328  ;;  %v1005_v43 = vld [vmem:[#allocation8 + $0x78] sm:$0xff] }
 0x2aa   :  { %v13331_v52 = vpop.eup %13330  ;;  %v10856_v48 = vpack.c.bf16 %v1005_v43, %v1000_v41  ;;  %v10894_v41 = vpack.c.bf16 %v1007_v33, %v1002_v30  ;;  %v1013_v43 = vld [vmem:[#allocation8 + $0xb8] sm:$0xff]  ;;  %v1048_v30 = vld [vmem:[#allocation8 + $0x1d0] sm:$0xff] }
 0x2ab   :  { %v13333_v53 = vpop.eup %13332  ;;  %v820_v55 = vadd.f32 1.0, %v13331_v52  ;;  %v1021_v52 = vld [vmem:[#allocation8 + $0xf8] sm:$0xff] }
 0x2ac   :  { %v819_v54 = vadd.f32 1.0, %v13333_v53  ;;  %v1026_v53 = vld [vmem:[#allocation8 + $0x120] sm:$0xff]  ;;  %10857 = vmatpush1.bf16.msra.mxu1 %v10856_v48  ;;  %v1051_v48 = vld [vmem:[#allocation8 + $0x1e8] sm:$0xff] }
 0x2ad   :  { %867 = vrot.lane.b32.xlu1 %v13329_v44, %s13924_s6  ;;  %13334 = vrcp.f32 %v820_v55  ;;  %v1011_v44 = vld [vmem:[#allocation8 + $0xa8] sm:$0xff] }
 0x2ae   :  { %13336 = vrcp.f32 %v819_v54  ;;  %v10860_v54 = vpack.c.bf16 %v1015_v51, %v1010_v50  ;;  %v1012_v50 = vld [vmem:[#allocation8 + $0xb0] sm:$0xff]  ;;  %v1017_v51 = vld [vmem:[#allocation8 + $0xd8] sm:$0xff] }
 0x2af   :  { %13338 = vpow2.f32 %v10411_v63  ;;  %v1035_v63 = vld [vmem:[#allocation8 + $0x168] sm:$0xff] }
 0x2b1   :  { %856 = vrot.lane.b32.xlu1 %v853_v45, %s13923_s17  ;;  %v1016_v45 = vld [vmem:[#allocation8 + $0xd0] sm:$0xff] }
 0x2b2   :  { %v10858_v49 = vpack.c.bf16 %v1016_v45, %v1011_v44  ;;  %v1018_v44 = vld [vmem:[#allocation8 + $0xe0] sm:$0xff] }
 0x2b4   :  { %10859 = vmatprep.subr.bf16.mxu1 %v10858_v49  ;;  %v10896_v49 = vpack.c.bf16 %v1018_v44, %v1013_v43  ;;  %v1075_v43 = vld [vmem:[#allocation8 + $0x2a8] sm:$0xf] }
 0x2b5   :  { %10861 = vmatpush1.bf16.msra.mxu1 %v10860_v54  ;;  %v10872_v54 = vpack.c.bf16 %v1045_v40, %v1040_v27  ;;  %v1076_v27 = vld [vmem:[#allocation8 + $0x2b0] sm:$0xf]  ;;  %v10906_v40 = vpack.c.bf16 %v1037_v26, %v1032_v25  ;;  %v1077_v26 = vld [vmem:[#allocation8 + $0x2b8] sm:$0xf] }
 0x2b6   :  { %v1072_v25 = vld [vmem:[#allocation8 + $0x290] sm:$0xff] }
 0x2b7   :  { %v13335_v57 = vpop.eup %13334 }
 0x2b8   :  { %v13337_v59 = vpop.eup %13336  ;;  %v861_v12 = vmul.f32 %v13335_v57, %v855_v4 }
 0x2b9   :  { %v13339_v0 = vpop.eup %13338 }
 0x2ba   :  { %v828_v1 = vadd.f32 1.0, %v13339_v0 }
 0x2bc   :  { %13340 = vrcp.f32 %v828_v1  ;;  %v14284_v1 = vld.sshfl [vmem:[%s15855_s2 + $0x4] sm:$0x33 pattern:$0x76325410]  ;;  %s13926_s2 = smov 92  }
 0x2c6   :  { %v13341_v7 = vpop.eup %13340 }
 0x31b   :  { %v866_v56 = vpop.permute.xlu1 %865 }
 0x31f   :  { %v868_v58 = vpop.permute.xlu1 %867 }
 0x320   :  { %v870_v60 = vsel %vm869_vm7, %v866_v56, %v868_v58  ;;  %v874_v61 = vmul.f32 %v13335_v57, %v868_v58  ;;  %v10862_v57 = vpack.c.bf16 %v1026_v53, %v1021_v52  ;;  %v1020_v58 = vld [vmem:[#allocation8 + $0xf0] sm:$0xff]  ;;  %v1023_v53 = vld [vmem:[#allocation8 + $0x108] sm:$0xff] }
 0x321   :  { %v873_v62 = vmul.f32 %v13337_v59, %v870_v60  ;;  %v1025_v59 = vld [vmem:[#allocation8 + $0x118] sm:$0xff]  ;;  %v1031_v60 = vld [vmem:[#allocation8 + $0x148] sm:$0xff]  ;;  %v1056_v52 = vld [vmem:[#allocation8 + $0x210] sm:$0xff] }
 0x322   :  { %879 = vrot.lane.b32.xlu1 %v874_v61, %s13923_s17  ;;  %v1036_v61 = vld [vmem:[#allocation8 + $0x170] sm:$0xff]  ;;  %v10864_v0 = vpack.c.bf16 %v1025_v59, %v1020_v58  ;;  %10863 = vmatprep.subr.bf16.mxu1 %v10862_v57  ;;  %v1055_v57 = vld [vmem:[#allocation8 + $0x208] sm:$0xff]  ;;  %v10898_v58 = vpack.c.bf16 %v1017_v51, %v1012_v50  ;;  %v10874_v59 = vpack.c.bf16 %v1056_v52, %v1051_v48  ;;  %v1058_v50 = vld [vmem:[#allocation8 + $0x220] sm:$0xff] }
 0x323   :  { %877 = vrot.lane.b32.xlu0 %v873_v62, %s13923_s17  ;;  %v857_v2 = vpop.permute.xlu1 %856  ;;  %v1030_v62 = vld [vmem:[#allocation8 + $0x140] sm:$0xff]  ;;  %v1047_v48 = vld [vmem:[#allocation8 + $0x1c8] sm:$0xff] }
 0x324   :  { %v858_v5 = vsel %vm577_vm0, %v855_v4, %v857_v2  ;;  %v993_v2 = vld [vmem:[#allocation8 + $0x18] sm:$0xff]  ;;  %v998_v4 = vld [vmem:[#allocation8 + $0x40] sm:$0xff]  ;;  %10865 = vmatpush1.bf16.msra.mxu1 %v10864_v0  ;;  %v10868_v38 = vpack.c.bf16 %v1035_v63, %v1030_v62  ;;  %v1027_v63 = vld [vmem:[#allocation8 + $0x128] sm:$0xff] }
 0x325   :  { %v862_v35 = vmul.f32 %v13341_v7, %v858_v5  ;;  %v10866_v5 = vpack.c.bf16 %v1036_v61, %v1031_v60  ;;  %v1041_v7 = vld [vmem:[#allocation8 + $0x198] sm:$0xff]  ;;  %v1022_v62 = vld [vmem:[#allocation8 + $0x100] sm:$0xff] }
 0x326   :  { %v1061_v60 = vld [vmem:[#allocation8 + $0x238] sm:$0xff]  ;;  %v1066_v0 = vld [vmem:[#allocation8 + $0x260] sm:$0xff] }
 0x327   :  { %10867 = vmatprep.subr.bf16.mxu1 %v10866_v5  ;;  %v994_v52 = vld [vmem:[#allocation8 + $0x20] sm:$0xff] }
 0x328   :  { %10869 = vmatpush1.bf16.msra.mxu1 %v10868_v38  ;;  %v1070_v38 = vld [vmem:[#allocation8 + $0x280] sm:$0xff] }
 0x329   :  { %v10885_v51 = vpack.c.bf16 %v1075_v43, %v1070_v38  ;;  %v10923_v38 = vpack.c.bf16 %v1077_v26, %v1072_v25  ;;  %v902_v43 = vld [vmem:[#allocation6 + $0x10] sm:$0xff]  ;;  %v948_v25 = vld [vmem:[#allocation6 + $0x180] sm:$0xff] }
 0x394   :  { %v880_v13 = vpop.permute.xlu1 %879 }
 0x395   :  { %v878_v14 = vpop.permute.xlu0 %877 }
 0x396   :  { %v881_v15 = vsel %vm577_vm0, %v878_v14, %v880_v13  ;;  %v14273_v16 = vadd.f32 %v878_v14, %v861_v12  ;;  %v14288_v12 = vcombine.high %v14284_v1, %v14284_v1  ;;  %v10888_v13 = vpack.c.bf16 %v998_v4, %v993_v2  ;;  %v997_v14 = vld [vmem:[#allocation8 + $0x38] sm:$0xff]  ;;  %v1038_v4 = vld [vmem:[#allocation8 + $0x180] sm:$0xff] }
 0x397   :  { %v14275_v19 = vadd.f32 %v881_v15, %v862_v35  ;;  %v992_v35 = vld [vmem:[#allocation8 + $0x10] sm:$0xff]  ;;  %v1046_v15 = vld [vmem:[#allocation8 + $0x1c0] sm:$0xff]  ;;  %v1033_v2 = vld [vmem:[#allocation8 + $0x158] sm:$0xff] }
 0x398   :  { %13342 = vtanh.f32 %v14273_v16  ;;  %v10890_v24 = vpack.c.bf16 %v997_v14, %v992_v35  ;;  %10418 = vmatprep.mubr.msk.f32.mxu1 %vm577_vm0, %v14288_v12  ;;  %10889 = vmatprep.subr.bf16.mxu0 %v10888_v13  ;;  %v10870_v45 = vpack.c.bf16 %v1046_v15, %v1041_v7  ;;  %v1060_v7 = vld [vmem:[#allocation8 + $0x230] sm:$0xff]  ;;  %v1065_v13 = vld [vmem:[#allocation8 + $0x258] sm:$0xff]  ;;  %v10902_v35 = vpack.c.bf16 %v1027_v63, %v1022_v62  ;;  %v1071_v15 = vld [vmem:[#allocation8 + $0x288] sm:$0xff] }
 0x399   :  { %13344 = vtanh.f32 %v14275_v19  ;;  %10421 = vmatprep.mubr.msk.f32.mxu0 %vm577_vm0, %v14288_v12  ;;  %v10878_v14 = vpack.c.bf16 %v1066_v0, %v1061_v60  ;;  %v10880_v33 = vpack.c.bf16 %v1065_v13, %v1060_v7  ;;  %v1009_v63 = vld [vmem:[#allocation8 + $0x98] sm:$0xff]  ;;  %v1078_v7 = vld [vmem:[#allocation8 + $0x2c0] sm:$0xf] }
 0x39a   :  { %10891 = vmatpush1.bf16.msra.mxu0 %v10890_v24  ;;  %10871 = vmatprep.subr.bf16.mxu1 %v10870_v45  ;;  %v10904_v24 = vpack.c.bf16 %v1038_v4, %v1033_v2  ;;  %v1042_v45 = vld [vmem:[#allocation8 + $0x1a0] sm:$0xff]  ;;  %v1067_v4 = vld [vmem:[#allocation8 + $0x268] sm:$0xff] }
 0x39b   :  { %10893 = vmatprep.subr.bf16.mxu0 %v10892_v28  ;;  %10873 = vmatpush1.bf16.msra.mxu1 %v10872_v54  ;;  %v1043_v28 = vld [vmem:[#allocation8 + $0x1a8] sm:$0xff]  ;;  %v1062_v2 = vld [vmem:[#allocation8 + $0x240] sm:$0xff] }
 0x39c   :  { %10875 = vmatprep.subr.bf16.mxu1 %v10874_v59  ;;  %v10908_v44 = vpack.c.bf16 %v1048_v30, %v1043_v28  ;;  %v1068_v59 = vld [vmem:[#allocation8 + $0x270] sm:$0xff] }
 0x39d   :  { %v908_v28 = vld [vmem:[#allocation6 + $0x40] sm:$0xff] }
 0x39e   :  { %10895 = vmatpush1.bf16.msra.mxu0 %v10894_v41  ;;  %v10882_v41 = vpack.c.bf16 %v1076_v27, %v1071_v15  ;;  %v1019_v15 = vld [vmem:[#allocation8 + $0xe8] sm:$0xff] }
 0x39f   :  { %10897 = vmatprep.subr.bf16.mxu0 %v10896_v49  ;;  %v1053_v49 = vld [vmem:[#allocation8 + $0x1f8] sm:$0xff]  ;;  %v903_v27 = vld [vmem:[#allocation6 + $0x18] sm:$0xff] }
 0x3a0   :  { %v10912_v54 = vpack.c.bf16 %v1058_v50, %v1053_v49  ;;  %v1034_v49 = vld [vmem:[#allocation8 + $0x160] sm:$0xff] }
 0x3a2   :  { %v13343_v55 = vpop.eup %13342  ;;  %10899 = vmatpush1.bf16.msra.mxu0 %v10898_v58  ;;  %v1063_v58 = vld [vmem:[#allocation8 + $0x248] sm:$0xff] }
 0x3a3   :  { %v13345_v56 = vpop.eup %13344  ;;  %890 = vrot.lane.b32.xlu0 %v13343_v55, %s13925_s19  ;;  %v1028_v55 = vld [vmem:[#allocation8 + $0x130] sm:$0xff]  ;;  %v10916_v0 = vpack.c.bf16 %v1068_v59, %v1063_v58 }
 0x3a4   :  { %892 = vrot.lane.b32.xlu1 %v13345_v56, %s13925_s19  ;;  %v1050_v56 = vld [vmem:[#allocation8 + $0x1e0] sm:$0xff]  ;;  %v10900_v61 = vpack.c.bf16 %v1028_v55, %v1023_v53  ;;  %v10910_v53 = vpack.c.bf16 %v1047_v48, %v1042_v45  ;;  %v999_v55 = vld [vmem:[#allocation8 + $0x48] sm:$0xff]  ;;  %v913_v45 = vld [vmem:[#allocation6 + $0x68] sm:$0xff] }
 0x3a5   :  { %v10876_v5 = vpack.c.bf16 %v1055_v57, %v1050_v56  ;;  %v1052_v56 = vld [vmem:[#allocation8 + $0x1f0] sm:$0xff]  ;;  %v1057_v57 = vld [vmem:[#allocation8 + $0x218] sm:$0xff]  ;;  %v10927_v60 = vpack.c.bf16 %v999_v55, %v994_v52  ;;  %v918_v48 = vld [vmem:[#allocation6 + $0x90] sm:$0xff] }
 0x3a6   :  { %10901 = vmatprep.subr.bf16.mxu0 %v10900_v61  ;;  %v1004_v61 = vld [vmem:[#allocation8 + $0x70] sm:$0xff]  ;;  %v10914_v62 = vpack.c.bf16 %v1057_v57, %v1052_v56  ;;  %v10996_v52 = vpack.c.bf16 %v918_v48, %v913_v45  ;;  %v917_v55 = vld [vmem:[#allocation6 + $0x88] sm:$0xff]  ;;  %v1074_v45 = vld [vmem:[#allocation8 + $0x2a0] sm:$0xff] }
 0x3a7   :  { %10877 = vmatpush1.bf16.msra.mxu1 %v10876_v5  ;;  %10903 = vmatpush1.bf16.msra.mxu0 %v10902_v35  ;;  %v1073_v5 = vld [vmem:[#allocation8 + $0x298] sm:$0xff]  ;;  %v10930_v13 = vpack.c.bf16 %v1009_v63, %v1004_v61  ;;  %v1014_v35 = vld [vmem:[#allocation8 + $0xc0] sm:$0xff]  ;;  %v928_v56 = vld [vmem:[#allocation6 + $0xe0] sm:$0xff] }
 0x3a8   :  { %10879 = vmatprep.subr.bf16.mxu1 %v10878_v14  ;;  %10905 = vmatprep.subr.bf16.mxu0 %v10904_v24  ;;  %v10918_v14 = vpack.c.bf16 %v1067_v4, %v1062_v2  ;;  %v10920_v24 = vpack.c.bf16 %v1078_v7, %v1073_v5  ;;  %v10933_v30 = vpack.c.bf16 %v1019_v15, %v1014_v35  ;;  %v1044_v58 = vld [vmem:[#allocation8 + $0x1b0] sm:$0xff]  ;;  %v927_v63 = vld [vmem:[#allocation6 + $0xd8] sm:$0xff]  ;;  %v938_v2 = vld [vmem:[#allocation6 + $0x130] sm:$0xff] }
 0x3a9   :  { %v1054_v5 = vld [vmem:[#allocation8 + $0x200] sm:$0xff]  ;;  %v937_v15 = vld [vmem:[#allocation6 + $0x128] sm:$0xff]  ;;  %v1079_v48 = vld [vmem:[#allocation8 + $0x2c8] sm:$0xf] }
 0x3ab   :  { %10881 = vmatpush1.bf16.msra.mxu1 %v10880_v33  ;;  %10907 = vmatpush1.bf16.msra.mxu0 %v10906_v40  ;;  %v1024_v33 = vld [vmem:[#allocation8 + $0x110] sm:$0xff]  ;;  %v1029_v40 = vld [vmem:[#allocation8 + $0x138] sm:$0xff] }
 0x3ac   :  { %10884 = vmatprep.subr.msk.bf16.mxu1 %vm14099_vm3, %v10882_v41  ;;  %10909 = vmatprep.subr.bf16.mxu0 %v10908_v44  ;;  %v10992_v41 = vpack.c.bf16 %v908_v28, %v903_v27  ;;  %v907_v44 = vld [vmem:[#allocation6 + $0x38] sm:$0xff]  ;;  %v1064_v27 = vld [vmem:[#allocation8 + $0x250] sm:$0xff] }
 0x3ad   :  { %v10994_v50 = vpack.c.bf16 %v907_v44, %v902_v43  ;;  %v958_v43 = vld [vmem:[#allocation6 + $0x1d0] sm:$0xff] }
 0x3af   :  { %10887 = vmatpush1.bf16.msk.msra.mxu1 %vm14099_vm3, %v10885_v51  ;;  %10911 = vmatpush1.bf16.msra.mxu0 %v10910_v53  ;;  %v1039_v51 = vld [vmem:[#allocation8 + $0x188] sm:$0xff]  ;;  %v912_v53 = vld [vmem:[#allocation6 + $0x60] sm:$0xff] }
 0x3b0   :  { %10926 = vmatprep.subr.bf16.mxu1 %v13921_v8  ;;  %10913 = vmatprep.subr.bf16.mxu0 %v10912_v54  ;;  %v923_v54 = vld [vmem:[#allocation6 + $0xb8] sm:$0xff]  ;;  %v10939_v57 = vpack.c.bf16 %v1039_v51, %v1034_v49  ;;  %v10998_v59 = vpack.c.bf16 %v917_v55, %v912_v53  ;;  %v901_v49 = vld [vmem:[#allocation6 + $0x8] sm:$0xff]  ;;  %v952_v51 = vld [vmem:[#allocation6 + $0x1a0] sm:$0xff] }
 0x3b1   :  { %v11000_v61 = vpack.c.bf16 %v928_v56, %v923_v54  ;;  %v906_v53 = vld [vmem:[#allocation6 + $0x30] sm:$0xff]  ;;  %v963_v55 = vld [vmem:[#allocation6 + $0x1f8] sm:$0xff]  ;;  %v968_v54 = vld [vmem:[#allocation6 + $0x220] sm:$0xff]  ;;  %v10951_v56 = vpack.c.bf16 %v1079_v48, %v1074_v45 }
 0x3b2   :  { %1172 = vmatmul.mubr.f32.vlgmr.msra.gmra.mrb[14].mxu1 %v14284_v1  ;;  %v982_v48 = vld [vmem:[#allocation6 + $0x290] sm:$0xff] }
 0x3b3   :  { %10928 = vmatpush1.bf16.msra.mxu1 %v10927_v60  ;;  %10915 = vmatpush1.bf16.msra.mxu0 %v10914_v62  ;;  %v1049_v60 = vld [vmem:[#allocation8 + $0x1d8] sm:$0xff]  ;;  %v922_v62 = vld [vmem:[#allocation6 + $0xb0] sm:$0xff] }
 0x3b4   :  { %10929 = vmatprep.subr.bf16.mxu1 %v13921_v8  ;;  %10917 = vmatprep.subr.bf16.mxu0 %v10916_v0  ;;  %v933_v0 = vld [vmem:[#allocation6 + $0x108] sm:$0xff]  ;;  %v10942_v4 = vpack.c.bf16 %v1049_v60, %v1044_v58  ;;  %v11002_v7 = vpack.c.bf16 %v927_v63, %v922_v62  ;;  %v10954_v60 = vpack.c.bf16 %v906_v53, %v901_v49  ;;  %v962_v63 = vld [vmem:[#allocation6 + $0x1f0] sm:$0xff]  ;;  %v931_v49 = vld [vmem:[#allocation6 + $0xf8] sm:$0xff] }
 0x3b5   :  { %10423 = vmatprep.mubr.msk.f32.mxu1 %vm577_vm0, %v14288_v12  ;;  %v10936_v12 = vpack.c.bf16 %v1029_v40, %v1024_v33  ;;  %v11004_v35 = vpack.c.bf16 %v938_v2, %v933_v0  ;;  %v947_v40 = vld [vmem:[#allocation6 + $0x178] sm:$0xff]  ;;  %v905_v58 = vld [vmem:[#allocation6 + $0x28] sm:$0xff]  ;;  %v11016_v62 = vpack.c.bf16 %v968_v54, %v963_v55  ;;  %v916_v2 = vld [vmem:[#allocation6 + $0x80] sm:$0xff] }
 0x3b6   :  { %v967_v0 = vld [vmem:[#allocation6 + $0x218] sm:$0xff]  ;;  %v930_v53 = vld [vmem:[#allocation6 + $0xf0] sm:$0xff]  ;;  %v941_v54 = vld [vmem:[#allocation6 + $0x148] sm:$0xff] }
 0x3b7   :  { %10931 = vmatpush1.bf16.msra.mxu1 %v10930_v13  ;;  %10919 = vmatpush1.bf16.msra.mxu0 %v10918_v14  ;;  %v1059_v13 = vld [vmem:[#allocation8 + $0x228] sm:$0xff]  ;;  %v932_v14 = vld [vmem:[#allocation6 + $0x100] sm:$0xff] }
 0x3b8   :  { %10932 = vmatprep.subr.bf16.mxu1 %v13921_v8  ;;  %10922 = vmatprep.subr.msk.bf16.mxu0 %vm14099_vm3, %v10920_v24  ;;  %v943_v24 = vld [vmem:[#allocation6 + $0x158] sm:$0xff]  ;;  %v10945_v26 = vpack.c.bf16 %v1059_v13, %v1054_v5  ;;  %v11006_v28 = vpack.c.bf16 %v937_v15, %v932_v14  ;;  %v978_v5 = vld [vmem:[#allocation6 + $0x270] sm:$0xff]  ;;  %v11018_v14 = vpack.c.bf16 %v967_v0, %v962_v63  ;;  %v956_v63 = vld [vmem:[#allocation6 + $0x1c0] sm:$0xff] }
 0x3b9   :  { %v11008_v33 = vpack.c.bf16 %v948_v25, %v943_v24  ;;  %v910_v13 = vld [vmem:[#allocation6 + $0x50] sm:$0xff]  ;;  %v921_v24 = vld [vmem:[#allocation6 + $0xa8] sm:$0xff]  ;;  %v935_v55 = vld [vmem:[#allocation6 + $0x118] sm:$0xff] }
 0x3bb   :  { %10934 = vmatpush1.bf16.msra.mxu1 %v10933_v30  ;;  %10925 = vmatpush1.bf16.msk.msra.mxu0 %vm14099_vm3, %v10923_v38  ;;  %v1069_v30 = vld [vmem:[#allocation8 + $0x278] sm:$0xff]  ;;  %v942_v38 = vld [vmem:[#allocation6 + $0x150] sm:$0xff] }
 0x3bc   :  { %10935 = vmatprep.subr.bf16.mxu1 %v13921_v8  ;;  %10993 = vmatprep.subr.bf16.mxu0 %v10992_v41  ;;  %v953_v41 = vld [vmem:[#allocation6 + $0x1a8] sm:$0xff]  ;;  %v10948_v44 = vpack.c.bf16 %v1069_v30, %v1064_v27  ;;  %v983_v30 = vld [vmem:[#allocation6 + $0x298] sm:$0xff] }
 0x3bd   :  { %v977_v27 = vld [vmem:[#allocation6 + $0x268] sm:$0xff] }
 0x3be   :  { %1243 = vmatmul.mubr.f32.vlgmr.msra.gmra.mrb[4].mxu0 %v14284_v1 }
 0x3bf   :  { %10937 = vmatpush1.bf16.msra.mxu1 %v10936_v12  ;;  %10995 = vmatpush1.bf16.msra.mxu0 %v10994_v50  ;;  %v11010_v12 = vpack.c.bf16 %v947_v40, %v942_v38  ;;  %v11012_v50 = vpack.c.bf16 %v958_v43, %v953_v41  ;;  %v920_v40 = vld [vmem:[#allocation6 + $0xa0] sm:$0xff] }
 0x3c0   :  { %10938 = vmatprep.subr.bf16.mxu1 %v13921_v8  ;;  %10997 = vmatprep.subr.bf16.mxu0 %v10996_v52  ;;  %v957_v52 = vld [vmem:[#allocation6 + $0x1c8] sm:$0xff] }
 0x3c3   :  { %10940 = vmatpush1.bf16.msra.mxu1 %v10939_v57  ;;  %10999 = vmatpush1.bf16.msra.mxu0 %v10998_v59  ;;  %v900_v57 = vld [vmem:[#allocation6] sm:$0xff]  ;;  %v11014_v59 = vpack.c.bf16 %v957_v52, %v952_v51 }
 0x3c4   :  { %10941 = vmatprep.subr.bf16.mxu1 %v13921_v8  ;;  %11001 = vmatprep.subr.bf16.mxu0 %v11000_v61  ;;  %v911_v61 = vld [vmem:[#allocation6 + $0x58] sm:$0xff] }
 0x3c5   :  { %v10958_v15 = vpack.c.bf16 %v916_v2, %v911_v61  ;;  %v14325_v61 = vadd.f32 %v14246_v36, %v14239_v31  ;;  %v960_v36 = vld [vmem:[#allocation6 + $0x1e0] sm:$0xff] }
 0x3c7   :  { %10943 = vmatpush1.bf16.msra.mxu1 %v10942_v4  ;;  %11003 = vmatpush1.bf16.msra.mxu0 %v11002_v7  ;;  %v973_v4 = vld [vmem:[#allocation6 + $0x248] sm:$0xff]  ;;  %v10956_v7 = vpack.c.bf16 %v905_v58, %v900_v57  ;;  %v10968_v57 = vpack.c.bf16 %v935_v55, %v930_v53 }
 0x3c8   :  { %10944 = vmatprep.subr.bf16.mxu1 %v13921_v8  ;;  %11005 = vmatprep.subr.bf16.mxu0 %v11004_v35  ;;  %v915_v35 = vld [vmem:[#allocation6 + $0x78] sm:$0xff]  ;;  %v11020_v25 = vpack.c.bf16 %v978_v5, %v973_v4  ;;  %v950_v4 = vld [vmem:[#allocation6 + $0x190] sm:$0xff] }
 0x3c9   :  { %v10960_v38 = vpack.c.bf16 %v915_v35, %v910_v13  ;;  %v955_v5 = vld [vmem:[#allocation6 + $0x1b8] sm:$0xff]  ;;  %v961_v13 = vld [vmem:[#allocation6 + $0x1e8] sm:$0xff]  ;;  %v966_v35 = vld [vmem:[#allocation6 + $0x210] sm:$0xff] }
 0x3ca   :  { %v10978_v31 = vpack.c.bf16 %v966_v35, %v961_v13  ;;  %v914_v13 = vld [vmem:[#allocation6 + $0x70] sm:$0xff] }
 0x3cb   :  { %10946 = vmatpush1.bf16.msra.mxu1 %v10945_v26  ;;  %11007 = vmatpush1.bf16.msra.mxu0 %v11006_v28  ;;  %v972_v26 = vld [vmem:[#allocation6 + $0x240] sm:$0xff]  ;;  %v926_v28 = vld [vmem:[#allocation6 + $0xd0] sm:$0xff] }
 0x3cc   :  { %10947 = vmatprep.subr.bf16.mxu1 %v13921_v8  ;;  %11009 = vmatprep.subr.bf16.mxu0 %v11008_v33  ;;  %v988_v33 = vld [vmem:[#allocation6 + $0x2c0] sm:$0xf]  ;;  %v11022_v41 = vpack.c.bf16 %v977_v27, %v972_v26  ;;  %v10962_v43 = vpack.c.bf16 %v926_v28, %v921_v24  ;;  %v965_v24 = vld [vmem:[#allocation6 + $0x208] sm:$0xff]  ;;  %v971_v26 = vld [vmem:[#allocation6 + $0x238] sm:$0xff] }
 0x3cd   :  { %v11024_v45 = vpack.c.bf16 %v988_v33, %v983_v30  ;;  %v976_v27 = vld [vmem:[#allocation6 + $0x260] sm:$0xff]  ;;  %v10980_v28 = vpack.c.bf16 %v965_v24, %v960_v36  ;;  %v970_v33 = vld [vmem:[#allocation6 + $0x230] sm:$0xff]  ;;  %v1733_v36 = vld [vmem:[#allocation3 + $0x78] sm:$0xff] }
 0x3ce   :  { %v10982_v30 = vpack.c.bf16 %v976_v27, %v971_v26  ;;  %v1739_v26 = vld [vmem:[#allocation3 + $0xa8] sm:$0xff]  ;;  %v1744_v27 = vld [vmem:[#allocation3 + $0xd0] sm:$0xff] }
 0x3cf   :  { %10949 = vmatpush1.bf16.msra.mxu1 %v10948_v44  ;;  %11011 = vmatpush1.bf16.msra.mxu0 %v11010_v12  ;;  %v925_v44 = vld [vmem:[#allocation6 + $0xc8] sm:$0xff]  ;;  %v987_v12 = vld [vmem:[#allocation6 + $0x2b8] sm:$0xf] }
 0x3d0   :  { %10950 = vmatprep.subr.bf16.mxu1 %v13921_v8  ;;  %11013 = vmatprep.subr.bf16.mxu0 %v11012_v50  ;;  %v936_v50 = vld [vmem:[#allocation6 + $0x120] sm:$0xff]  ;;  %v10964_v51 = vpack.c.bf16 %v925_v44, %v920_v40  ;;  %v11027_v52 = vpack.c.bf16 %v987_v12, %v982_v48  ;;  %v986_v40 = vld [vmem:[#allocation6 + $0x2b0] sm:$0xf]  ;;  %v985_v44 = vld [vmem:[#allocation6 + $0x2a8] sm:$0xf] }
 0x3d3   :  { %10953 = vmatpush1.bf16.msk.msra.mxu1 %vm14099_vm3, %v10951_v56  ;;  %11015 = vmatpush1.bf16.msra.mxu0 %v11014_v59  ;;  %v946_v56 = vld [vmem:[#allocation6 + $0x170] sm:$0xff]  ;;  %v940_v59 = vld [vmem:[#allocation6 + $0x140] sm:$0xff] }
 0x3d4   :  { %10955 = vmatprep.subr.bf16.mxu1 %v10954_v60  ;;  %11017 = vmatprep.subr.bf16.mxu0 %v11016_v62  ;;  %v10970_v58 = vpack.c.bf16 %v946_v56, %v941_v54  ;;  %v945_v60 = vld [vmem:[#allocation6 + $0x168] sm:$0xff]  ;;  %v951_v62 = vld [vmem:[#allocation6 + $0x198] sm:$0xff] }
 0x3d5   :  { %v10972_v0 = vpack.c.bf16 %v945_v60, %v940_v59  ;;  %v10974_v2 = vpack.c.bf16 %v956_v63, %v951_v62  ;;  %v904_v60 = vld [vmem:[#allocation6 + $0x20] sm:$0xff]  ;;  %v909_v62 = vld [vmem:[#allocation6 + $0x48] sm:$0xff]  ;;  %v1718_v63 = vld [vmem:[#allocation3] sm:$0xff] }
 0x3d6   :  { %1314 = vmatmul.mubr.f32.vlgmr.msra.gmra.mrb[16].mxu1 %v14284_v1  ;;  %v10966_v1 = vpack.c.bf16 %v936_v50, %v931_v49 }
 0x3d7   :  { %10957 = vmatpush1.bf16.msra.mxu1 %v10956_v7  ;;  %11019 = vmatpush1.bf16.msra.mxu0 %v11018_v14  ;;  %v812_v7 = vadd.f32 %v14205_v6, %v14325_v61  ;;  %v10412_v14 = vmul.f32 -1.442695, %v14254_v42  ;;  %v975_v6 = vld [vmem:[#allocation6 + $0x258] sm:$0xff] }
 0x3d8   :  { %10959 = vmatprep.subr.bf16.mxu1 %v10958_v15  ;;  %11021 = vmatprep.subr.bf16.mxu0 %v11020_v25  ;;  %v10976_v15 = vpack.c.bf16 %v955_v5, %v950_v4  ;;  %v10984_v42 = vpack.c.bf16 %v975_v6, %v970_v33  ;;  %v1734_v4 = vld [vmem:[#allocation3 + $0x80] sm:$0xff]  ;;  %v11031_v5 = vpack.c.bf16 %v909_v62, %v904_v60  ;;  %v924_v33 = vld [vmem:[#allocation6 + $0xc0] sm:$0xff]  ;;  %v1769_v60 = vld [vmem:[#allocation3 + $0x198] sm:$0xff] }
 0x3d9   :  { %v10413_v25 = vmul.f32 -1.442695, %v812_v7  ;;  %13346 = vpow2.f32 %v10412_v14  ;;  %v11066_v6 = vpack.c.bf16 %v1744_v27, %v1739_v26  ;;  %v1774_v62 = vld [vmem:[#allocation3 + $0x1c0] sm:$0xff]  ;;  %v969_v27 = vld [vmem:[#allocation6 + $0x228] sm:$0xff] }
 0x3db   :  { %10961 = vmatpush1.bf16.msra.mxu1 %v10960_v38  ;;  %11023 = vmatpush1.bf16.msra.mxu0 %v11022_v41  ;;  %13348 = vpow2.f32 %v10413_v25  ;;  %v981_v38 = vld [vmem:[#allocation6 + $0x288] sm:$0xff] }
 0x3dc   :  { %10963 = vmatprep.subr.bf16.mxu1 %v10962_v43  ;;  %11026 = vmatprep.subr.msk.bf16.mxu0 %vm14099_vm3, %v11024_v45  ;;  %v10986_v41 = vpack.c.bf16 %v986_v40, %v981_v38  ;;  %v980_v43 = vld [vmem:[#allocation6 + $0x280] sm:$0xff]  ;;  %v929_v38 = vld [vmem:[#allocation6 + $0xe8] sm:$0xff]  ;;  %v1738_v40 = vld [vmem:[#allocation3 + $0xa0] sm:$0xff] }
 0x3dd   :  { %v10989_v45 = vpack.c.bf16 %v985_v44, %v980_v43  ;;  %v1754_v43 = vld [vmem:[#allocation3 + $0x120] sm:$0xff]  ;;  %v11037_v44 = vpack.c.bf16 %v929_v38, %v924_v33  ;;  %v1789_v33 = vld [vmem:[#allocation3 + $0x238] sm:$0xff] }
 0x3df   :  { %10965 = vmatpush1.bf16.msra.mxu1 %v10964_v51  ;;  %11029 = vmatpush1.bf16.msk.msra.mxu0 %vm14099_vm3, %v11027_v52  ;;  %v1719_v51 = vld [vmem:[#allocation3 + $0x8] sm:$0xff]  ;;  %v1724_v52 = vld [vmem:[#allocation3 + $0x30] sm:$0xff] }
 0x3e0   :  { %10967 = vmatprep.subr.bf16.mxu1 %v10966_v1  ;;  %11030 = vmatprep.subr.bf16.mxu0 %v13921_v8  ;;  %v11058_v1 = vpack.c.bf16 %v1724_v52, %v1719_v51  ;;  %v1753_v51 = vld [vmem:[#allocation3 + $0x118] sm:$0xff]  ;;  %v1759_v52 = vld [vmem:[#allocation3 + $0x148] sm:$0xff] }
 0x3e3   :  { %10969 = vmatpush1.bf16.msra.mxu1 %v10968_v57  ;;  %v13347_v48 = vpop.eup %13346 }
 0x3e4   :  { %10971 = vmatprep.subr.bf16.mxu1 %v10970_v58  ;;  %v839_v49 = vadd.f32 1.0, %v13347_v48  ;;  %v934_v48 = vld [vmem:[#allocation6 + $0x110] sm:$0xff] }
 0x3e5   :  { %v13349_v12 = vpop.eup %13348 }
 0x3e6   :  { %v840_v50 = vadd.f32 1.0, %v13349_v12  ;;  %13350 = vrcp.f32 %v839_v49  ;;  %v939_v49 = vld [vmem:[#allocation6 + $0x138] sm:$0xff] }
 0x3e7   :  { %10973 = vmatpush1.bf16.msra.mxu1 %v10972_v0  ;;  %v1723_v0 = vld [vmem:[#allocation3 + $0x28] sm:$0xff] }
 0x3e8   :  { %10975 = vmatprep.subr.bf16.mxu1 %v10974_v2  ;;  %13352 = vrcp.f32 %v840_v50  ;;  %v1729_v2 = vld [vmem:[#allocation3 + $0x58] sm:$0xff]  ;;  %v11060_v7 = vpack.c.bf16 %v1723_v0, %v1718_v63  ;;  %v1748_v50 = vld [vmem:[#allocation3 + $0xf0] sm:$0xff] }
 0x3e9   :  { %v11062_v25 = vpack.c.bf16 %v1734_v4, %v1729_v2  ;;  %v954_v2 = vld [vmem:[#allocation6 + $0x1b0] sm:$0xff]  ;;  %v11078_v4 = vpack.c.bf16 %v1774_v62, %v1769_v60  ;;  %v1720_v60 = vld [vmem:[#allocation3 + $0x10] sm:$0xff]  ;;  %v1725_v62 = vld [vmem:[#allocation3 + $0x38] sm:$0xff] }
 0x3eb   :  { %10977 = vmatpush1.bf16.msra.mxu1 %v10976_v15  ;;  %v919_v15 = vld [vmem:[#allocation6 + $0x98] sm:$0xff] }
 0x3ec   :  { %10979 = vmatprep.subr.bf16.mxu1 %v10978_v31  ;;  %v1728_v31 = vld [vmem:[#allocation3 + $0x50] sm:$0xff] }
 0x3ef   :  { %10981 = vmatpush1.bf16.msra.mxu1 %v10980_v28  ;;  %v11034_v28 = vpack.c.bf16 %v919_v15, %v914_v13  ;;  %v1773_v13 = vld [vmem:[#allocation3 + $0x1b8] sm:$0xff]  ;;  %v1784_v15 = vld [vmem:[#allocation3 + $0x210] sm:$0xff] }
 0x3f0   :  { %10983 = vmatprep.subr.bf16.mxu1 %v10982_v30  ;;  %v13351_v53 = vpop.eup %13350  ;;  %v11064_v30 = vpack.c.bf16 %v1733_v36, %v1728_v31 }
 0x3f2   :  { %v13353_v57 = vpop.eup %13352 }
 0x3f3   :  { %10985 = vmatpush1.bf16.msra.mxu1 %v10984_v42  ;;  %v1743_v42 = vld [vmem:[#allocation3 + $0xc8] sm:$0xff] }
 0x3f4   :  { %10988 = vmatprep.subr.msk.bf16.mxu1 %vm14099_vm3, %v10986_v41  ;;  %v1749_v41 = vld [vmem:[#allocation3 + $0xf8] sm:$0xff] }
 0x3f5   :  { %v11070_v12 = vpack.c.bf16 %v1754_v43, %v1749_v41  ;;  %v979_v43 = vld [vmem:[#allocation6 + $0x278] sm:$0xff] }
 0x3f7   :  { %10991 = vmatpush1.bf16.msk.msra.mxu1 %vm14099_vm3, %v10989_v45  ;;  %v11068_v45 = vpack.c.bf16 %v1743_v42, %v1738_v40  ;;  %v974_v42 = vld [vmem:[#allocation6 + $0x250] sm:$0xff] }
 0x3f8   :  { %11059 = vmatprep.subr.bf16.mxu1 %v11058_v1  ;;  %v1764_v1 = vld [vmem:[#allocation3 + $0x170] sm:$0xff] }
 0x415   :  { %v891_v55 = vpop.permute.xlu0 %890 }
 0x416   :  { %v898_v54 = vmul.f32 %v13351_v53, %v891_v55  ;;  %v893_v56 = vpop.permute.xlu1 %892  ;;  %v11040_v53 = vpack.c.bf16 %v939_v49, %v934_v48  ;;  %v1799_v48 = vld [vmem:[#allocation3 + $0x288] sm:$0xff]  ;;  %v11052_v49 = vpack.c.bf16 %v979_v43, %v974_v42 }
 0x417   :  { %v895_v58 = vsel %vm894_vm8, %v891_v55, %v893_v56  ;;  %v11072_v55 = vpack.c.bf16 %v1753_v51, %v1748_v50  ;;  %v11074_v56 = vpack.c.bf16 %v1764_v1, %v1759_v52  ;;  %v984_v51 = vld [vmem:[#allocation6 + $0x2a0] sm:$0xff]  ;;  %v989_v1 = vld [vmem:[#allocation6 + $0x2c8] sm:$0xf]  ;;  %v1751_v42 = vld [vmem:[#allocation3 + $0x108] sm:$0xff] }
 0x418   :  { %v899_v59 = vmul.f32 %v13353_v57, %v895_v58  ;;  %1321 = vrot.lane.b32.xlu0 %v898_v54, %s13926_s2  ;;  %v944_v54 = vld [vmem:[#allocation6 + $0x160] sm:$0xff]  ;;  %v949_v57 = vld [vmem:[#allocation6 + $0x188] sm:$0xff]  ;;  %v1758_v58 = vld [vmem:[#allocation3 + $0x140] sm:$0xff] }
 0x419   :  { %v11043_v63 = vpack.c.bf16 %v949_v57, %v944_v54  ;;  %v1721_v54 = vld [vmem:[#allocation3 + $0x18] sm:$0xff]  ;;  %v11055_v57 = vpack.c.bf16 %v989_v1, %v984_v51 }
 0x41a   :  { %1323 = vrot.lane.b32.xlu1 %v899_v59, %s13926_s2  ;;  %v1763_v59 = vld [vmem:[#allocation3 + $0x168] sm:$0xff]  ;;  %v1761_v51 = vld [vmem:[#allocation3 + $0x158] sm:$0xff] }
 0x41b   :  { %v11076_v0 = vpack.c.bf16 %v1763_v59, %v1758_v58 }
 0x48a   :  { %v1322_v35 = vpop.permute.xlu0 %1321 }
 0x48c   :  { %v14337_v14 = vpop.permute.xlu1 %1323 }
 0x48d   :  { %10426 = vmatprep.mubr.msk.f32.mxu1 %vm577_vm0, %v14337_v14  ;;  %10429 = vmatprep.mubr.msk.f32.mxu0 %vm577_vm0, %v14337_v14  ;;  %v14345_v24 = vsel %vm1325_vm9, %v1322_v35, %v14337_v14  ;;  %v1779_v35 = vld [vmem:[#allocation3 + $0x1e8] sm:$0xff] }
 0x48e   :  { %1410 = vmatmul.mubr.f32.vlgmr.msra.gmra.mrb[14].mxu1 %v14345_v24  ;;  %1481 = vmatmul.mubr.f32.vlgmr.msra.gmra.mrb[4].mxu0 %v14345_v24  ;;  %v11082_v26 = vpack.c.bf16 %v1784_v15, %v1779_v35  ;;  %v1735_v35 = vld [vmem:[#allocation3 + $0x88] sm:$0xff]  ;;  %v1732_v15 = vld [vmem:[#allocation3 + $0x70] sm:$0xff] }
 0x48f   :  { %11032 = vmatpush1.bf16.msra.mxu0 %v11031_v5  ;;  %11061 = vmatpush1.bf16.msra.mxu1 %v11060_v7  ;;  %v959_v5 = vld [vmem:[#allocation6 + $0x1d8] sm:$0xff]  ;;  %v1768_v7 = vld [vmem:[#allocation3 + $0x190] sm:$0xff] }
 0x490   :  { %10431 = vmatprep.mubr.msk.f32.mxu0 %vm577_vm0, %v14337_v14  ;;  %10440 = vmatprep.mubr.msk.f32.mxu1 %vm577_vm0, %v14337_v14  ;;  %v11046_v31 = vpack.c.bf16 %v959_v5, %v954_v2  ;;  %v11080_v36 = vpack.c.bf16 %v1773_v13, %v1768_v7  ;;  %v1731_v2 = vld [vmem:[#allocation3 + $0x68] sm:$0xff]  ;;  %v11098_v5 = vpack.c.bf16 %v1725_v62, %v1720_v60  ;;  %v1730_v13 = vld [vmem:[#allocation3 + $0x60] sm:$0xff]  ;;  %v1776_v62 = vld [vmem:[#allocation3 + $0x1d0] sm:$0xff] }
 0x491   :  { %11033 = vmatprep.subr.bf16.mxu0 %v13921_v8  ;;  %11063 = vmatprep.subr.bf16.mxu1 %v11062_v25  ;;  %v964_v25 = vld [vmem:[#allocation6 + $0x200] sm:$0xff]  ;;  %v1771_v60 = vld [vmem:[#allocation3 + $0x1a8] sm:$0xff] }
 0x492   :  { %v11049_v38 = vpack.c.bf16 %v969_v27, %v964_v25  ;;  %v1741_v25 = vld [vmem:[#allocation3 + $0xb8] sm:$0xff]  ;;  %v11102_v27 = vpack.c.bf16 %v1735_v35, %v1730_v13 }
 0x493   :  { %11035 = vmatpush1.bf16.msra.mxu0 %v11034_v28  ;;  %11065 = vmatpush1.bf16.msra.mxu1 %v11064_v30  ;;  %v1778_v28 = vld [vmem:[#allocation3 + $0x1e0] sm:$0xff]  ;;  %v1783_v30 = vld [vmem:[#allocation3 + $0x208] sm:$0xff]  ;;  %v1777_v13 = vld [vmem:[#allocation3 + $0x1d8] sm:$0xff] }
 0x494   :  { %11036 = vmatprep.subr.bf16.mxu0 %v13921_v8  ;;  %11067 = vmatprep.subr.bf16.mxu1 %v11066_v6  ;;  %v1794_v6 = vld [vmem:[#allocation3 + $0x260] sm:$0xff]  ;;  %v11084_v40 = vpack.c.bf16 %v1783_v30, %v1778_v28  ;;  %v1781_v35 = vld [vmem:[#allocation3 + $0x1f8] sm:$0xff] }
 0x495   :  { %v11086_v41 = vpack.c.bf16 %v1794_v6, %v1789_v33  ;;  %v1740_v33 = vld [vmem:[#allocation3 + $0xb0] sm:$0xff]  ;;  %v1745_v6 = vld [vmem:[#allocation3 + $0xd8] sm:$0xff] }
 0x496   :  { %v11106_v43 = vpack.c.bf16 %v1745_v6, %v1740_v33  ;;  %v1791_v33 = vld [vmem:[#allocation3 + $0x248] sm:$0xff]  ;;  %v1796_v6 = vld [vmem:[#allocation3 + $0x270] sm:$0xff] }
 0x497   :  { %11038 = vmatpush1.bf16.msra.mxu0 %v11037_v44  ;;  %11069 = vmatpush1.bf16.msra.mxu1 %v11068_v45  ;;  %v1788_v44 = vld [vmem:[#allocation3 + $0x230] sm:$0xff]  ;;  %v1793_v45 = vld [vmem:[#allocation3 + $0x258] sm:$0xff] }
 0x498   :  { %11039 = vmatprep.subr.bf16.mxu0 %v13921_v8  ;;  %11071 = vmatprep.subr.bf16.mxu1 %v11070_v12  ;;  %v1804_v12 = vld [vmem:[#allocation3 + $0x2b0] sm:$0xf]  ;;  %v11088_v50 = vpack.c.bf16 %v1793_v45, %v1788_v44 }
 0x499   :  { %v11090_v52 = vpack.c.bf16 %v1804_v12, %v1799_v48  ;;  %v1750_v48 = vld [vmem:[#allocation3 + $0x100] sm:$0xff]  ;;  %v1755_v12 = vld [vmem:[#allocation3 + $0x128] sm:$0xff] }
 0x49b   :  { %11041 = vmatpush1.bf16.msra.mxu0 %v11040_v53  ;;  %11073 = vmatpush1.bf16.msra.mxu1 %v11072_v55  ;;  %v1798_v53 = vld [vmem:[#allocation3 + $0x280] sm:$0xff]  ;;  %v1803_v55 = vld [vmem:[#allocation3 + $0x2a8] sm:$0xf] }
 0x49c   :  { %11042 = vmatprep.subr.bf16.mxu0 %v13921_v8  ;;  %11075 = vmatprep.subr.bf16.mxu1 %v11074_v56  ;;  %v1726_v56 = vld [vmem:[#allocation3 + $0x40] sm:$0xff]  ;;  %v11093_v58 = vpack.c.bf16 %v1803_v55, %v1798_v53  ;;  %v11110_v53 = vpack.c.bf16 %v1755_v12, %v1750_v48  ;;  %v1801_v48 = vld [vmem:[#allocation3 + $0x298] sm:$0xff] }
 0x49d   :  { %v11096_v59 = vpack.c.bf16 %v1726_v56, %v1721_v54  ;;  %v1760_v56 = vld [vmem:[#allocation3 + $0x150] sm:$0xff]  ;;  %v1806_v12 = vld [vmem:[#allocation3 + $0x2c0] sm:$0xf] }
 0x49f   :  { %11044 = vmatpush1.bf16.msra.mxu0 %v11043_v63  ;;  %11077 = vmatpush1.bf16.msra.mxu1 %v11076_v0  ;;  %v1722_v63 = vld [vmem:[#allocation3 + $0x20] sm:$0xff]  ;;  %v1727_v0 = vld [vmem:[#allocation3 + $0x48] sm:$0xff] }
 0x4a0   :  { %11045 = vmatprep.subr.bf16.mxu0 %v13921_v8  ;;  %11079 = vmatprep.subr.bf16.mxu1 %v11078_v4  ;;  %v1736_v4 = vld [vmem:[#allocation3 + $0x90] sm:$0xff]  ;;  %v11135_v7 = vpack.c.bf16 %v1727_v0, %v1722_v63 }
 0x4a3   :  { %11047 = vmatpush1.bf16.msra.mxu0 %v11046_v31  ;;  %11081 = vmatpush1.bf16.msra.mxu1 %v11080_v36  ;;  %v11100_v31 = vpack.c.bf16 %v1736_v4, %v1731_v2  ;;  %v1737_v36 = vld [vmem:[#allocation3 + $0x98] sm:$0xff]  ;;  %v11116_v2 = vpack.c.bf16 %v1776_v62, %v1771_v60  ;;  %v1770_v4 = vld [vmem:[#allocation3 + $0x1a0] sm:$0xff] }
 0x4a4   :  { %11048 = vmatprep.subr.bf16.mxu0 %v13921_v8  ;;  %11083 = vmatprep.subr.bf16.mxu1 %v11082_v26  ;;  %v1746_v26 = vld [vmem:[#allocation3 + $0xe0] sm:$0xff]  ;;  %v11138_v28 = vpack.c.bf16 %v1737_v36, %v1732_v15 }
 0x4a5   :  { %v11104_v30 = vpack.c.bf16 %v1746_v26, %v1741_v25  ;;  %v1786_v15 = vld [vmem:[#allocation3 + $0x220] sm:$0xff]  ;;  %v1780_v26 = vld [vmem:[#allocation3 + $0x1f0] sm:$0xff] }
 0x4a6   :  { %v11120_v25 = vpack.c.bf16 %v1786_v15, %v1781_v35 }
 0x4a7   :  { %11050 = vmatpush1.bf16.msra.mxu0 %v11049_v38  ;;  %11085 = vmatpush1.bf16.msra.mxu1 %v11084_v40  ;;  %v1742_v38 = vld [vmem:[#allocation3 + $0xc0] sm:$0xff]  ;;  %v1747_v40 = vld [vmem:[#allocation3 + $0xe8] sm:$0xff] }
 0x4a8   :  { %11051 = vmatprep.subr.bf16.mxu0 %v13921_v8  ;;  %11087 = vmatprep.subr.bf16.mxu1 %v11086_v41  ;;  %v1756_v41 = vld [vmem:[#allocation3 + $0x130] sm:$0xff]  ;;  %v11141_v44 = vpack.c.bf16 %v1747_v40, %v1742_v38 }
 0x4a9   :  { %v11108_v45 = vpack.c.bf16 %v1756_v41, %v1751_v42  ;;  %v11124_v42 = vpack.c.bf16 %v1796_v6, %v1791_v33  ;;  %v1790_v41 = vld [vmem:[#allocation3 + $0x240] sm:$0xff] }
 0x4ab   :  { %11053 = vmatpush1.bf16.msra.mxu0 %v11052_v49  ;;  %11089 = vmatpush1.bf16.msra.mxu1 %v11088_v50  ;;  %v14375_v49 = vpop.f32.mrb[16].mxu1  ;;  %v1757_v50 = vld [vmem:[#allocation3 + $0x138] sm:$0xff] }
 0x4ac   :  { %11054 = vmatprep.subr.bf16.mxu0 %v13921_v8  ;;  %11092 = vmatprep.subr.msk.bf16.mxu1 %vm14099_vm3, %v11090_v52  ;;  %v1766_v52 = vld [vmem:[#allocation3 + $0x180] sm:$0xff]  ;;  %v1317_v1 = vpop.f32.mrb[17].mxu1 }
 0x4ad   :  { %v11112_v54 = vpack.c.bf16 %v1766_v52, %v1761_v51  ;;  %v11128_v51 = vpack.c.bf16 %v1806_v12, %v1801_v48  ;;  %v1800_v52 = vld [vmem:[#allocation3 + $0x290] sm:$0xff]  ;;  %v1805_v1 = vld [vmem:[#allocation3 + $0x2b8] sm:$0xf] }
 0x4af   :  { %11057 = vmatpush1.bf16.msk.msra.mxu0 %vm14099_vm3, %v11055_v57  ;;  %11095 = vmatpush1.bf16.msk.msra.mxu1 %vm14099_vm3, %v11093_v58  ;;  %v1765_v57 = vld [vmem:[#allocation3 + $0x178] sm:$0xff]  ;;  %v1762_v58 = vld [vmem:[#allocation3 + $0x160] sm:$0xff] }
 0x4b0   :  { %11097 = vmatprep.subr.bf16.mxu0 %v11096_v59  ;;  %11134 = vmatprep.subr.bf16.mxu1 %v13921_v8  ;;  %v1767_v59 = vld [vmem:[#allocation3 + $0x188] sm:$0xff]  ;;  %v11114_v63 = vpack.c.bf16 %v1765_v57, %v1760_v56  ;;  %v1557_v57 = vld [vmem:[%s15862_s9] sm:$0x1f] }
 0x4b1   :  { %v11147_v0 = vpack.c.bf16 %v1767_v59, %v1762_v58  ;;  %v1562_v58 = vrot.slane %v1557_v57, %v14211_v10  ;;  %v1570_v59 = vrot.slane %v1557_v57, %v14226_v21  ;;  %v1566_v60 = vrot.slane %v1557_v57, %v14214_v11 }
 0x4b2   :  { %1552 = vmatmul.mubr.f32.vlgmr.msra.gmra.mrb[6].mxu0 %v14345_v24  ;;  %1888 = vmatmul.mubr.f32.vlgmr.msra.gmra.mrb[18].mxu1 %v14345_v24  ;;  %v1574_v62 = vrot.slane %v1557_v57, %v14229_v22 }
 0x4b3   :  { %11099 = vmatpush1.bf16.msra.mxu0 %v11098_v5  ;;  %10443 = vmatprep.mubr.msk.f32.mxu0 %vm577_vm0, %v14337_v14  ;;  %v1775_v5 = vld [vmem:[#allocation3 + $0x1c8] sm:$0xff] }
 0x4b4   :  { %11136 = vmatpush1.bf16.msra.mxu1 %v11135_v7  ;;  %10445 = vmatprep.mubr.msk.f32.mxu1 %vm577_vm0, %v14337_v14  ;;  %v1752_v14 = vld [vmem:[#allocation3 + $0x110] sm:$0xff] }
 0x4b5   :  { %11101 = vmatprep.subr.bf16.mxu0 %v11100_v31  ;;  %11137 = vmatprep.subr.bf16.mxu1 %v13921_v8  ;;  %v11144_v55 = vpack.c.bf16 %v1757_v50, %v1752_v14  ;;  %v1772_v7 = vld [vmem:[#allocation3 + $0x1b0] sm:$0xff]  ;;  %v11118_v31 = vpack.c.bf16 %v1775_v5, %v1770_v4 }
 0x4b6   :  { %v11150_v36 = vpack.c.bf16 %v1777_v13, %v1772_v7 }
 0x4b7   :  { %11103 = vmatpush1.bf16.msra.mxu0 %v11102_v27  ;;  %v1785_v27 = vld [vmem:[#allocation3 + $0x218] sm:$0xff] }
 0x4b8   :  { %11139 = vmatpush1.bf16.msra.mxu1 %v11138_v28  ;;  %11105 = vmatprep.subr.bf16.mxu0 %v11104_v30  ;;  %v1782_v28 = vld [vmem:[#allocation3 + $0x200] sm:$0xff]  ;;  %v1787_v30 = vld [vmem:[#allocation3 + $0x228] sm:$0xff]  ;;  %v11122_v38 = vpack.c.bf16 %v1785_v27, %v1780_v26 }
 0x4b9   :  { %11140 = vmatprep.subr.bf16.mxu1 %v13921_v8  ;;  %v11153_v40 = vpack.c.bf16 %v1787_v30, %v1782_v28 }
 0x4bb   :  { %11107 = vmatpush1.bf16.msra.mxu0 %v11106_v43  ;;  %v1795_v43 = vld [vmem:[#allocation3 + $0x268] sm:$0xff] }
 0x4bc   :  { %11142 = vmatpush1.bf16.msra.mxu1 %v11141_v44  ;;  %11109 = vmatprep.subr.bf16.mxu0 %v11108_v45  ;;  %v1792_v44 = vld [vmem:[#allocation3 + $0x250] sm:$0xff]  ;;  %v1797_v45 = vld [vmem:[#allocation3 + $0x278] sm:$0xff]  ;;  %v11126_v14 = vpack.c.bf16 %v1795_v43, %v1790_v41 }
 0x4bd   :  { %11143 = vmatprep.subr.bf16.mxu1 %v13921_v8  ;;  %v11156_v50 = vpack.c.bf16 %v1797_v45, %v1792_v44 }
 0x4bf   :  { %11111 = vmatpush1.bf16.msra.mxu0 %v11110_v53  ;;  %v1802_v53 = vld [vmem:[#allocation3 + $0x2a0] sm:$0xff] }
 0x4c0   :  { %11145 = vmatpush1.bf16.msra.mxu1 %v11144_v55  ;;  %11113 = vmatprep.subr.bf16.mxu0 %v11112_v54  ;;  %v1807_v55 = vld [vmem:[#allocation3 + $0x2c8] sm:$0xf]  ;;  %v11131_v54 = vpack.c.bf16 %v1805_v1, %v1800_v52 }
 0x4c1   :  { %11146 = vmatprep.subr.bf16.mxu1 %v13921_v8  ;;  %v11159_v56 = vpack.c.bf16 %v1807_v55, %v1802_v53  ;;  %v2090_v53 = vrot.slane %v14275_v19, 6 }
 0x4c3   :  { %11115 = vmatpush1.bf16.msra.mxu0 %v11114_v63 }
 0x4c4   :  { %11148 = vmatpush1.bf16.msra.mxu1 %v11147_v0  ;;  %11117 = vmatprep.subr.bf16.mxu0 %v11116_v2 }
 0x4c5   :  { %11149 = vmatprep.subr.bf16.mxu1 %v13921_v8 }
 0x4c7   :  { %11119 = vmatpush1.bf16.msra.mxu0 %v11118_v31  ;;  %v1578_v31 = vrot.slane %v1557_v57, %v14232_v23 }
 0x4c8   :  { %11151 = vmatpush1.bf16.msra.mxu1 %v11150_v36  ;;  %11121 = vmatprep.subr.bf16.mxu0 %v11120_v25 }
 0x4c9   :  { %11152 = vmatprep.subr.bf16.mxu1 %v13921_v8 }
 0x4cb   :  { %11123 = vmatpush1.bf16.msra.mxu0 %v11122_v38 }
 0x4cc   :  { %11154 = vmatpush1.bf16.msra.mxu1 %v11153_v40  ;;  %11125 = vmatprep.subr.bf16.mxu0 %v11124_v42 }
 0x4cd   :  { %11155 = vmatprep.subr.bf16.mxu1 %v13921_v8 }
 0x4cf   :  { %11127 = vmatpush1.bf16.msra.mxu0 %v11126_v14 }
 0x4d0   :  { %11157 = vmatpush1.bf16.msra.mxu1 %v11156_v50  ;;  %11130 = vmatprep.subr.msk.bf16.mxu0 %vm14099_vm3, %v11128_v51 }
 0x4d1   :  { %11158 = vmatprep.subr.bf16.mxu1 %v13921_v8 }
 0x4d3   :  { %11133 = vmatpush1.bf16.msk.msra.mxu0 %vm14099_vm3, %v11131_v54 }
 0x4d4   :  { %11161 = vmatpush1.bf16.msk.msra.mxu1 %vm14099_vm3, %v11159_v56 }
 0x4d6   :  { %1959 = vmatmul.mubr.f32.vlgmr.msra.gmra.mrb[8].mxu0 %v14345_v24 }
 0x4d7   :  { %2030 = vmatmul.mubr.f32.vlgmr.msra.gmra.mrb[20].mxu1 %v14345_v24 }
 0x561   :  { %v1411_v63 = vpop.f32.mrb[14].mxu1  ;;  %v1482_v0 = vpop.f32.mrb[4].mxu0 }
 0x562   :  { %v1584_v2 = vadd.f32 %v1562_v58, %v1411_v63  ;;  %v14399_v4 = vadd.f32 %v1570_v59, %v1482_v0  ;;  %v1413_v5 = vpop.f32.mrb[15].mxu1  ;;  %v1484_v7 = vpop.f32.mrb[5].mxu0 }
 0x563   :  { %v1585_v24 = vadd.f32 %v1566_v60, %v1413_v5  ;;  %v14401_v13 = vadd.f32 %v1574_v62, %v1484_v7 }
 0x564   :  { %13354 = vtanh.f32 %v14399_v4  ;;  %v10432_v1 = vmul.f32 -1.442695, %v1584_v2 }
 0x565   :  { %13356 = vtanh.f32 %v14401_v13  ;;  %v10433_v52 = vmul.f32 -1.442695, %v1585_v24 }
 0x56e   :  { %v13355_v35 = vpop.eup %13354 }
 0x56f   :  { %v13357_v15 = vpop.eup %13356  ;;  %1641 = vrot.lane.b32.xlu0 %v13355_v35, %s13924_s6 }
 0x570   :  { %1643 = vrot.lane.b32.xlu1 %v13357_v15, %s13924_s6 }
 0x585   :  { %v1553_v36 = vpop.f32.mrb[6].mxu0  ;;  %v1889_v25 = vpop.f32.mrb[18].mxu1 }
 0x586   :  { %v1554_v26 = vadd.f32 %v1553_v36, %v14375_v49  ;;  %v1555_v27 = vpop.f32.mrb[7].mxu0  ;;  %v1891_v28 = vpop.f32.mrb[19].mxu1  ;;  %v10437_v49 = vld.sshfl [vmem:[%s15856_s3 + $0x4] sm:$0x33 pattern:$0x76325410] }
 0x587   :  { %v1629_v50 = vcombine.high %v10437_v49, %v10437_v49  ;;  %v2041_v19 = vrot.slane %v1891_v28, 6  ;;  %v2040_v24 = vrot.slane %v1889_v25, 6 }
 0x588   :  { %v14409_v30 = vadd.f32 %v1578_v31, %v1554_v26 }
 0x589   :  { %v2051_v35 = vadd.f32 %v2041_v19, %v14262_v46  ;;  %v2050_v15 = vadd.f32 %v2040_v24, %v14264_v47  ;;  %v2221_v24 = vld [vmem:[#allocation8 + $0x8] sm:$0xff] }
 0x58b   :  { %v10447_v31 = vmul.f32 -1.442695, %v2051_v35  ;;  %v10446_v36 = vmul.f32 -1.442695, %v2050_v15  ;;  %v2226_v35 = vld [vmem:[#allocation8 + $0x30] sm:$0xff]  ;;  %v2220_v15 = vld [vmem:[#allocation8] sm:$0xff] }
 0x5a9   :  { %v1960_v33 = vpop.f32.mrb[8].mxu0 }
 0x5aa   :  { %v2042_v6 = vrot.slane %v1960_v33, 6  ;;  %v14411_v38 = vpop.f32.mrb[20].mxu1  ;;  %v1962_v40 = vpop.f32.mrb[9].mxu0 }
 0x5ab   :  { %v2043_v42 = vrot.slane %v1962_v40, 6  ;;  %v2033_v41 = vpop.f32.mrb[21].mxu1 }
 0x5ac   :  { %v2052_v43 = vadd.f32 %v2042_v6, %v14248_v37 }
 0x5ad   :  { %v14415_v44 = vadd.f32 %v2043_v42, %v14250_v39 }
 0x5ae   :  { %v10448_v45 = vmul.f32 -1.442695, %v2052_v43  ;;  %13358 = vtanh.f32 %v2052_v43 }
 0x5af   :  { %13360 = vtanh.f32 %v14415_v44 }
 0x5b0   :  { %13362 = vpow2.f32 %v10448_v45 }
 0x5b8   :  { %v13359_v48 = vpop.eup %13358 }
 0x5b9   :  { %v13361_v12 = vpop.eup %13360  ;;  %2097 = vrot.lane.b32.xlu0 %v13359_v48, %s13924_s6 }
 0x5ba   :  { %v13363_v14 = vpop.eup %13362  ;;  %2099 = vrot.lane.b32.xlu1 %v13361_v12, %s13924_s6 }
 0x5bb   :  { %v2070_v51 = vadd.f32 1.0, %v13363_v14 }
 0x5bd   :  { %13364 = vrcp.f32 %v2070_v51  ;;  %1630 = vrot.lane.b32.xlu0 %v10437_v49, %s13923_s17  ;;  %v10434_v49 = vmul.f32 -1.442695, %v14399_v4 }
 0x5be   :  { %1632 = vrot.lane.b32.xlu1 %v1629_v50, %s13923_s17  ;;  %13366 = vpow2.f32 %v10433_v52 }
 0x5bf   :  { %13368 = vpow2.f32 %v10432_v1 }
 0x5c7   :  { %v13365_v55 = vpop.eup %13364 }
 0x5c8   :  { %v14426_v54 = vmul.f32 %v13365_v55, %v2090_v53  ;;  %v13367_v56 = vpop.eup %13366 }
 0x5c9   :  { %v13369_v57 = vpop.eup %13368  ;;  %v1596_v58 = vadd.f32 1.0, %v13367_v56 }
 0x5ca   :  { %v1595_v59 = vadd.f32 1.0, %v13369_v57 }
 0x5cb   :  { %13370 = vrcp.f32 %v1596_v58 }
 0x5cc   :  { %13372 = vrcp.f32 %v1595_v59 }
 0x5cd   :  { %13374 = vpow2.f32 %v10447_v31  ;;  %v11162_v31 = vpack.c.bf16 %v2226_v35, %v2221_v24  ;;  %v2251_v24 = vld [vmem:[#allocation8 + $0xf8] sm:$0xff]  ;;  %v2256_v35 = vld [vmem:[#allocation8 + $0x120] sm:$0xff] }
 0x5ce   :  { %13376 = vpow2.f32 %v10446_v36  ;;  %v2225_v36 = vld [vmem:[#allocation8 + $0x28] sm:$0xff] }
 0x5cf   :  { %11163 = vmatprep.subr.bf16.mxu0 %v11162_v31 }
 0x5d5   :  { %v13371_v62 = vpop.eup %13370 }
 0x5d6   :  { %v13373_v0 = vpop.eup %13372 }
 0x5d7   :  { %v13375_v26 = vpop.eup %13374 }
 0x5d8   :  { %v13377_v27 = vpop.eup %13376  ;;  %v2062_v33 = vadd.f32 1.0, %v13375_v26  ;;  %v2228_v26 = vld [vmem:[#allocation8 + $0x40] sm:$0xff] }
 0x5d9   :  { %v2061_v6 = vadd.f32 1.0, %v13377_v27  ;;  %v11164_v27 = vpack.c.bf16 %v2225_v36, %v2220_v15  ;;  %v2250_v15 = vld [vmem:[#allocation8 + $0xf0] sm:$0xff]  ;;  %v11174_v36 = vpack.c.bf16 %v2256_v35, %v2251_v24  ;;  %v2281_v24 = vld [vmem:[#allocation8 + $0x1e8] sm:$0xff] }
 0x5da   :  { %13378 = vrcp.f32 %v2062_v33  ;;  %v2286_v35 = vld [vmem:[#allocation8 + $0x210] sm:$0xff] }
 0x5db   :  { %13380 = vrcp.f32 %v2061_v6  ;;  %v2222_v6 = vld [vmem:[#allocation8 + $0x10] sm:$0xff]  ;;  %11165 = vmatpush1.bf16.msra.mxu0 %v11164_v27 }
 0x5dc   :  { %13382 = vpow2.f32 %v10434_v49  ;;  %v2233_v49 = vld [vmem:[#allocation8 + $0x68] sm:$0xff]  ;;  %v2258_v27 = vld [vmem:[#allocation8 + $0x130] sm:$0xff] }
 0x5e1   :  { %v1642_v60 = vpop.permute.xlu0 %1641 }
 0x5e2   :  { %v1644_v63 = vpop.permute.xlu1 %1643 }
 0x5e3   :  { %v1645_v5 = vsel %vm869_vm7, %v1642_v60, %v1644_v63  ;;  %v1649_v2 = vmul.f32 %v13371_v62, %v1644_v63 }
 0x5e4   :  { %v1648_v7 = vmul.f32 %v13373_v0, %v1645_v5  ;;  %v13379_v42 = vpop.eup %13378 }
 0x5e5   :  { %1654 = vrot.lane.b32.xlu1 %v1649_v2, %s13923_s17  ;;  %v13381_v43 = vpop.eup %13380 }
 0x5e6   :  { %1652 = vrot.lane.b32.xlu0 %v1648_v7, %s13923_s17  ;;  %v13383_v48 = vpop.eup %13382 }
 0x5e7   :  { %v1604_v12 = vadd.f32 1.0, %v13383_v48  ;;  %v2238_v48 = vld [vmem:[#allocation8 + $0x90] sm:$0xff] }
 0x5e9   :  { %13384 = vrcp.f32 %v1604_v12  ;;  %v2232_v12 = vld [vmem:[#allocation8 + $0x60] sm:$0xff] }
 0x5f3   :  { %v13385_v52 = vpop.eup %13384 }
 0x62b   :  { %v2098_v40 = vpop.permute.xlu0 %2097 }
 0x62c   :  { %v2100_v41 = vpop.permute.xlu1 %2099 }
 0x62d   :  { %v2101_v25 = vsel %vm869_vm7, %v2098_v40, %v2100_v41  ;;  %v2105_v28 = vmul.f32 %v13379_v42, %v2100_v41  ;;  %v2227_v40 = vld [vmem:[#allocation8 + $0x38] sm:$0xff] }
 0x62e   :  { %v2104_v45 = vmul.f32 %v13381_v43, %v2101_v25  ;;  %v11202_v41 = vpack.c.bf16 %v2227_v40, %v2222_v6  ;;  %v2230_v43 = vld [vmem:[#allocation8 + $0x50] sm:$0xff]  ;;  %v2235_v25 = vld [vmem:[#allocation8 + $0x78] sm:$0xff]  ;;  %v2252_v6 = vld [vmem:[#allocation8 + $0x100] sm:$0xff] }
 0x62f   :  { %2110 = vrot.lane.b32.xlu1 %v2105_v28, %s13923_s17  ;;  %v1631_v14 = vpop.permute.xlu0 %1630  ;;  %v2257_v40 = vld [vmem:[#allocation8 + $0x128] sm:$0xff] }
 0x630   :  { %2108 = vrot.lane.b32.xlu0 %v2104_v45, %s13923_s17  ;;  %v1633_v50 = vpop.permute.xlu1 %1632  ;;  %v1637_v1 = vmul.f32 %v13371_v62, %v1631_v14  ;;  %v2089_v62 = vrot.slane %v14273_v16, 6  ;;  %v2223_v16 = vld [vmem:[#allocation8 + $0x18] sm:$0xff]  ;;  %v11168_v45 = vpack.c.bf16 %v2235_v25, %v2230_v43  ;;  %v2268_v25 = vld [vmem:[#allocation8 + $0x180] sm:$0xff] }
 0x631   :  { %v1634_v51 = vsel %vm577_vm0, %v1631_v14, %v1633_v50  ;;  %v11200_v33 = vpack.c.bf16 %v2228_v26, %v2223_v16  ;;  %v11204_v14 = vpack.c.bf16 %v2238_v48, %v2233_v49  ;;  %v2237_v50 = vld [vmem:[#allocation8 + $0x88] sm:$0xff]  ;;  %v2255_v16 = vld [vmem:[#allocation8 + $0x118] sm:$0xff]  ;;  %v2260_v49 = vld [vmem:[#allocation8 + $0x140] sm:$0xff] }
 0x632   :  { %v1638_v55 = vmul.f32 %v13385_v52, %v1634_v51  ;;  %v2093_v0 = vmul.f32 %v13379_v42, %v2089_v62  ;;  %v2231_v42 = vld [vmem:[#allocation8 + $0x58] sm:$0xff]  ;;  %v2241_v51 = vld [vmem:[#allocation8 + $0xa8] sm:$0xff]  ;;  %v2246_v52 = vld [vmem:[#allocation8 + $0xd0] sm:$0xff] }
 0x633   :  { %11201 = vmatprep.subr.bf16.mxu1 %v11200_v33  ;;  %v2248_v62 = vld [vmem:[#allocation8 + $0xe0] sm:$0xff]  ;;  %v2253_v26 = vld [vmem:[#allocation8 + $0x108] sm:$0xff]  ;;  %v2263_v43 = vld [vmem:[#allocation8 + $0x158] sm:$0xff] }
 0x634   :  { %11203 = vmatpush1.bf16.msra.mxu1 %v11202_v41  ;;  %v11212_v33 = vpack.c.bf16 %v2258_v27, %v2253_v26  ;;  %v2266_v41 = vld [vmem:[#allocation8 + $0x170] sm:$0xff]  ;;  %v2265_v48 = vld [vmem:[#allocation8 + $0x168] sm:$0xff]  ;;  %v2280_v26 = vld [vmem:[#allocation8 + $0x1e0] sm:$0xff] }
 0x635   :  { %11205 = vmatprep.subr.bf16.mxu1 %v11204_v14  ;;  %v11216_v14 = vpack.c.bf16 %v2268_v25, %v2263_v43  ;;  %v2285_v27 = vld [vmem:[#allocation8 + $0x208] sm:$0xff] }
 0x636   :  { %v11188_v43 = vpack.c.bf16 %v2285_v27, %v2280_v26 }
 0x657   :  { %v1655_v53 = vpop.permute.xlu1 %1654 }
 0x658   :  { %v1653_v56 = vpop.permute.xlu0 %1652 }
 0x659   :  { %v1656_v57 = vsel %vm577_vm0, %v1653_v56, %v1655_v53  ;;  %v14439_v58 = vadd.f32 %v1653_v56, %v1637_v1  ;;  %v11206_v53 = vpack.c.bf16 %v2237_v50, %v2232_v12  ;;  %v2240_v56 = vld [vmem:[#allocation8 + $0xa0] sm:$0xff]  ;;  %v2262_v12 = vld [vmem:[#allocation8 + $0x150] sm:$0xff]  ;;  %v2267_v50 = vld [vmem:[#allocation8 + $0x178] sm:$0xff] }
 0x65a   :  { %v14441_v59 = vadd.f32 %v1656_v57, %v1638_v55  ;;  %v11170_v55 = vpack.c.bf16 %v2246_v52, %v2241_v51  ;;  %v2245_v57 = vld [vmem:[#allocation8 + $0xc8] sm:$0xff]  ;;  %v2271_v51 = vld [vmem:[#allocation8 + $0x198] sm:$0xff]  ;;  %v2276_v52 = vld [vmem:[#allocation8 + $0x1c0] sm:$0xff] }
 0x65b   :  { %13386 = vtanh.f32 %v14439_v58  ;;  %11207 = vmatpush1.bf16.msra.mxu1 %v11206_v53  ;;  %v2278_v53 = vld [vmem:[#allocation8 + $0x1d0] sm:$0xff] }
 0x65c   :  { %13388 = vtanh.f32 %v14441_v59 }
 0x665   :  { %v13387_v4 = vpop.eup %13386 }
 0x666   :  { %v13389_v60 = vpop.eup %13388  ;;  %1665 = vrot.lane.b32.xlu0 %v13387_v4, %s13925_s19  ;;  %v2243_v4 = vld [vmem:[#allocation8 + $0xb8] sm:$0xff] }
 0x667   :  { %1667 = vrot.lane.b32.xlu1 %v13389_v60, %s13925_s19 }
 0x6a1   :  { %v2111_v63 = vpop.permute.xlu1 %2110 }
 0x6a2   :  { %v2109_v5 = vpop.permute.xlu0 %2108 }
 0x6a3   :  { %v2112_v2 = vsel %vm577_vm0, %v2109_v5, %v2111_v63  ;;  %v14449_v7 = vadd.f32 %v2109_v5, %v2093_v0  ;;  %v2242_v63 = vld [vmem:[#allocation8 + $0xb0] sm:$0xff]  ;;  %v2247_v0 = vld [vmem:[#allocation8 + $0xd8] sm:$0xff]  ;;  %v11172_v5 = vpack.c.bf16 %v2245_v57, %v2240_v56  ;;  %v11180_v56 = vpack.c.bf16 %v2265_v48, %v2260_v49  ;;  %v2292_v48 = vld [vmem:[#allocation8 + $0x240] sm:$0xff] }
 0x6a4   :  { %v14452_v19 = vadd.f32 %v2112_v2, %v14426_v54  ;;  %v2236_v54 = vld [vmem:[#allocation8 + $0x80] sm:$0xff]  ;;  %v11208_v2 = vpack.c.bf16 %v2248_v62, %v2243_v4  ;;  %v11210_v31 = vpack.c.bf16 %v2247_v0, %v2242_v63  ;;  %v11218_v57 = vpack.c.bf16 %v2267_v50, %v2262_v12  ;;  %v2275_v62 = vld [vmem:[#allocation8 + $0x1b8] sm:$0xff]  ;;  %v2301_v50 = vld [vmem:[#allocation8 + $0x288] sm:$0xff] }
 0x6a5   :  { %13390 = vtanh.f32 %v14449_v7  ;;  %v11166_v28 = vpack.c.bf16 %v2236_v54, %v2231_v42  ;;  %v2261_v42 = vld [vmem:[#allocation8 + $0x148] sm:$0xff]  ;;  %v11176_v54 = vpack.c.bf16 %v2255_v16, %v2250_v15  ;;  %v11182_v4 = vpack.c.bf16 %v2276_v52, %v2271_v51  ;;  %v2272_v63 = vld [vmem:[#allocation8 + $0x1a0] sm:$0xff]  ;;  %v2283_v15 = vld [vmem:[#allocation8 + $0x1f8] sm:$0xff] }
 0x6a6   :  { %13392 = vtanh.f32 %v14452_v19  ;;  %11209 = vmatprep.subr.bf16.mxu1 %v11208_v2  ;;  %v10436_v0 = vmul.f32 -1.442695, %v14409_v30  ;;  %v2277_v2 = vld [vmem:[#allocation8 + $0x1c8] sm:$0xff]  ;;  %v11186_v16 = vpack.c.bf16 %v2286_v35, %v2281_v24  ;;  %v2295_v49 = vld [vmem:[#allocation8 + $0x258] sm:$0xff]  ;;  %v2306_v51 = vld [vmem:[#allocation8 + $0x2b0] sm:$0xf] }
 0x6a7   :  { %11167 = vmatprep.subr.bf16.mxu0 %v11166_v28  ;;  %11211 = vmatpush1.bf16.msra.mxu1 %v11210_v31  ;;  %v11214_v28 = vpack.c.bf16 %v2257_v40, %v2252_v6  ;;  %v2288_v31 = vld [vmem:[#allocation8 + $0x220] sm:$0xff]  ;;  %v2287_v6 = vld [vmem:[#allocation8 + $0x218] sm:$0xff]  ;;  %v2302_v24 = vld [vmem:[#allocation8 + $0x290] sm:$0xff] }
 0x6a8   :  { %11169 = vmatpush1.bf16.msra.mxu0 %v11168_v45  ;;  %v11178_v45 = vpack.c.bf16 %v2266_v41, %v2261_v42  ;;  %11213 = vmatprep.subr.bf16.mxu1 %v11212_v33  ;;  %v2282_v33 = vld [vmem:[#allocation8 + $0x1f0] sm:$0xff]  ;;  %v11224_v30 = vpack.c.bf16 %v2288_v31, %v2283_v15  ;;  %v2291_v40 = vld [vmem:[#allocation8 + $0x238] sm:$0xff]  ;;  %v2296_v42 = vld [vmem:[#allocation8 + $0x260] sm:$0xff] }
 0x6a9   :  { %11171 = vmatprep.subr.bf16.mxu0 %v11170_v55  ;;  %v10435_v55 = vmul.f32 -1.442695, %v14401_v13  ;;  %v2293_v41 = vld [vmem:[#allocation8 + $0x248] sm:$0xff]  ;;  %v11226_v25 = vpack.c.bf16 %v2287_v6, %v2282_v33  ;;  %v2303_v52 = vld [vmem:[#allocation8 + $0x298] sm:$0xff] }
 0x6aa   :  { %v2307_v35 = vld [vmem:[#allocation8 + $0x2b8] sm:$0xf]  ;;  %v2133_v6 = vld [vmem:[#allocation6 + $0x18] sm:$0xff] }
 0x6ab   :  { %11215 = vmatpush1.bf16.msra.mxu1 %v11214_v28  ;;  %13394 = vpow2.f32 %v10435_v55  ;;  %v11190_v28 = vpack.c.bf16 %v2296_v42, %v2291_v40  ;;  %v11235_v15 = vpack.c.bf16 %v2307_v35, %v2302_v24  ;;  %v2138_v40 = vld [vmem:[#allocation6 + $0x40] sm:$0xff]  ;;  %v2239_v24 = vld [vmem:[#allocation8 + $0x98] sm:$0xff] }
 0x6ac   :  { %11173 = vmatpush1.bf16.msra.mxu0 %v11172_v5  ;;  %11217 = vmatprep.subr.bf16.mxu1 %v11216_v14  ;;  %13396 = vpow2.f32 %v10436_v0  ;;  %v2297_v14 = vld [vmem:[#allocation8 + $0x268] sm:$0xff]  ;;  %v11304_v42 = vpack.c.bf16 %v2138_v40, %v2133_v6  ;;  %v2244_v40 = vld [vmem:[#allocation8 + $0xc0] sm:$0xff] }
 0x6ad   :  { %11175 = vmatprep.subr.bf16.mxu0 %v11174_v36  ;;  %v11222_v36 = vpack.c.bf16 %v2277_v2, %v2272_v63  ;;  %v11230_v55 = vpack.c.bf16 %v2297_v14, %v2292_v48 }
 0x6af   :  { %v13391_v1 = vpop.eup %13390  ;;  %11219 = vmatpush1.bf16.msra.mxu1 %v11218_v57  ;;  %v2300_v57 = vld [vmem:[#allocation8 + $0x280] sm:$0xff] }
 0x6b0   :  { %v13393_v60 = vpop.eup %13392  ;;  %2121 = vrot.lane.b32.xlu0 %v13391_v1, %s13925_s19  ;;  %v2273_v1 = vld [vmem:[#allocation8 + $0x1a8] sm:$0xff]  ;;  %11177 = vmatpush1.bf16.msra.mxu0 %v11176_v54  ;;  %v2298_v54 = vld [vmem:[#allocation8 + $0x270] sm:$0xff] }
 0x6b1   :  { %2123 = vrot.lane.b32.xlu1 %v13393_v60, %s13925_s19  ;;  %11179 = vmatprep.subr.bf16.mxu0 %v11178_v45  ;;  %v2270_v60 = vld [vmem:[#allocation8 + $0x190] sm:$0xff]  ;;  %v11220_v5 = vpack.c.bf16 %v2278_v53, %v2273_v1  ;;  %v11228_v12 = vpack.c.bf16 %v2298_v54, %v2293_v41  ;;  %v2308_v1 = vld [vmem:[#allocation8 + $0x2c0] sm:$0xf]  ;;  %v2044_v41 = vrot.slane %v14411_v38, 6 }
 0x6b2   :  { %v11184_v13 = vpack.c.bf16 %v2275_v62, %v2270_v60  ;;  %v2290_v45 = vld [vmem:[#allocation8 + $0x230] sm:$0xff]  ;;  %v11232_v62 = vpack.c.bf16 %v2308_v1, %v2303_v52 }
 0x6b3   :  { %11221 = vmatprep.subr.bf16.mxu1 %v11220_v5  ;;  %v11192_v53 = vpack.c.bf16 %v2295_v49, %v2290_v45  ;;  %v2054_v54 = vadd.f32 %v2044_v41, %v14325_v61 }
 0x6b4   :  { %11181 = vmatpush1.bf16.msra.mxu0 %v11180_v56  ;;  %11223 = vmatpush1.bf16.msra.mxu1 %v11222_v36  ;;  %v11194_v56 = vpack.c.bf16 %v2306_v51, %v2301_v50 }
 0x6b5   :  { %11183 = vmatprep.subr.bf16.mxu0 %v11182_v4  ;;  %11225 = vmatprep.subr.bf16.mxu1 %v11224_v30  ;;  %v2305_v4 = vld [vmem:[#allocation8 + $0x2a8] sm:$0xf]  ;;  %v13395_v60 = vpop.eup %13394 }
 0x6b6   :  { %v13397_v63 = vpop.eup %13396  ;;  %v11197_v0 = vpack.c.bf16 %v2305_v4, %v2300_v57  ;;  %v1615_v5 = vadd.f32 1.0, %v13395_v60  ;;  %v2132_v57 = vld [vmem:[#allocation6 + $0x10] sm:$0xff]  ;;  %v2137_v4 = vld [vmem:[#allocation6 + $0x38] sm:$0xff]  ;;  %v2143_v60 = vld [vmem:[#allocation6 + $0x68] sm:$0xff] }
 0x6b7   :  { %v1616_v2 = vadd.f32 1.0, %v13397_v63  ;;  %v11306_v35 = vpack.c.bf16 %v2137_v4, %v2132_v57  ;;  %v2172_v4 = vld [vmem:[#allocation6 + $0x150] sm:$0xff] }
 0x6b8   :  { %11185 = vmatpush1.bf16.msra.mxu0 %v11184_v13  ;;  %11227 = vmatpush1.bf16.msra.mxu1 %v11226_v25  ;;  %13398 = vrcp.f32 %v1615_v5  ;;  %v10450_v25 = vmul.f32 -1.442695, %v2054_v54 }
 0x6b9   :  { %11187 = vmatprep.subr.bf16.mxu0 %v11186_v16  ;;  %11229 = vmatprep.subr.bf16.mxu1 %v11228_v12  ;;  %13400 = vrcp.f32 %v1616_v2  ;;  %v2234_v2 = vld [vmem:[#allocation8 + $0x70] sm:$0xff] }
 0x6ba   :  { %v11242_v6 = vpack.c.bf16 %v2239_v24, %v2234_v2  ;;  %v2279_v2 = vld [vmem:[#allocation8 + $0x1d8] sm:$0xff] }
 0x6bc   :  { %11189 = vmatpush1.bf16.msra.mxu0 %v11188_v43  ;;  %11231 = vmatpush1.bf16.msra.mxu1 %v11230_v55  ;;  %v10449_v43 = vmul.f32 -1.442695, %v14415_v44  ;;  %v2224_v44 = vld [vmem:[#allocation8 + $0x20] sm:$0xff] }
 0x6bd   :  { %11191 = vmatprep.subr.bf16.mxu0 %v11190_v28  ;;  %11234 = vmatprep.subr.msk.bf16.mxu1 %vm14099_vm3, %v11232_v62  ;;  %v2148_v62 = vld [vmem:[#allocation6 + $0x90] sm:$0xff] }
 0x6be   :  { %13402 = vpow2.f32 %v10449_v43  ;;  %v2152_v43 = vld [vmem:[#allocation6 + $0xb0] sm:$0xff] }
 0x6bf   :  { %13404 = vpow2.f32 %v10450_v25  ;;  %v2157_v25 = vld [vmem:[#allocation6 + $0xd8] sm:$0xff] }
 0x6c0   :  { %11193 = vmatpush1.bf16.msra.mxu0 %v11192_v53  ;;  %11237 = vmatpush1.bf16.msk.msra.mxu1 %vm14099_vm3, %v11235_v15 }
 0x6c1   :  { %11196 = vmatprep.subr.msk.bf16.mxu0 %vm14099_vm3, %v11194_v56  ;;  %11305 = vmatprep.subr.bf16.mxu1 %v11304_v42  ;;  %v2229_v56 = vld [vmem:[#allocation8 + $0x48] sm:$0xff] }
 0x6c2   :  { %v13399_v31 = vpop.eup %13398  ;;  %v11239_v63 = vpack.c.bf16 %v2229_v56, %v2224_v44  ;;  %v2249_v42 = vld [vmem:[#allocation8 + $0xe8] sm:$0xff] }
 0x6c3   :  { %v13401_v26 = vpop.eup %13400  ;;  %v2269_v44 = vld [vmem:[#allocation8 + $0x188] sm:$0xff] }
 0x6c4   :  { %11199 = vmatpush1.bf16.msk.msra.mxu0 %vm14099_vm3, %v11197_v0 }
 0x6c5   :  { %11238 = vmatprep.subr.bf16.mxu0 %v13921_v8 }
 0x6c8   :  { %v13403_v28 = vpop.eup %13402 }
 0x6c9   :  { %v13405_v45 = vpop.eup %13404  ;;  %v2081_v49 = vadd.f32 1.0, %v13403_v28  ;;  %v2163_v28 = vld [vmem:[#allocation6 + $0x108] sm:$0xff] }
 0x6ca   :  { %v2082_v48 = vadd.f32 1.0, %v13405_v45  ;;  %v2168_v45 = vld [vmem:[#allocation6 + $0x130] sm:$0xff] }
 0x6cb   :  { %13406 = vrcp.f32 %v2081_v49  ;;  %v11245_v49 = vpack.c.bf16 %v2249_v42, %v2244_v40  ;;  %v2289_v40 = vld [vmem:[#allocation8 + $0x228] sm:$0xff] }
 0x6cc   :  { %13408 = vrcp.f32 %v2082_v48  ;;  %v2254_v48 = vld [vmem:[#allocation8 + $0x110] sm:$0xff] }
 0x6d5   :  { %v13407_v12 = vpop.eup %13406 }
 0x6d6   :  { %v13409_v52 = vpop.eup %13408 }
 0x6d8   :  { %v1666_v13 = vpop.permute.xlu0 %1665 }
 0x6d9   :  { %v14469_v36 = vmul.f32 %v13399_v31, %v1666_v13  ;;  %v1668_v16 = vpop.permute.xlu1 %1667  ;;  %v11308_v31 = vpack.c.bf16 %v2148_v62, %v2143_v60  ;;  %v2177_v60 = vld [vmem:[#allocation6 + $0x178] sm:$0xff]  ;;  %v2183_v62 = vld [vmem:[#allocation6 + $0x1a8] sm:$0xff] }
 0x6da   :  { %v1669_v27 = vsel %vm894_vm8, %v1666_v13, %v1668_v16  ;;  %v2142_v13 = vld [vmem:[#allocation6 + $0x60] sm:$0xff]  ;;  %v2147_v16 = vld [vmem:[#allocation6 + $0x88] sm:$0xff]  ;;  %v11322_v24 = vpack.c.bf16 %v2177_v60, %v2172_v4  ;;  %v2212_v60 = vld [vmem:[#allocation6 + $0x290] sm:$0xff] }
 0x6db   :  { %v14472_v33 = vmul.f32 %v13401_v26, %v1669_v27  ;;  %2310 = vrot.lane.b32.xlu0 %v14469_v36, %s13926_s2  ;;  %v2153_v26 = vld [vmem:[#allocation6 + $0xb8] sm:$0xff]  ;;  %v2158_v27 = vld [vmem:[#allocation6 + $0xe0] sm:$0xff]  ;;  %v11310_v41 = vpack.c.bf16 %v2147_v16, %v2142_v13  ;;  %v2187_v13 = vld [vmem:[#allocation6 + $0x1c8] sm:$0xff] }
 0x6dc   :  { %v11312_v54 = vpack.c.bf16 %v2158_v27, %v2153_v26  ;;  %v2193_v16 = vld [vmem:[#allocation6 + $0x1f8] sm:$0xff]  ;;  %v2198_v26 = vld [vmem:[#allocation6 + $0x220] sm:$0xff] }
 0x6dd   :  { %v1676_v30 = vcombine.low %v14469_v36, %v14472_v33  ;;  %2312 = vrot.lane.b32.xlu1 %v14472_v33, %s13926_s2 }
 0x722   :  { %v2122_v14 = vpop.permute.xlu0 %2121 }
 0x723   :  { %v2128_v50 = vmul.f32 %v13407_v12, %v2122_v14  ;;  %v2124_v51 = vpop.permute.xlu1 %2123  ;;  %v2259_v12 = vld [vmem:[#allocation8 + $0x138] sm:$0xff] }
 0x724   :  { %v2125_v38 = vsel %vm894_vm8, %v2122_v14, %v2124_v51  ;;  %v11314_v14 = vpack.c.bf16 %v2157_v25, %v2152_v43  ;;  %v2162_v51 = vld [vmem:[#allocation6 + $0x100] sm:$0xff]  ;;  %v2197_v43 = vld [vmem:[#allocation6 + $0x218] sm:$0xff]  ;;  %v2203_v25 = vld [vmem:[#allocation6 + $0x248] sm:$0xff] }
 0x725   :  { %v2129_v1 = vmul.f32 %v13409_v52, %v2125_v38  ;;  %v2547_v53 = vrot.slane %v2128_v50, 2  ;;  %v11316_v50 = vpack.c.bf16 %v2168_v45, %v2163_v28  ;;  %v2167_v52 = vld [vmem:[#allocation6 + $0x128] sm:$0xff]  ;;  %v2173_v38 = vld [vmem:[#allocation6 + $0x158] sm:$0xff]  ;;  %v2208_v28 = vld [vmem:[#allocation6 + $0x270] sm:$0xff] }
 0x726   :  { %v11318_v56 = vpack.c.bf16 %v2167_v52, %v2162_v51  ;;  %v2207_v51 = vld [vmem:[#allocation6 + $0x268] sm:$0xff]  ;;  %v2213_v52 = vld [vmem:[#allocation6 + $0x298] sm:$0xff] }
 0x727   :  { %v2548_v55 = vrot.slane %v2129_v1, 2  ;;  %2549 = vrot.lane.b32.xlu0 %v2547_v53, %s13926_s2  ;;  %v2178_v1 = vld [vmem:[#allocation6 + $0x180] sm:$0xff]  ;;  %v11248_v53 = vpack.c.bf16 %v2259_v12, %v2254_v48  ;;  %v2299_v48 = vld [vmem:[#allocation8 + $0x278] sm:$0xff] }
 0x728   :  { %v11320_v57 = vpack.c.bf16 %v2178_v1, %v2173_v38  ;;  %v2218_v38 = vld [vmem:[#allocation6 + $0x2c0] sm:$0xf] }
 0x729   :  { %2551 = vrot.lane.b32.xlu1 %v2548_v55, %s13926_s2  ;;  %v2264_v55 = vld [vmem:[#allocation8 + $0x160] sm:$0xff]  ;;  %v11336_v4 = vpack.c.bf16 %v2218_v38, %v2213_v52  ;;  %v2170_v52 = vld [vmem:[#allocation6 + $0x140] sm:$0xff]  ;;  %v2175_v38 = vld [vmem:[#allocation6 + $0x168] sm:$0xff] }
 0x74d   :  { %v2311_v0 = vpop.permute.xlu0 %2310 }
 0x74f   :  { %v2313_v5 = vpop.permute.xlu1 %2312 }
 0x750   :  { %10453 = vmatprep.mubr.msk.f32.mxu0 %vm577_vm0, %v2313_v5  ;;  %10456 = vmatprep.mubr.msk.f32.mxu1 %vm577_vm0, %v2313_v5  ;;  %v14489_v15 = vsel %vm1325_vm9, %v2311_v0, %v2313_v5  ;;  %v11251_v0 = vpack.c.bf16 %v2269_v44, %v2264_v55  ;;  %v2309_v55 = vld [vmem:[#allocation8 + $0x2c8] sm:$0xf]  ;;  %v2131_v44 = vld [vmem:[#allocation6 + $0x8] sm:$0xff] }
 0x751   :  { %2398 = vmatmul.mubr.f32.vlgmr.msra.gmra.mrb[10].mxu0 %v14489_v15  ;;  %2469 = vmatmul.mubr.f32.vlgmr.msra.gmra.mrb[22].mxu1 %v14489_v15 }
 0x752   :  { %11240 = vmatpush1.bf16.msra.mxu0 %v11239_v63  ;;  %10458 = vmatprep.mubr.msk.f32.mxu0 %vm577_vm0, %v2313_v5  ;;  %v2188_v63 = vld [vmem:[#allocation6 + $0x1d0] sm:$0xff]  ;;  %v2274_v5 = vld [vmem:[#allocation8 + $0x1b0] sm:$0xff] }
 0x753   :  { %11241 = vmatprep.subr.bf16.mxu0 %v13921_v8  ;;  %11307 = vmatpush1.bf16.msra.mxu1 %v11306_v35  ;;  %v11324_v35 = vpack.c.bf16 %v2188_v63, %v2183_v62  ;;  %v11254_v27 = vpack.c.bf16 %v2279_v2, %v2274_v5  ;;  %v2217_v62 = vld [vmem:[#allocation6 + $0x2b8] sm:$0xf]  ;;  %v2130_v5 = vld [vmem:[#allocation6] sm:$0xff]  ;;  %v2135_v2 = vld [vmem:[#allocation6 + $0x28] sm:$0xff] }
 0x754   :  { %11309 = vmatprep.subr.bf16.mxu1 %v11308_v31  ;;  %v2182_v31 = vld [vmem:[#allocation6 + $0x1a0] sm:$0xff] }
 0x755   :  { %v11326_v42 = vpack.c.bf16 %v2187_v13, %v2182_v31  ;;  %v2146_v31 = vld [vmem:[#allocation6 + $0x80] sm:$0xff]  ;;  %v11268_v13 = vpack.c.bf16 %v2135_v2, %v2130_v5  ;;  %v2195_v5 = vld [vmem:[#allocation6 + $0x208] sm:$0xff]  ;;  %v2201_v2 = vld [vmem:[#allocation6 + $0x238] sm:$0xff] }
 0x756   :  { %11243 = vmatpush1.bf16.msra.mxu0 %v11242_v6  ;;  %v2284_v6 = vld [vmem:[#allocation8 + $0x200] sm:$0xff] }
 0x757   :  { %11244 = vmatprep.subr.bf16.mxu0 %v13921_v8  ;;  %11311 = vmatpush1.bf16.msra.mxu1 %v11310_v41  ;;  %v11328_v41 = vpack.c.bf16 %v2198_v26, %v2193_v16  ;;  %v11257_v45 = vpack.c.bf16 %v2289_v40, %v2284_v6  ;;  %v2140_v26 = vld [vmem:[#allocation6 + $0x50] sm:$0xff]  ;;  %v2151_v6 = vld [vmem:[#allocation6 + $0xa8] sm:$0xff] }
 0x758   :  { %11313 = vmatprep.subr.bf16.mxu1 %v11312_v54  ;;  %v2192_v54 = vld [vmem:[#allocation6 + $0x1f0] sm:$0xff] }
 0x759   :  { %v11330_v12 = vpack.c.bf16 %v2197_v43, %v2192_v54  ;;  %v2156_v40 = vld [vmem:[#allocation6 + $0xd0] sm:$0xff]  ;;  %v2150_v54 = vld [vmem:[#allocation6 + $0xa0] sm:$0xff]  ;;  %v2155_v43 = vld [vmem:[#allocation6 + $0xc8] sm:$0xff] }
 0x75a   :  { %11246 = vmatpush1.bf16.msra.mxu0 %v11245_v49  ;;  %v2294_v49 = vld [vmem:[#allocation8 + $0x250] sm:$0xff] }
 0x75b   :  { %11247 = vmatprep.subr.bf16.mxu0 %v13921_v8  ;;  %11315 = vmatpush1.bf16.msra.mxu1 %v11314_v14  ;;  %v11332_v14 = vpack.c.bf16 %v2208_v28, %v2203_v25  ;;  %v11260_v1 = vpack.c.bf16 %v2299_v48, %v2294_v49  ;;  %v2161_v25 = vld [vmem:[#allocation6 + $0xf8] sm:$0xff]  ;;  %v2166_v28 = vld [vmem:[#allocation6 + $0x120] sm:$0xff]  ;;  %v2160_v48 = vld [vmem:[#allocation6 + $0xf0] sm:$0xff] }
 0x75c   :  { %11317 = vmatprep.subr.bf16.mxu1 %v11316_v50  ;;  %v2202_v50 = vld [vmem:[#allocation6 + $0x240] sm:$0xff]  ;;  %v11278_v49 = vpack.c.bf16 %v2166_v28, %v2161_v25 }
 0x75e   :  { %11249 = vmatpush1.bf16.msra.mxu0 %v11248_v53  ;;  %v2304_v53 = vld [vmem:[#allocation8 + $0x2a0] sm:$0xff] }
 0x75f   :  { %11250 = vmatprep.subr.bf16.mxu0 %v13921_v8  ;;  %11319 = vmatpush1.bf16.msra.mxu1 %v11318_v56  ;;  %v11334_v56 = vpack.c.bf16 %v2207_v51, %v2202_v50  ;;  %v11263_v63 = vpack.c.bf16 %v2309_v55, %v2304_v53  ;;  %v2176_v50 = vld [vmem:[#allocation6 + $0x170] sm:$0xff]  ;;  %v2186_v53 = vld [vmem:[#allocation6 + $0x1c0] sm:$0xff]  ;;  %v11284_v55 = vpack.c.bf16 %v2175_v38, %v2170_v52 }
 0x760   :  { %11321 = vmatprep.subr.bf16.mxu1 %v11320_v57  ;;  %v2136_v57 = vld [vmem:[#allocation6 + $0x30] sm:$0xff] }
 0x761   :  { %v2144_v52 = vld [vmem:[#allocation6 + $0x70] sm:$0xff] }
 0x762   :  { %11252 = vmatpush1.bf16.msra.mxu0 %v11251_v0  ;;  %v11266_v0 = vpack.c.bf16 %v2136_v57, %v2131_v44  ;;  %v2185_v57 = vld [vmem:[#allocation6 + $0x1b8] sm:$0xff] }
 0x763   :  { %11253 = vmatprep.subr.bf16.mxu0 %v13921_v8  ;;  %11323 = vmatpush1.bf16.msra.mxu1 %v11322_v24  ;;  %v11339_v24 = vpack.c.bf16 %v2217_v62, %v2212_v60  ;;  %v2196_v60 = vld [vmem:[#allocation6 + $0x210] sm:$0xff] }
 0x764   :  { %11325 = vmatprep.subr.bf16.mxu1 %v11324_v35  ;;  %v2141_v35 = vld [vmem:[#allocation6 + $0x58] sm:$0xff] }
 0x765   :  { %v11270_v16 = vpack.c.bf16 %v2146_v31, %v2141_v35 }
 0x766   :  { %11255 = vmatpush1.bf16.msra.mxu0 %v11254_v27  ;;  %v2145_v27 = vld [vmem:[#allocation6 + $0x78] sm:$0xff] }
 0x767   :  { %11256 = vmatprep.subr.bf16.mxu0 %v13921_v8  ;;  %11327 = vmatpush1.bf16.msra.mxu1 %v11326_v42  ;;  %v11272_v42 = vpack.c.bf16 %v2145_v27, %v2140_v26  ;;  %v2211_v26 = vld [vmem:[#allocation6 + $0x288] sm:$0xff]  ;;  %v2216_v27 = vld [vmem:[#allocation6 + $0x2b0] sm:$0xf] }
 0x768   :  { %11329 = vmatprep.subr.bf16.mxu1 %v11328_v41  ;;  %v11274_v41 = vpack.c.bf16 %v2156_v40, %v2151_v6  ;;  %v11298_v40 = vpack.c.bf16 %v2216_v27, %v2211_v26  ;;  %v2164_v27 = vld [vmem:[#allocation6 + $0x110] sm:$0xff] }
 0x76a   :  { %11258 = vmatpush1.bf16.msra.mxu0 %v11257_v45  ;;  %v11276_v45 = vpack.c.bf16 %v2155_v43, %v2150_v54  ;;  %v2927_v54 = vld [vmem:[#allocation3 + $0x8] sm:$0xff]  ;;  %v2932_v43 = vld [vmem:[#allocation3 + $0x30] sm:$0xff] }
 0x76b   :  { %11259 = vmatprep.subr.bf16.mxu0 %v13921_v8  ;;  %11331 = vmatpush1.bf16.msra.mxu1 %v11330_v12  ;;  %v2165_v12 = vld [vmem:[#allocation6 + $0x118] sm:$0xff]  ;;  %v11370_v28 = vpack.c.bf16 %v2932_v43, %v2927_v54  ;;  %v2972_v43 = vld [vmem:[#allocation3 + $0x170] sm:$0xff] }
 0x76c   :  { %11333 = vmatprep.subr.bf16.mxu1 %v11332_v14  ;;  %v2171_v14 = vld [vmem:[#allocation6 + $0x148] sm:$0xff]  ;;  %v11280_v51 = vpack.c.bf16 %v2165_v12, %v2160_v48  ;;  %v2926_v48 = vld [vmem:[#allocation3] sm:$0xff]  ;;  %v2931_v12 = vld [vmem:[#allocation3 + $0x28] sm:$0xff] }
 0x76d   :  { %v2967_v54 = vld [vmem:[#allocation3 + $0x148] sm:$0xff] }
 0x76e   :  { %11261 = vmatpush1.bf16.msra.mxu0 %v11260_v1  ;;  %v2181_v1 = vld [vmem:[#allocation6 + $0x198] sm:$0xff] }
 0x76f   :  { %11262 = vmatprep.subr.bf16.mxu0 %v13921_v8  ;;  %11335 = vmatpush1.bf16.msra.mxu1 %v11334_v56  ;;  %v11286_v44 = vpack.c.bf16 %v2186_v53, %v2181_v1  ;;  %v2180_v56 = vld [vmem:[#allocation6 + $0x190] sm:$0xff]  ;;  %v2149_v53 = vld [vmem:[#allocation6 + $0x98] sm:$0xff] }
 0x770   :  { %11338 = vmatprep.subr.msk.bf16.mxu1 %vm14099_vm3, %v11336_v4  ;;  %v2191_v4 = vld [vmem:[#allocation6 + $0x1e8] sm:$0xff]  ;;  %v11288_v62 = vpack.c.bf16 %v2185_v57, %v2180_v56 }
 0x772   :  { %11265 = vmatpush1.bf16.msk.msra.mxu0 %vm14099_vm3, %v11263_v63  ;;  %v11290_v63 = vpack.c.bf16 %v2196_v60, %v2191_v4  ;;  %v2947_v4 = vld [vmem:[#allocation3 + $0xa8] sm:$0xff]  ;;  %v2952_v60 = vld [vmem:[#allocation3 + $0xd0] sm:$0xff] }
 0x773   :  { %11267 = vmatprep.subr.bf16.mxu0 %v11266_v0  ;;  %11341 = vmatpush1.bf16.msk.msra.mxu1 %vm14099_vm3, %v11339_v24  ;;  %v2190_v0 = vld [vmem:[#allocation6 + $0x1e0] sm:$0xff] }
 0x774   :  { %11342 = vmatprep.subr.bf16.mxu1 %v13921_v8  ;;  %v2206_v24 = vld [vmem:[#allocation6 + $0x260] sm:$0xff]  ;;  %v11292_v35 = vpack.c.bf16 %v2195_v5, %v2190_v0  ;;  %v11378_v5 = vpack.c.bf16 %v2952_v60, %v2947_v4  ;;  %v2987_v4 = vld [vmem:[#allocation3 + $0x1e8] sm:$0xff] }
 0x775   :  { %2540 = vmatmul.mubr.f32.vlgmr.msra.gmra.mrb[12].mxu0 %v14489_v15  ;;  %v11282_v15 = vpack.c.bf16 %v2176_v50, %v2171_v14  ;;  %v11294_v31 = vpack.c.bf16 %v2206_v24, %v2201_v2  ;;  %v2937_v14 = vld [vmem:[#allocation3 + $0x58] sm:$0xff]  ;;  %v2942_v50 = vld [vmem:[#allocation3 + $0x80] sm:$0xff]  ;;  %v2154_v0 = vld [vmem:[#allocation6 + $0xc0] sm:$0xff] }
 0x776   :  { %11269 = vmatpush1.bf16.msra.mxu0 %v11268_v13  ;;  %v2200_v13 = vld [vmem:[#allocation6 + $0x230] sm:$0xff]  ;;  %v11374_v57 = vpack.c.bf16 %v2942_v50, %v2937_v14  ;;  %v2159_v2 = vld [vmem:[#allocation6 + $0xe8] sm:$0xff]  ;;  %v2971_v14 = vld [vmem:[#allocation3 + $0x168] sm:$0xff] }
 0x777   :  { %11271 = vmatprep.subr.bf16.mxu0 %v11270_v16  ;;  %v2205_v16 = vld [vmem:[#allocation6 + $0x258] sm:$0xff]  ;;  %v2946_v24 = vld [vmem:[#allocation3 + $0xa0] sm:$0xff]  ;;  %v2977_v50 = vld [vmem:[#allocation3 + $0x198] sm:$0xff] }
 0x778   :  { %v11296_v6 = vpack.c.bf16 %v2205_v16, %v2200_v13  ;;  %v2962_v13 = vld [vmem:[#allocation3 + $0x120] sm:$0xff]  ;;  %v11349_v16 = vpack.c.bf16 %v2159_v2, %v2154_v0  ;;  %v2992_v60 = vld [vmem:[#allocation3 + $0x210] sm:$0xff]  ;;  %v2199_v2 = vld [vmem:[#allocation6 + $0x228] sm:$0xff] }
 0x779   :  { %v2194_v0 = vld [vmem:[#allocation6 + $0x200] sm:$0xff] }
 0x77a   :  { %11273 = vmatpush1.bf16.msra.mxu0 %v11272_v42  ;;  %v2210_v42 = vld [vmem:[#allocation6 + $0x280] sm:$0xff] }
 0x77b   :  { %11275 = vmatprep.subr.bf16.mxu0 %v11274_v41  ;;  %v2215_v41 = vld [vmem:[#allocation6 + $0x2a8] sm:$0xf] }
 0x77c   :  { %v11301_v25 = vpack.c.bf16 %v2215_v41, %v2210_v42  ;;  %v2956_v42 = vld [vmem:[#allocation3 + $0xf0] sm:$0xff]  ;;  %v2961_v41 = vld [vmem:[#allocation3 + $0x118] sm:$0xff] }
 0x77e   :  { %11277 = vmatpush1.bf16.msra.mxu0 %v11276_v45  ;;  %v2134_v45 = vld [vmem:[#allocation6 + $0x20] sm:$0xff] }
 0x77f   :  { %11279 = vmatprep.subr.bf16.mxu0 %v11278_v49  ;;  %v2139_v49 = vld [vmem:[#allocation6 + $0x48] sm:$0xff] }
 0x782   :  { %11281 = vmatpush1.bf16.msra.mxu0 %v11280_v51  ;;  %v11343_v51 = vpack.c.bf16 %v2139_v49, %v2134_v45  ;;  %v2174_v45 = vld [vmem:[#allocation6 + $0x160] sm:$0xff]  ;;  %v11386_v49 = vpack.c.bf16 %v2972_v43, %v2967_v54  ;;  %v3007_v54 = vld [vmem:[#allocation3 + $0x288] sm:$0xff] }
 0x783   :  { %11283 = vmatprep.subr.bf16.mxu0 %v11282_v15  ;;  %v11372_v15 = vpack.c.bf16 %v2931_v12, %v2926_v48  ;;  %v2179_v48 = vld [vmem:[#allocation6 + $0x188] sm:$0xff]  ;;  %v2966_v12 = vld [vmem:[#allocation3 + $0x140] sm:$0xff]  ;;  %v3012_v43 = vld [vmem:[#allocation3 + $0x2b0] sm:$0xf] }
 0x786   :  { %11285 = vmatpush1.bf16.msra.mxu0 %v11284_v55  ;;  %v2936_v55 = vld [vmem:[#allocation3 + $0x50] sm:$0xff] }
 0x787   :  { %11287 = vmatprep.subr.bf16.mxu0 %v11286_v44  ;;  %v2941_v44 = vld [vmem:[#allocation3 + $0x78] sm:$0xff] }
 0x78a   :  { %11289 = vmatpush1.bf16.msra.mxu0 %v11288_v62  ;;  %v11346_v62 = vpack.c.bf16 %v2149_v53, %v2144_v52  ;;  %v11388_v52 = vpack.c.bf16 %v2971_v14, %v2966_v12  ;;  %v3006_v12 = vld [vmem:[#allocation3 + $0x280] sm:$0xff]  ;;  %v3011_v14 = vld [vmem:[#allocation3 + $0x2a8] sm:$0xf] }
 0x78b   :  { %11291 = vmatprep.subr.bf16.mxu0 %v11290_v63  ;;  %v11376_v63 = vpack.c.bf16 %v2941_v44, %v2936_v55  ;;  %v2189_v55 = vld [vmem:[#allocation6 + $0x1d8] sm:$0xff]  ;;  %v2976_v44 = vld [vmem:[#allocation3 + $0x190] sm:$0xff] }
 0x78e   :  { %11293 = vmatpush1.bf16.msra.mxu0 %v11292_v35  ;;  %v2951_v35 = vld [vmem:[#allocation3 + $0xc8] sm:$0xff] }
 0x78f   :  { %11295 = vmatprep.subr.bf16.mxu0 %v11294_v31  ;;  %v2957_v31 = vld [vmem:[#allocation3 + $0xf8] sm:$0xff]  ;;  %v11380_v26 = vpack.c.bf16 %v2951_v35, %v2946_v24  ;;  %v2986_v24 = vld [vmem:[#allocation3 + $0x1e0] sm:$0xff]  ;;  %v2991_v35 = vld [vmem:[#allocation3 + $0x208] sm:$0xff] }
 0x792   :  { %11297 = vmatpush1.bf16.msra.mxu0 %v11296_v6  ;;  %v11382_v6 = vpack.c.bf16 %v2962_v13, %v2957_v31  ;;  %v2997_v31 = vld [vmem:[#allocation3 + $0x238] sm:$0xff]  ;;  %v3002_v13 = vld [vmem:[#allocation3 + $0x260] sm:$0xff] }
 0x793   :  { %11300 = vmatprep.subr.msk.bf16.mxu0 %vm14099_vm3, %v11298_v40  ;;  %v2169_v40 = vld [vmem:[#allocation6 + $0x138] sm:$0xff] }
 0x796   :  { %11303 = vmatpush1.bf16.msk.msra.mxu0 %vm14099_vm3, %v11301_v25  ;;  %v11352_v25 = vpack.c.bf16 %v2169_v40, %v2164_v27  ;;  %v2204_v27 = vld [vmem:[#allocation6 + $0x250] sm:$0xff]  ;;  %v2209_v40 = vld [vmem:[#allocation6 + $0x278] sm:$0xff] }
 0x797   :  { %11371 = vmatprep.subr.bf16.mxu0 %v11370_v28  ;;  %v11384_v28 = vpack.c.bf16 %v2961_v41, %v2956_v42  ;;  %v2996_v42 = vld [vmem:[#allocation3 + $0x230] sm:$0xff]  ;;  %v3001_v41 = vld [vmem:[#allocation3 + $0x258] sm:$0xff] }
 0x799   :  { %v2550_v38 = vpop.permute.xlu0 %2549 }
 0x79b   :  { %v14514_v1 = vpop.permute.xlu1 %2551 }
 0x79c   :  { %10461 = vmatprep.mubr.msk.f32.mxu0 %vm577_vm0, %v14514_v1  ;;  %10464 = vmatprep.mubr.msk.f32.mxu1 %vm577_vm0, %v14514_v1  ;;  %v14522_v56 = vsel %vm1325_vm9, %v2550_v38, %v14514_v1  ;;  %v2184_v38 = vld [vmem:[#allocation6 + $0x1b0] sm:$0xff] }
 0x79d   :  { %2637 = vmatmul.mubr.f32.vlgmr.msra.gmra.mrb[10].mxu0 %v14522_v56  ;;  %2708 = vmatmul.mubr.f32.vlgmr.msra.gmra.mrb[22].mxu1 %v14522_v56 }
 0x79e   :  { %11344 = vmatpush1.bf16.msra.mxu1 %v11343_v51  ;;  %11373 = vmatpush1.bf16.msra.mxu0 %v11372_v15  ;;  %v2982_v51 = vld [vmem:[#allocation3 + $0x1c0] sm:$0xff]  ;;  %v11355_v15 = vpack.c.bf16 %v2179_v48, %v2174_v45  ;;  %v2214_v45 = vld [vmem:[#allocation6 + $0x2a0] sm:$0xff]  ;;  %v2219_v48 = vld [vmem:[#allocation6 + $0x2c8] sm:$0xf] }
 0x79f   :  { %10466 = vmatprep.mubr.msk.f32.mxu1 %vm577_vm0, %v14514_v1  ;;  %10474 = vmatprep.mubr.msk.f32.mxu0 %vm577_vm0, %v14514_v1  ;;  %v11390_v53 = vpack.c.bf16 %v2982_v51, %v2977_v50  ;;  %v2929_v50 = vld [vmem:[#allocation3 + $0x18] sm:$0xff]  ;;  %v2934_v51 = vld [vmem:[#allocation3 + $0x40] sm:$0xff] }
 0x7a0   :  { %11345 = vmatprep.subr.bf16.mxu1 %v13921_v8  ;;  %11375 = vmatprep.subr.bf16.mxu0 %v11374_v57  ;;  %v2981_v57 = vld [vmem:[#allocation3 + $0x1b8] sm:$0xff] }
 0x7a2   :  { %11347 = vmatpush1.bf16.msra.mxu1 %v11346_v62  ;;  %11377 = vmatpush1.bf16.msra.mxu0 %v11376_v63  ;;  %v11358_v62 = vpack.c.bf16 %v2189_v55, %v2184_v38  ;;  %v11392_v63 = vpack.c.bf16 %v2981_v57, %v2976_v44  ;;  %v11408_v38 = vpack.c.bf16 %v2934_v51, %v2929_v50  ;;  %v2933_v55 = vld [vmem:[#allocation3 + $0x38] sm:$0xff]  ;;  %v2930_v44 = vld [vmem:[#allocation3 + $0x20] sm:$0xff]  ;;  %v2935_v57 = vld [vmem:[#allocation3 + $0x48] sm:$0xff] }
 0x7a3   :  { %11348 = vmatprep.subr.bf16.mxu1 %v13921_v8  ;;  %11379 = vmatprep.subr.bf16.mxu0 %v11378_v5  ;;  %v11394_v5 = vpack.c.bf16 %v2992_v60, %v2987_v4  ;;  %v2939_v4 = vld [vmem:[#allocation3 + $0x68] sm:$0xff]  ;;  %v2944_v60 = vld [vmem:[#allocation3 + $0x90] sm:$0xff]  ;;  %v2974_v50 = vld [vmem:[#allocation3 + $0x180] sm:$0xff] }
 0x7a6   :  { %11350 = vmatpush1.bf16.msra.mxu1 %v11349_v16  ;;  %11381 = vmatpush1.bf16.msra.mxu0 %v11380_v26  ;;  %v11361_v16 = vpack.c.bf16 %v2199_v2, %v2194_v0  ;;  %v11396_v26 = vpack.c.bf16 %v2991_v35, %v2986_v24  ;;  %v2938_v0 = vld [vmem:[#allocation3 + $0x60] sm:$0xff]  ;;  %v2940_v2 = vld [vmem:[#allocation3 + $0x70] sm:$0xff]  ;;  %v11412_v24 = vpack.c.bf16 %v2944_v60, %v2939_v4  ;;  %v2945_v35 = vld [vmem:[#allocation3 + $0x98] sm:$0xff] }
 0x7a7   :  { %11351 = vmatprep.subr.bf16.mxu1 %v13921_v8  ;;  %11383 = vmatprep.subr.bf16.mxu0 %v11382_v6  ;;  %v11398_v6 = vpack.c.bf16 %v3002_v13, %v2997_v31  ;;  %v2949_v31 = vld [vmem:[#allocation3 + $0xb8] sm:$0xff]  ;;  %v2954_v13 = vld [vmem:[#allocation3 + $0xe0] sm:$0xff]  ;;  %v2984_v4 = vld [vmem:[#allocation3 + $0x1d0] sm:$0xff] }
 0x7aa   :  { %11353 = vmatpush1.bf16.msra.mxu1 %v11352_v25  ;;  %11385 = vmatpush1.bf16.msra.mxu0 %v11384_v28  ;;  %v11364_v25 = vpack.c.bf16 %v2209_v40, %v2204_v27  ;;  %v11400_v28 = vpack.c.bf16 %v3001_v41, %v2996_v42  ;;  %v11416_v27 = vpack.c.bf16 %v2954_v13, %v2949_v31  ;;  %v2953_v40 = vld [vmem:[#allocation3 + $0xd8] sm:$0xff]  ;;  %v2950_v42 = vld [vmem:[#allocation3 + $0xc0] sm:$0xff]  ;;  %v2955_v41 = vld [vmem:[#allocation3 + $0xe8] sm:$0xff] }
 0x7ab   :  { %11354 = vmatprep.subr.bf16.mxu1 %v13921_v8  ;;  %11387 = vmatprep.subr.bf16.mxu0 %v11386_v49  ;;  %v11402_v49 = vpack.c.bf16 %v3012_v43, %v3007_v54  ;;  %v2959_v54 = vld [vmem:[#allocation3 + $0x108] sm:$0xff]  ;;  %v2964_v43 = vld [vmem:[#allocation3 + $0x130] sm:$0xff]  ;;  %v2994_v31 = vld [vmem:[#allocation3 + $0x220] sm:$0xff] }
 0x7ae   :  { %11356 = vmatpush1.bf16.msra.mxu1 %v11355_v15  ;;  %11389 = vmatpush1.bf16.msra.mxu0 %v11388_v52  ;;  %v11367_v15 = vpack.c.bf16 %v2219_v48, %v2214_v45  ;;  %v11405_v52 = vpack.c.bf16 %v3011_v14, %v3006_v12  ;;  %v11420_v45 = vpack.c.bf16 %v2964_v43, %v2959_v54  ;;  %v2963_v48 = vld [vmem:[#allocation3 + $0x128] sm:$0xff]  ;;  %v2965_v12 = vld [vmem:[#allocation3 + $0x138] sm:$0xff]  ;;  %v3004_v54 = vld [vmem:[#allocation3 + $0x270] sm:$0xff] }
 0x7af   :  { %11357 = vmatprep.subr.bf16.mxu1 %v13921_v8  ;;  %11391 = vmatprep.subr.bf16.mxu0 %v11390_v53  ;;  %v2928_v53 = vld [vmem:[#allocation3 + $0x10] sm:$0xff]  ;;  %v2969_v14 = vld [vmem:[#allocation3 + $0x158] sm:$0xff] }
 0x7b2   :  { %11359 = vmatpush1.bf16.msra.mxu1 %v11358_v62  ;;  %11393 = vmatpush1.bf16.msra.mxu0 %v11392_v63  ;;  %v11410_v62 = vpack.c.bf16 %v2933_v55, %v2928_v53  ;;  %v11447_v63 = vpack.c.bf16 %v2935_v57, %v2930_v44  ;;  %v2973_v53 = vld [vmem:[#allocation3 + $0x178] sm:$0xff]  ;;  %v2970_v55 = vld [vmem:[#allocation3 + $0x160] sm:$0xff]  ;;  %v2975_v44 = vld [vmem:[#allocation3 + $0x188] sm:$0xff] }
 0x7b3   :  { %11360 = vmatprep.subr.bf16.mxu1 %v13921_v8  ;;  %11395 = vmatprep.subr.bf16.mxu0 %v11394_v5  ;;  %v2943_v5 = vld [vmem:[#allocation3 + $0x88] sm:$0xff] }
 0x7b4   :  { %v2979_v57 = vld [vmem:[#allocation3 + $0x1a8] sm:$0xff] }
 0x7b6   :  { %11362 = vmatpush1.bf16.msra.mxu1 %v11361_v16  ;;  %11397 = vmatpush1.bf16.msra.mxu0 %v11396_v26  ;;  %v11414_v16 = vpack.c.bf16 %v2943_v5, %v2938_v0  ;;  %v11450_v26 = vpack.c.bf16 %v2945_v35, %v2940_v2  ;;  %v2978_v0 = vld [vmem:[#allocation3 + $0x1a0] sm:$0xff]  ;;  %v2983_v5 = vld [vmem:[#allocation3 + $0x1c8] sm:$0xff]  ;;  %v2980_v2 = vld [vmem:[#allocation3 + $0x1b0] sm:$0xff] }
 0x7b7   :  { %11363 = vmatprep.subr.bf16.mxu1 %v13921_v8  ;;  %11399 = vmatprep.subr.bf16.mxu0 %v11398_v6  ;;  %v2948_v6 = vld [vmem:[#allocation3 + $0xb0] sm:$0xff]  ;;  %v2989_v35 = vld [vmem:[#allocation3 + $0x1f8] sm:$0xff]  ;;  %v11430_v13 = vpack.c.bf16 %v2983_v5, %v2978_v0 }
 0x7ba   :  { %11365 = vmatpush1.bf16.msra.mxu1 %v11364_v25  ;;  %11401 = vmatpush1.bf16.msra.mxu0 %v11400_v28  ;;  %v11418_v25 = vpack.c.bf16 %v2953_v40, %v2948_v6  ;;  %v11453_v28 = vpack.c.bf16 %v2955_v41, %v2950_v42  ;;  %v2993_v6 = vld [vmem:[#allocation3 + $0x218] sm:$0xff]  ;;  %v2990_v40 = vld [vmem:[#allocation3 + $0x200] sm:$0xff]  ;;  %v2995_v42 = vld [vmem:[#allocation3 + $0x228] sm:$0xff] }
 0x7bb   :  { %11366 = vmatprep.subr.bf16.mxu1 %v13921_v8  ;;  %11404 = vmatprep.subr.msk.bf16.mxu0 %vm14099_vm3, %v11402_v49  ;;  %v2958_v49 = vld [vmem:[#allocation3 + $0x100] sm:$0xff]  ;;  %v2999_v41 = vld [vmem:[#allocation3 + $0x248] sm:$0xff] }
 0x7bc   :  { %v11422_v51 = vpack.c.bf16 %v2963_v48, %v2958_v49  ;;  %v3003_v49 = vld [vmem:[#allocation3 + $0x268] sm:$0xff]  ;;  %v3000_v48 = vld [vmem:[#allocation3 + $0x250] sm:$0xff] }
 0x7be   :  { %11369 = vmatpush1.bf16.msk.msra.mxu1 %vm14099_vm3, %v11367_v15  ;;  %11407 = vmatpush1.bf16.msk.msra.mxu0 %vm14099_vm3, %v11405_v52  ;;  %v11424_v52 = vpack.c.bf16 %v2974_v50, %v2969_v14  ;;  %v3014_v14 = vld [vmem:[#allocation3 + $0x2c0] sm:$0xf] }
 0x7bf   :  { %11409 = vmatprep.subr.bf16.mxu1 %v11408_v38  ;;  %11446 = vmatprep.subr.bf16.mxu0 %v13921_v8  ;;  %v2968_v38 = vld [vmem:[#allocation3 + $0x150] sm:$0xff] }
 0x7c0   :  { %v11426_v60 = vpack.c.bf16 %v2973_v53, %v2968_v38  ;;  %v3013_v38 = vld [vmem:[#allocation3 + $0x2b8] sm:$0xf]  ;;  %v3010_v53 = vld [vmem:[#allocation3 + $0x2a0] sm:$0xff] }
 0x7c1   :  { %2779 = vmatmul.mubr.f32.vlgmr.msra.gmra.mrb[24].mxu1 %v14522_v56  ;;  %3096 = vmatmul.mubr.f32.vlgmr.msra.gmra.mrb[14].mxu0 %v14522_v56 }
 0x7c2   :  { %11411 = vmatpush1.bf16.msra.mxu1 %v11410_v62  ;;  %10477 = vmatprep.mubr.msk.f32.mxu1 %vm577_vm0, %v14514_v1  ;;  %v11459_v62 = vpack.c.bf16 %v2975_v44, %v2970_v55  ;;  %v3015_v55 = vld [vmem:[#allocation3 + $0x2c8] sm:$0xf] }
 0x7c3   :  { %11448 = vmatpush1.bf16.msra.mxu0 %v11447_v63  ;;  %10479 = vmatprep.mubr.msk.f32.mxu0 %vm577_vm0, %v14514_v1  ;;  %v2960_v1 = vld [vmem:[#allocation3 + $0x110] sm:$0xff]  ;;  %v11428_v63 = vpack.c.bf16 %v2984_v4, %v2979_v57  ;;  %v11471_v57 = vpack.c.bf16 %v3015_v55, %v3010_v53 }
 0x7c4   :  { %11413 = vmatprep.subr.bf16.mxu1 %v11412_v24  ;;  %11449 = vmatprep.subr.bf16.mxu0 %v13921_v8  ;;  %v11456_v15 = vpack.c.bf16 %v2965_v12, %v2960_v1  ;;  %v2985_v24 = vld [vmem:[#allocation3 + $0x1d8] sm:$0xff] }
 0x7c5   :  { %v3005_v1 = vld [vmem:[#allocation3 + $0x278] sm:$0xff] }
 0x7c6   :  { %11415 = vmatpush1.bf16.msra.mxu1 %v11414_v16  ;;  %v11462_v16 = vpack.c.bf16 %v2985_v24, %v2980_v2  ;;  %v3009_v12 = vld [vmem:[#allocation3 + $0x298] sm:$0xff] }
 0x7c7   :  { %11451 = vmatpush1.bf16.msra.mxu0 %v11450_v26  ;;  %11417 = vmatprep.subr.bf16.mxu1 %v11416_v27  ;;  %v11432_v26 = vpack.c.bf16 %v2994_v31, %v2989_v35  ;;  %v2988_v27 = vld [vmem:[#allocation3 + $0x1f0] sm:$0xff] }
 0x7c8   :  { %11452 = vmatprep.subr.bf16.mxu0 %v13921_v8  ;;  %v11434_v43 = vpack.c.bf16 %v2993_v6, %v2988_v27 }
 0x7ca   :  { %11419 = vmatpush1.bf16.msra.mxu1 %v11418_v25  ;;  %v11465_v25 = vpack.c.bf16 %v2995_v42, %v2990_v40 }
 0x7cb   :  { %11454 = vmatpush1.bf16.msra.mxu0 %v11453_v28  ;;  %11421 = vmatprep.subr.bf16.mxu1 %v11420_v45  ;;  %v11436_v28 = vpack.c.bf16 %v3004_v54, %v2999_v41  ;;  %v2998_v45 = vld [vmem:[#allocation3 + $0x240] sm:$0xff] }
 0x7cc   :  { %11455 = vmatprep.subr.bf16.mxu0 %v13921_v8  ;;  %v11438_v50 = vpack.c.bf16 %v3003_v49, %v2998_v45 }
 0x7ce   :  { %11423 = vmatpush1.bf16.msra.mxu1 %v11422_v51  ;;  %v11468_v51 = vpack.c.bf16 %v3005_v1, %v3000_v48 }
 0x7cf   :  { %11457 = vmatpush1.bf16.msra.mxu0 %v11456_v15  ;;  %11425 = vmatprep.subr.bf16.mxu1 %v11424_v52  ;;  %v11440_v15 = vpack.c.bf16 %v3014_v14, %v3009_v12  ;;  %v3008_v52 = vld [vmem:[#allocation3 + $0x290] sm:$0xff] }
 0x7d0   :  { %11458 = vmatprep.subr.bf16.mxu0 %v13921_v8  ;;  %v11443_v44 = vpack.c.bf16 %v3013_v38, %v3008_v52 }
 0x7d2   :  { %11427 = vmatpush1.bf16.msra.mxu1 %v11426_v60 }
 0x7d3   :  { %11460 = vmatpush1.bf16.msra.mxu0 %v11459_v62  ;;  %11429 = vmatprep.subr.bf16.mxu1 %v11428_v63  ;;  %v2784_v62 = vld [vmem:[%s15862_s9] sm:$0x1f] }
 0x7d4   :  { %11461 = vmatprep.subr.bf16.mxu0 %v13921_v8  ;;  %v2789_v63 = vrot.slane %v2784_v62, %v14211_v10  ;;  %v2797_v0 = vrot.slane %v2784_v62, %v14226_v21  ;;  %v2793_v5 = vrot.slane %v2784_v62, %v14214_v11  ;;  %v2801_v2 = vrot.slane %v2784_v62, %v14229_v22 }
 0x7d5   :  { %v2805_v42 = vrot.slane %v2784_v62, %v14232_v23 }
 0x7d6   :  { %11431 = vmatpush1.bf16.msra.mxu1 %v11430_v13 }
 0x7d7   :  { %11463 = vmatpush1.bf16.msra.mxu0 %v11462_v16  ;;  %11433 = vmatprep.subr.bf16.mxu1 %v11432_v26 }
 0x7d8   :  { %11464 = vmatprep.subr.bf16.mxu0 %v13921_v8 }
 0x7da   :  { %11435 = vmatpush1.bf16.msra.mxu1 %v11434_v43 }
 0x7db   :  { %11466 = vmatpush1.bf16.msra.mxu0 %v11465_v25  ;;  %11437 = vmatprep.subr.bf16.mxu1 %v11436_v28 }
 0x7dc   :  { %11467 = vmatprep.subr.bf16.mxu0 %v13921_v8 }
 0x7de   :  { %11439 = vmatpush1.bf16.msra.mxu1 %v11438_v50 }
 0x7df   :  { %11469 = vmatpush1.bf16.msra.mxu0 %v11468_v51  ;;  %11442 = vmatprep.subr.msk.bf16.mxu1 %vm14099_vm3, %v11440_v15 }
 0x7e0   :  { %11470 = vmatprep.subr.bf16.mxu0 %v13921_v8 }
 0x7e2   :  { %11445 = vmatpush1.bf16.msk.msra.mxu1 %vm14099_vm3, %v11443_v44 }
 0x7e3   :  { %11473 = vmatpush1.bf16.msk.msra.mxu0 %vm14099_vm3, %v11471_v57 }
 0x7e5   :  { %3167 = vmatmul.mubr.f32.vlgmr.msra.gmra.mrb[26].mxu1 %v14522_v56 }
 0x7e6   :  { %3238 = vmatmul.mubr.f32.vlgmr.msra.gmra.mrb[16].mxu0 %v14522_v56 }
 0x848   :  { %v2541_v4 = vpop.f32.mrb[12].mxu0 }
 0x849   :  { %v2543_v60 = vpop.f32.mrb[13].mxu0 }
 0x84a   :  { %v3298_v60 = vrot.slane %v14452_v19, 6 }
 0x870   :  { %v2638_v24 = vpop.f32.mrb[10].mxu0  ;;  %v2709_v35 = vpop.f32.mrb[22].mxu1 }
 0x871   :  { %v2811_v31 = vadd.f32 %v2789_v63, %v2638_v24  ;;  %v14574_v13 = vadd.f32 %v2797_v0, %v2709_v35  ;;  %v2640_v56 = vpop.f32.mrb[11].mxu0  ;;  %v2711_v16 = vpop.f32.mrb[23].mxu1 }
 0x872   :  { %v2812_v26 = vadd.f32 %v2793_v5, %v2640_v56  ;;  %v14576_v27 = vadd.f32 %v2801_v2, %v2711_v16 }
 0x873   :  { %13410 = vtanh.f32 %v14574_v13 }
 0x874   :  { %13412 = vtanh.f32 %v14576_v27  ;;  %v10468_v57 = vmul.f32 -1.442695, %v2812_v26 }
 0x87d   :  { %v13411_v6 = vpop.eup %13410 }
 0x87e   :  { %v13413_v40 = vpop.eup %13412  ;;  %2852 = vrot.lane.b32.xlu0 %v13411_v6, %s13924_s6 }
 0x87f   :  { %2854 = vrot.lane.b32.xlu1 %v13413_v40, %s13924_s6 }
 0x894   :  { %v2780_v41 = vpop.f32.mrb[24].mxu1  ;;  %v3097_v54 = vpop.f32.mrb[14].mxu0 }
 0x895   :  { %v2781_v43 = vadd.f32 %v2780_v41, %v2541_v4  ;;  %v2782_v25 = vpop.f32.mrb[25].mxu1  ;;  %v3099_v28 = vpop.f32.mrb[15].mxu0  ;;  %v10467_v4 = vmul.f32 -1.442695, %v2811_v31 }
 0x896   :  { %v3249_v19 = vrot.slane %v3099_v28, 4 }
 0x897   :  { %v14583_v45 = vadd.f32 %v2805_v42, %v2781_v43  ;;  %v3248_v42 = vrot.slane %v3097_v54, 4 }
 0x898   :  { %v3259_v41 = vadd.f32 %v3249_v19, %v14262_v46 }
 0x899   :  { %v3258_v43 = vadd.f32 %v3248_v42, %v14264_v47  ;;  %v3429_v42 = vld [vmem:[#allocation8 + $0x8] sm:$0xff] }
 0x89a   :  { %v10481_v25 = vmul.f32 -1.442695, %v3259_v41  ;;  %v3434_v41 = vld [vmem:[#allocation8 + $0x30] sm:$0xff] }
 0x8b8   :  { %v3168_v49 = vpop.f32.mrb[26].mxu1 }
 0x8b9   :  { %v3250_v48 = vrot.slane %v3168_v49, 4  ;;  %v14585_v1 = vpop.f32.mrb[16].mxu0  ;;  %v3170_v12 = vpop.f32.mrb[27].mxu1  ;;  %v10480_v49 = vmul.f32 -1.442695, %v3258_v43  ;;  %v3428_v43 = vld [vmem:[#allocation8] sm:$0xff] }
 0x8ba   :  { %v3251_v14 = vrot.slane %v3170_v12, 4  ;;  %v3241_v50 = vpop.f32.mrb[17].mxu0 }
 0x8bb   :  { %v3260_v51 = vadd.f32 %v3250_v48, %v14248_v37 }
 0x8bc   :  { %v14589_v15 = vadd.f32 %v3251_v14, %v14250_v39 }
 0x8bd   :  { %v10482_v52 = vmul.f32 -1.442695, %v3260_v51  ;;  %13414 = vtanh.f32 %v3260_v51 }
 0x8be   :  { %13416 = vtanh.f32 %v14589_v15 }
 0x8bf   :  { %13418 = vpow2.f32 %v10482_v52 }
 0x8c7   :  { %v13415_v38 = vpop.eup %13414 }
 0x8c8   :  { %v13417_v53 = vpop.eup %13416  ;;  %3305 = vrot.lane.b32.xlu0 %v13415_v38, %s13924_s6 }
 0x8c9   :  { %v13419_v55 = vpop.eup %13418  ;;  %3307 = vrot.lane.b32.xlu1 %v13417_v53, %s13924_s6 }
 0x8ca   :  { %v3278_v44 = vadd.f32 1.0, %v13419_v55 }
 0x8cc   :  { %13420 = vrcp.f32 %v3278_v44  ;;  %v10469_v44 = vmul.f32 -1.442695, %v14574_v13 }
 0x8cd   :  { %13422 = vpow2.f32 %v10468_v57 }
 0x8ce   :  { %13424 = vpow2.f32 %v10467_v4 }
 0x8d6   :  { %v13421_v62 = vpop.eup %13420 }
 0x8d7   :  { %v14595_v63 = vmul.f32 %v13421_v62, %v3298_v60  ;;  %v13423_v0 = vpop.eup %13422 }
 0x8d8   :  { %v13425_v5 = vpop.eup %13424  ;;  %v2823_v2 = vadd.f32 1.0, %v13423_v0 }
 0x8d9   :  { %v2822_v24 = vadd.f32 1.0, %v13425_v5 }
 0x8da   :  { %13426 = vrcp.f32 %v2823_v2 }
 0x8db   :  { %13428 = vrcp.f32 %v2822_v24 }
 0x8dc   :  { %13430 = vpow2.f32 %v10481_v25  ;;  %v11474_v25 = vpack.c.bf16 %v3434_v41, %v3429_v42  ;;  %v3455_v42 = vld [vmem:[#allocation8 + $0xd8] sm:$0xff] }
 0x8dd   :  { %13432 = vpow2.f32 %v10480_v49  ;;  %v3433_v49 = vld [vmem:[#allocation8 + $0x28] sm:$0xff] }
 0x8de   :  { %11475 = vmatprep.subr.bf16.mxu1 %v11474_v25  ;;  %v3459_v25 = vld [vmem:[#allocation8 + $0xf8] sm:$0xff] }
 0x8e4   :  { %v13427_v56 = vpop.eup %13426 }
 0x8e5   :  { %v13429_v6 = vpop.eup %13428  ;;  %v2848_v0 = vmul.f32 %v13427_v56, %v14439_v58  ;;  %v3297_v58 = vrot.slane %v14449_v7, 6  ;;  %v3431_v7 = vld [vmem:[#allocation8 + $0x18] sm:$0xff] }
 0x8e6   :  { %v13431_v48 = vpop.eup %13430 }
 0x8e7   :  { %v13433_v12 = vpop.eup %13432  ;;  %v3270_v14 = vadd.f32 1.0, %v13431_v48  ;;  %v3436_v48 = vld [vmem:[#allocation8 + $0x40] sm:$0xff] }
 0x8e8   :  { %v3269_v50 = vadd.f32 1.0, %v13433_v12  ;;  %v11476_v12 = vpack.c.bf16 %v3433_v49, %v3428_v43  ;;  %v3464_v49 = vld [vmem:[#allocation8 + $0x120] sm:$0xff] }
 0x8e9   :  { %13434 = vrcp.f32 %v3270_v14  ;;  %v11512_v14 = vpack.c.bf16 %v3436_v48, %v3431_v7  ;;  %v3458_v7 = vld [vmem:[#allocation8 + $0xf0] sm:$0xff] }
 0x8ea   :  { %13436 = vrcp.f32 %v3269_v50  ;;  %v3430_v50 = vld [vmem:[#allocation8 + $0x10] sm:$0xff]  ;;  %11477 = vmatpush1.bf16.msra.mxu1 %v11476_v12  ;;  %v11486_v12 = vpack.c.bf16 %v3464_v49, %v3459_v25  ;;  %v10471_v25 = vmul.f32 -1.442695, %v14583_v45 }
 0x8eb   :  { %13438 = vpow2.f32 %v10469_v44  ;;  %11513 = vmatprep.subr.bf16.mxu0 %v11512_v14  ;;  %v3441_v44 = vld [vmem:[#allocation8 + $0x68] sm:$0xff]  ;;  %v3463_v14 = vld [vmem:[#allocation8 + $0x118] sm:$0xff] }
 0x8f0   :  { %v2853_v35 = vpop.permute.xlu0 %2852 }
 0x8f1   :  { %v2855_v16 = vpop.permute.xlu1 %2854 }
 0x8f2   :  { %v2856_v26 = vsel %vm869_vm7, %v2853_v35, %v2855_v16  ;;  %v2860_v31 = vmul.f32 %v13427_v56, %v2855_v16 }
 0x8f3   :  { %v2859_v40 = vmul.f32 %v13429_v6, %v2856_v26  ;;  %v13435_v52 = vpop.eup %13434 }
 0x8f4   :  { %2865 = vrot.lane.b32.xlu1 %v2860_v31, %s13923_s17  ;;  %v13437_v53 = vpop.eup %13436  ;;  %v3301_v56 = vmul.f32 %v13435_v52, %v3297_v58  ;;  %v3453_v58 = vld [vmem:[#allocation8 + $0xc8] sm:$0xff] }
 0x8f5   :  { %2863 = vrot.lane.b32.xlu0 %v2859_v40, %s13923_s17  ;;  %v13439_v57 = vpop.eup %13438 }
 0x8f6   :  { %v2831_v4 = vadd.f32 1.0, %v13439_v57  ;;  %v3446_v57 = vld [vmem:[#allocation8 + $0x90] sm:$0xff] }
 0x8f8   :  { %13440 = vrcp.f32 %v2831_v4  ;;  %v3440_v4 = vld [vmem:[#allocation8 + $0x60] sm:$0xff] }
 0x902   :  { %v13441_v60 = vpop.eup %13440 }
 0x903   :  { %v2849_v5 = vmul.f32 %v13441_v60, %v14441_v59  ;;  %v11516_v60 = vpack.c.bf16 %v3446_v57, %v3441_v44  ;;  %v3476_v44 = vld [vmem:[#allocation8 + $0x180] sm:$0xff] }
 0x93a   :  { %v3306_v51 = vpop.permute.xlu0 %3305 }
 0x93b   :  { %v3308_v38 = vpop.permute.xlu1 %3307 }
 0x93c   :  { %v3309_v54 = vsel %vm869_vm7, %v3306_v51, %v3308_v38  ;;  %v3313_v28 = vmul.f32 %v13435_v52, %v3308_v38  ;;  %v3435_v51 = vld [vmem:[#allocation8 + $0x38] sm:$0xff] }
 0x93d   :  { %v3312_v55 = vmul.f32 %v13437_v53, %v3309_v54  ;;  %v3439_v52 = vld [vmem:[#allocation8 + $0x58] sm:$0xff]  ;;  %v11514_v38 = vpack.c.bf16 %v3435_v51, %v3430_v50  ;;  %v3438_v53 = vld [vmem:[#allocation8 + $0x50] sm:$0xff]  ;;  %v3461_v50 = vld [vmem:[#allocation8 + $0x108] sm:$0xff] }
 0x93e   :  { %3318 = vrot.lane.b32.xlu1 %v3313_v28, %s13923_s17  ;;  %v3443_v54 = vld [vmem:[#allocation8 + $0x78] sm:$0xff]  ;;  %v3466_v51 = vld [vmem:[#allocation8 + $0x130] sm:$0xff] }
 0x93f   :  { %3316 = vrot.lane.b32.xlu0 %v3312_v55, %s13923_s17  ;;  %v11480_v55 = vpack.c.bf16 %v3443_v54, %v3438_v53  ;;  %11515 = vmatpush1.bf16.msra.mxu0 %v11514_v38  ;;  %v3460_v38 = vld [vmem:[#allocation8 + $0x100] sm:$0xff]  ;;  %v3469_v53 = vld [vmem:[#allocation8 + $0x148] sm:$0xff]  ;;  %v3474_v54 = vld [vmem:[#allocation8 + $0x170] sm:$0xff] }
 0x940   :  { %11517 = vmatprep.subr.bf16.mxu0 %v11516_v60  ;;  %v3468_v60 = vld [vmem:[#allocation8 + $0x140] sm:$0xff] }
 0x966   :  { %v2866_v62 = vpop.permute.xlu1 %2865 }
 0x967   :  { %v2864_v2 = vpop.permute.xlu0 %2863 }
 0x968   :  { %v2867_v24 = vsel %vm577_vm0, %v2864_v2, %v2866_v62  ;;  %v14609_v35 = vadd.f32 %v2864_v2, %v2848_v0  ;;  %v3445_v62 = vld [vmem:[#allocation8 + $0x88] sm:$0xff] }
 0x969   :  { %v14611_v16 = vadd.f32 %v2867_v24, %v2849_v5  ;;  %v3449_v0 = vld [vmem:[#allocation8 + $0xa8] sm:$0xff]  ;;  %v3454_v5 = vld [vmem:[#allocation8 + $0xd0] sm:$0xff]  ;;  %v11518_v24 = vpack.c.bf16 %v3445_v62, %v3440_v4  ;;  %v11490_v4 = vpack.c.bf16 %v3474_v54, %v3469_v53  ;;  %v3495_v54 = vld [vmem:[#allocation8 + $0x218] sm:$0xff] }
 0x96a   :  { %13442 = vtanh.f32 %v14609_v35  ;;  %v3473_v62 = vld [vmem:[#allocation8 + $0x168] sm:$0xff]  ;;  %v3490_v53 = vld [vmem:[#allocation8 + $0x1f0] sm:$0xff] }
 0x96b   :  { %13444 = vtanh.f32 %v14611_v16  ;;  %11519 = vmatpush1.bf16.msra.mxu0 %v11518_v24  ;;  %v3479_v24 = vld [vmem:[#allocation8 + $0x198] sm:$0xff] }
 0x974   :  { %v13443_v13 = vpop.eup %13442 }
 0x975   :  { %v13445_v6 = vpop.eup %13444  ;;  %2876 = vrot.lane.b32.xlu0 %v13443_v13, %s13925_s19  ;;  %v11482_v13 = vpack.c.bf16 %v3454_v5, %v3449_v0  ;;  %v3470_v0 = vld [vmem:[#allocation8 + $0x150] sm:$0xff] }
 0x976   :  { %2878 = vrot.lane.b32.xlu1 %v13445_v6, %s13925_s19  ;;  %v3448_v6 = vld [vmem:[#allocation8 + $0xa0] sm:$0xff] }
 0x977   :  { %v11484_v41 = vpack.c.bf16 %v3453_v58, %v3448_v6  ;;  %v3481_v6 = vld [vmem:[#allocation8 + $0x1a8] sm:$0xff]  ;;  %v3486_v58 = vld [vmem:[#allocation8 + $0x1d0] sm:$0xff] }
 0x978   :  { %v11532_v49 = vpack.c.bf16 %v3486_v58, %v3481_v6  ;;  %v3509_v6 = vld [vmem:[#allocation8 + $0x288] sm:$0xff]  ;;  %v3514_v58 = vld [vmem:[#allocation8 + $0x2b0] sm:$0xf] }
 0x9b0   :  { %v3319_v59 = vpop.permute.xlu1 %3318 }
 0x9b1   :  { %v3317_v26 = vpop.permute.xlu0 %3316 }
 0x9b2   :  { %v3320_v31 = vsel %vm577_vm0, %v3317_v26, %v3319_v59  ;;  %v14619_v40 = vadd.f32 %v3317_v26, %v3301_v56  ;;  %v3451_v59 = vld [vmem:[#allocation8 + $0xb8] sm:$0xff]  ;;  %v3456_v26 = vld [vmem:[#allocation8 + $0xe0] sm:$0xff] }
 0x9b3   :  { %v14622_v19 = vadd.f32 %v3320_v31, %v14595_v63  ;;  %v3444_v63 = vld [vmem:[#allocation8 + $0x80] sm:$0xff]  ;;  %v3450_v31 = vld [vmem:[#allocation8 + $0xb0] sm:$0xff]  ;;  %v11520_v43 = vpack.c.bf16 %v3456_v26, %v3451_v59  ;;  %v10470_v59 = vmul.f32 -1.442695, %v14576_v27 }
 0x9b4   :  { %13446 = vtanh.f32 %v14619_v40  ;;  %v11478_v28 = vpack.c.bf16 %v3444_v63, %v3439_v52  ;;  %v11522_v48 = vpack.c.bf16 %v3455_v42, %v3450_v31  ;;  %v11524_v52 = vpack.c.bf16 %v3466_v51, %v3461_v50  ;;  %v3465_v63 = vld [vmem:[#allocation8 + $0x128] sm:$0xff]  ;;  %v3478_v42 = vld [vmem:[#allocation8 + $0x190] sm:$0xff]  ;;  %v3496_v50 = vld [vmem:[#allocation8 + $0x220] sm:$0xff] }
 0x9b5   :  { %13448 = vtanh.f32 %v14622_v19  ;;  %11521 = vmatprep.subr.bf16.mxu0 %v11520_v43  ;;  %v11526_v57 = vpack.c.bf16 %v3465_v63, %v3460_v38  ;;  %v3480_v43 = vld [vmem:[#allocation8 + $0x1a0] sm:$0xff]  ;;  %v3493_v63 = vld [vmem:[#allocation8 + $0x208] sm:$0xff] }
 0x9b6   :  { %11479 = vmatprep.subr.bf16.mxu1 %v11478_v28  ;;  %v11488_v28 = vpack.c.bf16 %v3463_v14, %v3458_v7  ;;  %11523 = vmatpush1.bf16.msra.mxu0 %v11522_v48  ;;  %v3485_v7 = vld [vmem:[#allocation8 + $0x1c8] sm:$0xff]  ;;  %v3491_v14 = vld [vmem:[#allocation8 + $0x1f8] sm:$0xff]  ;;  %13450 = vpow2.f32 %v10470_v59  ;;  %v3488_v38 = vld [vmem:[#allocation8 + $0x1e0] sm:$0xff] }
 0x9b7   :  { %11481 = vmatpush1.bf16.msra.mxu1 %v11480_v55  ;;  %v3471_v55 = vld [vmem:[#allocation8 + $0x158] sm:$0xff]  ;;  %11525 = vmatprep.subr.bf16.mxu0 %v11524_v52  ;;  %v3489_v48 = vld [vmem:[#allocation8 + $0x1e8] sm:$0xff]  ;;  %v11534_v51 = vpack.c.bf16 %v3485_v7, %v3480_v43  ;;  %13452 = vpow2.f32 %v10471_v25  ;;  %v11536_v45 = vpack.c.bf16 %v3496_v50, %v3491_v14  ;;  %v3510_v50 = vld [vmem:[#allocation8 + $0x290] sm:$0xff] }
 0x9b8   :  { %11483 = vmatprep.subr.bf16.mxu1 %v11482_v13  ;;  %v11528_v5 = vpack.c.bf16 %v3476_v44, %v3471_v55  ;;  %v3484_v13 = vld [vmem:[#allocation8 + $0x1c0] sm:$0xff]  ;;  %v3501_v44 = vld [vmem:[#allocation8 + $0x248] sm:$0xff]  ;;  %v3511_v59 = vld [vmem:[#allocation8 + $0x298] sm:$0xff] }
 0x9b9   :  { %v11494_v31 = vpack.c.bf16 %v3484_v13, %v3479_v24  ;;  %v3504_v55 = vld [vmem:[#allocation8 + $0x260] sm:$0xff]  ;;  %v3505_v13 = vld [vmem:[#allocation8 + $0x268] sm:$0xff] }
 0x9ba   :  { %11527 = vmatpush1.bf16.msra.mxu0 %v11526_v57  ;;  %v3506_v57 = vld [vmem:[#allocation8 + $0x270] sm:$0xff]  ;;  %v3513_v43 = vld [vmem:[#allocation8 + $0x2a8] sm:$0xf] }
 0x9bb   :  { %11485 = vmatpush1.bf16.msra.mxu1 %v11484_v41  ;;  %v3483_v41 = vld [vmem:[#allocation8 + $0x1b8] sm:$0xff]  ;;  %11529 = vmatprep.subr.bf16.mxu0 %v11528_v5  ;;  %v11540_v24 = vpack.c.bf16 %v3506_v57, %v3501_v44  ;;  %v3341_v44 = vld [vmem:[#allocation6 + $0x18] sm:$0xff]  ;;  %v3346_v57 = vld [vmem:[#allocation6 + $0x40] sm:$0xff] }
 0x9bc   :  { %11487 = vmatprep.subr.bf16.mxu1 %v11486_v12  ;;  %v3494_v12 = vld [vmem:[#allocation8 + $0x210] sm:$0xff]  ;;  %v11496_v27 = vpack.c.bf16 %v3483_v41, %v3478_v42  ;;  %v3503_v5 = vld [vmem:[#allocation8 + $0x258] sm:$0xff]  ;;  %v11506_v42 = vpack.c.bf16 %v3514_v58, %v3509_v6  ;;  %v3508_v41 = vld [vmem:[#allocation8 + $0x280] sm:$0xff] }
 0x9bd   :  { %v11498_v52 = vpack.c.bf16 %v3494_v12, %v3489_v48  ;;  %v11509_v48 = vpack.c.bf16 %v3513_v43, %v3508_v41 }
 0x9be   :  { %v13447_v2 = vpop.eup %13446 }
 0x9bf   :  { %v13449_v56 = vpop.eup %13448  ;;  %3329 = vrot.lane.b32.xlu0 %v13447_v2, %s13925_s19  ;;  %v3475_v2 = vld [vmem:[#allocation8 + $0x178] sm:$0xff]  ;;  %11489 = vmatpush1.bf16.msra.mxu1 %v11488_v28 }
 0x9c0   :  { %3331 = vrot.lane.b32.xlu1 %v13449_v56, %s13925_s19  ;;  %v11492_v56 = vpack.c.bf16 %v3473_v62, %v3468_v60  ;;  %11491 = vmatprep.subr.bf16.mxu1 %v11490_v4  ;;  %v11530_v26 = vpack.c.bf16 %v3475_v2, %v3470_v0  ;;  %v3499_v28 = vld [vmem:[#allocation8 + $0x238] sm:$0xff]  ;;  %v11500_v4 = vpack.c.bf16 %v3493_v63, %v3488_v38  ;;  %v3498_v0 = vld [vmem:[#allocation8 + $0x230] sm:$0xff]  ;;  %v3500_v2 = vld [vmem:[#allocation8 + $0x240] sm:$0xff]  ;;  %v13451_v25 = vpop.eup %13450 }
 0x9c1   :  { %v11538_v60 = vpack.c.bf16 %v3495_v54, %v3490_v53  ;;  %v11502_v62 = vpack.c.bf16 %v3504_v55, %v3499_v28  ;;  %v13453_v7 = vpop.eup %13452  ;;  %v2842_v12 = vadd.f32 1.0, %v13451_v25  ;;  %v3437_v25 = vld [vmem:[#allocation8 + $0x48] sm:$0xff] }
 0x9c2   :  { %11531 = vmatpush1.bf16.msra.mxu0 %v11530_v26  ;;  %v11504_v26 = vpack.c.bf16 %v3503_v5, %v3498_v0  ;;  %v2843_v14 = vadd.f32 1.0, %v13453_v7  ;;  %v10483_v0 = vmul.f32 -1.442695, %v14589_v15  ;;  %v3432_v15 = vld [vmem:[#allocation8 + $0x20] sm:$0xff]  ;;  %v3345_v7 = vld [vmem:[#allocation6 + $0x38] sm:$0xff] }
 0x9c3   :  { %11493 = vmatpush1.bf16.msra.mxu1 %v11492_v56  ;;  %11533 = vmatprep.subr.bf16.mxu0 %v11532_v49  ;;  %v3516_v56 = vld [vmem:[#allocation8 + $0x2c0] sm:$0xf]  ;;  %13454 = vrcp.f32 %v2842_v12 }
 0x9c4   :  { %11495 = vmatprep.subr.bf16.mxu1 %v11494_v31  ;;  %v11542_v31 = vpack.c.bf16 %v3505_v13, %v3500_v2  ;;  %v11544_v49 = vpack.c.bf16 %v3516_v56, %v3511_v59  ;;  %13456 = vrcp.f32 %v2843_v14  ;;  %v3356_v12 = vld [vmem:[#allocation6 + $0x90] sm:$0xff]  ;;  %v11551_v14 = vpack.c.bf16 %v3437_v25, %v3432_v15  ;;  %v3386_v15 = vld [vmem:[#allocation6 + $0x180] sm:$0xff] }
 0x9c5   :  { %13458 = vpow2.f32 %v10483_v0  ;;  %v3457_v0 = vld [vmem:[#allocation8 + $0xe8] sm:$0xff] }
 0x9c6   :  { %11535 = vmatpush1.bf16.msra.mxu0 %v11534_v51 }
 0x9c7   :  { %11497 = vmatpush1.bf16.msra.mxu1 %v11496_v27  ;;  %11537 = vmatprep.subr.bf16.mxu0 %v11536_v45  ;;  %v3515_v27 = vld [vmem:[#allocation8 + $0x2b8] sm:$0xf] }
 0x9c8   :  { %11499 = vmatprep.subr.bf16.mxu1 %v11498_v52  ;;  %v11547_v51 = vpack.c.bf16 %v3515_v27, %v3510_v50 }
 0x9ca   :  { %11539 = vmatpush1.bf16.msra.mxu0 %v11538_v60  ;;  %v3252_v60 = vrot.slane %v14585_v1, 4 }
 0x9cb   :  { %11501 = vmatpush1.bf16.msra.mxu1 %v11500_v4  ;;  %11541 = vmatprep.subr.bf16.mxu0 %v11540_v24  ;;  %v11616_v4 = vpack.c.bf16 %v3346_v57, %v3341_v44  ;;  %v3355_v44 = vld [vmem:[#allocation6 + $0x88] sm:$0xff]  ;;  %v3361_v57 = vld [vmem:[#allocation6 + $0xb8] sm:$0xff] }
 0x9cc   :  { %11503 = vmatprep.subr.bf16.mxu1 %v11502_v62  ;;  %v3262_v62 = vadd.f32 %v3252_v60, %v14325_v61 }
 0x9cd   :  { %v13455_v52 = vpop.eup %13454 }
 0x9ce   :  { %11543 = vmatpush1.bf16.msra.mxu0 %v11542_v31  ;;  %v13457_v45 = vpop.eup %13456  ;;  %v10484_v5 = vmul.f32 -1.442695, %v3262_v62  ;;  %v3452_v62 = vld [vmem:[#allocation8 + $0xc0] sm:$0xff] }
 0x9cf   :  { %11505 = vmatpush1.bf16.msra.mxu1 %v11504_v26  ;;  %11546 = vmatprep.subr.msk.bf16.mxu0 %vm14099_vm3, %v11544_v49  ;;  %v13459_v2 = vpop.eup %13458  ;;  %v3340_v49 = vld [vmem:[#allocation6 + $0x10] sm:$0xff] }
 0x9d0   :  { %11508 = vmatprep.subr.msk.bf16.mxu1 %vm14099_vm3, %v11506_v42  ;;  %13460 = vpow2.f32 %v10484_v5  ;;  %v3289_v13 = vadd.f32 1.0, %v13459_v2 }
 0x9d2   :  { %11549 = vmatpush1.bf16.msk.msra.mxu0 %vm14099_vm3, %v11547_v51  ;;  %13462 = vrcp.f32 %v3289_v13  ;;  %v3442_v51 = vld [vmem:[#allocation8 + $0x70] sm:$0xff]  ;;  %v3365_v13 = vld [vmem:[#allocation6 + $0xd8] sm:$0xff] }
 0x9d3   :  { %11511 = vmatpush1.bf16.msk.msra.mxu1 %vm14099_vm3, %v11509_v48  ;;  %11617 = vmatprep.subr.bf16.mxu0 %v11616_v4  ;;  %v3351_v48 = vld [vmem:[#allocation6 + $0x68] sm:$0xff]  ;;  %v3366_v4 = vld [vmem:[#allocation6 + $0xe0] sm:$0xff] }
 0x9d4   :  { %11550 = vmatprep.subr.bf16.mxu1 %v13921_v8  ;;  %v11624_v2 = vpack.c.bf16 %v3366_v4, %v3361_v57  ;;  %v3390_v57 = vld [vmem:[#allocation6 + $0x1a0] sm:$0xff]  ;;  %v3395_v4 = vld [vmem:[#allocation6 + $0x1c8] sm:$0xff] }
 0x9da   :  { %v13461_v24 = vpop.eup %13460 }
 0x9db   :  { %v3290_v6 = vadd.f32 1.0, %v13461_v24  ;;  %v3360_v24 = vld [vmem:[#allocation6 + $0xb0] sm:$0xff] }
 0x9dc   :  { %v13463_v58 = vpop.eup %13462 }
 0x9dd   :  { %13464 = vrcp.f32 %v3290_v6  ;;  %v3371_v6 = vld [vmem:[#allocation6 + $0x108] sm:$0xff] }
 0x9e7   :  { %v2877_v38 = vpop.permute.xlu0 %2876  ;;  %v13465_v31 = vpop.eup %13464 }
 0x9e8   :  { %v14639_v63 = vmul.f32 %v13455_v52, %v2877_v38  ;;  %v2879_v53 = vpop.permute.xlu1 %2878  ;;  %v3447_v52 = vld [vmem:[#allocation8 + $0x98] sm:$0xff] }
 0x9e9   :  { %v2880_v54 = vsel %vm894_vm8, %v2877_v38, %v2879_v53  ;;  %v11618_v38 = vpack.c.bf16 %v3345_v7, %v3340_v49  ;;  %v11554_v60 = vpack.c.bf16 %v3447_v52, %v3442_v51  ;;  %v3472_v49 = vld [vmem:[#allocation8 + $0x160] sm:$0xff]  ;;  %v3477_v7 = vld [vmem:[#allocation8 + $0x188] sm:$0xff] }
 0x9ea   :  { %v14642_v28 = vmul.f32 %v13457_v45, %v2880_v54  ;;  %3518 = vrot.lane.b32.xlu0 %v14639_v63, %s13926_s2  ;;  %v11620_v45 = vpack.c.bf16 %v3356_v12, %v3351_v48  ;;  %v3350_v54 = vld [vmem:[#allocation6 + $0x60] sm:$0xff]  ;;  %v3396_v51 = vld [vmem:[#allocation6 + $0x1d0] sm:$0xff]  ;;  %v11563_v52 = vpack.c.bf16 %v3477_v7, %v3472_v49 }
 0x9eb   :  { %v11622_v5 = vpack.c.bf16 %v3355_v44, %v3350_v54  ;;  %v3426_v49 = vld [vmem:[#allocation6 + $0x2c0] sm:$0xf] }
 0x9ec   :  { %v2887_v55 = vcombine.low %v14639_v63, %v14642_v28  ;;  %3520 = vrot.lane.b32.xlu1 %v14642_v28, %s13926_s2 }
 0xa31   :  { %v3330_v59 = vpop.permute.xlu0 %3329 }
 0xa32   :  { %v3336_v56 = vmul.f32 %v13463_v58, %v3330_v59  ;;  %v3332_v26 = vpop.permute.xlu1 %3331  ;;  %v3376_v58 = vld [vmem:[#allocation6 + $0x130] sm:$0xff] }
 0xa33   :  { %v3333_v1 = vsel %vm894_vm8, %v3330_v59, %v3332_v26  ;;  %v11557_v59 = vpack.c.bf16 %v3457_v0, %v3452_v62  ;;  %v3467_v26 = vld [vmem:[#allocation8 + $0x138] sm:$0xff]  ;;  %v3406_v62 = vld [vmem:[#allocation6 + $0x220] sm:$0xff] }
 0xa34   :  { %v3337_v42 = vmul.f32 %v13465_v31, %v3333_v1  ;;  %v3755_v41 = vrot.slane %v3336_v56, 4  ;;  %v3462_v56 = vld [vmem:[#allocation8 + $0x110] sm:$0xff]  ;;  %v11626_v31 = vpack.c.bf16 %v3365_v13, %v3360_v24  ;;  %v11628_v1 = vpack.c.bf16 %v3376_v58, %v3371_v6  ;;  %v3400_v6 = vld [vmem:[#allocation6 + $0x1f0] sm:$0xff]  ;;  %v3405_v58 = vld [vmem:[#allocation6 + $0x218] sm:$0xff] }
 0xa35   :  { %v11560_v25 = vpack.c.bf16 %v3467_v26, %v3462_v56  ;;  %v11638_v24 = vpack.c.bf16 %v3395_v4, %v3390_v57  ;;  %v3416_v56 = vld [vmem:[#allocation6 + $0x270] sm:$0xff]  ;;  %v3343_v57 = vld [vmem:[#allocation6 + $0x28] sm:$0xff] }
 0xa36   :  { %v3756_v43 = vrot.slane %v3337_v42, 4  ;;  %3757 = vrot.lane.b32.xlu0 %v3755_v41, %s13926_s2  ;;  %v3370_v42 = vld [vmem:[#allocation6 + $0x100] sm:$0xff]  ;;  %v3375_v41 = vld [vmem:[#allocation6 + $0x128] sm:$0xff] }
 0xa37   :  { %v11630_v48 = vpack.c.bf16 %v3375_v41, %v3370_v42  ;;  %v11642_v42 = vpack.c.bf16 %v3405_v58, %v3400_v6  ;;  %v3364_v6 = vld [vmem:[#allocation6 + $0xd0] sm:$0xff] }
 0xa38   :  { %3759 = vrot.lane.b32.xlu1 %v3756_v43, %s13926_s2  ;;  %v3381_v43 = vld [vmem:[#allocation6 + $0x158] sm:$0xff] }
 0xa39   :  { %v11632_v12 = vpack.c.bf16 %v3386_v15, %v3381_v43  ;;  %v3410_v43 = vld [vmem:[#allocation6 + $0x240] sm:$0xff]  ;;  %v3415_v15 = vld [vmem:[#allocation6 + $0x268] sm:$0xff] }
 0xa5c   :  { %v3519_v50 = vpop.permute.xlu0 %3518 }
 0xa5e   :  { %v3521_v27 = vpop.permute.xlu1 %3520 }
 0xa5f   :  { %10487 = vmatprep.mubr.msk.f32.mxu1 %vm577_vm0, %v3521_v27  ;;  %10490 = vmatprep.mubr.msk.f32.mxu0 %vm577_vm0, %v3521_v27  ;;  %v14659_v53 = vsel %vm1325_vm9, %v3519_v50, %v3521_v27  ;;  %v3385_v50 = vld [vmem:[#allocation6 + $0x178] sm:$0xff] }
 0xa60   :  { %3606 = vmatmul.mubr.f32.vlgmr.msra.gmra.mrb[28].mxu1 %v14659_v53  ;;  %3677 = vmatmul.mubr.f32.vlgmr.msra.gmra.mrb[18].mxu0 %v14659_v53 }
 0xa61   :  { %11552 = vmatpush1.bf16.msra.mxu1 %v11551_v14  ;;  %10492 = vmatprep.mubr.msk.f32.mxu1 %vm577_vm0, %v3521_v27  ;;  %v3380_v14 = vld [vmem:[#allocation6 + $0x150] sm:$0xff]  ;;  %v3391_v27 = vld [vmem:[#allocation6 + $0x1a8] sm:$0xff] }
 0xa62   :  { %11553 = vmatprep.subr.bf16.mxu1 %v13921_v8  ;;  %11619 = vmatpush1.bf16.msra.mxu0 %v11618_v38  ;;  %v3482_v38 = vld [vmem:[#allocation8 + $0x1b0] sm:$0xff]  ;;  %v11634_v54 = vpack.c.bf16 %v3385_v50, %v3380_v14  ;;  %v11636_v44 = vpack.c.bf16 %v3396_v51, %v3391_v27  ;;  %v3339_v14 = vld [vmem:[#allocation6 + $0x8] sm:$0xff]  ;;  %v11646_v50 = vpack.c.bf16 %v3415_v15, %v3410_v43  ;;  %v3344_v27 = vld [vmem:[#allocation6 + $0x30] sm:$0xff] }
 0xa63   :  { %11621 = vmatprep.subr.bf16.mxu0 %v11620_v45  ;;  %v3487_v45 = vld [vmem:[#allocation8 + $0x1d8] sm:$0xff]  ;;  %v3368_v43 = vld [vmem:[#allocation6 + $0xf0] sm:$0xff]  ;;  %v3373_v15 = vld [vmem:[#allocation6 + $0x118] sm:$0xff] }
 0xa64   :  { %v11566_v0 = vpack.c.bf16 %v3487_v45, %v3482_v38  ;;  %v3425_v38 = vld [vmem:[#allocation6 + $0x2b8] sm:$0xf] }
 0xa65   :  { %11555 = vmatpush1.bf16.msra.mxu1 %v11554_v60  ;;  %v3401_v60 = vld [vmem:[#allocation6 + $0x1f8] sm:$0xff] }
 0xa66   :  { %11556 = vmatprep.subr.bf16.mxu1 %v13921_v8  ;;  %11623 = vmatpush1.bf16.msra.mxu0 %v11622_v5  ;;  %v3492_v5 = vld [vmem:[#allocation8 + $0x200] sm:$0xff]  ;;  %v11640_v13 = vpack.c.bf16 %v3406_v62, %v3401_v60  ;;  %v3349_v60 = vld [vmem:[#allocation6 + $0x58] sm:$0xff]  ;;  %v3354_v62 = vld [vmem:[#allocation6 + $0x80] sm:$0xff] }
 0xa67   :  { %11625 = vmatprep.subr.bf16.mxu0 %v11624_v2  ;;  %v3497_v2 = vld [vmem:[#allocation8 + $0x228] sm:$0xff] }
 0xa68   :  { %v11569_v26 = vpack.c.bf16 %v3497_v2, %v3492_v5  ;;  %v11582_v5 = vpack.c.bf16 %v3354_v62, %v3349_v60  ;;  %v3348_v2 = vld [vmem:[#allocation6 + $0x50] sm:$0xff]  ;;  %v3403_v60 = vld [vmem:[#allocation6 + $0x208] sm:$0xff]  ;;  %v3409_v62 = vld [vmem:[#allocation6 + $0x238] sm:$0xff] }
 0xa69   :  { %11558 = vmatpush1.bf16.msra.mxu1 %v11557_v59  ;;  %v3411_v59 = vld [vmem:[#allocation6 + $0x248] sm:$0xff] }
 0xa6a   :  { %11559 = vmatprep.subr.bf16.mxu1 %v13921_v8  ;;  %11627 = vmatpush1.bf16.msra.mxu0 %v11626_v31  ;;  %v3502_v31 = vld [vmem:[#allocation8 + $0x250] sm:$0xff]  ;;  %v11644_v41 = vpack.c.bf16 %v3416_v56, %v3411_v59 }
 0xa6b   :  { %11629 = vmatprep.subr.bf16.mxu0 %v11628_v1  ;;  %v3507_v1 = vld [vmem:[#allocation8 + $0x278] sm:$0xff]  ;;  %v3358_v56 = vld [vmem:[#allocation6 + $0xa0] sm:$0xff] }
 0xa6c   :  { %v11572_v7 = vpack.c.bf16 %v3507_v1, %v3502_v31  ;;  %v3369_v31 = vld [vmem:[#allocation6 + $0xf8] sm:$0xff]  ;;  %v3374_v1 = vld [vmem:[#allocation6 + $0x120] sm:$0xff] }
 0xa6d   :  { %11561 = vmatpush1.bf16.msra.mxu1 %v11560_v25  ;;  %v3421_v25 = vld [vmem:[#allocation6 + $0x298] sm:$0xff] }
 0xa6e   :  { %11562 = vmatprep.subr.bf16.mxu1 %v13921_v8  ;;  %11631 = vmatpush1.bf16.msra.mxu0 %v11630_v48  ;;  %v3512_v48 = vld [vmem:[#allocation8 + $0x2a0] sm:$0xff]  ;;  %v11648_v51 = vpack.c.bf16 %v3426_v49, %v3421_v25  ;;  %v3379_v25 = vld [vmem:[#allocation6 + $0x148] sm:$0xff] }
 0xa6f   :  { %11633 = vmatprep.subr.bf16.mxu0 %v11632_v12  ;;  %v3517_v12 = vld [vmem:[#allocation8 + $0x2c8] sm:$0xf]  ;;  %v3384_v49 = vld [vmem:[#allocation6 + $0x170] sm:$0xff] }
 0xa70   :  { %v11575_v45 = vpack.c.bf16 %v3517_v12, %v3512_v48  ;;  %v3378_v48 = vld [vmem:[#allocation6 + $0x140] sm:$0xff]  ;;  %v3383_v12 = vld [vmem:[#allocation6 + $0x168] sm:$0xff] }
 0xa71   :  { %11564 = vmatpush1.bf16.msra.mxu1 %v11563_v52  ;;  %v3420_v52 = vld [vmem:[#allocation6 + $0x290] sm:$0xff] }
 0xa72   :  { %11565 = vmatprep.subr.bf16.mxu1 %v13921_v8  ;;  %11635 = vmatpush1.bf16.msra.mxu0 %v11634_v54  ;;  %v11578_v54 = vpack.c.bf16 %v3344_v27, %v3339_v14  ;;  %v11651_v4 = vpack.c.bf16 %v3425_v38, %v3420_v52  ;;  %v3389_v14 = vld [vmem:[#allocation6 + $0x198] sm:$0xff]  ;;  %v11596_v27 = vpack.c.bf16 %v3383_v12, %v3378_v48  ;;  %v3388_v52 = vld [vmem:[#allocation6 + $0x190] sm:$0xff] }
 0xa73   :  { %11637 = vmatprep.subr.bf16.mxu0 %v11636_v44  ;;  %v3338_v44 = vld [vmem:[#allocation6] sm:$0xff]  ;;  %v3393_v38 = vld [vmem:[#allocation6 + $0x1b8] sm:$0xff]  ;;  %v4150_v48 = vld [vmem:[#allocation3 + $0x80] sm:$0xff] }
 0xa75   :  { %11567 = vmatpush1.bf16.msra.mxu1 %v11566_v0  ;;  %v11580_v0 = vpack.c.bf16 %v3343_v57, %v3338_v44  ;;  %v11600_v44 = vpack.c.bf16 %v3393_v38, %v3388_v52  ;;  %v3357_v52 = vld [vmem:[#allocation6 + $0x98] sm:$0xff]  ;;  %v4144_v38 = vld [vmem:[#allocation3 + $0x50] sm:$0xff] }
 0xa76   :  { %11568 = vmatprep.subr.bf16.mxu1 %v13921_v8  ;;  %11639 = vmatpush1.bf16.msra.mxu0 %v11638_v24  ;;  %v3353_v24 = vld [vmem:[#allocation6 + $0x78] sm:$0xff] }
 0xa77   :  { %11641 = vmatprep.subr.bf16.mxu0 %v11640_v13  ;;  %v3359_v13 = vld [vmem:[#allocation6 + $0xa8] sm:$0xff]  ;;  %v11584_v58 = vpack.c.bf16 %v3353_v24, %v3348_v2  ;;  %v3408_v24 = vld [vmem:[#allocation6 + $0x230] sm:$0xff] }
 0xa78   :  { %v11586_v59 = vpack.c.bf16 %v3364_v6, %v3359_v13  ;;  %v3413_v13 = vld [vmem:[#allocation6 + $0x258] sm:$0xff]  ;;  %v3419_v6 = vld [vmem:[#allocation6 + $0x288] sm:$0xff] }
 0xa79   :  { %11570 = vmatpush1.bf16.msra.mxu1 %v11569_v26  ;;  %v3363_v26 = vld [vmem:[#allocation6 + $0xc8] sm:$0xff] }
 0xa7a   :  { %11571 = vmatprep.subr.bf16.mxu1 %v13921_v8  ;;  %11643 = vmatpush1.bf16.msra.mxu0 %v11642_v42  ;;  %v11588_v42 = vpack.c.bf16 %v3363_v26, %v3358_v56  ;;  %v3418_v26 = vld [vmem:[#allocation6 + $0x280] sm:$0xff] }
 0xa7b   :  { %11645 = vmatprep.subr.bf16.mxu0 %v11644_v41  ;;  %v11590_v41 = vpack.c.bf16 %v3374_v1, %v3369_v31  ;;  %v3423_v31 = vld [vmem:[#allocation6 + $0x2a8] sm:$0xf]  ;;  %v4135_v1 = vld [vmem:[#allocation3 + $0x8] sm:$0xff] }
 0xa7d   :  { %11573 = vmatpush1.bf16.msra.mxu1 %v11572_v7  ;;  %v11592_v7 = vpack.c.bf16 %v3373_v15, %v3368_v43  ;;  %v3342_v15 = vld [vmem:[#allocation6 + $0x20] sm:$0xff] }
 0xa7e   :  { %11574 = vmatprep.subr.bf16.mxu1 %v13921_v8  ;;  %11647 = vmatpush1.bf16.msra.mxu0 %v11646_v50  ;;  %v3394_v50 = vld [vmem:[#allocation6 + $0x1c0] sm:$0xff] }
 0xa7f   :  { %11650 = vmatprep.subr.msk.bf16.mxu0 %vm14099_vm3, %v11648_v51  ;;  %v11598_v51 = vpack.c.bf16 %v3394_v50, %v3389_v14  ;;  %v3352_v50 = vld [vmem:[#allocation6 + $0x70] sm:$0xff] }
 0xa81   :  { %11577 = vmatpush1.bf16.msk.msra.mxu1 %vm14099_vm3, %v11575_v45  ;;  %v3399_v45 = vld [vmem:[#allocation6 + $0x1e8] sm:$0xff] }
 0xa82   :  { %11579 = vmatprep.subr.bf16.mxu1 %v11578_v54  ;;  %11653 = vmatpush1.bf16.msk.msra.mxu0 %vm14099_vm3, %v11651_v4  ;;  %v3404_v54 = vld [vmem:[#allocation6 + $0x210] sm:$0xff]  ;;  %v3398_v4 = vld [vmem:[#allocation6 + $0x1e0] sm:$0xff] }
 0xa83   :  { %11654 = vmatprep.subr.bf16.mxu0 %v13921_v8  ;;  %v11602_v57 = vpack.c.bf16 %v3404_v54, %v3399_v45  ;;  %v4149_v45 = vld [vmem:[#allocation3 + $0x78] sm:$0xff] }
 0xa84   :  { %3748 = vmatmul.mubr.f32.vlgmr.msra.gmra.mrb[30].mxu1 %v14659_v53  ;;  %v11594_v53 = vpack.c.bf16 %v3384_v49, %v3379_v25  ;;  %v3347_v25 = vld [vmem:[#allocation6 + $0x48] sm:$0xff]  ;;  %v4134_v49 = vld [vmem:[#allocation3] sm:$0xff] }
 0xa85   :  { %11581 = vmatpush1.bf16.msra.mxu1 %v11580_v0  ;;  %v3414_v0 = vld [vmem:[#allocation6 + $0x260] sm:$0xff]  ;;  %v11655_v12 = vpack.c.bf16 %v3347_v25, %v3342_v15 }
 0xa86   :  { %11583 = vmatprep.subr.bf16.mxu1 %v11582_v5  ;;  %v11604_v5 = vpack.c.bf16 %v3403_v60, %v3398_v4  ;;  %v11606_v2 = vpack.c.bf16 %v3414_v0, %v3409_v62  ;;  %v4160_v4 = vld [vmem:[#allocation3 + $0xd0] sm:$0xff]  ;;  %v11658_v60 = vpack.c.bf16 %v3357_v52, %v3352_v50  ;;  %v11688_v62 = vpack.c.bf16 %v4149_v45, %v4144_v38  ;;  %v4185_v50 = vld [vmem:[#allocation3 + $0x198] sm:$0xff]  ;;  %v3392_v45 = vld [vmem:[#allocation6 + $0x1b0] sm:$0xff] }
 0xa87   :  { %v3362_v0 = vld [vmem:[#allocation6 + $0xc0] sm:$0xff] }
 0xa88   :  { %v4180_v15 = vld [vmem:[#allocation3 + $0x170] sm:$0xff] }
 0xa89   :  { %11585 = vmatpush1.bf16.msra.mxu1 %v11584_v58  ;;  %v3424_v58 = vld [vmem:[#allocation6 + $0x2b0] sm:$0xf] }
 0xa8a   :  { %11587 = vmatprep.subr.bf16.mxu1 %v11586_v59  ;;  %v11608_v59 = vpack.c.bf16 %v3413_v13, %v3408_v24  ;;  %v11610_v56 = vpack.c.bf16 %v3424_v58, %v3419_v6  ;;  %v4154_v24 = vld [vmem:[#allocation3 + $0xa0] sm:$0xff]  ;;  %v4159_v13 = vld [vmem:[#allocation3 + $0xc8] sm:$0xff]  ;;  %v4165_v6 = vld [vmem:[#allocation3 + $0xf8] sm:$0xff] }
 0xa8b   :  { %v4170_v58 = vld [vmem:[#allocation3 + $0x120] sm:$0xff] }
 0xa8d   :  { %11589 = vmatpush1.bf16.msra.mxu1 %v11588_v42  ;;  %v4140_v42 = vld [vmem:[#allocation3 + $0x30] sm:$0xff] }
 0xa8e   :  { %11591 = vmatprep.subr.bf16.mxu1 %v11590_v41  ;;  %v11613_v41 = vpack.c.bf16 %v3423_v31, %v3418_v26  ;;  %v11682_v43 = vpack.c.bf16 %v4140_v42, %v4135_v1  ;;  %v3372_v26 = vld [vmem:[#allocation6 + $0x110] sm:$0xff]  ;;  %v11694_v31 = vpack.c.bf16 %v4170_v58, %v4165_v6  ;;  %v3377_v1 = vld [vmem:[#allocation6 + $0x138] sm:$0xff]  ;;  %v4164_v42 = vld [vmem:[#allocation3 + $0xf0] sm:$0xff] }
 0xa8f   :  { %v11664_v25 = vpack.c.bf16 %v3377_v1, %v3372_v26  ;;  %v3407_v6 = vld [vmem:[#allocation6 + $0x228] sm:$0xff]  ;;  %v4194_v58 = vld [vmem:[#allocation3 + $0x1e0] sm:$0xff] }
 0xa90   :  { %v4210_v26 = vld [vmem:[#allocation3 + $0x260] sm:$0xff] }
 0xa91   :  { %11593 = vmatpush1.bf16.msra.mxu1 %v11592_v7  ;;  %v4139_v7 = vld [vmem:[#allocation3 + $0x28] sm:$0xff] }
 0xa92   :  { %11595 = vmatprep.subr.bf16.mxu1 %v11594_v53  ;;  %v4145_v53 = vld [vmem:[#allocation3 + $0x58] sm:$0xff]  ;;  %v11684_v14 = vpack.c.bf16 %v4139_v7, %v4134_v49  ;;  %v3382_v7 = vld [vmem:[#allocation6 + $0x160] sm:$0xff] }
 0xa95   :  { %11597 = vmatpush1.bf16.msra.mxu1 %v11596_v27 }
 0xa96   :  { %11599 = vmatprep.subr.bf16.mxu1 %v11598_v51 }
 0xa99   :  { %11601 = vmatpush1.bf16.msra.mxu1 %v11600_v44  ;;  %v11686_v44 = vpack.c.bf16 %v4150_v48, %v4145_v53  ;;  %v3387_v48 = vld [vmem:[#allocation6 + $0x188] sm:$0xff] }
 0xa9a   :  { %11603 = vmatprep.subr.bf16.mxu1 %v11602_v57  ;;  %v4155_v57 = vld [vmem:[#allocation3 + $0xa8] sm:$0xff]  ;;  %v11667_v52 = vpack.c.bf16 %v3387_v48, %v3382_v7  ;;  %v4220_v7 = vld [vmem:[#allocation3 + $0x2b0] sm:$0xf] }
 0xa9d   :  { %11605 = vmatpush1.bf16.msra.mxu1 %v11604_v5  ;;  %v11690_v5 = vpack.c.bf16 %v4160_v4, %v4155_v57  ;;  %v3397_v57 = vld [vmem:[#allocation6 + $0x1d8] sm:$0xff]  ;;  %v4184_v4 = vld [vmem:[#allocation3 + $0x190] sm:$0xff] }
 0xa9e   :  { %11607 = vmatprep.subr.bf16.mxu1 %v11606_v2  ;;  %v3367_v2 = vld [vmem:[#allocation6 + $0xe8] sm:$0xff] }
 0xaa1   :  { %11609 = vmatpush1.bf16.msra.mxu1 %v11608_v59  ;;  %v11661_v59 = vpack.c.bf16 %v3367_v2, %v3362_v0  ;;  %v4200_v0 = vld [vmem:[#allocation3 + $0x210] sm:$0xff] }
 0xaa2   :  { %11612 = vmatprep.subr.msk.bf16.mxu1 %vm14099_vm3, %v11610_v56  ;;  %v11692_v56 = vpack.c.bf16 %v4159_v13, %v4154_v24  ;;  %v3402_v24 = vld [vmem:[#allocation6 + $0x200] sm:$0xff] }
 0xaa5   :  { %11615 = vmatpush1.bf16.msk.msra.mxu1 %vm14099_vm3, %v11613_v41  ;;  %v4169_v41 = vld [vmem:[#allocation3 + $0x118] sm:$0xff] }
 0xaa6   :  { %11683 = vmatprep.subr.bf16.mxu1 %v11682_v43  ;;  %v4175_v43 = vld [vmem:[#allocation3 + $0x148] sm:$0xff]  ;;  %v11696_v49 = vpack.c.bf16 %v4169_v41, %v4164_v42  ;;  %v3412_v42 = vld [vmem:[#allocation6 + $0x250] sm:$0xff] }
 0xaa7   :  { %v11698_v53 = vpack.c.bf16 %v4180_v15, %v4175_v43  ;;  %v3417_v43 = vld [vmem:[#allocation6 + $0x278] sm:$0xff]  ;;  %v4204_v15 = vld [vmem:[#allocation3 + $0x230] sm:$0xff] }
 0xaa8   :  { %v3758_v27 = vpop.permute.xlu0 %3757 }
 0xaaa   :  { %v14684_v51 = vpop.permute.xlu1 %3759 }
 0xaab   :  { %10495 = vmatprep.mubr.msk.f32.mxu1 %vm577_vm0, %v14684_v51  ;;  %10498 = vmatprep.mubr.msk.f32.mxu0 %vm577_vm0, %v14684_v51  ;;  %v14692_v54 = vsel %vm1325_vm9, %v3758_v27, %v14684_v51  ;;  %v4190_v27 = vld [vmem:[#allocation3 + $0x1c0] sm:$0xff] }
 0xaac   :  { %3845 = vmatmul.mubr.f32.vlgmr.msra.gmra.mrb[28].mxu1 %v14692_v54  ;;  %3916 = vmatmul.mubr.f32.vlgmr.msra.gmra.mrb[18].mxu0 %v14692_v54 }
 0xaad   :  { %11656 = vmatpush1.bf16.msra.mxu0 %v11655_v12  ;;  %11685 = vmatpush1.bf16.msra.mxu1 %v11684_v14  ;;  %v4174_v12 = vld [vmem:[#allocation3 + $0x140] sm:$0xff]  ;;  %v4179_v14 = vld [vmem:[#allocation3 + $0x168] sm:$0xff] }
 0xaae   :  { %10500 = vmatprep.mubr.msk.f32.mxu0 %vm577_vm0, %v14684_v51  ;;  %10508 = vmatprep.mubr.msk.f32.mxu1 %vm577_vm0, %v14684_v51  ;;  %v11700_v38 = vpack.c.bf16 %v4179_v14, %v4174_v12  ;;  %v3422_v12 = vld [vmem:[#allocation6 + $0x2a0] sm:$0xff] }
 0xaaf   :  { %11657 = vmatprep.subr.bf16.mxu0 %v13921_v8  ;;  %11687 = vmatprep.subr.bf16.mxu1 %v11686_v44  ;;  %v11702_v44 = vpack.c.bf16 %v4190_v27, %v4185_v50  ;;  %v3427_v50 = vld [vmem:[#allocation6 + $0x2c8] sm:$0xf]  ;;  %v4214_v27 = vld [vmem:[#allocation3 + $0x280] sm:$0xff] }
 0xab1   :  { %11659 = vmatpush1.bf16.msra.mxu0 %v11658_v60  ;;  %11689 = vmatpush1.bf16.msra.mxu1 %v11688_v62  ;;  %v4189_v60 = vld [vmem:[#allocation3 + $0x1b8] sm:$0xff]  ;;  %v4195_v62 = vld [vmem:[#allocation3 + $0x1e8] sm:$0xff] }
 0xab2   :  { %11660 = vmatprep.subr.bf16.mxu0 %v13921_v8  ;;  %11691 = vmatprep.subr.bf16.mxu1 %v11690_v5  ;;  %v11670_v5 = vpack.c.bf16 %v3397_v57, %v3392_v45  ;;  %v11704_v2 = vpack.c.bf16 %v4189_v60, %v4184_v4  ;;  %v11706_v13 = vpack.c.bf16 %v4200_v0, %v4195_v62  ;;  %v4142_v45 = vld [vmem:[#allocation3 + $0x40] sm:$0xff]  ;;  %v4136_v60 = vld [vmem:[#allocation3 + $0x10] sm:$0xff]  ;;  %v4141_v62 = vld [vmem:[#allocation3 + $0x38] sm:$0xff] }
 0xab3   :  { %v4138_v0 = vld [vmem:[#allocation3 + $0x20] sm:$0xff] }
 0xab5   :  { %11662 = vmatpush1.bf16.msra.mxu0 %v11661_v59  ;;  %11693 = vmatpush1.bf16.msra.mxu1 %v11692_v56  ;;  %v4199_v59 = vld [vmem:[#allocation3 + $0x208] sm:$0xff]  ;;  %v4205_v56 = vld [vmem:[#allocation3 + $0x238] sm:$0xff] }
 0xab6   :  { %11663 = vmatprep.subr.bf16.mxu0 %v13921_v8  ;;  %11695 = vmatprep.subr.bf16.mxu1 %v11694_v31  ;;  %v11673_v31 = vpack.c.bf16 %v3407_v6, %v3402_v24  ;;  %v11708_v1 = vpack.c.bf16 %v4199_v59, %v4194_v58  ;;  %v11710_v41 = vpack.c.bf16 %v4210_v26, %v4205_v56  ;;  %v4152_v24 = vld [vmem:[#allocation3 + $0x90] sm:$0xff]  ;;  %v4146_v58 = vld [vmem:[#allocation3 + $0x60] sm:$0xff]  ;;  %v4151_v59 = vld [vmem:[#allocation3 + $0x88] sm:$0xff] }
 0xab7   :  { %v4148_v56 = vld [vmem:[#allocation3 + $0x70] sm:$0xff] }
 0xab9   :  { %11665 = vmatpush1.bf16.msra.mxu0 %v11664_v25  ;;  %11697 = vmatpush1.bf16.msra.mxu1 %v11696_v49  ;;  %v4209_v25 = vld [vmem:[#allocation3 + $0x258] sm:$0xff]  ;;  %v4215_v49 = vld [vmem:[#allocation3 + $0x288] sm:$0xff] }
 0xaba   :  { %11666 = vmatprep.subr.bf16.mxu0 %v13921_v8  ;;  %11699 = vmatprep.subr.bf16.mxu1 %v11698_v53  ;;  %v11676_v53 = vpack.c.bf16 %v3417_v43, %v3412_v42  ;;  %v11712_v48 = vpack.c.bf16 %v4209_v25, %v4204_v15  ;;  %v11714_v14 = vpack.c.bf16 %v4220_v7, %v4215_v49  ;;  %v4162_v42 = vld [vmem:[#allocation3 + $0xe0] sm:$0xff]  ;;  %v4156_v25 = vld [vmem:[#allocation3 + $0xb0] sm:$0xff]  ;;  %v4161_v49 = vld [vmem:[#allocation3 + $0xd8] sm:$0xff] }
 0xabb   :  { %v4158_v7 = vld [vmem:[#allocation3 + $0xc0] sm:$0xff] }
 0xabd   :  { %11668 = vmatpush1.bf16.msra.mxu0 %v11667_v52  ;;  %11701 = vmatpush1.bf16.msra.mxu1 %v11700_v38  ;;  %v4219_v52 = vld [vmem:[#allocation3 + $0x2a8] sm:$0xf]  ;;  %v4137_v38 = vld [vmem:[#allocation3 + $0x18] sm:$0xff] }
 0xabe   :  { %11669 = vmatprep.subr.bf16.mxu0 %v13921_v8  ;;  %11703 = vmatprep.subr.bf16.mxu1 %v11702_v44  ;;  %v11679_v44 = vpack.c.bf16 %v3427_v50, %v3422_v12  ;;  %v11717_v57 = vpack.c.bf16 %v4219_v52, %v4214_v27  ;;  %v11720_v4 = vpack.c.bf16 %v4142_v45, %v4137_v38  ;;  %v4172_v12 = vld [vmem:[#allocation3 + $0x130] sm:$0xff]  ;;  %v4166_v52 = vld [vmem:[#allocation3 + $0x100] sm:$0xff]  ;;  %v4171_v38 = vld [vmem:[#allocation3 + $0x128] sm:$0xff] }
 0xabf   :  { %v4173_v45 = vld [vmem:[#allocation3 + $0x138] sm:$0xff] }
 0xac1   :  { %11671 = vmatpush1.bf16.msra.mxu0 %v11670_v5  ;;  %11705 = vmatpush1.bf16.msra.mxu1 %v11704_v2  ;;  %v4143_v5 = vld [vmem:[#allocation3 + $0x48] sm:$0xff] }
 0xac2   :  { %11672 = vmatprep.subr.bf16.mxu0 %v13921_v8  ;;  %11707 = vmatprep.subr.bf16.mxu1 %v11706_v13  ;;  %v4147_v2 = vld [vmem:[#allocation3 + $0x68] sm:$0xff]  ;;  %v11722_v13 = vpack.c.bf16 %v4141_v62, %v4136_v60  ;;  %v11759_v6 = vpack.c.bf16 %v4143_v5, %v4138_v0  ;;  %v4176_v0 = vld [vmem:[#allocation3 + $0x150] sm:$0xff]  ;;  %v4181_v5 = vld [vmem:[#allocation3 + $0x178] sm:$0xff] }
 0xac3   :  { %v11724_v26 = vpack.c.bf16 %v4152_v24, %v4147_v2  ;;  %v4178_v2 = vld [vmem:[#allocation3 + $0x160] sm:$0xff]  ;;  %v4183_v24 = vld [vmem:[#allocation3 + $0x188] sm:$0xff] }
 0xac5   :  { %11674 = vmatpush1.bf16.msra.mxu0 %v11673_v31  ;;  %11709 = vmatpush1.bf16.msra.mxu1 %v11708_v1  ;;  %v4153_v31 = vld [vmem:[#allocation3 + $0x98] sm:$0xff] }
 0xac6   :  { %11675 = vmatprep.subr.bf16.mxu0 %v13921_v8  ;;  %11711 = vmatprep.subr.bf16.mxu1 %v11710_v41  ;;  %v4157_v1 = vld [vmem:[#allocation3 + $0xb8] sm:$0xff]  ;;  %v11726_v41 = vpack.c.bf16 %v4151_v59, %v4146_v58  ;;  %v11762_v43 = vpack.c.bf16 %v4153_v31, %v4148_v56  ;;  %v11738_v58 = vpack.c.bf16 %v4181_v5, %v4176_v0  ;;  %v4191_v31 = vld [vmem:[#allocation3 + $0x1c8] sm:$0xff] }
 0xac7   :  { %v11728_v15 = vpack.c.bf16 %v4162_v42, %v4157_v1  ;;  %v11771_v59 = vpack.c.bf16 %v4183_v24, %v4178_v2  ;;  %v4188_v1 = vld [vmem:[#allocation3 + $0x1b0] sm:$0xff]  ;;  %v4193_v42 = vld [vmem:[#allocation3 + $0x1d8] sm:$0xff] }
 0xac8   :  { %v4216_v2 = vld [vmem:[#allocation3 + $0x290] sm:$0xff]  ;;  %v4221_v24 = vld [vmem:[#allocation3 + $0x2b8] sm:$0xf] }
 0xac9   :  { %11677 = vmatpush1.bf16.msra.mxu0 %v11676_v53  ;;  %11713 = vmatpush1.bf16.msra.mxu1 %v11712_v48  ;;  %v4163_v53 = vld [vmem:[#allocation3 + $0xe8] sm:$0xff] }
 0xaca   :  { %11678 = vmatprep.subr.bf16.mxu0 %v13921_v8  ;;  %11716 = vmatprep.subr.msk.bf16.mxu1 %vm14099_vm3, %v11714_v14  ;;  %v4167_v48 = vld [vmem:[#allocation3 + $0x108] sm:$0xff]  ;;  %v11730_v14 = vpack.c.bf16 %v4161_v49, %v4156_v25  ;;  %v11765_v50 = vpack.c.bf16 %v4163_v53, %v4158_v7  ;;  %v11774_v25 = vpack.c.bf16 %v4193_v42, %v4188_v1  ;;  %v4196_v7 = vld [vmem:[#allocation3 + $0x1f0] sm:$0xff]  ;;  %v4201_v53 = vld [vmem:[#allocation3 + $0x218] sm:$0xff] }
 0xacb   :  { %v11732_v27 = vpack.c.bf16 %v4172_v12, %v4167_v48  ;;  %v4198_v48 = vld [vmem:[#allocation3 + $0x200] sm:$0xff]  ;;  %v4203_v12 = vld [vmem:[#allocation3 + $0x228] sm:$0xff] }
 0xacd   :  { %11681 = vmatpush1.bf16.msk.msra.mxu0 %vm14099_vm3, %v11679_v44  ;;  %11719 = vmatpush1.bf16.msk.msra.mxu1 %vm14099_vm3, %v11717_v57  ;;  %v4177_v44 = vld [vmem:[#allocation3 + $0x158] sm:$0xff]  ;;  %v4182_v57 = vld [vmem:[#allocation3 + $0x180] sm:$0xff] }
 0xace   :  { %11721 = vmatprep.subr.bf16.mxu0 %v11720_v4  ;;  %11758 = vmatprep.subr.bf16.mxu1 %v13921_v8  ;;  %v11734_v4 = vpack.c.bf16 %v4171_v38, %v4166_v52  ;;  %v11736_v62 = vpack.c.bf16 %v4182_v57, %v4177_v44  ;;  %v11777_v52 = vpack.c.bf16 %v4203_v12, %v4198_v48  ;;  %v4208_v44 = vld [vmem:[#allocation3 + $0x250] sm:$0xff]  ;;  %v4213_v57 = vld [vmem:[#allocation3 + $0x278] sm:$0xff] }
 0xacf   :  { %v11780_v0 = vpack.c.bf16 %v4213_v57, %v4208_v44 }
 0xad0   :  { %3987 = vmatmul.mubr.f32.vlgmr.msra.gmra.mrb[20].mxu0 %v14692_v54  ;;  %4304 = vmatmul.mubr.f32.vlgmr.msra.gmra.mrb[32].mxu1 %v14692_v54 }
 0xad1   :  { %11723 = vmatpush1.bf16.msra.mxu0 %v11722_v13  ;;  %10511 = vmatprep.mubr.msk.f32.mxu0 %vm577_vm0, %v14684_v51  ;;  %v4187_v13 = vld [vmem:[#allocation3 + $0x1a8] sm:$0xff] }
 0xad2   :  { %11760 = vmatpush1.bf16.msra.mxu1 %v11759_v6  ;;  %10513 = vmatprep.mubr.msk.f32.mxu1 %vm577_vm0, %v14684_v51  ;;  %v4168_v51 = vld [vmem:[#allocation3 + $0x110] sm:$0xff] }
 0xad3   :  { %11725 = vmatprep.subr.bf16.mxu0 %v11724_v26  ;;  %11761 = vmatprep.subr.bf16.mxu1 %v13921_v8  ;;  %v11768_v60 = vpack.c.bf16 %v4173_v45, %v4168_v51  ;;  %v4192_v6 = vld [vmem:[#allocation3 + $0x1d0] sm:$0xff]  ;;  %v4186_v26 = vld [vmem:[#allocation3 + $0x1a0] sm:$0xff]  ;;  %v4211_v45 = vld [vmem:[#allocation3 + $0x268] sm:$0xff] }
 0xad4   :  { %v11740_v56 = vpack.c.bf16 %v4192_v6, %v4187_v13  ;;  %v4206_v51 = vld [vmem:[#allocation3 + $0x240] sm:$0xff]  ;;  %v4223_v6 = vld [vmem:[#allocation3 + $0x2c8] sm:$0xf] }
 0xad5   :  { %11727 = vmatpush1.bf16.msra.mxu0 %v11726_v41  ;;  %v4197_v41 = vld [vmem:[#allocation3 + $0x1f8] sm:$0xff]  ;;  %v4218_v13 = vld [vmem:[#allocation3 + $0x2a0] sm:$0xff] }
 0xad6   :  { %11763 = vmatpush1.bf16.msra.mxu1 %v11762_v43  ;;  %11729 = vmatprep.subr.bf16.mxu0 %v11728_v15  ;;  %v4202_v43 = vld [vmem:[#allocation3 + $0x220] sm:$0xff]  ;;  %v11742_v15 = vpack.c.bf16 %v4191_v31, %v4186_v26 }
 0xad7   :  { %11764 = vmatprep.subr.bf16.mxu1 %v13921_v8  ;;  %v11744_v49 = vpack.c.bf16 %v4202_v43, %v4197_v41  ;;  %v3992_v31 = vld [vmem:[%s15862_s9] sm:$0x1f] }
 0xad8   :  { %v3997_v1 = vrot.slane %v3992_v31, %v14211_v10  ;;  %v4005_v42 = vrot.slane %v3992_v31, %v14226_v21  ;;  %v4001_v41 = vrot.slane %v3992_v31, %v14214_v11  ;;  %v4009_v43 = vrot.slane %v3992_v31, %v14229_v22 }
 0xad9   :  { %11731 = vmatpush1.bf16.msra.mxu0 %v11730_v14  ;;  %v4207_v14 = vld [vmem:[#allocation3 + $0x248] sm:$0xff] }
 0xada   :  { %11766 = vmatpush1.bf16.msra.mxu1 %v11765_v50  ;;  %11733 = vmatprep.subr.bf16.mxu0 %v11732_v27  ;;  %v4212_v50 = vld [vmem:[#allocation3 + $0x270] sm:$0xff]  ;;  %v11746_v27 = vpack.c.bf16 %v4201_v53, %v4196_v7 }
 0xadb   :  { %11767 = vmatprep.subr.bf16.mxu1 %v13921_v8  ;;  %v11748_v38 = vpack.c.bf16 %v4212_v50, %v4207_v14 }
 0xadd   :  { %11735 = vmatpush1.bf16.msra.mxu0 %v11734_v4  ;;  %v4217_v4 = vld [vmem:[#allocation3 + $0x298] sm:$0xff] }
 0xade   :  { %11769 = vmatpush1.bf16.msra.mxu1 %v11768_v60  ;;  %11737 = vmatprep.subr.bf16.mxu0 %v11736_v62  ;;  %v4222_v60 = vld [vmem:[#allocation3 + $0x2c0] sm:$0xf]  ;;  %v11750_v62 = vpack.c.bf16 %v4211_v45, %v4206_v51 }
 0xadf   :  { %11770 = vmatprep.subr.bf16.mxu1 %v13921_v8  ;;  %v11752_v5 = vpack.c.bf16 %v4222_v60, %v4217_v4 }
 0xae1   :  { %11739 = vmatpush1.bf16.msra.mxu0 %v11738_v58  ;;  %v11755_v58 = vpack.c.bf16 %v4221_v24, %v4216_v2 }
 0xae2   :  { %11772 = vmatpush1.bf16.msra.mxu1 %v11771_v59  ;;  %11741 = vmatprep.subr.bf16.mxu0 %v11740_v56  ;;  %v11783_v59 = vpack.c.bf16 %v4223_v6, %v4218_v13 }
 0xae3   :  { %11773 = vmatprep.subr.bf16.mxu1 %v13921_v8 }
 0xae5   :  { %11743 = vmatpush1.bf16.msra.mxu0 %v11742_v15 }
 0xae6   :  { %11775 = vmatpush1.bf16.msra.mxu1 %v11774_v25  ;;  %11745 = vmatprep.subr.bf16.mxu0 %v11744_v49 }
 0xae7   :  { %11776 = vmatprep.subr.bf16.mxu1 %v13921_v8 }
 0xae9   :  { %11747 = vmatpush1.bf16.msra.mxu0 %v11746_v27  ;;  %v4013_v27 = vrot.slane %v3992_v31, %v14232_v23 }
 0xaea   :  { %11778 = vmatpush1.bf16.msra.mxu1 %v11777_v52  ;;  %11749 = vmatprep.subr.bf16.mxu0 %v11748_v38 }
 0xaeb   :  { %11779 = vmatprep.subr.bf16.mxu1 %v13921_v8 }
 0xaed   :  { %11751 = vmatpush1.bf16.msra.mxu0 %v11750_v62 }
 0xaee   :  { %11781 = vmatpush1.bf16.msra.mxu1 %v11780_v0  ;;  %11754 = vmatprep.subr.msk.bf16.mxu0 %vm14099_vm3, %v11752_v5 }
 0xaef   :  { %11782 = vmatprep.subr.bf16.mxu1 %v13921_v8 }
 0xaf1   :  { %11757 = vmatpush1.bf16.msk.msra.mxu0 %vm14099_vm3, %v11755_v58 }
 0xaf2   :  { %11785 = vmatpush1.bf16.msk.msra.mxu1 %vm14099_vm3, %v11783_v59 }
 0xaf4   :  { %4375 = vmatmul.mubr.f32.vlgmr.msra.gmra.mrb[22].mxu0 %v14692_v54 }
 0xaf5   :  { %4446 = vmatmul.mubr.f32.vlgmr.msra.gmra.mrb[34].mxu1 %v14692_v54 }
 0xb57   :  { %v3749_v56 = vpop.f32.mrb[30].mxu1 }
 0xb58   :  { %v3751_v26 = vpop.f32.mrb[31].mxu1 }
 0xb7f   :  { %v3846_v15 = vpop.f32.mrb[28].mxu1  ;;  %v3917_v25 = vpop.f32.mrb[18].mxu0 }
 0xb80   :  { %v4019_v49 = vadd.f32 %v3997_v1, %v3846_v15  ;;  %v14744_v7 = vadd.f32 %v4005_v42, %v3917_v25  ;;  %v3848_v54 = vpop.f32.mrb[29].mxu1  ;;  %v3919_v53 = vpop.f32.mrb[19].mxu0 }
 0xb81   :  { %v4020_v48 = vadd.f32 %v4001_v41, %v3848_v54  ;;  %v14746_v12 = vadd.f32 %v4009_v43, %v3919_v53 }
 0xb82   :  { %13466 = vtanh.f32 %v14744_v7  ;;  %v10501_v1 = vmul.f32 -1.442695, %v4019_v49 }
 0xb83   :  { %13468 = vtanh.f32 %v14746_v12  ;;  %v10502_v31 = vmul.f32 -1.442695, %v4020_v48 }
 0xb8c   :  { %v13467_v14 = vpop.eup %13466 }
 0xb8d   :  { %v13469_v50 = vpop.eup %13468  ;;  %4060 = vrot.lane.b32.xlu0 %v13467_v14, %s13924_s6 }
 0xb8e   :  { %4062 = vrot.lane.b32.xlu1 %v13469_v50, %s13924_s6 }
 0xba3   :  { %v3988_v52 = vpop.f32.mrb[20].mxu0  ;;  %v4305_v38 = vpop.f32.mrb[32].mxu1 }
 0xba4   :  { %v3989_v51 = vadd.f32 %v3988_v52, %v3749_v56  ;;  %v3990_v45 = vpop.f32.mrb[21].mxu0  ;;  %v4307_v44 = vpop.f32.mrb[33].mxu1  ;;  %v4456_v52 = vrot.slane %v4305_v38, 2 }
 0xba6   :  { %v14753_v57 = vadd.f32 %v4013_v27, %v3989_v51  ;;  %v4466_v45 = vadd.f32 %v4456_v52, %v14264_v47  ;;  %v10503_v47 = vmul.f32 -1.442695, %v14744_v7  ;;  %v4642_v52 = vld [vmem:[#allocation8 + $0x30] sm:$0xff] }
 0xbc7   :  { %v4376_v4 = vpop.f32.mrb[22].mxu0 }
 0xbc8   :  { %v4458_v60 = vrot.slane %v4376_v4, 2  ;;  %v14755_v62 = vpop.f32.mrb[34].mxu1  ;;  %v4378_v0 = vpop.f32.mrb[23].mxu0 }
 0xbc9   :  { %v4459_v5 = vrot.slane %v4378_v0, 2  ;;  %v4449_v2 = vpop.f32.mrb[35].mxu1 }
 0xbca   :  { %v4468_v24 = vadd.f32 %v4458_v60, %v14248_v37  ;;  %v4506_v37 = vrot.slane %v14622_v19, 6  ;;  %v4457_v19 = vrot.slane %v4307_v44, 2  ;;  %v10514_v60 = vmul.f32 -1.442695, %v4466_v45 }
 0xbcb   :  { %v14759_v13 = vadd.f32 %v4459_v5, %v14250_v39 }
 0xbcc   :  { %v10516_v6 = vmul.f32 -1.442695, %v4468_v24  ;;  %13470 = vtanh.f32 %v4468_v24  ;;  %v4467_v51 = vadd.f32 %v4457_v19, %v14262_v46  ;;  %v4637_v19 = vld [vmem:[#allocation8 + $0x8] sm:$0xff] }
 0xbcd   :  { %13472 = vtanh.f32 %v14759_v13  ;;  %v11786_v45 = vpack.c.bf16 %v4642_v52, %v4637_v19 }
 0xbce   :  { %13474 = vpow2.f32 %v10516_v6  ;;  %v10515_v4 = vmul.f32 -1.442695, %v4467_v51  ;;  %v4636_v51 = vld [vmem:[#allocation8] sm:$0xff] }
 0xbcf   :  { %11787 = vmatprep.subr.bf16.mxu0 %v11786_v45  ;;  %v4672_v45 = vld [vmem:[#allocation8 + $0x120] sm:$0xff] }
 0xbd6   :  { %v13471_v58 = vpop.eup %13470 }
 0xbd7   :  { %v13473_v59 = vpop.eup %13472  ;;  %4513 = vrot.lane.b32.xlu0 %v13471_v58, %s13924_s6 }
 0xbd8   :  { %v13475_v56 = vpop.eup %13474  ;;  %4515 = vrot.lane.b32.xlu1 %v13473_v59, %s13924_s6 }
 0xbd9   :  { %v4486_v26 = vadd.f32 1.0, %v13475_v56 }
 0xbdb   :  { %13476 = vrcp.f32 %v4486_v26 }
 0xbdc   :  { %13478 = vpow2.f32 %v10502_v31 }
 0xbdd   :  { %13480 = vpow2.f32 %v10501_v1 }
 0xbe5   :  { %v13477_v39 = vpop.eup %13476 }
 0xbe6   :  { %v14765_v42 = vmul.f32 %v13477_v39, %v4506_v37  ;;  %v13479_v41 = vpop.eup %13478 }
 0xbe7   :  { %v13481_v43 = vpop.eup %13480  ;;  %v4031_v15 = vadd.f32 1.0, %v13479_v41 }
 0xbe8   :  { %v4030_v25 = vadd.f32 1.0, %v13481_v43 }
 0xbe9   :  { %13482 = vrcp.f32 %v4031_v15 }
 0xbea   :  { %13484 = vrcp.f32 %v4030_v25 }
 0xbeb   :  { %13486 = vpow2.f32 %v10515_v4  ;;  %v4641_v4 = vld [vmem:[#allocation8 + $0x28] sm:$0xff] }
 0xbec   :  { %13488 = vpow2.f32 %v10514_v60  ;;  %v4644_v60 = vld [vmem:[#allocation8 + $0x40] sm:$0xff] }
 0xbf3   :  { %v13483_v53 = vpop.eup %13482 }
 0xbf4   :  { %v13485_v50 = vpop.eup %13484  ;;  %v4056_v39 = vmul.f32 %v13483_v53, %v14609_v35  ;;  %v4505_v35 = vrot.slane %v14619_v40, 6  ;;  %v4639_v40 = vld [vmem:[#allocation8 + $0x18] sm:$0xff] }
 0xbf5   :  { %v13487_v0 = vpop.eup %13486 }
 0xbf6   :  { %v13489_v5 = vpop.eup %13488  ;;  %v4478_v2 = vadd.f32 1.0, %v13487_v0  ;;  %v11788_v0 = vpack.c.bf16 %v4641_v4, %v4636_v51  ;;  %v4667_v51 = vld [vmem:[#allocation8 + $0xf8] sm:$0xff]  ;;  %v4666_v4 = vld [vmem:[#allocation8 + $0xf0] sm:$0xff] }
 0xbf7   :  { %v4477_v24 = vadd.f32 1.0, %v13489_v5  ;;  %v11824_v5 = vpack.c.bf16 %v4644_v60, %v4639_v40  ;;  %v11798_v60 = vpack.c.bf16 %v4672_v45, %v4667_v51  ;;  %v4693_v45 = vld [vmem:[#allocation8 + $0x1c8] sm:$0xff] }
 0xbf8   :  { %13490 = vrcp.f32 %v4478_v2  ;;  %v4638_v2 = vld [vmem:[#allocation8 + $0x10] sm:$0xff]  ;;  %11789 = vmatpush1.bf16.msra.mxu0 %v11788_v0  ;;  %v4671_v0 = vld [vmem:[#allocation8 + $0x118] sm:$0xff] }
 0xbf9   :  { %13492 = vrcp.f32 %v4477_v24  ;;  %v4643_v24 = vld [vmem:[#allocation8 + $0x38] sm:$0xff]  ;;  %11825 = vmatprep.subr.bf16.mxu1 %v11824_v5  ;;  %v4669_v5 = vld [vmem:[#allocation8 + $0x108] sm:$0xff] }
 0xbfa   :  { %13494 = vpow2.f32 %v10503_v47  ;;  %v4654_v47 = vld [vmem:[#allocation8 + $0x90] sm:$0xff] }
 0xbff   :  { %v4061_v54 = vpop.permute.xlu0 %4060 }
 0xc00   :  { %v4063_v14 = vpop.permute.xlu1 %4062 }
 0xc01   :  { %v4064_v48 = vsel %vm869_vm7, %v4061_v54, %v4063_v14  ;;  %v4068_v49 = vmul.f32 %v13483_v53, %v4063_v14 }
 0xc02   :  { %v4067_v27 = vmul.f32 %v13485_v50, %v4064_v48  ;;  %v13491_v58 = vpop.eup %13490 }
 0xc03   :  { %4073 = vrot.lane.b32.xlu1 %v4068_v49, %s13923_s17  ;;  %v13493_v56 = vpop.eup %13492  ;;  %v4509_v53 = vmul.f32 %v13491_v58, %v4505_v35  ;;  %v4659_v35 = vld [vmem:[#allocation8 + $0xb8] sm:$0xff] }
 0xc04   :  { %4071 = vrot.lane.b32.xlu0 %v4067_v27, %s13923_s17  ;;  %v13495_v26 = vpop.eup %13494 }
 0xc05   :  { %v4039_v31 = vadd.f32 1.0, %v13495_v26  ;;  %v4648_v26 = vld [vmem:[#allocation8 + $0x60] sm:$0xff] }
 0xc07   :  { %13496 = vrcp.f32 %v4039_v31 }
 0xc11   :  { %v13497_v1 = vpop.eup %13496 }
 0xc12   :  { %v4057_v41 = vmul.f32 %v13497_v1, %v14611_v16  ;;  %v4653_v1 = vld [vmem:[#allocation8 + $0x88] sm:$0xff] }
 0xc49   :  { %v4514_v6 = vpop.permute.xlu0 %4513 }
 0xc4a   :  { %v4516_v59 = vpop.permute.xlu1 %4515 }
 0xc4b   :  { %v4517_v38 = vsel %vm869_vm7, %v4514_v6, %v4516_v59  ;;  %v4521_v44 = vmul.f32 %v13491_v58, %v4516_v59  ;;  %v4647_v6 = vld [vmem:[#allocation8 + $0x58] sm:$0xff]  ;;  %v11826_v58 = vpack.c.bf16 %v4643_v24, %v4638_v2  ;;  %v4646_v59 = vld [vmem:[#allocation8 + $0x50] sm:$0xff] }
 0xc4c   :  { %v4520_v46 = vmul.f32 %v13493_v56, %v4517_v38  ;;  %v4651_v56 = vld [vmem:[#allocation8 + $0x78] sm:$0xff]  ;;  %v4674_v2 = vld [vmem:[#allocation8 + $0x130] sm:$0xff] }
 0xc4d   :  { %4526 = vrot.lane.b32.xlu1 %v4521_v44, %s13923_s17  ;;  %v11792_v44 = vpack.c.bf16 %v4651_v56, %v4646_v59  ;;  %11827 = vmatpush1.bf16.msra.mxu1 %v11826_v58  ;;  %v11836_v24 = vpack.c.bf16 %v4674_v2, %v4669_v5  ;;  %v4673_v58 = vld [vmem:[#allocation8 + $0x128] sm:$0xff]  ;;  %v4682_v59 = vld [vmem:[#allocation8 + $0x170] sm:$0xff]  ;;  %v11800_v56 = vpack.c.bf16 %v4671_v0, %v4666_v4  ;;  %v4704_v0 = vld [vmem:[#allocation8 + $0x220] sm:$0xff] }
 0xc4e   :  { %4524 = vrot.lane.b32.xlu0 %v4520_v46, %s13923_s17  ;;  %v4649_v46 = vld [vmem:[#allocation8 + $0x68] sm:$0xff] }
 0xc4f   :  { %v11828_v31 = vpack.c.bf16 %v4654_v47, %v4649_v46  ;;  %v4697_v4 = vld [vmem:[#allocation8 + $0x1e8] sm:$0xff] }
 0xc51   :  { %11829 = vmatprep.subr.bf16.mxu1 %v11828_v31  ;;  %v4681_v31 = vld [vmem:[#allocation8 + $0x168] sm:$0xff] }
 0xc75   :  { %v4074_v37 = vpop.permute.xlu1 %4073 }
 0xc76   :  { %v4072_v43 = vpop.permute.xlu0 %4071 }
 0xc77   :  { %v4075_v15 = vsel %vm577_vm0, %v4072_v43, %v4074_v37  ;;  %v14779_v25 = vadd.f32 %v4072_v43, %v4056_v39  ;;  %v4657_v37 = vld [vmem:[#allocation8 + $0xa8] sm:$0xff]  ;;  %v4662_v39 = vld [vmem:[#allocation8 + $0xd0] sm:$0xff]  ;;  %v11830_v43 = vpack.c.bf16 %v4653_v1, %v4648_v26  ;;  %v4676_v26 = vld [vmem:[#allocation8 + $0x140] sm:$0xff] }
 0xc78   :  { %v14781_v54 = vadd.f32 %v4075_v15, %v4057_v41  ;;  %v11794_v15 = vpack.c.bf16 %v4662_v39, %v4657_v37  ;;  %v4678_v1 = vld [vmem:[#allocation8 + $0x150] sm:$0xff]  ;;  %v4683_v39 = vld [vmem:[#allocation8 + $0x178] sm:$0xff] }
 0xc79   :  { %13498 = vtanh.f32 %v14779_v25  ;;  %11831 = vmatpush1.bf16.msra.mxu1 %v11830_v43  ;;  %v4692_v43 = vld [vmem:[#allocation8 + $0x1c0] sm:$0xff] }
 0xc7a   :  { %13500 = vtanh.f32 %v14781_v54 }
 0xc83   :  { %v13499_v7 = vpop.eup %13498 }
 0xc84   :  { %v13501_v14 = vpop.eup %13500  ;;  %4084 = vrot.lane.b32.xlu0 %v13499_v7, %s13925_s19  ;;  %v4656_v7 = vld [vmem:[#allocation8 + $0xa0] sm:$0xff] }
 0xc85   :  { %4086 = vrot.lane.b32.xlu1 %v13501_v14, %s13925_s19  ;;  %v4661_v14 = vld [vmem:[#allocation8 + $0xc8] sm:$0xff] }
 0xc86   :  { %v11796_v19 = vpack.c.bf16 %v4661_v14, %v4656_v7  ;;  %v4694_v7 = vld [vmem:[#allocation8 + $0x1d0] sm:$0xff]  ;;  %v10504_v14 = vmul.f32 -1.442695, %v14746_v12 }
 0xcbf   :  { %v4527_v16 = vpop.permute.xlu1 %4526 }
 0xcc0   :  { %v4525_v50 = vpop.permute.xlu0 %4524 }
 0xcc1   :  { %v4528_v48 = vsel %vm577_vm0, %v4525_v50, %v4527_v16  ;;  %v14789_v49 = vadd.f32 %v4525_v50, %v4509_v53  ;;  %v4664_v53 = vld [vmem:[#allocation8 + $0xe0] sm:$0xff]  ;;  %v4658_v50 = vld [vmem:[#allocation8 + $0xb0] sm:$0xff] }
 0xcc2   :  { %v14792_v27 = vadd.f32 %v4528_v48, %v14765_v42  ;;  %v4652_v42 = vld [vmem:[#allocation8 + $0x80] sm:$0xff]  ;;  %v4663_v48 = vld [vmem:[#allocation8 + $0xd8] sm:$0xff]  ;;  %v11832_v52 = vpack.c.bf16 %v4664_v53, %v4659_v35  ;;  %v11804_v35 = vpack.c.bf16 %v4681_v31, %v4676_v26  ;;  %v4706_v31 = vld [vmem:[#allocation8 + $0x230] sm:$0xff] }
 0xcc3   :  { %13502 = vtanh.f32 %v14789_v49  ;;  %v11790_v38 = vpack.c.bf16 %v4652_v42, %v4647_v6  ;;  %v11834_v40 = vpack.c.bf16 %v4663_v48, %v4658_v50  ;;  %v4668_v6 = vld [vmem:[#allocation8 + $0x100] sm:$0xff]  ;;  %v4677_v42 = vld [vmem:[#allocation8 + $0x148] sm:$0xff]  ;;  %v4686_v50 = vld [vmem:[#allocation8 + $0x190] sm:$0xff] }
 0xcc4   :  { %13504 = vtanh.f32 %v14792_v27  ;;  %11833 = vmatprep.subr.bf16.mxu1 %v11832_v52  ;;  %v11838_v46 = vpack.c.bf16 %v4673_v58, %v4668_v6  ;;  %v11802_v47 = vpack.c.bf16 %v4682_v59, %v4677_v42  ;;  %v4691_v48 = vld [vmem:[#allocation8 + $0x1b8] sm:$0xff]  ;;  %v10505_v52 = vmul.f32 -1.442695, %v14753_v57  ;;  %v4701_v6 = vld [vmem:[#allocation8 + $0x208] sm:$0xff]  ;;  %v4698_v58 = vld [vmem:[#allocation8 + $0x1f0] sm:$0xff] }
 0xcc5   :  { %11791 = vmatprep.subr.bf16.mxu0 %v11790_v38  ;;  %v4679_v38 = vld [vmem:[#allocation8 + $0x158] sm:$0xff]  ;;  %11835 = vmatpush1.bf16.msra.mxu1 %v11834_v40  ;;  %v4702_v40 = vld [vmem:[#allocation8 + $0x210] sm:$0xff]  ;;  %13506 = vpow2.f32 %v10504_v14  ;;  %v11808_v12 = vpack.c.bf16 %v4691_v48, %v4686_v50  ;;  %v4724_v14 = vld [vmem:[#allocation8 + $0x2c0] sm:$0xf] }
 0xcc6   :  { %11793 = vmatpush1.bf16.msra.mxu0 %v11792_v44  ;;  %v4684_v44 = vld [vmem:[#allocation8 + $0x180] sm:$0xff]  ;;  %11837 = vmatprep.subr.bf16.mxu1 %v11836_v24  ;;  %v11810_v2 = vpack.c.bf16 %v4702_v40, %v4697_v4  ;;  %13508 = vpow2.f32 %v10505_v52  ;;  %v4703_v42 = vld [vmem:[#allocation8 + $0x218] sm:$0xff]  ;;  %v4721_v48 = vld [vmem:[#allocation8 + $0x2a8] sm:$0xf] }
 0xcc7   :  { %11795 = vmatprep.subr.bf16.mxu0 %v11794_v15  ;;  %v11840_v37 = vpack.c.bf16 %v4684_v44, %v4679_v38  ;;  %v4689_v15 = vld [vmem:[#allocation8 + $0x1a8] sm:$0xff]  ;;  %v4696_v24 = vld [vmem:[#allocation8 + $0x1e0] sm:$0xff]  ;;  %v4707_v59 = vld [vmem:[#allocation8 + $0x238] sm:$0xff] }
 0xcc8   :  { %v11844_v51 = vpack.c.bf16 %v4694_v7, %v4689_v15  ;;  %v4709_v38 = vld [vmem:[#allocation8 + $0x248] sm:$0xff]  ;;  %v4714_v44 = vld [vmem:[#allocation8 + $0x270] sm:$0xff]  ;;  %v4719_v7 = vld [vmem:[#allocation8 + $0x298] sm:$0xff] }
 0xcc9   :  { %11839 = vmatpush1.bf16.msra.mxu1 %v11838_v46  ;;  %v11812_v46 = vpack.c.bf16 %v4701_v6, %v4696_v24  ;;  %v4722_v15 = vld [vmem:[#allocation8 + $0x2b0] sm:$0xf]  ;;  %v4716_v50 = vld [vmem:[#allocation8 + $0x280] sm:$0xff]  ;;  %v11856_v52 = vpack.c.bf16 %v4724_v14, %v4719_v7 }
 0xcca   :  { %11797 = vmatpush1.bf16.msra.mxu0 %v11796_v19  ;;  %v4688_v19 = vld [vmem:[#allocation8 + $0x1a0] sm:$0xff]  ;;  %11841 = vmatprep.subr.bf16.mxu1 %v11840_v37 }
 0xccb   :  { %11799 = vmatprep.subr.bf16.mxu0 %v11798_v60  ;;  %v4699_v60 = vld [vmem:[#allocation8 + $0x1f8] sm:$0xff]  ;;  %v11846_v5 = vpack.c.bf16 %v4693_v45, %v4688_v19  ;;  %v4708_v37 = vld [vmem:[#allocation8 + $0x240] sm:$0xff]  ;;  %v11821_v45 = vpack.c.bf16 %v4721_v48, %v4716_v50  ;;  %v4645_v50 = vld [vmem:[#allocation8 + $0x48] sm:$0xff] }
 0xccc   :  { %v11848_v57 = vpack.c.bf16 %v4704_v0, %v4699_v60  ;;  %v4718_v60 = vld [vmem:[#allocation8 + $0x290] sm:$0xff]  ;;  %v4723_v0 = vld [vmem:[#allocation8 + $0x2b8] sm:$0xf]  ;;  %v4548_v48 = vld [vmem:[#allocation6 + $0x10] sm:$0xff] }
 0xccd   :  { %v13503_v41 = vpop.eup %13502 }
 0xcce   :  { %v13505_v16 = vpop.eup %13504  ;;  %4537 = vrot.lane.b32.xlu0 %v13503_v41, %s13925_s19  ;;  %v4687_v41 = vld [vmem:[#allocation8 + $0x198] sm:$0xff]  ;;  %11801 = vmatpush1.bf16.msra.mxu0 %v11800_v56  ;;  %v4712_v56 = vld [vmem:[#allocation8 + $0x260] sm:$0xff] }
 0xccf   :  { %4539 = vrot.lane.b32.xlu1 %v13505_v16, %s13925_s19  ;;  %11803 = vmatprep.subr.bf16.mxu0 %v11802_v47  ;;  %v11842_v16 = vpack.c.bf16 %v4683_v39, %v4678_v1  ;;  %v11806_v53 = vpack.c.bf16 %v4692_v43, %v4687_v41  ;;  %v11850_v47 = vpack.c.bf16 %v4703_v42, %v4698_v58  ;;  %v4711_v1 = vld [vmem:[#allocation8 + $0x258] sm:$0xff]  ;;  %v4713_v41 = vld [vmem:[#allocation8 + $0x268] sm:$0xff]  ;;  %v13507_v19 = vpop.eup %13506 }
 0xcd0   :  { %v11814_v26 = vpack.c.bf16 %v4712_v56, %v4707_v59  ;;  %v11852_v39 = vpack.c.bf16 %v4714_v44, %v4709_v38  ;;  %v4717_v43 = vld [vmem:[#allocation8 + $0x288] sm:$0xff]  ;;  %v4050_v4 = vadd.f32 1.0, %v13507_v19  ;;  %v4554_v38 = vld [vmem:[#allocation6 + $0x40] sm:$0xff] }
 0xcd1   :  { %11843 = vmatpush1.bf16.msra.mxu1 %v11842_v16  ;;  %v11854_v16 = vpack.c.bf16 %v4713_v41, %v4708_v37  ;;  %v4549_v56 = vld [vmem:[#allocation6 + $0x18] sm:$0xff] }
 0xcd2   :  { %11805 = vmatpush1.bf16.msra.mxu0 %v11804_v35  ;;  %11845 = vmatprep.subr.bf16.mxu1 %v11844_v51  ;;  %v11816_v35 = vpack.c.bf16 %v4711_v1, %v4706_v31  ;;  %v13509_v51 = vpop.eup %13508  ;;  %13510 = vrcp.f32 %v4050_v4  ;;  %v11928_v44 = vpack.c.bf16 %v4554_v38, %v4549_v56  ;;  %v4553_v19 = vld [vmem:[#allocation6 + $0x38] sm:$0xff]  ;;  %v4574_v56 = vld [vmem:[#allocation6 + $0xe0] sm:$0xff] }
 0xcd3   :  { %11807 = vmatprep.subr.bf16.mxu0 %v11806_v53  ;;  %v11818_v53 = vpack.c.bf16 %v4722_v15, %v4717_v43  ;;  %v4051_v40 = vadd.f32 1.0, %v13509_v51  ;;  %v4564_v51 = vld [vmem:[#allocation6 + $0x90] sm:$0xff] }
 0xcd5   :  { %11847 = vmatpush1.bf16.msra.mxu1 %v11846_v5  ;;  %13512 = vrcp.f32 %v4051_v40 }
 0xcd6   :  { %11809 = vmatpush1.bf16.msra.mxu0 %v11808_v12  ;;  %11849 = vmatprep.subr.bf16.mxu1 %v11848_v57  ;;  %v11859_v12 = vpack.c.bf16 %v4723_v0, %v4718_v60  ;;  %v4650_v60 = vld [vmem:[#allocation8 + $0x70] sm:$0xff]  ;;  %v4655_v0 = vld [vmem:[#allocation8 + $0x98] sm:$0xff] }
 0xcd7   :  { %11811 = vmatprep.subr.bf16.mxu0 %v11810_v2  ;;  %v11866_v38 = vpack.c.bf16 %v4655_v0, %v4650_v60  ;;  %v4690_v60 = vld [vmem:[#allocation8 + $0x1b0] sm:$0xff]  ;;  %v4695_v0 = vld [vmem:[#allocation8 + $0x1d8] sm:$0xff] }
 0xcd9   :  { %11851 = vmatpush1.bf16.msra.mxu1 %v11850_v47 }
 0xcda   :  { %11813 = vmatpush1.bf16.msra.mxu0 %v11812_v46  ;;  %11853 = vmatprep.subr.bf16.mxu1 %v11852_v39  ;;  %v4460_v46 = vrot.slane %v14755_v62, 2 }
 0xcdb   :  { %11815 = vmatprep.subr.bf16.mxu0 %v11814_v26  ;;  %v10517_v26 = vmul.f32 -1.442695, %v14759_v13  ;;  %v4640_v13 = vld [vmem:[#allocation8 + $0x20] sm:$0xff] }
 0xcdc   :  { %v13511_v5 = vpop.eup %13510  ;;  %v4470_v47 = vadd.f32 %v4460_v46, %v14325_v61  ;;  %v4665_v46 = vld [vmem:[#allocation8 + $0xe8] sm:$0xff] }
 0xcdd   :  { %11855 = vmatpush1.bf16.msra.mxu1 %v11854_v16  ;;  %13514 = vpow2.f32 %v10517_v26 }
 0xcde   :  { %11817 = vmatpush1.bf16.msra.mxu0 %v11816_v35  ;;  %11858 = vmatprep.subr.msk.bf16.mxu1 %vm14099_vm3, %v11856_v52  ;;  %v10518_v31 = vmul.f32 -1.442695, %v4470_v47  ;;  %v4559_v52 = vld [vmem:[#allocation6 + $0x68] sm:$0xff] }
 0xcdf   :  { %11820 = vmatprep.subr.msk.bf16.mxu0 %vm14099_vm3, %v11818_v53  ;;  %v13513_v58 = vpop.eup %13512 }
 0xce0   :  { %13516 = vpow2.f32 %v10518_v31  ;;  %v4568_v31 = vld [vmem:[#allocation6 + $0xb0] sm:$0xff] }
 0xce1   :  { %11861 = vmatpush1.bf16.msk.msra.mxu1 %vm14099_vm3, %v11859_v12  ;;  %v11930_v12 = vpack.c.bf16 %v4553_v19, %v4548_v48 }
 0xce2   :  { %11823 = vmatpush1.bf16.msk.msra.mxu0 %vm14099_vm3, %v11821_v45  ;;  %11929 = vmatprep.subr.bf16.mxu1 %v11928_v44  ;;  %v11863_v45 = vpack.c.bf16 %v4645_v50, %v4640_v13  ;;  %v4660_v44 = vld [vmem:[#allocation8 + $0xc0] sm:$0xff]  ;;  %v4685_v50 = vld [vmem:[#allocation8 + $0x188] sm:$0xff] }
 0xce3   :  { %11862 = vmatprep.subr.bf16.mxu0 %v13921_v8  ;;  %v4680_v13 = vld [vmem:[#allocation8 + $0x160] sm:$0xff] }
 0xce7   :  { %v13515_v1 = vpop.eup %13514 }
 0xce8   :  { %v4497_v39 = vadd.f32 1.0, %v13515_v1  ;;  %v4573_v1 = vld [vmem:[#allocation6 + $0xd8] sm:$0xff] }
 0xcea   :  { %v13517_v37 = vpop.eup %13516  ;;  %13518 = vrcp.f32 %v4497_v39  ;;  %v4584_v39 = vld [vmem:[#allocation6 + $0x130] sm:$0xff] }
 0xceb   :  { %v4498_v41 = vadd.f32 1.0, %v13517_v37  ;;  %v4579_v37 = vld [vmem:[#allocation6 + $0x108] sm:$0xff] }
 0xced   :  { %13520 = vrcp.f32 %v4498_v41  ;;  %v11869_v41 = vpack.c.bf16 %v4665_v46, %v4660_v44  ;;  %v4700_v44 = vld [vmem:[#allocation8 + $0x200] sm:$0xff]  ;;  %v4705_v46 = vld [vmem:[#allocation8 + $0x228] sm:$0xff] }
 0xcf4   :  { %v13519_v43 = vpop.eup %13518 }
 0xcf6   :  { %v4085_v2 = vpop.permute.xlu0 %4084 }
 0xcf7   :  { %v14809_v24 = vmul.f32 %v13511_v5, %v4085_v2  ;;  %v4087_v6 = vpop.permute.xlu1 %4086  ;;  %v13521_v35 = vpop.eup %13520 }
 0xcf8   :  { %v4088_v57 = vsel %vm894_vm8, %v4085_v2, %v4087_v6  ;;  %v11932_v2 = vpack.c.bf16 %v4564_v51, %v4559_v52  ;;  %v4558_v6 = vld [vmem:[#allocation6 + $0x60] sm:$0xff]  ;;  %v4588_v52 = vld [vmem:[#allocation6 + $0x150] sm:$0xff]  ;;  %v4593_v51 = vld [vmem:[#allocation6 + $0x178] sm:$0xff] }
 0xcf9   :  { %v14812_v42 = vmul.f32 %v13513_v58, %v4088_v57  ;;  %4726 = vrot.lane.b32.xlu0 %v14809_v24, %s13926_s2  ;;  %v4563_v58 = vld [vmem:[#allocation6 + $0x88] sm:$0xff]  ;;  %v4569_v57 = vld [vmem:[#allocation6 + $0xb8] sm:$0xff] }
 0xcfa   :  { %v11934_v47 = vpack.c.bf16 %v4563_v58, %v4558_v6  ;;  %v11936_v26 = vpack.c.bf16 %v4574_v56, %v4569_v57  ;;  %v4598_v6 = vld [vmem:[#allocation6 + $0x1a0] sm:$0xff]  ;;  %v4603_v58 = vld [vmem:[#allocation6 + $0x1c8] sm:$0xff]  ;;  %v4609_v57 = vld [vmem:[#allocation6 + $0x1f8] sm:$0xff] }
 0xcfb   :  { %v4095_v59 = vcombine.low %v14809_v24, %v14812_v42  ;;  %4728 = vrot.lane.b32.xlu1 %v14812_v42, %s13926_s2  ;;  %v4614_v56 = vld [vmem:[#allocation6 + $0x220] sm:$0xff] }
 0xd40   :  { %v4538_v15 = vpop.permute.xlu0 %4537 }
 0xd41   :  { %v4544_v7 = vmul.f32 %v13519_v43, %v4538_v15  ;;  %v4540_v14 = vpop.permute.xlu1 %4539  ;;  %v4670_v43 = vld [vmem:[#allocation8 + $0x110] sm:$0xff] }
 0xd42   :  { %v4541_v62 = vsel %vm894_vm8, %v4538_v15, %v4540_v14  ;;  %v4675_v15 = vld [vmem:[#allocation8 + $0x138] sm:$0xff]  ;;  %v11940_v14 = vpack.c.bf16 %v4584_v39, %v4579_v37  ;;  %v4624_v39 = vld [vmem:[#allocation6 + $0x270] sm:$0xff] }
 0xd43   :  { %v4963_v16 = vrot.slane %v4544_v7, 6  ;;  %v4545_v61 = vmul.f32 %v13521_v35, %v4541_v62  ;;  %v11938_v7 = vpack.c.bf16 %v4573_v1, %v4568_v31  ;;  %v4578_v35 = vld [vmem:[#allocation6 + $0x100] sm:$0xff]  ;;  %v4583_v62 = vld [vmem:[#allocation6 + $0x128] sm:$0xff]  ;;  %v4608_v31 = vld [vmem:[#allocation6 + $0x1f0] sm:$0xff] }
 0xd44   :  { %v11942_v48 = vpack.c.bf16 %v4583_v62, %v4578_v35  ;;  %v4613_v1 = vld [vmem:[#allocation6 + $0x218] sm:$0xff]  ;;  %v4619_v37 = vld [vmem:[#allocation6 + $0x248] sm:$0xff]  ;;  %v4618_v35 = vld [vmem:[#allocation6 + $0x240] sm:$0xff] }
 0xd45   :  { %v4964_v53 = vrot.slane %v4545_v61, 6  ;;  %4965 = vrot.lane.b32.xlu0 %v4963_v16, %s13926_s2  ;;  %v4589_v16 = vld [vmem:[#allocation6 + $0x158] sm:$0xff]  ;;  %v4594_v61 = vld [vmem:[#allocation6 + $0x180] sm:$0xff]  ;;  %v4623_v62 = vld [vmem:[#allocation6 + $0x268] sm:$0xff] }
 0xd46   :  { %v11944_v19 = vpack.c.bf16 %v4594_v61, %v4589_v16  ;;  %v4629_v16 = vld [vmem:[#allocation6 + $0x298] sm:$0xff]  ;;  %v4634_v61 = vld [vmem:[#allocation6 + $0x2c0] sm:$0xf] }
 0xd47   :  { %4967 = vrot.lane.b32.xlu1 %v4964_v53, %s13926_s2  ;;  %v11872_v53 = vpack.c.bf16 %v4675_v15, %v4670_v43  ;;  %v4710_v43 = vld [vmem:[#allocation8 + $0x250] sm:$0xff]  ;;  %v4715_v15 = vld [vmem:[#allocation8 + $0x278] sm:$0xff] }
 0xd6b   :  { %v4727_v4 = vpop.permute.xlu0 %4726 }
 0xd6d   :  { %v4729_v40 = vpop.permute.xlu1 %4728 }
 0xd6e   :  { %10521 = vmatprep.mubr.msk.f32.mxu0 %vm577_vm0, %v4729_v40  ;;  %10524 = vmatprep.mubr.msk.f32.mxu1 %vm577_vm0, %v4729_v40  ;;  %v14829_v5 = vsel %vm1325_vm9, %v4727_v4, %v4729_v40  ;;  %v4604_v4 = vld [vmem:[#allocation6 + $0x1d0] sm:$0xff] }
 0xd6f   :  { %4814 = vmatmul.mubr.f32.vlgmr.msra.gmra.mrb[24].mxu0 %v14829_v5  ;;  %4885 = vmatmul.mubr.f32.vlgmr.msra.gmra.mrb[36].mxu1 %v14829_v5 }
 0xd70   :  { %11864 = vmatpush1.bf16.msra.mxu0 %v11863_v45  ;;  %10526 = vmatprep.mubr.msk.f32.mxu0 %vm577_vm0, %v4729_v40  ;;  %v4599_v45 = vld [vmem:[#allocation6 + $0x1a8] sm:$0xff]  ;;  %v11875_v40 = vpack.c.bf16 %v4685_v50, %v4680_v13  ;;  %v4720_v13 = vld [vmem:[#allocation8 + $0x2a0] sm:$0xff]  ;;  %v4725_v50 = vld [vmem:[#allocation8 + $0x2c8] sm:$0xf] }
 0xd71   :  { %11865 = vmatprep.subr.bf16.mxu0 %v13921_v8  ;;  %11931 = vmatpush1.bf16.msra.mxu1 %v11930_v12  ;;  %v11946_v12 = vpack.c.bf16 %v4593_v51, %v4588_v52  ;;  %v4552_v52 = vld [vmem:[#allocation6 + $0x30] sm:$0xff]  ;;  %v11960_v51 = vpack.c.bf16 %v4634_v61, %v4629_v16  ;;  %v4586_v61 = vld [vmem:[#allocation6 + $0x140] sm:$0xff] }
 0xd72   :  { %11933 = vmatprep.subr.bf16.mxu1 %v11932_v2  ;;  %v11948_v2 = vpack.c.bf16 %v4604_v4, %v4599_v45  ;;  %v4628_v45 = vld [vmem:[#allocation6 + $0x290] sm:$0xff]  ;;  %v4633_v4 = vld [vmem:[#allocation6 + $0x2b8] sm:$0xf] }
 0xd74   :  { %11867 = vmatpush1.bf16.msra.mxu0 %v11866_v38  ;;  %v11878_v38 = vpack.c.bf16 %v4695_v0, %v4690_v60  ;;  %v4546_v0 = vld [vmem:[#allocation6] sm:$0xff] }
 0xd75   :  { %11868 = vmatprep.subr.bf16.mxu0 %v13921_v8  ;;  %11935 = vmatpush1.bf16.msra.mxu1 %v11934_v47  ;;  %v11950_v47 = vpack.c.bf16 %v4603_v58, %v4598_v6  ;;  %v4557_v6 = vld [vmem:[#allocation6 + $0x58] sm:$0xff]  ;;  %v4562_v58 = vld [vmem:[#allocation6 + $0x80] sm:$0xff] }
 0xd76   :  { %11937 = vmatprep.subr.bf16.mxu1 %v11936_v26  ;;  %v11952_v26 = vpack.c.bf16 %v4614_v56, %v4609_v57  ;;  %v11894_v56 = vpack.c.bf16 %v4562_v58, %v4557_v6  ;;  %v4622_v6 = vld [vmem:[#allocation6 + $0x260] sm:$0xff] }
 0xd78   :  { %11870 = vmatpush1.bf16.msra.mxu0 %v11869_v41  ;;  %v11881_v41 = vpack.c.bf16 %v4705_v46, %v4700_v44  ;;  %v4561_v44 = vld [vmem:[#allocation6 + $0x78] sm:$0xff]  ;;  %v4567_v46 = vld [vmem:[#allocation6 + $0xa8] sm:$0xff] }
 0xd79   :  { %11871 = vmatprep.subr.bf16.mxu0 %v13921_v8  ;;  %11939 = vmatpush1.bf16.msra.mxu1 %v11938_v7  ;;  %v11954_v7 = vpack.c.bf16 %v4613_v1, %v4608_v31  ;;  %v4566_v1 = vld [vmem:[#allocation6 + $0xa0] sm:$0xff] }
 0xd7a   :  { %11941 = vmatprep.subr.bf16.mxu1 %v11940_v14  ;;  %v11956_v14 = vpack.c.bf16 %v4624_v39, %v4619_v37  ;;  %v4571_v37 = vld [vmem:[#allocation6 + $0xc8] sm:$0xff]  ;;  %v4577_v39 = vld [vmem:[#allocation6 + $0xf8] sm:$0xff] }
 0xd7c   :  { %11873 = vmatpush1.bf16.msra.mxu0 %v11872_v53  ;;  %v11884_v53 = vpack.c.bf16 %v4715_v15, %v4710_v43  ;;  %v11900_v43 = vpack.c.bf16 %v4571_v37, %v4566_v1  ;;  %v4631_v1 = vld [vmem:[#allocation6 + $0x2a8] sm:$0xf]  ;;  %v5343_v37 = vld [vmem:[#allocation3 + $0x8] sm:$0xff] }
 0xd7d   :  { %11874 = vmatprep.subr.bf16.mxu0 %v13921_v8  ;;  %11943 = vmatpush1.bf16.msra.mxu1 %v11942_v48  ;;  %v4547_v48 = vld [vmem:[#allocation6 + $0x8] sm:$0xff] }
 0xd7e   :  { %11945 = vmatprep.subr.bf16.mxu1 %v11944_v19  ;;  %v11958_v19 = vpack.c.bf16 %v4623_v62, %v4618_v35  ;;  %v11890_v60 = vpack.c.bf16 %v4552_v52, %v4547_v48  ;;  %v4587_v35 = vld [vmem:[#allocation6 + $0x148] sm:$0xff]  ;;  %v4592_v62 = vld [vmem:[#allocation6 + $0x170] sm:$0xff] }
 0xd7f   :  { %v4596_v52 = vld [vmem:[#allocation6 + $0x190] sm:$0xff] }
 0xd80   :  { %11876 = vmatpush1.bf16.msra.mxu0 %v11875_v40  ;;  %v11887_v40 = vpack.c.bf16 %v4725_v50, %v4720_v13  ;;  %v4597_v13 = vld [vmem:[#allocation6 + $0x198] sm:$0xff]  ;;  %v4602_v50 = vld [vmem:[#allocation6 + $0x1c0] sm:$0xff] }
 0xd81   :  { %11877 = vmatprep.subr.bf16.mxu0 %v13921_v8  ;;  %11947 = vmatpush1.bf16.msra.mxu1 %v11946_v12  ;;  %v4551_v12 = vld [vmem:[#allocation6 + $0x28] sm:$0xff] }
 0xd82   :  { %11949 = vmatprep.subr.bf16.mxu1 %v11948_v2  ;;  %v11963_v2 = vpack.c.bf16 %v4633_v4, %v4628_v45  ;;  %v11892_v57 = vpack.c.bf16 %v4551_v12, %v4546_v0  ;;  %v4607_v45 = vld [vmem:[#allocation6 + $0x1e8] sm:$0xff]  ;;  %v4612_v4 = vld [vmem:[#allocation6 + $0x210] sm:$0xff]  ;;  %v4606_v0 = vld [vmem:[#allocation6 + $0x1e0] sm:$0xff] }
 0xd83   :  { %v4611_v12 = vld [vmem:[#allocation6 + $0x208] sm:$0xff] }
 0xd84   :  { %11879 = vmatpush1.bf16.msra.mxu0 %v11878_v38  ;;  %v4556_v38 = vld [vmem:[#allocation6 + $0x50] sm:$0xff]  ;;  %v11916_v58 = vpack.c.bf16 %v4611_v12, %v4606_v0  ;;  %v4570_v12 = vld [vmem:[#allocation6 + $0xc0] sm:$0xff] }
 0xd85   :  { %11880 = vmatprep.subr.bf16.mxu0 %v13921_v8  ;;  %11951 = vmatpush1.bf16.msra.mxu1 %v11950_v47  ;;  %v4572_v47 = vld [vmem:[#allocation6 + $0xd0] sm:$0xff] }
 0xd86   :  { %11953 = vmatprep.subr.bf16.mxu1 %v11952_v26  ;;  %v11896_v26 = vpack.c.bf16 %v4561_v44, %v4556_v38  ;;  %v11898_v31 = vpack.c.bf16 %v4572_v47, %v4567_v46  ;;  %v4621_v38 = vld [vmem:[#allocation6 + $0x258] sm:$0xff]  ;;  %v4627_v44 = vld [vmem:[#allocation6 + $0x288] sm:$0xff]  ;;  %v4632_v46 = vld [vmem:[#allocation6 + $0x2b0] sm:$0xf] }
 0xd88   :  { %11882 = vmatpush1.bf16.msra.mxu0 %v11881_v41  ;;  %v4582_v41 = vld [vmem:[#allocation6 + $0x120] sm:$0xff] }
 0xd89   :  { %11883 = vmatprep.subr.bf16.mxu0 %v13921_v8  ;;  %11955 = vmatpush1.bf16.msra.mxu1 %v11954_v7  ;;  %v11902_v15 = vpack.c.bf16 %v4582_v41, %v4577_v39  ;;  %v4576_v7 = vld [vmem:[#allocation6 + $0xf0] sm:$0xff]  ;;  %v5348_v39 = vld [vmem:[#allocation3 + $0x30] sm:$0xff] }
 0xd8a   :  { %11957 = vmatprep.subr.bf16.mxu1 %v11956_v14  ;;  %v4581_v14 = vld [vmem:[#allocation6 + $0x118] sm:$0xff] }
 0xd8b   :  { %v11904_v16 = vpack.c.bf16 %v4581_v14, %v4576_v7  ;;  %v4555_v7 = vld [vmem:[#allocation6 + $0x48] sm:$0xff]  ;;  %v5342_v14 = vld [vmem:[#allocation3] sm:$0xff] }
 0xd8c   :  { %11885 = vmatpush1.bf16.msra.mxu0 %v11884_v53  ;;  %v4591_v53 = vld [vmem:[#allocation6 + $0x168] sm:$0xff] }
 0xd8d   :  { %11886 = vmatprep.subr.bf16.mxu0 %v13921_v8  ;;  %11959 = vmatpush1.bf16.msra.mxu1 %v11958_v19  ;;  %v11908_v48 = vpack.c.bf16 %v4591_v53, %v4586_v61  ;;  %v11910_v19 = vpack.c.bf16 %v4602_v50, %v4597_v13  ;;  %v4560_v53 = vld [vmem:[#allocation6 + $0x70] sm:$0xff] }
 0xd8e   :  { %11962 = vmatprep.subr.msk.bf16.mxu1 %vm14099_vm3, %v11960_v51  ;;  %v4601_v51 = vld [vmem:[#allocation6 + $0x1b8] sm:$0xff] }
 0xd90   :  { %11889 = vmatpush1.bf16.msk.msra.mxu0 %vm14099_vm3, %v11887_v40  ;;  %v11912_v40 = vpack.c.bf16 %v4601_v51, %v4596_v52  ;;  %v5357_v52 = vld [vmem:[#allocation3 + $0x78] sm:$0xff] }
 0xd91   :  { %11891 = vmatprep.subr.bf16.mxu0 %v11890_v60  ;;  %11965 = vmatpush1.bf16.msk.msra.mxu1 %vm14099_vm3, %v11963_v2  ;;  %v11914_v60 = vpack.c.bf16 %v4612_v4, %v4607_v45  ;;  %v4617_v2 = vld [vmem:[#allocation6 + $0x238] sm:$0xff] }
 0xd92   :  { %11966 = vmatprep.subr.bf16.mxu1 %v13921_v8  ;;  %v5363_v4 = vld [vmem:[#allocation3 + $0xa8] sm:$0xff] }
 0xd93   :  { %4956 = vmatmul.mubr.f32.vlgmr.msra.gmra.mrb[26].mxu0 %v14829_v5  ;;  %v11906_v5 = vpack.c.bf16 %v4592_v62, %v4587_v35  ;;  %v5347_v35 = vld [vmem:[#allocation3 + $0x28] sm:$0xff]  ;;  %v5353_v62 = vld [vmem:[#allocation3 + $0x58] sm:$0xff] }
 0xd94   :  { %11893 = vmatpush1.bf16.msra.mxu0 %v11892_v57  ;;  %v11918_v57 = vpack.c.bf16 %v4622_v6, %v4617_v2  ;;  %v11996_v61 = vpack.c.bf16 %v5347_v35, %v5342_v14  ;;  %v4575_v6 = vld [vmem:[#allocation6 + $0xe8] sm:$0xff] }
 0xd95   :  { %11895 = vmatprep.subr.bf16.mxu0 %v11894_v56  ;;  %v4616_v56 = vld [vmem:[#allocation6 + $0x230] sm:$0xff]  ;;  %v4595_v35 = vld [vmem:[#allocation6 + $0x188] sm:$0xff] }
 0xd96   :  { %v11920_v47 = vpack.c.bf16 %v4621_v38, %v4616_v56  ;;  %v5373_v56 = vld [vmem:[#allocation3 + $0xf8] sm:$0xff]  ;;  %v5378_v38 = vld [vmem:[#allocation3 + $0x120] sm:$0xff] }
 0xd98   :  { %11897 = vmatpush1.bf16.msra.mxu0 %v11896_v26  ;;  %v11922_v26 = vpack.c.bf16 %v4632_v46, %v4627_v44  ;;  %v11973_v44 = vpack.c.bf16 %v4575_v6, %v4570_v12 }
 0xd99   :  { %11899 = vmatprep.subr.bf16.mxu0 %v11898_v31  ;;  %v4626_v31 = vld [vmem:[#allocation6 + $0x280] sm:$0xff] }
 0xd9a   :  { %v11925_v41 = vpack.c.bf16 %v4631_v1, %v4626_v31  ;;  %v4585_v31 = vld [vmem:[#allocation6 + $0x138] sm:$0xff]  ;;  %v5372_v1 = vld [vmem:[#allocation3 + $0xf0] sm:$0xff] }
 0xd9c   :  { %11901 = vmatpush1.bf16.msra.mxu0 %v11900_v43  ;;  %v11994_v43 = vpack.c.bf16 %v5348_v39, %v5343_v37  ;;  %v5377_v37 = vld [vmem:[#allocation3 + $0x118] sm:$0xff]  ;;  %v5383_v39 = vld [vmem:[#allocation3 + $0x148] sm:$0xff] }
 0xd9d   :  { %11903 = vmatprep.subr.bf16.mxu0 %v11902_v15  ;;  %v4550_v15 = vld [vmem:[#allocation6 + $0x20] sm:$0xff] }
 0xda0   :  { %11905 = vmatpush1.bf16.msra.mxu0 %v11904_v16  ;;  %v5358_v16 = vld [vmem:[#allocation3 + $0x80] sm:$0xff] }
 0xda1   :  { %11907 = vmatprep.subr.bf16.mxu0 %v11906_v5  ;;  %v11967_v5 = vpack.c.bf16 %v4555_v7, %v4550_v15  ;;  %v11998_v45 = vpack.c.bf16 %v5358_v16, %v5353_v62  ;;  %v12008_v15 = vpack.c.bf16 %v5377_v37, %v5372_v1  ;;  %v4590_v7 = vld [vmem:[#allocation6 + $0x160] sm:$0xff]  ;;  %v5382_v62 = vld [vmem:[#allocation3 + $0x140] sm:$0xff]  ;;  %v5387_v16 = vld [vmem:[#allocation3 + $0x168] sm:$0xff] }
 0xda2   :  { %v4625_v1 = vld [vmem:[#allocation6 + $0x278] sm:$0xff]  ;;  %v5412_v37 = vld [vmem:[#allocation3 + $0x230] sm:$0xff] }
 0xda4   :  { %11909 = vmatpush1.bf16.msra.mxu0 %v11908_v48  ;;  %v4565_v48 = vld [vmem:[#allocation6 + $0x98] sm:$0xff] }
 0xda5   :  { %11911 = vmatprep.subr.bf16.mxu0 %v11910_v19  ;;  %v5352_v19 = vld [vmem:[#allocation3 + $0x50] sm:$0xff] }
 0xda6   :  { %v12000_v0 = vpack.c.bf16 %v5357_v52, %v5352_v19  ;;  %v4605_v52 = vld [vmem:[#allocation6 + $0x1d8] sm:$0xff] }
 0xda8   :  { %11913 = vmatpush1.bf16.msra.mxu0 %v11912_v40  ;;  %v5368_v40 = vld [vmem:[#allocation3 + $0xd0] sm:$0xff] }
 0xda9   :  { %11915 = vmatprep.subr.bf16.mxu0 %v11914_v60  ;;  %v11970_v60 = vpack.c.bf16 %v4565_v48, %v4560_v53  ;;  %v12002_v2 = vpack.c.bf16 %v5368_v40, %v5363_v4  ;;  %v11979_v53 = vpack.c.bf16 %v4595_v35, %v4590_v7  ;;  %v4600_v48 = vld [vmem:[#allocation6 + $0x1b0] sm:$0xff]  ;;  %v5397_v4 = vld [vmem:[#allocation3 + $0x1b8] sm:$0xff]  ;;  %v5403_v40 = vld [vmem:[#allocation3 + $0x1e8] sm:$0xff] }
 0xdac   :  { %11917 = vmatpush1.bf16.msra.mxu0 %v11916_v58  ;;  %v5362_v58 = vld [vmem:[#allocation3 + $0xa0] sm:$0xff] }
 0xdad   :  { %11919 = vmatprep.subr.bf16.mxu0 %v11918_v57  ;;  %v5367_v57 = vld [vmem:[#allocation3 + $0xc8] sm:$0xff] }
 0xdae   :  { %v12004_v46 = vpack.c.bf16 %v5367_v57, %v5362_v58  ;;  %v4615_v58 = vld [vmem:[#allocation6 + $0x228] sm:$0xff]  ;;  %v5402_v57 = vld [vmem:[#allocation3 + $0x1e0] sm:$0xff] }
 0xdb0   :  { %11921 = vmatpush1.bf16.msra.mxu0 %v11920_v47  ;;  %v4580_v47 = vld [vmem:[#allocation6 + $0x110] sm:$0xff] }
 0xdb1   :  { %11924 = vmatprep.subr.msk.bf16.mxu0 %vm14099_vm3, %v11922_v26  ;;  %v12006_v26 = vpack.c.bf16 %v5378_v38, %v5373_v56  ;;  %v5407_v56 = vld [vmem:[#allocation3 + $0x208] sm:$0xff]  ;;  %v5413_v38 = vld [vmem:[#allocation3 + $0x238] sm:$0xff] }
 0xdb4   :  { %11927 = vmatpush1.bf16.msk.msra.mxu0 %vm14099_vm3, %v11925_v41  ;;  %v5388_v41 = vld [vmem:[#allocation3 + $0x170] sm:$0xff] }
 0xdb5   :  { %11995 = vmatprep.subr.bf16.mxu0 %v11994_v43  ;;  %v11976_v43 = vpack.c.bf16 %v4585_v31, %v4580_v47  ;;  %v12010_v14 = vpack.c.bf16 %v5388_v41, %v5383_v39  ;;  %v12020_v47 = vpack.c.bf16 %v5407_v56, %v5402_v57  ;;  %v5417_v39 = vld [vmem:[#allocation3 + $0x258] sm:$0xff]  ;;  %v5423_v41 = vld [vmem:[#allocation3 + $0x288] sm:$0xff]  ;;  %v5356_v57 = vld [vmem:[#allocation3 + $0x70] sm:$0xff] }
 0xdb6   :  { %v12024_v7 = vpack.c.bf16 %v5417_v39, %v5412_v37  ;;  %v5369_v37 = vld [vmem:[#allocation3 + $0xd8] sm:$0xff]  ;;  %v5366_v39 = vld [vmem:[#allocation3 + $0xc0] sm:$0xff] }
 0xdb7   :  { %v4966_v13 = vpop.permute.xlu0 %4965 }
 0xdb9   :  { %v14854_v50 = vpop.permute.xlu1 %4967 }
 0xdba   :  { %10529 = vmatprep.mubr.msk.f32.mxu0 %vm577_vm0, %v14854_v50  ;;  %10532 = vmatprep.mubr.msk.f32.mxu1 %vm577_vm0, %v14854_v50  ;;  %v14862_v51 = vsel %vm1325_vm9, %v4966_v13, %v14854_v50  ;;  %v12012_v13 = vpack.c.bf16 %v5387_v16, %v5382_v62  ;;  %v4635_v62 = vld [vmem:[#allocation6 + $0x2c8] sm:$0xf]  ;;  %v5422_v16 = vld [vmem:[#allocation3 + $0x280] sm:$0xff] }
 0xdbb   :  { %5053 = vmatmul.mubr.f32.vlgmr.msra.gmra.mrb[24].mxu0 %v14862_v51  ;;  %5124 = vmatmul.mubr.f32.vlgmr.msra.gmra.mrb[36].mxu1 %v14862_v51 }
 0xdbc   :  { %11968 = vmatpush1.bf16.msra.mxu1 %v11967_v5  ;;  %11997 = vmatpush1.bf16.msra.mxu0 %v11996_v61  ;;  %v5393_v5 = vld [vmem:[#allocation3 + $0x198] sm:$0xff]  ;;  %v5398_v61 = vld [vmem:[#allocation3 + $0x1c0] sm:$0xff] }
 0xdbd   :  { %10534 = vmatprep.mubr.msk.f32.mxu1 %vm577_vm0, %v14854_v50  ;;  %10542 = vmatprep.mubr.msk.f32.mxu0 %vm577_vm0, %v14854_v50  ;;  %v12014_v19 = vpack.c.bf16 %v5398_v61, %v5393_v5  ;;  %v5427_v5 = vld [vmem:[#allocation3 + $0x2a8] sm:$0xf]  ;;  %v5345_v61 = vld [vmem:[#allocation3 + $0x18] sm:$0xff] }
 0xdbe   :  { %11969 = vmatprep.subr.bf16.mxu1 %v13921_v8  ;;  %11999 = vmatprep.subr.bf16.mxu0 %v11998_v45  ;;  %v5392_v45 = vld [vmem:[#allocation3 + $0x190] sm:$0xff] }
 0xdbf   :  { %v12016_v12 = vpack.c.bf16 %v5397_v4, %v5392_v45  ;;  %v5349_v45 = vld [vmem:[#allocation3 + $0x38] sm:$0xff]  ;;  %v5346_v4 = vld [vmem:[#allocation3 + $0x20] sm:$0xff] }
 0xdc0   :  { %11971 = vmatpush1.bf16.msra.mxu1 %v11970_v60  ;;  %12001 = vmatpush1.bf16.msra.mxu0 %v12000_v0  ;;  %v5408_v60 = vld [vmem:[#allocation3 + $0x210] sm:$0xff]  ;;  %v11982_v0 = vpack.c.bf16 %v4605_v52, %v4600_v48  ;;  %v12029_v48 = vpack.c.bf16 %v5427_v5, %v5422_v16  ;;  %v5379_v16 = vld [vmem:[#allocation3 + $0x128] sm:$0xff]  ;;  %v5381_v5 = vld [vmem:[#allocation3 + $0x138] sm:$0xff] }
 0xdc1   :  { %11972 = vmatprep.subr.bf16.mxu1 %v13921_v8  ;;  %12003 = vmatprep.subr.bf16.mxu0 %v12002_v2  ;;  %v4610_v2 = vld [vmem:[#allocation6 + $0x200] sm:$0xff]  ;;  %v12018_v6 = vpack.c.bf16 %v5408_v60, %v5403_v40  ;;  %v5351_v40 = vld [vmem:[#allocation3 + $0x48] sm:$0xff] }
 0xdc2   :  { %v5344_v52 = vld [vmem:[#allocation3 + $0x10] sm:$0xff]  ;;  %v5355_v60 = vld [vmem:[#allocation3 + $0x68] sm:$0xff] }
 0xdc4   :  { %11974 = vmatpush1.bf16.msra.mxu1 %v11973_v44  ;;  %12005 = vmatpush1.bf16.msra.mxu0 %v12004_v46  ;;  %v5418_v44 = vld [vmem:[#allocation3 + $0x260] sm:$0xff]  ;;  %v11985_v46 = vpack.c.bf16 %v4615_v58, %v4610_v2  ;;  %v12071_v2 = vpack.c.bf16 %v5351_v40, %v5346_v4  ;;  %v5359_v58 = vld [vmem:[#allocation3 + $0x88] sm:$0xff] }
 0xdc5   :  { %11975 = vmatprep.subr.bf16.mxu1 %v13921_v8  ;;  %12007 = vmatprep.subr.bf16.mxu0 %v12006_v26  ;;  %v4620_v26 = vld [vmem:[#allocation6 + $0x250] sm:$0xff]  ;;  %v12022_v31 = vpack.c.bf16 %v5418_v44, %v5413_v38  ;;  %v5361_v38 = vld [vmem:[#allocation3 + $0x98] sm:$0xff]  ;;  %v5391_v40 = vld [vmem:[#allocation3 + $0x188] sm:$0xff] }
 0xdc6   :  { %v5365_v44 = vld [vmem:[#allocation3 + $0xb8] sm:$0xff]  ;;  %v5386_v4 = vld [vmem:[#allocation3 + $0x160] sm:$0xff] }
 0xdc8   :  { %11977 = vmatpush1.bf16.msra.mxu1 %v11976_v43  ;;  %12009 = vmatpush1.bf16.msra.mxu0 %v12008_v15  ;;  %v5428_v43 = vld [vmem:[#allocation3 + $0x2b0] sm:$0xf]  ;;  %v11988_v15 = vpack.c.bf16 %v4625_v1, %v4620_v26  ;;  %v12074_v26 = vpack.c.bf16 %v5361_v38, %v5356_v57  ;;  %v5399_v57 = vld [vmem:[#allocation3 + $0x1c8] sm:$0xff]  ;;  %v5401_v38 = vld [vmem:[#allocation3 + $0x1d8] sm:$0xff] }
 0xdc9   :  { %11978 = vmatprep.subr.bf16.mxu1 %v13921_v8  ;;  %12011 = vmatprep.subr.bf16.mxu0 %v12010_v14  ;;  %v4630_v14 = vld [vmem:[#allocation6 + $0x2a0] sm:$0xff]  ;;  %v12026_v35 = vpack.c.bf16 %v5428_v43, %v5423_v41  ;;  %v5371_v41 = vld [vmem:[#allocation3 + $0xe8] sm:$0xff] }
 0xdca   :  { %v5364_v1 = vld [vmem:[#allocation3 + $0xb0] sm:$0xff]  ;;  %v5375_v43 = vld [vmem:[#allocation3 + $0x108] sm:$0xff] }
 0xdcc   :  { %11980 = vmatpush1.bf16.msra.mxu1 %v11979_v53  ;;  %12013 = vmatpush1.bf16.msra.mxu0 %v12012_v13  ;;  %v5350_v53 = vld [vmem:[#allocation3 + $0x40] sm:$0xff]  ;;  %v11991_v13 = vpack.c.bf16 %v4635_v62, %v4630_v14  ;;  %v12077_v14 = vpack.c.bf16 %v5371_v41, %v5366_v39  ;;  %v5411_v41 = vld [vmem:[#allocation3 + $0x228] sm:$0xff] }
 0xdcd   :  { %11981 = vmatprep.subr.bf16.mxu1 %v13921_v8  ;;  %12015 = vmatprep.subr.bf16.mxu0 %v12014_v19  ;;  %v12032_v19 = vpack.c.bf16 %v5350_v53, %v5345_v61  ;;  %v5374_v62 = vld [vmem:[#allocation3 + $0x100] sm:$0xff]  ;;  %v5385_v61 = vld [vmem:[#allocation3 + $0x158] sm:$0xff] }
 0xdce   :  { %v5390_v53 = vld [vmem:[#allocation3 + $0x180] sm:$0xff] }
 0xdcf   :  { %v5406_v39 = vld [vmem:[#allocation3 + $0x200] sm:$0xff] }
 0xdd0   :  { %11983 = vmatpush1.bf16.msra.mxu1 %v11982_v0  ;;  %12017 = vmatpush1.bf16.msra.mxu0 %v12016_v12  ;;  %v5360_v0 = vld [vmem:[#allocation3 + $0x90] sm:$0xff]  ;;  %v12034_v12 = vpack.c.bf16 %v5349_v45, %v5344_v52  ;;  %v5389_v45 = vld [vmem:[#allocation3 + $0x178] sm:$0xff] }
 0xdd1   :  { %11984 = vmatprep.subr.bf16.mxu1 %v13921_v8  ;;  %12019 = vmatprep.subr.bf16.mxu0 %v12018_v6  ;;  %v5354_v6 = vld [vmem:[#allocation3 + $0x60] sm:$0xff]  ;;  %v12036_v56 = vpack.c.bf16 %v5360_v0, %v5355_v60  ;;  %v5384_v52 = vld [vmem:[#allocation3 + $0x150] sm:$0xff]  ;;  %v5395_v60 = vld [vmem:[#allocation3 + $0x1a8] sm:$0xff] }
 0xdd2   :  { %v5400_v0 = vld [vmem:[#allocation3 + $0x1d0] sm:$0xff] }
 0xdd4   :  { %11986 = vmatpush1.bf16.msra.mxu1 %v11985_v46  ;;  %12021 = vmatpush1.bf16.msra.mxu0 %v12020_v47  ;;  %v5370_v46 = vld [vmem:[#allocation3 + $0xe0] sm:$0xff]  ;;  %v12038_v47 = vpack.c.bf16 %v5359_v58, %v5354_v6  ;;  %v12052_v6 = vpack.c.bf16 %v5400_v0, %v5395_v60 }
 0xdd5   :  { %11987 = vmatprep.subr.bf16.mxu1 %v13921_v8  ;;  %12023 = vmatprep.subr.bf16.mxu0 %v12022_v31  ;;  %v12040_v31 = vpack.c.bf16 %v5370_v46, %v5365_v44  ;;  %v5394_v58 = vld [vmem:[#allocation3 + $0x1a0] sm:$0xff]  ;;  %v5405_v44 = vld [vmem:[#allocation3 + $0x1f8] sm:$0xff] }
 0xdd6   :  { %v5410_v46 = vld [vmem:[#allocation3 + $0x220] sm:$0xff] }
 0xdd8   :  { %11989 = vmatpush1.bf16.msra.mxu1 %v11988_v15  ;;  %12025 = vmatpush1.bf16.msra.mxu0 %v12024_v7  ;;  %v5380_v15 = vld [vmem:[#allocation3 + $0x130] sm:$0xff]  ;;  %v12042_v7 = vpack.c.bf16 %v5369_v37, %v5364_v1  ;;  %v5409_v37 = vld [vmem:[#allocation3 + $0x218] sm:$0xff] }
 0xdd9   :  { %11990 = vmatprep.subr.bf16.mxu1 %v13921_v8  ;;  %12028 = vmatprep.subr.msk.bf16.mxu0 %vm14099_vm3, %v12026_v35  ;;  %v12044_v35 = vpack.c.bf16 %v5380_v15, %v5375_v43  ;;  %v5404_v1 = vld [vmem:[#allocation3 + $0x1f0] sm:$0xff]  ;;  %v5415_v43 = vld [vmem:[#allocation3 + $0x248] sm:$0xff] }
 0xdda   :  { %v5420_v15 = vld [vmem:[#allocation3 + $0x270] sm:$0xff] }
 0xddc   :  { %11993 = vmatpush1.bf16.msk.msra.mxu1 %vm14099_vm3, %v11991_v13  ;;  %12031 = vmatpush1.bf16.msk.msra.mxu0 %vm14099_vm3, %v12029_v48  ;;  %v12046_v13 = vpack.c.bf16 %v5379_v16, %v5374_v62  ;;  %v5414_v62 = vld [vmem:[#allocation3 + $0x240] sm:$0xff]  ;;  %v5419_v16 = vld [vmem:[#allocation3 + $0x268] sm:$0xff] }
 0xddd   :  { %12033 = vmatprep.subr.bf16.mxu1 %v12032_v19  ;;  %12070 = vmatprep.subr.bf16.mxu0 %v13921_v8  ;;  %v12048_v19 = vpack.c.bf16 %v5390_v53, %v5385_v61  ;;  %v5425_v61 = vld [vmem:[#allocation3 + $0x298] sm:$0xff]  ;;  %v5430_v53 = vld [vmem:[#allocation3 + $0x2c0] sm:$0xf] }
 0xddf   :  { %5195 = vmatmul.mubr.f32.vlgmr.msra.gmra.mrb[38].mxu1 %v14862_v51  ;;  %5512 = vmatmul.mubr.f32.vlgmr.msra.gmra.mrb[28].mxu0 %v14862_v51 }
 0xde0   :  { %12035 = vmatpush1.bf16.msra.mxu1 %v12034_v12  ;;  %10545 = vmatprep.mubr.msk.f32.mxu1 %vm577_vm0, %v14854_v50  ;;  %v12050_v12 = vpack.c.bf16 %v5389_v45, %v5384_v52  ;;  %v5424_v52 = vld [vmem:[#allocation3 + $0x290] sm:$0xff]  ;;  %v5429_v45 = vld [vmem:[#allocation3 + $0x2b8] sm:$0xf] }
 0xde1   :  { %12072 = vmatpush1.bf16.msra.mxu0 %v12071_v2  ;;  %10547 = vmatprep.mubr.msk.f32.mxu0 %vm577_vm0, %v14854_v50  ;;  %v5376_v50 = vld [vmem:[#allocation3 + $0x110] sm:$0xff]  ;;  %v12083_v2 = vpack.c.bf16 %v5391_v40, %v5386_v4  ;;  %v5426_v4 = vld [vmem:[#allocation3 + $0x2a0] sm:$0xff]  ;;  %v5431_v40 = vld [vmem:[#allocation3 + $0x2c8] sm:$0xf]  ;;  %v12067_v60 = vpack.c.bf16 %v5429_v45, %v5424_v52 }
 0xde2   :  { %12037 = vmatprep.subr.bf16.mxu1 %v12036_v56  ;;  %12073 = vmatprep.subr.bf16.mxu0 %v13921_v8  ;;  %v12080_v48 = vpack.c.bf16 %v5381_v5, %v5376_v50  ;;  %v5396_v56 = vld [vmem:[#allocation3 + $0x1b0] sm:$0xff]  ;;  %v5421_v5 = vld [vmem:[#allocation3 + $0x278] sm:$0xff]  ;;  %v12095_v0 = vpack.c.bf16 %v5431_v40, %v5426_v4 }
 0xde3   :  { %v5416_v50 = vld [vmem:[#allocation3 + $0x250] sm:$0xff] }
 0xde4   :  { %12039 = vmatpush1.bf16.msra.mxu1 %v12038_v47  ;;  %v12054_v47 = vpack.c.bf16 %v5399_v57, %v5394_v58 }
 0xde5   :  { %12075 = vmatpush1.bf16.msra.mxu0 %v12074_v26  ;;  %12041 = vmatprep.subr.bf16.mxu1 %v12040_v31  ;;  %v12086_v26 = vpack.c.bf16 %v5401_v38, %v5396_v56  ;;  %v12056_v31 = vpack.c.bf16 %v5410_v46, %v5405_v44 }
 0xde6   :  { %12076 = vmatprep.subr.bf16.mxu0 %v13921_v8 }
 0xde8   :  { %12043 = vmatpush1.bf16.msra.mxu1 %v12042_v7  ;;  %v12058_v7 = vpack.c.bf16 %v5409_v37, %v5404_v1 }
 0xde9   :  { %12078 = vmatpush1.bf16.msra.mxu0 %v12077_v14  ;;  %12045 = vmatprep.subr.bf16.mxu1 %v12044_v35  ;;  %v12089_v14 = vpack.c.bf16 %v5411_v41, %v5406_v39  ;;  %v12060_v35 = vpack.c.bf16 %v5420_v15, %v5415_v43 }
 0xdea   :  { %12079 = vmatprep.subr.bf16.mxu0 %v13921_v8 }
 0xdec   :  { %12047 = vmatpush1.bf16.msra.mxu1 %v12046_v13  ;;  %v12062_v13 = vpack.c.bf16 %v5419_v16, %v5414_v62 }
 0xded   :  { %12081 = vmatpush1.bf16.msra.mxu0 %v12080_v48  ;;  %12049 = vmatprep.subr.bf16.mxu1 %v12048_v19  ;;  %v12092_v48 = vpack.c.bf16 %v5421_v5, %v5416_v50  ;;  %v12064_v19 = vpack.c.bf16 %v5430_v53, %v5425_v61 }
 0xdee   :  { %12082 = vmatprep.subr.bf16.mxu0 %v13921_v8 }
 0xdf0   :  { %12051 = vmatpush1.bf16.msra.mxu1 %v12050_v12 }
 0xdf1   :  { %12084 = vmatpush1.bf16.msra.mxu0 %v12083_v2  ;;  %12053 = vmatprep.subr.bf16.mxu1 %v12052_v6  ;;  %v5200_v6 = vld [vmem:[%s15862_s9] sm:$0x1f] }
 0xdf2   :  { %12085 = vmatprep.subr.bf16.mxu0 %v13921_v8  ;;  %v5205_v58 = vrot.slane %v5200_v6, %v14211_v10  ;;  %v5213_v57 = vrot.slane %v5200_v6, %v14226_v21  ;;  %v5209_v56 = vrot.slane %v5200_v6, %v14214_v11  ;;  %v5217_v38 = vrot.slane %v5200_v6, %v14229_v22 }
 0xdf3   :  { %v5221_v43 = vrot.slane %v5200_v6, %v14232_v23 }
 0xdf4   :  { %12055 = vmatpush1.bf16.msra.mxu1 %v12054_v47 }
 0xdf5   :  { %12087 = vmatpush1.bf16.msra.mxu0 %v12086_v26  ;;  %12057 = vmatprep.subr.bf16.mxu1 %v12056_v31 }
 0xdf6   :  { %12088 = vmatprep.subr.bf16.mxu0 %v13921_v8 }
 0xdf8   :  { %12059 = vmatpush1.bf16.msra.mxu1 %v12058_v7 }
 0xdf9   :  { %12090 = vmatpush1.bf16.msra.mxu0 %v12089_v14  ;;  %12061 = vmatprep.subr.bf16.mxu1 %v12060_v35 }
 0xdfa   :  { %12091 = vmatprep.subr.bf16.mxu0 %v13921_v8 }
 0xdfc   :  { %12063 = vmatpush1.bf16.msra.mxu1 %v12062_v13 }
 0xdfd   :  { %12093 = vmatpush1.bf16.msra.mxu0 %v12092_v48  ;;  %12066 = vmatprep.subr.msk.bf16.mxu1 %vm14099_vm3, %v12064_v19 }
 0xdfe   :  { %12094 = vmatprep.subr.bf16.mxu0 %v13921_v8 }
 0xe00   :  { %12069 = vmatpush1.bf16.msk.msra.mxu1 %vm14099_vm3, %v12067_v60 }
 0xe01   :  { %12097 = vmatpush1.bf16.msk.msra.mxu0 %vm14099_vm3, %v12095_v0  ;;  %v5699_v0 = vrot.slane %v14792_v27, 6 }
 0xe03   :  { %5583 = vmatmul.mubr.f32.vlgmr.msra.gmra.mrb[40].mxu1 %v14862_v51 }
 0xe04   :  { %5654 = vmatmul.mubr.f32.vlgmr.msra.gmra.mrb[30].mxu0 %v14862_v51 }
 0xe66   :  { %v4957_v12 = vpop.f32.mrb[26].mxu0 }
 0xe67   :  { %v4959_v2 = vpop.f32.mrb[27].mxu0 }
 0xe8e   :  { %v5054_v44 = vpop.f32.mrb[24].mxu0  ;;  %v5125_v46 = vpop.f32.mrb[36].mxu1 }
 0xe8f   :  { %v5227_v47 = vadd.f32 %v5205_v58, %v5054_v44  ;;  %v14914_v26 = vadd.f32 %v5213_v57, %v5125_v46  ;;  %v5056_v51 = vpop.f32.mrb[25].mxu0  ;;  %v5127_v31 = vpop.f32.mrb[37].mxu1 }
 0xe90   :  { %v5228_v1 = vadd.f32 %v5209_v56, %v5056_v51  ;;  %v14916_v37 = vadd.f32 %v5217_v38, %v5127_v31 }
 0xe91   :  { %13522 = vtanh.f32 %v14914_v26 }
 0xe92   :  { %13524 = vtanh.f32 %v14916_v37  ;;  %v10536_v60 = vmul.f32 -1.442695, %v5228_v1 }
 0xe9b   :  { %v13523_v39 = vpop.eup %13522 }
 0xe9c   :  { %v13525_v41 = vpop.eup %13524  ;;  %5268 = vrot.lane.b32.xlu0 %v13523_v39, %s13924_s6 }
 0xe9d   :  { %5270 = vrot.lane.b32.xlu1 %v13525_v41, %s13924_s6 }
 0xeb2   :  { %v5196_v15 = vpop.f32.mrb[38].mxu1  ;;  %v5513_v7 = vpop.f32.mrb[28].mxu0 }
 0xeb3   :  { %v5197_v14 = vadd.f32 %v5196_v15, %v4957_v12  ;;  %v5198_v35 = vpop.f32.mrb[39].mxu1  ;;  %v5515_v62 = vpop.f32.mrb[29].mxu0  ;;  %v10535_v12 = vmul.f32 -1.442695, %v5227_v47  ;;  %v5659_v41 = vadd.f32 %v5513_v7, %v14221_v17  ;;  %v10537_v7 = vmul.f32 -1.442695, %v14914_v26 }
 0xeb4   :  { %v5660_v47 = vadd.f32 %v5515_v62, %v14223_v20 }
 0xeb5   :  { %v14923_v16 = vadd.f32 %v5221_v43, %v5197_v14  ;;  %v10548_v15 = vmul.f32 -1.442695, %v5659_v41  ;;  %v5835_v41 = vld [vmem:[#allocation8 + $0x30] sm:$0xff] }
 0xeb6   :  { %v10549_v43 = vmul.f32 -1.442695, %v5660_v47  ;;  %v5830_v47 = vld [vmem:[#allocation8 + $0x8] sm:$0xff] }
 0xed6   :  { %v5584_v50 = vpop.f32.mrb[40].mxu1 }
 0xed7   :  { %v5661_v5 = vadd.f32 %v5584_v50, %v14236_v29  ;;  %v14926_v61 = vpop.f32.mrb[30].mxu0  ;;  %v5586_v53 = vpop.f32.mrb[41].mxu1 }
 0xed8   :  { %v14929_v13 = vadd.f32 %v5586_v53, %v14241_v32  ;;  %v5657_v48 = vpop.f32.mrb[31].mxu0 }
 0xed9   :  { %v10550_v19 = vmul.f32 -1.442695, %v5661_v5  ;;  %13526 = vtanh.f32 %v5661_v5 }
 0xeda   :  { %13528 = vtanh.f32 %v14929_v13 }
 0xedb   :  { %13530 = vpow2.f32 %v10550_v19 }
 0xee3   :  { %v13527_v52 = vpop.eup %13526 }
 0xee4   :  { %v13529_v45 = vpop.eup %13528  ;;  %5706 = vrot.lane.b32.xlu0 %v13527_v52, %s13924_s6 }
 0xee5   :  { %v13531_v4 = vpop.eup %13530  ;;  %5708 = vrot.lane.b32.xlu1 %v13529_v45, %s13924_s6 }
 0xee6   :  { %v5679_v40 = vadd.f32 1.0, %v13531_v4 }
 0xee8   :  { %13532 = vrcp.f32 %v5679_v40 }
 0xee9   :  { %13534 = vpow2.f32 %v10536_v60 }
 0xeea   :  { %13536 = vpow2.f32 %v10535_v12 }
 0xef2   :  { %v13533_v2 = vpop.eup %13532 }
 0xef3   :  { %v14935_v6 = vmul.f32 %v13533_v2, %v5699_v0  ;;  %v13535_v58 = vpop.eup %13534 }
 0xef4   :  { %v13537_v57 = vpop.eup %13536  ;;  %v5239_v56 = vadd.f32 1.0, %v13535_v58 }
 0xef5   :  { %v5238_v38 = vadd.f32 1.0, %v13537_v57 }
 0xef6   :  { %13538 = vrcp.f32 %v5239_v56 }
 0xef7   :  { %13540 = vrcp.f32 %v5238_v38 }
 0xef8   :  { %13542 = vpow2.f32 %v10549_v43  ;;  %v5829_v43 = vld [vmem:[#allocation8] sm:$0xff] }
 0xef9   :  { %13544 = vpow2.f32 %v10548_v15  ;;  %v12098_v15 = vpack.c.bf16 %v5835_v41, %v5830_v47 }
 0xefb   :  { %12099 = vmatprep.subr.bf16.mxu1 %v12098_v15  ;;  %v5860_v15 = vld [vmem:[#allocation8 + $0xf8] sm:$0xff] }
 0xf00   :  { %v13539_v46 = vpop.eup %13538 }
 0xf01   :  { %v13541_v31 = vpop.eup %13540  ;;  %v5264_v2 = vmul.f32 %v13539_v46, %v14779_v25  ;;  %v5698_v25 = vrot.slane %v14789_v49, 6  ;;  %v5832_v49 = vld [vmem:[#allocation8 + $0x18] sm:$0xff] }
 0xf02   :  { %v13543_v14 = vpop.eup %13542 }
 0xf03   :  { %v13545_v35 = vpop.eup %13544  ;;  %v5671_v50 = vadd.f32 1.0, %v13543_v14  ;;  %v5834_v14 = vld [vmem:[#allocation8 + $0x28] sm:$0xff] }
 0xf04   :  { %v5670_v5 = vadd.f32 1.0, %v13545_v35  ;;  %v5837_v35 = vld [vmem:[#allocation8 + $0x40] sm:$0xff] }
 0xf05   :  { %13546 = vrcp.f32 %v5671_v50  ;;  %v12100_v50 = vpack.c.bf16 %v5834_v14, %v5829_v43  ;;  %v5865_v14 = vld [vmem:[#allocation8 + $0x120] sm:$0xff] }
 0xf06   :  { %13548 = vrcp.f32 %v5670_v5  ;;  %v12136_v5 = vpack.c.bf16 %v5837_v35, %v5832_v49  ;;  %v5859_v49 = vld [vmem:[#allocation8 + $0xf0] sm:$0xff] }
 0xf07   :  { %13550 = vpow2.f32 %v10537_v7  ;;  %12101 = vmatpush1.bf16.msra.mxu1 %v12100_v50 }
 0xf08   :  { %12137 = vmatprep.subr.bf16.mxu0 %v12136_v5  ;;  %v12110_v5 = vpack.c.bf16 %v5865_v14, %v5860_v15  ;;  %v5881_v15 = vld [vmem:[#allocation8 + $0x1a0] sm:$0xff] }
 0xf0e   :  { %v5269_v44 = vpop.permute.xlu0 %5268 }
 0xf0f   :  { %v5271_v51 = vpop.permute.xlu1 %5270  ;;  %v13547_v48 = vpop.eup %13546 }
 0xf10   :  { %v5272_v1 = vsel %vm869_vm7, %v5269_v44, %v5271_v51  ;;  %v5276_v39 = vmul.f32 %v13539_v46, %v5271_v51  ;;  %v13549_v52 = vpop.eup %13548  ;;  %v5702_v46 = vmul.f32 %v13547_v48, %v5698_v25  ;;  %v5854_v25 = vld [vmem:[#allocation8 + $0xc8] sm:$0xff] }
 0xf11   :  { %v5275_v27 = vmul.f32 %v13541_v31, %v5272_v1  ;;  %v13551_v40 = vpop.eup %13550 }
 0xf12   :  { %5281 = vrot.lane.b32.xlu1 %v5276_v39, %s13923_s17  ;;  %v5247_v60 = vadd.f32 1.0, %v13551_v40  ;;  %v5842_v40 = vld [vmem:[#allocation8 + $0x68] sm:$0xff] }
 0xf13   :  { %5279 = vrot.lane.b32.xlu0 %v5275_v27, %s13923_s17 }
 0xf14   :  { %13552 = vrcp.f32 %v5247_v60  ;;  %v5847_v60 = vld [vmem:[#allocation8 + $0x90] sm:$0xff] }
 0xf1e   :  { %v13553_v0 = vpop.eup %13552 }
 0xf1f   :  { %v5265_v58 = vmul.f32 %v13553_v0, %v14781_v54  ;;  %v5841_v0 = vld [vmem:[#allocation8 + $0x60] sm:$0xff] }
 0xf56   :  { %v5707_v53 = vpop.permute.xlu0 %5706 }
 0xf57   :  { %v5709_v19 = vpop.permute.xlu1 %5708 }
 0xf58   :  { %v5710_v45 = vsel %vm869_vm7, %v5707_v53, %v5709_v19  ;;  %v5714_v4 = vmul.f32 %v13547_v48, %v5709_v19  ;;  %v5831_v53 = vld [vmem:[#allocation8 + $0x10] sm:$0xff]  ;;  %v5836_v48 = vld [vmem:[#allocation8 + $0x38] sm:$0xff] }
 0xf59   :  { %v5713_v62 = vmul.f32 %v13549_v52, %v5710_v45  ;;  %v5840_v19 = vld [vmem:[#allocation8 + $0x58] sm:$0xff]  ;;  %v12138_v52 = vpack.c.bf16 %v5836_v48, %v5831_v53  ;;  %v5839_v45 = vld [vmem:[#allocation8 + $0x50] sm:$0xff]  ;;  %v5862_v48 = vld [vmem:[#allocation8 + $0x108] sm:$0xff] }
 0xf5a   :  { %5719 = vrot.lane.b32.xlu1 %v5714_v4, %s13923_s17  ;;  %v5844_v4 = vld [vmem:[#allocation8 + $0x78] sm:$0xff] }
 0xf5b   :  { %5717 = vrot.lane.b32.xlu0 %v5713_v62, %s13923_s17  ;;  %v12104_v7 = vpack.c.bf16 %v5844_v4, %v5839_v45  ;;  %12139 = vmatpush1.bf16.msra.mxu0 %v12138_v52  ;;  %v5864_v53 = vld [vmem:[#allocation8 + $0x118] sm:$0xff]  ;;  %v5866_v45 = vld [vmem:[#allocation8 + $0x128] sm:$0xff] }
 0xf5c   :  { %v5870_v4 = vld [vmem:[#allocation8 + $0x148] sm:$0xff] }
 0xf84   :  { %v5282_v12 = vpop.permute.xlu1 %5281 }
 0xf85   :  { %v5280_v57 = vpop.permute.xlu0 %5279 }
 0xf86   :  { %v5283_v56 = vsel %vm577_vm0, %v5280_v57, %v5282_v12  ;;  %v14949_v38 = vadd.f32 %v5280_v57, %v5264_v2  ;;  %v12140_v12 = vpack.c.bf16 %v5847_v60, %v5842_v40  ;;  %v5846_v2 = vld [vmem:[#allocation8 + $0x88] sm:$0xff]  ;;  %v5855_v57 = vld [vmem:[#allocation8 + $0xd0] sm:$0xff]  ;;  %v5872_v40 = vld [vmem:[#allocation8 + $0x158] sm:$0xff] }
 0xf87   :  { %v14951_v44 = vadd.f32 %v5283_v56, %v5265_v58  ;;  %v5850_v58 = vld [vmem:[#allocation8 + $0xa8] sm:$0xff]  ;;  %v12142_v56 = vpack.c.bf16 %v5846_v2, %v5841_v0  ;;  %v5877_v60 = vld [vmem:[#allocation8 + $0x180] sm:$0xff] }
 0xf88   :  { %13554 = vtanh.f32 %v14949_v38  ;;  %12141 = vmatprep.subr.bf16.mxu0 %v12140_v12  ;;  %v5869_v2 = vld [vmem:[#allocation8 + $0x140] sm:$0xff] }
 0xf89   :  { %13556 = vtanh.f32 %v14951_v44  ;;  %12143 = vmatpush1.bf16.msra.mxu0 %v12142_v56  ;;  %v12152_v56 = vpack.c.bf16 %v5877_v60, %v5872_v40  ;;  %v5896_v60 = vld [vmem:[#allocation8 + $0x218] sm:$0xff] }
 0xf92   :  { %v13555_v26 = vpop.eup %13554 }
 0xf93   :  { %v13557_v51 = vpop.eup %13556  ;;  %5292 = vrot.lane.b32.xlu0 %v13555_v26, %s13925_s19  ;;  %v12106_v26 = vpack.c.bf16 %v5855_v57, %v5850_v58  ;;  %v5874_v58 = vld [vmem:[#allocation8 + $0x168] sm:$0xff]  ;;  %v5871_v57 = vld [vmem:[#allocation8 + $0x150] sm:$0xff] }
 0xf94   :  { %5294 = vrot.lane.b32.xlu1 %v13557_v51, %s13925_s19  ;;  %v5849_v51 = vld [vmem:[#allocation8 + $0xa0] sm:$0xff] }
 0xf95   :  { %v12108_v41 = vpack.c.bf16 %v5854_v25, %v5849_v51  ;;  %v5880_v51 = vld [vmem:[#allocation8 + $0x198] sm:$0xff]  ;;  %v5885_v25 = vld [vmem:[#allocation8 + $0x1c0] sm:$0xff] }
 0xfcc   :  { %v5720_v54 = vpop.permute.xlu1 %5719 }
 0xfcd   :  { %v5718_v31 = vpop.permute.xlu0 %5717 }
 0xfce   :  { %v5721_v1 = vsel %vm577_vm0, %v5718_v31, %v5720_v54  ;;  %v14959_v39 = vadd.f32 %v5718_v31, %v5702_v46  ;;  %v5852_v54 = vld [vmem:[#allocation8 + $0xb8] sm:$0xff]  ;;  %v5857_v46 = vld [vmem:[#allocation8 + $0xe0] sm:$0xff]  ;;  %v5851_v31 = vld [vmem:[#allocation8 + $0xb0] sm:$0xff] }
 0xfcf   :  { %v14962_v27 = vadd.f32 %v5721_v1, %v14935_v6  ;;  %v5845_v6 = vld [vmem:[#allocation8 + $0x80] sm:$0xff]  ;;  %v5856_v1 = vld [vmem:[#allocation8 + $0xd8] sm:$0xff]  ;;  %v12144_v43 = vpack.c.bf16 %v5857_v46, %v5852_v54  ;;  %v5882_v54 = vld [vmem:[#allocation8 + $0x1a8] sm:$0xff] }
 0xfd0   :  { %13558 = vtanh.f32 %v14959_v39  ;;  %v12102_v62 = vpack.c.bf16 %v5845_v6, %v5840_v19  ;;  %v12146_v50 = vpack.c.bf16 %v5856_v1, %v5851_v31  ;;  %v5867_v19 = vld [vmem:[#allocation8 + $0x130] sm:$0xff]  ;;  %v5861_v6 = vld [vmem:[#allocation8 + $0x100] sm:$0xff]  ;;  %v12116_v31 = vpack.c.bf16 %v5874_v58, %v5869_v2  ;;  %v5902_v2 = vld [vmem:[#allocation8 + $0x248] sm:$0xff] }
 0xfd1   :  { %13560 = vtanh.f32 %v14962_v27  ;;  %v12148_v52 = vpack.c.bf16 %v5867_v19, %v5862_v48  ;;  %12145 = vmatprep.subr.bf16.mxu0 %v12144_v43  ;;  %v12150_v0 = vpack.c.bf16 %v5866_v45, %v5861_v6  ;;  %v5887_v46 = vld [vmem:[#allocation8 + $0x1d0] sm:$0xff]  ;;  %v5884_v43 = vld [vmem:[#allocation8 + $0x1b8] sm:$0xff]  ;;  %v10538_v48 = vmul.f32 -1.442695, %v14916_v37  ;;  %v5889_v45 = vld [vmem:[#allocation8 + $0x1e0] sm:$0xff] }
 0xfd2   :  { %12103 = vmatprep.subr.bf16.mxu1 %v12102_v62  ;;  %v5875_v62 = vld [vmem:[#allocation8 + $0x170] sm:$0xff]  ;;  %12147 = vmatpush1.bf16.msra.mxu0 %v12146_v50  ;;  %v12156_v14 = vpack.c.bf16 %v5887_v46, %v5882_v54  ;;  %v5906_v54 = vld [vmem:[#allocation8 + $0x268] sm:$0xff] }
 0xfd3   :  { %12105 = vmatpush1.bf16.msra.mxu1 %v12104_v7  ;;  %v12112_v7 = vpack.c.bf16 %v5864_v53, %v5859_v49  ;;  %v12114_v12 = vpack.c.bf16 %v5875_v62, %v5870_v4  ;;  %12149 = vmatprep.subr.bf16.mxu0 %v12148_v52  ;;  %v5886_v49 = vld [vmem:[#allocation8 + $0x1c8] sm:$0xff]  ;;  %v5895_v50 = vld [vmem:[#allocation8 + $0x210] sm:$0xff]  ;;  %v5897_v53 = vld [vmem:[#allocation8 + $0x220] sm:$0xff]  ;;  %13562 = vpow2.f32 %v10538_v48 }
 0xfd4   :  { %12107 = vmatprep.subr.bf16.mxu1 %v12106_v26  ;;  %v5876_v26 = vld [vmem:[#allocation8 + $0x178] sm:$0xff]  ;;  %v12158_v52 = vpack.c.bf16 %v5886_v49, %v5881_v15  ;;  %v5894_v4 = vld [vmem:[#allocation8 + $0x208] sm:$0xff]  ;;  %v5891_v62 = vld [vmem:[#allocation8 + $0x1f0] sm:$0xff] }
 0xfd5   :  { %v12154_v1 = vpack.c.bf16 %v5876_v26, %v5871_v57  ;;  %v5907_v58 = vld [vmem:[#allocation8 + $0x270] sm:$0xff]  ;;  %v12124_v37 = vpack.c.bf16 %v5894_v4, %v5889_v45  ;;  %v12162_v57 = vpack.c.bf16 %v5896_v60, %v5891_v62  ;;  %v5910_v46 = vld [vmem:[#allocation8 + $0x288] sm:$0xff] }
 0xfd6   :  { %12151 = vmatpush1.bf16.msra.mxu0 %v12150_v0  ;;  %v5900_v0 = vld [vmem:[#allocation8 + $0x238] sm:$0xff]  ;;  %v5899_v26 = vld [vmem:[#allocation8 + $0x230] sm:$0xff]  ;;  %v5914_v49 = vld [vmem:[#allocation8 + $0x2a8] sm:$0xf] }
 0xfd7   :  { %12109 = vmatpush1.bf16.msra.mxu1 %v12108_v41  ;;  %v5879_v41 = vld [vmem:[#allocation8 + $0x190] sm:$0xff]  ;;  %12153 = vmatprep.subr.bf16.mxu0 %v12152_v56 }
 0xfd8   :  { %12111 = vmatprep.subr.bf16.mxu1 %v12110_v5  ;;  %v5892_v5 = vld [vmem:[#allocation8 + $0x1f8] sm:$0xff]  ;;  %v12120_v19 = vpack.c.bf16 %v5884_v43, %v5879_v41 }
 0xfd9   :  { %v12160_v40 = vpack.c.bf16 %v5897_v53, %v5892_v5 }
 0xfda   :  { %v13559_v47 = vpop.eup %13558  ;;  %12155 = vmatpush1.bf16.msra.mxu0 %v12154_v1  ;;  %v5912_v1 = vld [vmem:[#allocation8 + $0x298] sm:$0xff] }
 0xfdb   :  { %v13561_v35 = vpop.eup %13560  ;;  %5730 = vrot.lane.b32.xlu0 %v13559_v47, %s13925_s19  ;;  %12113 = vmatpush1.bf16.msra.mxu1 %v12112_v7  ;;  %v12118_v47 = vpack.c.bf16 %v5885_v25, %v5880_v51  ;;  %v10539_v7 = vmul.f32 -1.442695, %v14923_v16  ;;  %v5904_v51 = vld [vmem:[#allocation8 + $0x258] sm:$0xff]  ;;  %v5901_v25 = vld [vmem:[#allocation8 + $0x240] sm:$0xff]  ;;  %v12164_v16 = vpack.c.bf16 %v5907_v58, %v5902_v2  ;;  %v5742_v58 = vld [vmem:[#allocation6 + $0x18] sm:$0xff] }
 0xfdc   :  { %5732 = vrot.lane.b32.xlu1 %v13561_v35, %s13925_s19  ;;  %12115 = vmatprep.subr.bf16.mxu1 %v12114_v12  ;;  %v5890_v35 = vld [vmem:[#allocation8 + $0x1e8] sm:$0xff]  ;;  %v5905_v12 = vld [vmem:[#allocation8 + $0x260] sm:$0xff]  ;;  %v12128_v41 = vpack.c.bf16 %v5904_v51, %v5899_v26  ;;  %v12166_v43 = vpack.c.bf16 %v5906_v54, %v5901_v25  ;;  %v10551_v26 = vmul.f32 -1.442695, %v14929_v13 }
 0xfdd   :  { %v12122_v6 = vpack.c.bf16 %v5895_v50, %v5890_v35  ;;  %12157 = vmatprep.subr.bf16.mxu0 %v12156_v14  ;;  %v12126_v56 = vpack.c.bf16 %v5905_v12, %v5900_v0  ;;  %13564 = vpow2.f32 %v10539_v7  ;;  %v5909_v14 = vld [vmem:[#allocation8 + $0x280] sm:$0xff]  ;;  %v13563_v5 = vpop.eup %13562  ;;  %v5838_v13 = vld [vmem:[#allocation8 + $0x48] sm:$0xff] }
 0xfde   :  { %12159 = vmatpush1.bf16.msra.mxu0 %v12158_v52  ;;  %v12133_v50 = vpack.c.bf16 %v5914_v49, %v5909_v14  ;;  %v5258_v48 = vadd.f32 1.0, %v13563_v5  ;;  %v5911_v52 = vld [vmem:[#allocation8 + $0x290] sm:$0xff]  ;;  %v5741_v49 = vld [vmem:[#allocation6 + $0x10] sm:$0xff] }
 0xfdf   :  { %12117 = vmatpush1.bf16.msra.mxu1 %v12116_v31  ;;  %12161 = vmatprep.subr.bf16.mxu0 %v12160_v40  ;;  %v5915_v31 = vld [vmem:[#allocation8 + $0x2b0] sm:$0xf]  ;;  %v5757_v5 = vld [vmem:[#allocation6 + $0x90] sm:$0xff] }
 0xfe0   :  { %12119 = vmatprep.subr.bf16.mxu1 %v12118_v47  ;;  %v5917_v47 = vld [vmem:[#allocation8 + $0x2c0] sm:$0xf]  ;;  %v12130_v15 = vpack.c.bf16 %v5915_v31, %v5910_v46  ;;  %13566 = vrcp.f32 %v5258_v48 }
 0xfe1   :  { %v12168_v35 = vpack.c.bf16 %v5917_v47, %v5912_v1 }
 0xfe2   :  { %12163 = vmatpush1.bf16.msra.mxu0 %v12162_v57 }
 0xfe3   :  { %12121 = vmatpush1.bf16.msra.mxu1 %v12120_v19  ;;  %12165 = vmatprep.subr.bf16.mxu0 %v12164_v16 }
 0xfe4   :  { %12123 = vmatprep.subr.bf16.mxu1 %v12122_v6  ;;  %v5916_v6 = vld [vmem:[#allocation8 + $0x2b8] sm:$0xf] }
 0xfe5   :  { %v12171_v45 = vpack.c.bf16 %v5916_v6, %v5911_v52  ;;  %v5843_v52 = vld [vmem:[#allocation8 + $0x70] sm:$0xff]  ;;  %v5848_v6 = vld [vmem:[#allocation8 + $0x98] sm:$0xff] }
 0xfe6   :  { %12167 = vmatpush1.bf16.msra.mxu0 %v12166_v43 }
 0xfe7   :  { %12125 = vmatpush1.bf16.msra.mxu1 %v12124_v37  ;;  %12170 = vmatprep.subr.msk.bf16.mxu0 %vm14099_vm3, %v12168_v35  ;;  %v13565_v53 = vpop.eup %13564  ;;  %v5747_v37 = vld [vmem:[#allocation6 + $0x40] sm:$0xff]  ;;  %v5746_v35 = vld [vmem:[#allocation6 + $0x38] sm:$0xff] }
 0xfe8   :  { %12127 = vmatprep.subr.bf16.mxu1 %v12126_v56  ;;  %v5259_v19 = vadd.f32 1.0, %v13565_v53  ;;  %v12240_v57 = vpack.c.bf16 %v5747_v37, %v5742_v58  ;;  %v5663_v56 = vadd.f32 %v14926_v61, %v14244_v34  ;;  %v5833_v61 = vld [vmem:[#allocation8 + $0x20] sm:$0xff]  ;;  %v5767_v58 = vld [vmem:[#allocation6 + $0xe0] sm:$0xff]  ;;  %v12178_v37 = vpack.c.bf16 %v5848_v6, %v5843_v52  ;;  %v5792_v52 = vld [vmem:[#allocation6 + $0x1a8] sm:$0xff] }
 0xfe9   :  { %v12175_v53 = vpack.c.bf16 %v5838_v13, %v5833_v61  ;;  %v5782_v61 = vld [vmem:[#allocation6 + $0x158] sm:$0xff]  ;;  %v5787_v13 = vld [vmem:[#allocation6 + $0x180] sm:$0xff]  ;;  %v5797_v6 = vld [vmem:[#allocation6 + $0x1d0] sm:$0xff] }
 0xfea   :  { %13568 = vrcp.f32 %v5259_v19  ;;  %12173 = vmatpush1.bf16.msk.msra.mxu0 %vm14099_vm3, %v12171_v45  ;;  %v13567_v4 = vpop.eup %13566  ;;  %v10552_v51 = vmul.f32 -1.442695, %v5663_v56  ;;  %v12242_v45 = vpack.c.bf16 %v5746_v35, %v5741_v49  ;;  %v5858_v56 = vld [vmem:[#allocation8 + $0xe8] sm:$0xff]  ;;  %v5873_v35 = vld [vmem:[#allocation8 + $0x160] sm:$0xff] }
 0xfeb   :  { %12129 = vmatpush1.bf16.msra.mxu1 %v12128_v41  ;;  %12241 = vmatprep.subr.bf16.mxu0 %v12240_v57  ;;  %13570 = vpow2.f32 %v10551_v26  ;;  %v5853_v57 = vld [vmem:[#allocation8 + $0xc0] sm:$0xff] }
 0xfec   :  { %12132 = vmatprep.subr.msk.bf16.mxu1 %vm14099_vm3, %v12130_v15  ;;  %13572 = vpow2.f32 %v10552_v51 }
 0xfef   :  { %12135 = vmatpush1.bf16.msk.msra.mxu1 %vm14099_vm3, %v12133_v50  ;;  %v5752_v50 = vld [vmem:[#allocation6 + $0x68] sm:$0xff] }
 0xff0   :  { %12174 = vmatprep.subr.bf16.mxu1 %v13921_v8 }
 0xff4   :  { %v13569_v60 = vpop.eup %13568 }
 0xff5   :  { %v13571_v25 = vpop.eup %13570 }
 0xff6   :  { %v13573_v16 = vpop.eup %13572  ;;  %v5690_v54 = vadd.f32 1.0, %v13571_v25  ;;  %v5761_v25 = vld [vmem:[#allocation6 + $0xb0] sm:$0xff] }
 0xff7   :  { %v5691_v46 = vadd.f32 1.0, %v13573_v16  ;;  %v5766_v16 = vld [vmem:[#allocation6 + $0xd8] sm:$0xff] }
 0xff8   :  { %13574 = vrcp.f32 %v5690_v54  ;;  %v5772_v54 = vld [vmem:[#allocation6 + $0x108] sm:$0xff] }
 0xff9   :  { %13576 = vrcp.f32 %v5691_v46  ;;  %v5777_v46 = vld [vmem:[#allocation6 + $0x130] sm:$0xff] }
0x1002   :  { %v13575_v31 = vpop.eup %13574 }
0x1003   :  { %v13577_v43 = vpop.eup %13576 }
0x1005   :  { %v5293_v62 = vpop.permute.xlu0 %5292 }
0x1006   :  { %v14979_v7 = vmul.f32 %v13567_v4, %v5293_v62  ;;  %v5295_v40 = vpop.permute.xlu1 %5294 }
0x1007   :  { %v5296_v0 = vsel %vm894_vm8, %v5293_v62, %v5295_v40  ;;  %v12244_v62 = vpack.c.bf16 %v5757_v5, %v5752_v50  ;;  %v5751_v40 = vld [vmem:[#allocation6 + $0x60] sm:$0xff]  ;;  %v5878_v50 = vld [vmem:[#allocation8 + $0x188] sm:$0xff] }
0x1008   :  { %v14982_v12 = vmul.f32 %v13569_v60, %v5296_v0  ;;  %5919 = vrot.lane.b32.xlu0 %v14979_v7, %s13926_s2  ;;  %v5756_v60 = vld [vmem:[#allocation6 + $0x88] sm:$0xff]  ;;  %v5762_v0 = vld [vmem:[#allocation6 + $0xb8] sm:$0xff] }
0x1009   :  { %v12246_v26 = vpack.c.bf16 %v5756_v60, %v5751_v40  ;;  %v12248_v51 = vpack.c.bf16 %v5767_v58, %v5762_v0  ;;  %v5888_v40 = vld [vmem:[#allocation8 + $0x1d8] sm:$0xff]  ;;  %v12260_v0 = vpack.c.bf16 %v5797_v6, %v5792_v52  ;;  %v5791_v58 = vld [vmem:[#allocation6 + $0x1a0] sm:$0xff]  ;;  %v5745_v6 = vld [vmem:[#allocation6 + $0x30] sm:$0xff] }
0x100a   :  { %v5303_v2 = vcombine.low %v14979_v7, %v14982_v12  ;;  %5921 = vrot.lane.b32.xlu1 %v14982_v12, %s13926_s2 }
0x104d   :  { %v5731_v1 = vpop.permute.xlu0 %5730 }
0x104e   :  { %v5737_v47 = vmul.f32 %v13575_v31, %v5731_v1  ;;  %v5733_v41 = vpop.permute.xlu1 %5732  ;;  %v12181_v31 = vpack.c.bf16 %v5858_v56, %v5853_v57  ;;  %v5802_v57 = vld [vmem:[#allocation6 + $0x1f8] sm:$0xff]  ;;  %v5807_v56 = vld [vmem:[#allocation6 + $0x220] sm:$0xff] }
0x104f   :  { %v5734_v15 = vsel %vm894_vm8, %v5731_v1, %v5733_v41  ;;  %v5863_v1 = vld [vmem:[#allocation8 + $0x110] sm:$0xff]  ;;  %v12250_v41 = vpack.c.bf16 %v5766_v16, %v5761_v25  ;;  %v5898_v25 = vld [vmem:[#allocation8 + $0x228] sm:$0xff] }
0x1050   :  { %v5738_v14 = vmul.f32 %v13577_v43, %v5734_v15  ;;  %6156 = vrot.lane.b32.xlu0 %v5737_v47, %s13926_s2  ;;  %v5868_v47 = vld [vmem:[#allocation8 + $0x138] sm:$0xff]  ;;  %v12252_v43 = vpack.c.bf16 %v5777_v46, %v5772_v54  ;;  %v5771_v15 = vld [vmem:[#allocation6 + $0x100] sm:$0xff]  ;;  %v12264_v54 = vpack.c.bf16 %v5807_v56, %v5802_v57  ;;  %v5801_v46 = vld [vmem:[#allocation6 + $0x1f0] sm:$0xff] }
0x1051   :  { %v12184_v49 = vpack.c.bf16 %v5868_v47, %v5863_v1  ;;  %v5812_v1 = vld [vmem:[#allocation6 + $0x248] sm:$0xff]  ;;  %v5817_v47 = vld [vmem:[#allocation6 + $0x270] sm:$0xff]  ;;  %v5750_v56 = vld [vmem:[#allocation6 + $0x58] sm:$0xff] }
0x1052   :  { %6158 = vrot.lane.b32.xlu1 %v5738_v14, %s13926_s2  ;;  %v5776_v14 = vld [vmem:[#allocation6 + $0x128] sm:$0xff] }
0x1053   :  { %v12254_v5 = vpack.c.bf16 %v5776_v14, %v5771_v15  ;;  %v5908_v15 = vld [vmem:[#allocation8 + $0x278] sm:$0xff] }
0x107a   :  { %v5920_v48 = vpop.permute.xlu0 %5919 }
0x107c   :  { %v5922_v19 = vpop.permute.xlu1 %5921 }
0x107d   :  { %10555 = vmatprep.mubr.msk.f32.mxu1 %vm577_vm0, %v5922_v19  ;;  %10558 = vmatprep.mubr.msk.f32.mxu0 %vm577_vm0, %v5922_v19  ;;  %v14999_v4 = vsel %vm1325_vm9, %v5920_v48, %v5922_v19  ;;  %v5781_v48 = vld [vmem:[#allocation6 + $0x150] sm:$0xff] }
0x107e   :  { %6007 = vmatmul.mubr.f32.vlgmr.msra.gmra.mrb[42].mxu1 %v14999_v4  ;;  %6078 = vmatmul.mubr.f32.vlgmr.msra.gmra.mrb[32].mxu0 %v14999_v4 }
0x107f   :  { %12176 = vmatpush1.bf16.msra.mxu1 %v12175_v53  ;;  %10560 = vmatprep.mubr.msk.f32.mxu1 %vm577_vm0, %v5922_v19  ;;  %v12256_v53 = vpack.c.bf16 %v5787_v13, %v5782_v61  ;;  %v5786_v19 = vld [vmem:[#allocation6 + $0x178] sm:$0xff]  ;;  %v12268_v61 = vpack.c.bf16 %v5817_v47, %v5812_v1  ;;  %v5811_v13 = vld [vmem:[#allocation6 + $0x240] sm:$0xff] }
0x1080   :  { %12177 = vmatprep.subr.bf16.mxu1 %v13921_v8  ;;  %12243 = vmatpush1.bf16.msra.mxu0 %v12242_v45  ;;  %v12187_v45 = vpack.c.bf16 %v5878_v50, %v5873_v35  ;;  %v12258_v60 = vpack.c.bf16 %v5786_v19, %v5781_v48  ;;  %v5822_v35 = vld [vmem:[#allocation6 + $0x298] sm:$0xff]  ;;  %v5827_v50 = vld [vmem:[#allocation6 + $0x2c0] sm:$0xf]  ;;  %v5740_v19 = vld [vmem:[#allocation6 + $0x8] sm:$0xff] }
0x1081   :  { %12245 = vmatprep.subr.bf16.mxu0 %v12244_v62  ;;  %v5883_v62 = vld [vmem:[#allocation8 + $0x1b0] sm:$0xff]  ;;  %v5918_v48 = vld [vmem:[#allocation8 + $0x2c8] sm:$0xf] }
0x1083   :  { %12179 = vmatpush1.bf16.msra.mxu1 %v12178_v37  ;;  %v5796_v37 = vld [vmem:[#allocation6 + $0x1c8] sm:$0xff] }
0x1084   :  { %12180 = vmatprep.subr.bf16.mxu1 %v13921_v8  ;;  %12247 = vmatpush1.bf16.msra.mxu0 %v12246_v26  ;;  %v12190_v26 = vpack.c.bf16 %v5888_v40, %v5883_v62  ;;  %v12262_v16 = vpack.c.bf16 %v5796_v37, %v5791_v58  ;;  %v5821_v62 = vld [vmem:[#allocation6 + $0x290] sm:$0xff]  ;;  %v5826_v40 = vld [vmem:[#allocation6 + $0x2b8] sm:$0xf]  ;;  %v5739_v58 = vld [vmem:[#allocation6] sm:$0xff] }
0x1085   :  { %12249 = vmatprep.subr.bf16.mxu0 %v12248_v51  ;;  %v5893_v51 = vld [vmem:[#allocation8 + $0x200] sm:$0xff]  ;;  %v5744_v37 = vld [vmem:[#allocation6 + $0x28] sm:$0xff]  ;;  %v12275_v57 = vpack.c.bf16 %v5826_v40, %v5821_v62 }
0x1086   :  { %v5789_v40 = vld [vmem:[#allocation6 + $0x190] sm:$0xff] }
0x1087   :  { %12182 = vmatpush1.bf16.msra.mxu1 %v12181_v31  ;;  %v5806_v31 = vld [vmem:[#allocation6 + $0x218] sm:$0xff] }
0x1088   :  { %12183 = vmatprep.subr.bf16.mxu1 %v13921_v8  ;;  %12251 = vmatpush1.bf16.msra.mxu0 %v12250_v41  ;;  %v12193_v41 = vpack.c.bf16 %v5898_v25, %v5893_v51  ;;  %v12266_v14 = vpack.c.bf16 %v5806_v31, %v5801_v46  ;;  %v12204_v51 = vpack.c.bf16 %v5744_v37, %v5739_v58  ;;  %v5760_v46 = vld [vmem:[#allocation6 + $0xa8] sm:$0xff]  ;;  %v5765_v31 = vld [vmem:[#allocation6 + $0xd0] sm:$0xff] }
0x1089   :  { %12253 = vmatprep.subr.bf16.mxu0 %v12252_v43  ;;  %v5903_v43 = vld [vmem:[#allocation8 + $0x250] sm:$0xff]  ;;  %v12210_v47 = vpack.c.bf16 %v5765_v31, %v5760_v46  ;;  %v5805_v58 = vld [vmem:[#allocation6 + $0x210] sm:$0xff]  ;;  %v5814_v31 = vld [vmem:[#allocation6 + $0x258] sm:$0xff] }
0x108a   :  { %v5809_v46 = vld [vmem:[#allocation6 + $0x230] sm:$0xff] }
0x108b   :  { %12185 = vmatpush1.bf16.msra.mxu1 %v12184_v49  ;;  %v5816_v49 = vld [vmem:[#allocation6 + $0x268] sm:$0xff] }
0x108c   :  { %12186 = vmatprep.subr.bf16.mxu1 %v13921_v8  ;;  %12255 = vmatpush1.bf16.msra.mxu0 %v12254_v5  ;;  %v12196_v5 = vpack.c.bf16 %v5908_v15, %v5903_v43  ;;  %v12270_v52 = vpack.c.bf16 %v5816_v49, %v5811_v13  ;;  %v5764_v43 = vld [vmem:[#allocation6 + $0xc8] sm:$0xff]  ;;  %v5770_v15 = vld [vmem:[#allocation6 + $0xf8] sm:$0xff]  ;;  %v5769_v49 = vld [vmem:[#allocation6 + $0xf0] sm:$0xff] }
0x108d   :  { %12257 = vmatprep.subr.bf16.mxu0 %v12256_v53  ;;  %v5913_v53 = vld [vmem:[#allocation8 + $0x2a0] sm:$0xff] }
0x108f   :  { %12188 = vmatpush1.bf16.msra.mxu1 %v12187_v45  ;;  %v12272_v45 = vpack.c.bf16 %v5827_v50, %v5822_v35  ;;  %v5774_v35 = vld [vmem:[#allocation6 + $0x118] sm:$0xff]  ;;  %v5780_v50 = vld [vmem:[#allocation6 + $0x148] sm:$0xff] }
0x1090   :  { %12189 = vmatprep.subr.bf16.mxu1 %v13921_v8  ;;  %12259 = vmatpush1.bf16.msra.mxu0 %v12258_v60  ;;  %v12199_v60 = vpack.c.bf16 %v5918_v48, %v5913_v53  ;;  %v12216_v53 = vpack.c.bf16 %v5774_v35, %v5769_v49  ;;  %v5779_v48 = vld [vmem:[#allocation6 + $0x140] sm:$0xff] }
0x1091   :  { %12261 = vmatprep.subr.bf16.mxu0 %v12260_v0  ;;  %v12202_v0 = vpack.c.bf16 %v5745_v6, %v5740_v19  ;;  %v5784_v19 = vld [vmem:[#allocation6 + $0x168] sm:$0xff]  ;;  %v5795_v6 = vld [vmem:[#allocation6 + $0x1c0] sm:$0xff] }
0x1092   :  { %v5743_v35 = vld [vmem:[#allocation6 + $0x20] sm:$0xff] }
0x1093   :  { %12191 = vmatpush1.bf16.msra.mxu1 %v12190_v26  ;;  %v5755_v26 = vld [vmem:[#allocation6 + $0x80] sm:$0xff] }
0x1094   :  { %12192 = vmatprep.subr.bf16.mxu1 %v13921_v8  ;;  %12263 = vmatpush1.bf16.msra.mxu0 %v12262_v16  ;;  %v12206_v25 = vpack.c.bf16 %v5755_v26, %v5750_v56  ;;  %v5749_v16 = vld [vmem:[#allocation6 + $0x50] sm:$0xff]  ;;  %v5799_v56 = vld [vmem:[#allocation6 + $0x1e0] sm:$0xff]  ;;  %v5804_v26 = vld [vmem:[#allocation6 + $0x208] sm:$0xff] }
0x1095   :  { %12265 = vmatprep.subr.bf16.mxu0 %v12264_v54  ;;  %v5754_v54 = vld [vmem:[#allocation6 + $0x78] sm:$0xff] }
0x1096   :  { %v12208_v1 = vpack.c.bf16 %v5754_v54, %v5749_v16  ;;  %v12228_v16 = vpack.c.bf16 %v5804_v26, %v5799_v56  ;;  %v6554_v56 = vld [vmem:[#allocation3 + $0xa8] sm:$0xff]  ;;  %v6559_v26 = vld [vmem:[#allocation3 + $0xd0] sm:$0xff] }
0x1097   :  { %12194 = vmatpush1.bf16.msra.mxu1 %v12193_v41  ;;  %v5759_v41 = vld [vmem:[#allocation6 + $0xa0] sm:$0xff] }
0x1098   :  { %12195 = vmatprep.subr.bf16.mxu1 %v13921_v8  ;;  %12267 = vmatpush1.bf16.msra.mxu0 %v12266_v14  ;;  %v5775_v14 = vld [vmem:[#allocation6 + $0x120] sm:$0xff] }
0x1099   :  { %12269 = vmatprep.subr.bf16.mxu0 %v12268_v61  ;;  %v12212_v61 = vpack.c.bf16 %v5764_v43, %v5759_v41  ;;  %v12214_v13 = vpack.c.bf16 %v5775_v14, %v5770_v15  ;;  %v12232_v41 = vpack.c.bf16 %v5814_v31, %v5809_v46  ;;  %v5819_v15 = vld [vmem:[#allocation6 + $0x280] sm:$0xff]  ;;  %v5824_v14 = vld [vmem:[#allocation6 + $0x2a8] sm:$0xf]  ;;  %v12314_v46 = vpack.c.bf16 %v6559_v26, %v6554_v56  ;;  %v6553_v31 = vld [vmem:[#allocation3 + $0xa0] sm:$0xff] }
0x109a   :  { %v12237_v49 = vpack.c.bf16 %v5824_v14, %v5819_v15  ;;  %v5773_v14 = vld [vmem:[#allocation6 + $0x110] sm:$0xff]  ;;  %v5798_v56 = vld [vmem:[#allocation6 + $0x1d8] sm:$0xff] }
0x109b   :  { %12197 = vmatpush1.bf16.msra.mxu1 %v12196_v5  ;;  %v5785_v5 = vld [vmem:[#allocation6 + $0x170] sm:$0xff] }
0x109c   :  { %12198 = vmatprep.subr.bf16.mxu1 %v13921_v8  ;;  %12271 = vmatpush1.bf16.msra.mxu0 %v12270_v52  ;;  %v5790_v52 = vld [vmem:[#allocation6 + $0x198] sm:$0xff] }
0x109d   :  { %12274 = vmatprep.subr.msk.bf16.mxu0 %vm14099_vm3, %v12272_v45  ;;  %v12220_v45 = vpack.c.bf16 %v5784_v19, %v5779_v48  ;;  %v12222_v62 = vpack.c.bf16 %v5795_v6, %v5790_v52  ;;  %v6544_v48 = vld [vmem:[#allocation3 + $0x58] sm:$0xff]  ;;  %v6549_v19 = vld [vmem:[#allocation3 + $0x80] sm:$0xff] }
0x109f   :  { %12201 = vmatpush1.bf16.msk.msra.mxu1 %vm14099_vm3, %v12199_v60  ;;  %v5794_v60 = vld [vmem:[#allocation6 + $0x1b8] sm:$0xff] }
0x10a0   :  { %12203 = vmatprep.subr.bf16.mxu1 %v12202_v0  ;;  %12277 = vmatpush1.bf16.msk.msra.mxu0 %vm14099_vm3, %v12275_v57  ;;  %v5800_v0 = vld [vmem:[#allocation6 + $0x1e8] sm:$0xff]  ;;  %v12224_v37 = vpack.c.bf16 %v5794_v60, %v5789_v40  ;;  %v5753_v40 = vld [vmem:[#allocation6 + $0x70] sm:$0xff]  ;;  %v5758_v60 = vld [vmem:[#allocation6 + $0x98] sm:$0xff] }
0x10a1   :  { %12278 = vmatprep.subr.bf16.mxu0 %v13921_v8  ;;  %v12226_v57 = vpack.c.bf16 %v5805_v58, %v5800_v0  ;;  %v12310_v58 = vpack.c.bf16 %v6549_v19, %v6544_v48  ;;  %v5783_v48 = vld [vmem:[#allocation6 + $0x160] sm:$0xff]  ;;  %v5788_v19 = vld [vmem:[#allocation6 + $0x188] sm:$0xff] }
0x10a2   :  { %6149 = vmatmul.mubr.f32.vlgmr.msra.gmra.mrb[44].mxu1 %v14999_v4  ;;  %v12218_v4 = vpack.c.bf16 %v5785_v5, %v5780_v50  ;;  %v5748_v50 = vld [vmem:[#allocation6 + $0x48] sm:$0xff] }
0x10a3   :  { %12205 = vmatpush1.bf16.msra.mxu1 %v12204_v51  ;;  %v5810_v51 = vld [vmem:[#allocation6 + $0x238] sm:$0xff]  ;;  %v12279_v52 = vpack.c.bf16 %v5748_v50, %v5743_v35  ;;  %v6568_v35 = vld [vmem:[#allocation3 + $0x118] sm:$0xff] }
0x10a4   :  { %12207 = vmatprep.subr.bf16.mxu1 %v12206_v25  ;;  %v5815_v25 = vld [vmem:[#allocation6 + $0x260] sm:$0xff]  ;;  %v6574_v50 = vld [vmem:[#allocation3 + $0x148] sm:$0xff] }
0x10a5   :  { %v12230_v54 = vpack.c.bf16 %v5815_v25, %v5810_v51  ;;  %v12282_v51 = vpack.c.bf16 %v5758_v60, %v5753_v40  ;;  %v6584_v40 = vld [vmem:[#allocation3 + $0x198] sm:$0xff]  ;;  %v6589_v60 = vld [vmem:[#allocation3 + $0x1c0] sm:$0xff] }
0x10a6   :  { %v12326_v26 = vpack.c.bf16 %v6589_v60, %v6584_v40  ;;  %v5828_v40 = vld [vmem:[#allocation6 + $0x2c8] sm:$0xf]  ;;  %v6613_v60 = vld [vmem:[#allocation3 + $0x280] sm:$0xff] }
0x10a7   :  { %12209 = vmatpush1.bf16.msra.mxu1 %v12208_v1  ;;  %v5820_v1 = vld [vmem:[#allocation6 + $0x288] sm:$0xff] }
0x10a8   :  { %12211 = vmatprep.subr.bf16.mxu1 %v12210_v47  ;;  %v5825_v47 = vld [vmem:[#allocation6 + $0x2b0] sm:$0xf] }
0x10a9   :  { %v12234_v43 = vpack.c.bf16 %v5825_v47, %v5820_v1  ;;  %v6558_v1 = vld [vmem:[#allocation3 + $0xc8] sm:$0xff]  ;;  %v6564_v47 = vld [vmem:[#allocation3 + $0xf8] sm:$0xff] }
0x10aa   :  { %v12316_v15 = vpack.c.bf16 %v6558_v1, %v6553_v31  ;;  %v5803_v1 = vld [vmem:[#allocation6 + $0x200] sm:$0xff] }
0x10ab   :  { %12213 = vmatpush1.bf16.msra.mxu1 %v12212_v61  ;;  %v6534_v61 = vld [vmem:[#allocation3 + $0x8] sm:$0xff] }
0x10ac   :  { %12215 = vmatprep.subr.bf16.mxu1 %v12214_v13  ;;  %v6539_v13 = vld [vmem:[#allocation3 + $0x30] sm:$0xff] }
0x10ad   :  { %v12306_v5 = vpack.c.bf16 %v6539_v13, %v6534_v61  ;;  %v5778_v61 = vld [vmem:[#allocation6 + $0x138] sm:$0xff] }
0x10af   :  { %12217 = vmatpush1.bf16.msra.mxu1 %v12216_v53  ;;  %v6533_v53 = vld [vmem:[#allocation3] sm:$0xff] }
0x10b0   :  { %12219 = vmatprep.subr.bf16.mxu1 %v12218_v4  ;;  %v6538_v4 = vld [vmem:[#allocation3 + $0x28] sm:$0xff] }
0x10b3   :  { %12221 = vmatpush1.bf16.msra.mxu1 %v12220_v45 }
0x10b4   :  { %12223 = vmatprep.subr.bf16.mxu1 %v12222_v62  ;;  %v12308_v62 = vpack.c.bf16 %v6538_v4, %v6533_v53  ;;  %v12288_v53 = vpack.c.bf16 %v5778_v61, %v5773_v14  ;;  %v6604_v14 = vld [vmem:[#allocation3 + $0x238] sm:$0xff]  ;;  %v6609_v61 = vld [vmem:[#allocation3 + $0x260] sm:$0xff] }
0x10b7   :  { %12225 = vmatpush1.bf16.msra.mxu1 %v12224_v37  ;;  %v6543_v37 = vld [vmem:[#allocation3 + $0x50] sm:$0xff] }
0x10b8   :  { %12227 = vmatprep.subr.bf16.mxu1 %v12226_v57  ;;  %v6548_v57 = vld [vmem:[#allocation3 + $0x78] sm:$0xff] }
0x10b9   :  { %v12312_v25 = vpack.c.bf16 %v6548_v57, %v6543_v37  ;;  %v5793_v57 = vld [vmem:[#allocation6 + $0x1b0] sm:$0xff] }
0x10bb   :  { %12229 = vmatpush1.bf16.msra.mxu1 %v12228_v16  ;;  %v5763_v16 = vld [vmem:[#allocation6 + $0xc0] sm:$0xff] }
0x10bc   :  { %12231 = vmatprep.subr.bf16.mxu1 %v12230_v54  ;;  %v5768_v54 = vld [vmem:[#allocation6 + $0xe8] sm:$0xff] }
0x10bf   :  { %12233 = vmatpush1.bf16.msra.mxu1 %v12232_v41  ;;  %v6569_v41 = vld [vmem:[#allocation3 + $0x120] sm:$0xff] }
0x10c0   :  { %12236 = vmatprep.subr.msk.bf16.mxu1 %vm14099_vm3, %v12234_v43  ;;  %v12285_v43 = vpack.c.bf16 %v5768_v54, %v5763_v16  ;;  %v12318_v13 = vpack.c.bf16 %v6569_v41, %v6564_v47  ;;  %v6594_v16 = vld [vmem:[#allocation3 + $0x1e8] sm:$0xff]  ;;  %v6599_v54 = vld [vmem:[#allocation3 + $0x210] sm:$0xff]  ;;  %v5808_v47 = vld [vmem:[#allocation6 + $0x228] sm:$0xff] }
0x10c1   :  { %v12330_v41 = vpack.c.bf16 %v6599_v54, %v6594_v16  ;;  %v6535_v16 = vld [vmem:[#allocation3 + $0x10] sm:$0xff]  ;;  %v6540_v54 = vld [vmem:[#allocation3 + $0x38] sm:$0xff] }
0x10c2   :  { %v6157_v6 = vpop.permute.xlu0 %6156 }
0x10c3   :  { %12239 = vmatpush1.bf16.msk.msra.mxu1 %vm14099_vm3, %v12237_v49  ;;  %v6563_v49 = vld [vmem:[#allocation3 + $0xf0] sm:$0xff] }
0x10c4   :  { %v15024_v45 = vpop.permute.xlu1 %6158  ;;  %12307 = vmatprep.subr.bf16.mxu1 %v12306_v5  ;;  %v6579_v5 = vld [vmem:[#allocation3 + $0x170] sm:$0xff]  ;;  %v12320_v4 = vpack.c.bf16 %v6568_v35, %v6563_v49  ;;  %v5813_v35 = vld [vmem:[#allocation6 + $0x250] sm:$0xff] }
0x10c5   :  { %10563 = vmatprep.mubr.msk.f32.mxu1 %vm577_vm0, %v15024_v45  ;;  %10566 = vmatprep.mubr.msk.f32.mxu0 %vm577_vm0, %v15024_v45  ;;  %v15032_v0 = vsel %vm1325_vm9, %v6157_v6, %v15024_v45  ;;  %v6573_v6 = vld [vmem:[#allocation3 + $0x140] sm:$0xff] }
0x10c6   :  { %6244 = vmatmul.mubr.f32.vlgmr.msra.gmra.mrb[42].mxu1 %v15032_v0  ;;  %6315 = vmatmul.mubr.f32.vlgmr.msra.gmra.mrb[32].mxu0 %v15032_v0 }
0x10c7   :  { %12280 = vmatpush1.bf16.msra.mxu0 %v12279_v52  ;;  %10568 = vmatprep.mubr.msk.f32.mxu0 %vm577_vm0, %v15024_v45  ;;  %v12322_v52 = vpack.c.bf16 %v6579_v5, %v6574_v50  ;;  %v5818_v50 = vld [vmem:[#allocation6 + $0x278] sm:$0xff]  ;;  %v12334_v5 = vpack.c.bf16 %v6609_v61, %v6604_v14  ;;  %v6547_v61 = vld [vmem:[#allocation3 + $0x70] sm:$0xff] }
0x10c8   :  { %12309 = vmatpush1.bf16.msra.mxu1 %v12308_v62  ;;  %10576 = vmatprep.mubr.msk.f32.mxu1 %vm577_vm0, %v15024_v45  ;;  %v6578_v62 = vld [vmem:[#allocation3 + $0x168] sm:$0xff] }
0x10c9   :  { %12281 = vmatprep.subr.bf16.mxu0 %v13921_v8  ;;  %12311 = vmatprep.subr.bf16.mxu1 %v12310_v58  ;;  %v12291_v58 = vpack.c.bf16 %v5788_v19, %v5783_v48  ;;  %v12324_v37 = vpack.c.bf16 %v6578_v62, %v6573_v6  ;;  %v6614_v48 = vld [vmem:[#allocation3 + $0x288] sm:$0xff]  ;;  %v6619_v19 = vld [vmem:[#allocation3 + $0x2b0] sm:$0xf] }
0x10ca   :  { %v5823_v62 = vld [vmem:[#allocation6 + $0x2a0] sm:$0xff]  ;;  %v6550_v14 = vld [vmem:[#allocation3 + $0x88] sm:$0xff] }
0x10cb   :  { %12283 = vmatpush1.bf16.msra.mxu0 %v12282_v51  ;;  %v6583_v51 = vld [vmem:[#allocation3 + $0x190] sm:$0xff] }
0x10cc   :  { %12313 = vmatpush1.bf16.msra.mxu1 %v12312_v25  ;;  %12284 = vmatprep.subr.bf16.mxu0 %v13921_v8  ;;  %v6588_v25 = vld [vmem:[#allocation3 + $0x1b8] sm:$0xff] }
0x10cd   :  { %12315 = vmatprep.subr.bf16.mxu1 %v12314_v46  ;;  %v12294_v46 = vpack.c.bf16 %v5798_v56, %v5793_v57  ;;  %v12328_v31 = vpack.c.bf16 %v6588_v25, %v6583_v51  ;;  %v6536_v57 = vld [vmem:[#allocation3 + $0x18] sm:$0xff]  ;;  %v6541_v56 = vld [vmem:[#allocation3 + $0x40] sm:$0xff] }
0x10ce   :  { %v12344_v25 = vpack.c.bf16 %v6541_v56, %v6536_v57  ;;  %v6565_v57 = vld [vmem:[#allocation3 + $0x100] sm:$0xff]  ;;  %v6570_v56 = vld [vmem:[#allocation3 + $0x128] sm:$0xff] }
0x10cf   :  { %12286 = vmatpush1.bf16.msra.mxu0 %v12285_v43  ;;  %v6593_v43 = vld [vmem:[#allocation3 + $0x1e0] sm:$0xff] }
0x10d0   :  { %12317 = vmatpush1.bf16.msra.mxu1 %v12316_v15  ;;  %12287 = vmatprep.subr.bf16.mxu0 %v13921_v8  ;;  %v6598_v15 = vld [vmem:[#allocation3 + $0x208] sm:$0xff] }
0x10d1   :  { %12319 = vmatprep.subr.bf16.mxu1 %v12318_v13  ;;  %v12297_v13 = vpack.c.bf16 %v5808_v47, %v5803_v1  ;;  %v12332_v49 = vpack.c.bf16 %v6598_v15, %v6593_v43  ;;  %v6546_v1 = vld [vmem:[#allocation3 + $0x68] sm:$0xff]  ;;  %v6551_v47 = vld [vmem:[#allocation3 + $0x90] sm:$0xff]  ;;  %v6545_v15 = vld [vmem:[#allocation3 + $0x60] sm:$0xff] }
0x10d3   :  { %12289 = vmatpush1.bf16.msra.mxu0 %v12288_v53  ;;  %v6603_v53 = vld [vmem:[#allocation3 + $0x230] sm:$0xff] }
0x10d4   :  { %12321 = vmatpush1.bf16.msra.mxu1 %v12320_v4  ;;  %12290 = vmatprep.subr.bf16.mxu0 %v13921_v8  ;;  %v6608_v4 = vld [vmem:[#allocation3 + $0x258] sm:$0xff] }
0x10d5   :  { %12323 = vmatprep.subr.bf16.mxu1 %v12322_v52  ;;  %v12300_v52 = vpack.c.bf16 %v5818_v50, %v5813_v35  ;;  %v12336_v6 = vpack.c.bf16 %v6608_v4, %v6603_v53  ;;  %v6556_v35 = vld [vmem:[#allocation3 + $0xb8] sm:$0xff]  ;;  %v6561_v50 = vld [vmem:[#allocation3 + $0xe0] sm:$0xff] }
0x10d6   :  { %v12352_v4 = vpack.c.bf16 %v6561_v50, %v6556_v35  ;;  %v6590_v35 = vld [vmem:[#allocation3 + $0x1c8] sm:$0xff]  ;;  %v6587_v50 = vld [vmem:[#allocation3 + $0x1b0] sm:$0xff] }
0x10d7   :  { %12292 = vmatpush1.bf16.msra.mxu0 %v12291_v58  ;;  %v12338_v58 = vpack.c.bf16 %v6619_v19, %v6614_v48  ;;  %v6555_v48 = vld [vmem:[#allocation3 + $0xb0] sm:$0xff]  ;;  %v6560_v19 = vld [vmem:[#allocation3 + $0xd8] sm:$0xff] }
0x10d8   :  { %12325 = vmatpush1.bf16.msra.mxu1 %v12324_v37  ;;  %12293 = vmatprep.subr.bf16.mxu0 %v13921_v8  ;;  %v6618_v37 = vld [vmem:[#allocation3 + $0x2a8] sm:$0xf] }
0x10d9   :  { %12327 = vmatprep.subr.bf16.mxu1 %v12326_v26  ;;  %v12303_v26 = vpack.c.bf16 %v5828_v40, %v5823_v62  ;;  %v12341_v51 = vpack.c.bf16 %v6618_v37, %v6613_v60  ;;  %v6566_v62 = vld [vmem:[#allocation3 + $0x108] sm:$0xff]  ;;  %v6571_v40 = vld [vmem:[#allocation3 + $0x130] sm:$0xff]  ;;  %v12354_v60 = vpack.c.bf16 %v6560_v19, %v6555_v48 }
0x10da   :  { %v12356_v37 = vpack.c.bf16 %v6571_v40, %v6566_v62  ;;  %v6600_v62 = vld [vmem:[#allocation3 + $0x218] sm:$0xff]  ;;  %v6597_v40 = vld [vmem:[#allocation3 + $0x200] sm:$0xff] }
0x10db   :  { %12295 = vmatpush1.bf16.msra.mxu0 %v12294_v46  ;;  %v6537_v46 = vld [vmem:[#allocation3 + $0x20] sm:$0xff] }
0x10dc   :  { %12329 = vmatpush1.bf16.msra.mxu1 %v12328_v31  ;;  %12296 = vmatprep.subr.bf16.mxu0 %v13921_v8  ;;  %v6542_v31 = vld [vmem:[#allocation3 + $0x48] sm:$0xff] }
0x10dd   :  { %12331 = vmatprep.subr.bf16.mxu1 %v12330_v41  ;;  %v12346_v41 = vpack.c.bf16 %v6540_v54, %v6535_v16  ;;  %v12383_v43 = vpack.c.bf16 %v6542_v31, %v6537_v46  ;;  %v12358_v16 = vpack.c.bf16 %v6570_v56, %v6565_v57  ;;  %v6575_v31 = vld [vmem:[#allocation3 + $0x150] sm:$0xff] }
0x10df   :  { %12298 = vmatpush1.bf16.msra.mxu0 %v12297_v13  ;;  %v12348_v13 = vpack.c.bf16 %v6551_v47, %v6546_v1  ;;  %v6580_v1 = vld [vmem:[#allocation3 + $0x178] sm:$0xff]  ;;  %v6577_v47 = vld [vmem:[#allocation3 + $0x160] sm:$0xff] }
0x10e0   :  { %12333 = vmatpush1.bf16.msra.mxu1 %v12332_v49  ;;  %12299 = vmatprep.subr.bf16.mxu0 %v13921_v8  ;;  %v6552_v49 = vld [vmem:[#allocation3 + $0x98] sm:$0xff] }
0x10e1   :  { %12335 = vmatprep.subr.bf16.mxu1 %v12334_v5  ;;  %v12350_v5 = vpack.c.bf16 %v6550_v14, %v6545_v15  ;;  %v12386_v53 = vpack.c.bf16 %v6552_v49, %v6547_v61  ;;  %v6591_v15 = vld [vmem:[#allocation3 + $0x1d0] sm:$0xff]  ;;  %v12362_v14 = vpack.c.bf16 %v6580_v1, %v6575_v31  ;;  %v6585_v49 = vld [vmem:[#allocation3 + $0x1a0] sm:$0xff] }
0x10e2   :  { %v12366_v48 = vpack.c.bf16 %v6590_v35, %v6585_v49 }
0x10e3   :  { %12301 = vmatpush1.bf16.msra.mxu0 %v12300_v52  ;;  %v6557_v52 = vld [vmem:[#allocation3 + $0xc0] sm:$0xff] }
0x10e4   :  { %12337 = vmatpush1.bf16.msra.mxu1 %v12336_v6  ;;  %12302 = vmatprep.subr.bf16.mxu0 %v13921_v8  ;;  %v6562_v6 = vld [vmem:[#allocation3 + $0xe8] sm:$0xff] }
0x10e5   :  { %12340 = vmatprep.subr.msk.bf16.mxu1 %vm14099_vm3, %v12338_v58  ;;  %v12389_v58 = vpack.c.bf16 %v6562_v6, %v6557_v52  ;;  %v6595_v6 = vld [vmem:[#allocation3 + $0x1f0] sm:$0xff] }
0x10e6   :  { %v12370_v57 = vpack.c.bf16 %v6600_v62, %v6595_v6 }
0x10e7   :  { %12305 = vmatpush1.bf16.msk.msra.mxu0 %vm14099_vm3, %v12303_v26  ;;  %v6567_v26 = vld [vmem:[#allocation3 + $0x110] sm:$0xff] }
0x10e8   :  { %12343 = vmatpush1.bf16.msk.msra.mxu1 %vm14099_vm3, %v12341_v51  ;;  %12345 = vmatprep.subr.bf16.mxu0 %v12344_v25  ;;  %v6572_v51 = vld [vmem:[#allocation3 + $0x138] sm:$0xff] }
0x10e9   :  { %12382 = vmatprep.subr.bf16.mxu1 %v13921_v8  ;;  %v6576_v25 = vld [vmem:[#allocation3 + $0x158] sm:$0xff]  ;;  %v12392_v54 = vpack.c.bf16 %v6572_v51, %v6567_v26  ;;  %v6605_v51 = vld [vmem:[#allocation3 + $0x240] sm:$0xff] }
0x10ea   :  { %6386 = vmatmul.mubr.f32.vlgmr.msra.gmra.mrb[34].mxu0 %v15032_v0 }
0x10eb   :  { %6703 = vmatmul.mubr.f32.vlgmr.msra.gmra.mrb[46].mxu1 %v15032_v0  ;;  %12347 = vmatpush1.bf16.msra.mxu0 %v12346_v41  ;;  %v6582_v41 = vld [vmem:[#allocation3 + $0x188] sm:$0xff] }
0x10ec   :  { %10579 = vmatprep.mubr.msk.f32.mxu0 %vm577_vm0, %v15024_v45  ;;  %12384 = vmatpush1.bf16.msra.mxu1 %v12383_v43  ;;  %v6586_v43 = vld [vmem:[#allocation3 + $0x1a8] sm:$0xff]  ;;  %v12395_v61 = vpack.c.bf16 %v6582_v41, %v6577_v47  ;;  %v6615_v41 = vld [vmem:[#allocation3 + $0x290] sm:$0xff] }
0x10ed   :  { %10581 = vmatprep.mubr.msk.f32.mxu1 %vm577_vm0, %v15024_v45  ;;  %12349 = vmatprep.subr.bf16.mxu0 %v12348_v13  ;;  %v6581_v45 = vld [vmem:[#allocation3 + $0x180] sm:$0xff]  ;;  %v12364_v13 = vpack.c.bf16 %v6591_v15, %v6586_v43  ;;  %v6620_v43 = vld [vmem:[#allocation3 + $0x2b8] sm:$0xf] }
0x10ee   :  { %12385 = vmatprep.subr.bf16.mxu1 %v13921_v8  ;;  %v12360_v46 = vpack.c.bf16 %v6581_v45, %v6576_v25  ;;  %v6610_v25 = vld [vmem:[#allocation3 + $0x268] sm:$0xff]  ;;  %v6607_v45 = vld [vmem:[#allocation3 + $0x250] sm:$0xff]  ;;  %v6617_v15 = vld [vmem:[#allocation3 + $0x2a0] sm:$0xff] }
0x10ef   :  { %12351 = vmatpush1.bf16.msra.mxu0 %v12350_v5  ;;  %v6592_v5 = vld [vmem:[#allocation3 + $0x1d8] sm:$0xff]  ;;  %v12374_v31 = vpack.c.bf16 %v6610_v25, %v6605_v51 }
0x10f0   :  { %12387 = vmatpush1.bf16.msra.mxu1 %v12386_v53  ;;  %12353 = vmatprep.subr.bf16.mxu0 %v12352_v4  ;;  %v6596_v53 = vld [vmem:[#allocation3 + $0x1f8] sm:$0xff]  ;;  %v6601_v4 = vld [vmem:[#allocation3 + $0x220] sm:$0xff]  ;;  %v12398_v19 = vpack.c.bf16 %v6592_v5, %v6587_v50 }
0x10f1   :  { %12388 = vmatprep.subr.bf16.mxu1 %v13921_v8  ;;  %v12368_v52 = vpack.c.bf16 %v6601_v4, %v6596_v53  ;;  %v6391_v50 = vld [vmem:[%s15862_s9] sm:$0x1f] }
0x10f2   :  { %v6396_v5 = vrot.slane %v6391_v50, %v14211_v10  ;;  %v6404_v53 = vrot.slane %v6391_v50, %v14226_v21  ;;  %v6400_v4 = vrot.slane %v6391_v50, %v14214_v11 }
0x10f3   :  { %12355 = vmatpush1.bf16.msra.mxu0 %v12354_v60  ;;  %v6602_v60 = vld [vmem:[#allocation3 + $0x228] sm:$0xff] }
0x10f4   :  { %12390 = vmatpush1.bf16.msra.mxu1 %v12389_v58  ;;  %12357 = vmatprep.subr.bf16.mxu0 %v12356_v37  ;;  %v6606_v58 = vld [vmem:[#allocation3 + $0x248] sm:$0xff]  ;;  %v6611_v37 = vld [vmem:[#allocation3 + $0x270] sm:$0xff]  ;;  %v12401_v56 = vpack.c.bf16 %v6602_v60, %v6597_v40 }
0x10f5   :  { %12391 = vmatprep.subr.bf16.mxu1 %v13921_v8  ;;  %v12372_v26 = vpack.c.bf16 %v6611_v37, %v6606_v58 }
0x10f7   :  { %12359 = vmatpush1.bf16.msra.mxu0 %v12358_v16  ;;  %v6612_v16 = vld [vmem:[#allocation3 + $0x278] sm:$0xff] }
0x10f8   :  { %12393 = vmatpush1.bf16.msra.mxu1 %v12392_v54  ;;  %12361 = vmatprep.subr.bf16.mxu0 %v12360_v46  ;;  %v6616_v54 = vld [vmem:[#allocation3 + $0x298] sm:$0xff]  ;;  %v6621_v46 = vld [vmem:[#allocation3 + $0x2c0] sm:$0xf]  ;;  %v12404_v1 = vpack.c.bf16 %v6612_v16, %v6607_v45 }
0x10f9   :  { %12394 = vmatprep.subr.bf16.mxu1 %v13921_v8  ;;  %v12376_v47 = vpack.c.bf16 %v6621_v46, %v6616_v54 }
0x10fb   :  { %12363 = vmatpush1.bf16.msra.mxu0 %v12362_v14  ;;  %v6622_v14 = vld [vmem:[#allocation3 + $0x2c8] sm:$0xf] }
0x10fc   :  { %12396 = vmatpush1.bf16.msra.mxu1 %v12395_v61  ;;  %12365 = vmatprep.subr.bf16.mxu0 %v12364_v13  ;;  %v12379_v61 = vpack.c.bf16 %v6620_v43, %v6615_v41  ;;  %v12407_v13 = vpack.c.bf16 %v6622_v14, %v6617_v15 }
0x10fd   :  { %12397 = vmatprep.subr.bf16.mxu1 %v13921_v8 }
0x10ff   :  { %12367 = vmatpush1.bf16.msra.mxu0 %v12366_v48  ;;  %v6408_v48 = vrot.slane %v6391_v50, %v14229_v22 }
0x1100   :  { %12399 = vmatpush1.bf16.msra.mxu1 %v12398_v19  ;;  %12369 = vmatprep.subr.bf16.mxu0 %v12368_v52 }
0x1101   :  { %12400 = vmatprep.subr.bf16.mxu1 %v13921_v8 }
0x1103   :  { %12371 = vmatpush1.bf16.msra.mxu0 %v12370_v57 }
0x1104   :  { %12402 = vmatpush1.bf16.msra.mxu1 %v12401_v56  ;;  %12373 = vmatprep.subr.bf16.mxu0 %v12372_v26  ;;  %v6412_v56 = vrot.slane %v6391_v50, %v14232_v23 }
0x1105   :  { %12403 = vmatprep.subr.bf16.mxu1 %v13921_v8 }
0x1107   :  { %12375 = vmatpush1.bf16.msra.mxu0 %v12374_v31 }
0x1108   :  { %12405 = vmatpush1.bf16.msra.mxu1 %v12404_v1  ;;  %12378 = vmatprep.subr.msk.bf16.mxu0 %vm14099_vm3, %v12376_v47 }
0x1109   :  { %12406 = vmatprep.subr.bf16.mxu1 %v13921_v8 }
0x110b   :  { %12381 = vmatpush1.bf16.msk.msra.mxu0 %vm14099_vm3, %v12379_v61 }
0x110c   :  { %12409 = vmatpush1.bf16.msk.msra.mxu1 %vm14099_vm3, %v12407_v13 }
0x110e   :  { %6774 = vmatmul.mubr.f32.vlgmr.msra.gmra.mrb[36].mxu0 %v15032_v0 }
0x110f   :  { %6845 = vmatmul.mubr.f32.vlgmr.msra.gmra.mrb[48].mxu1 %v15032_v0 }
0x1175   :  { %v6150_v49 = vpop.f32.mrb[44].mxu1 }
0x1176   :  { %v6152_v35 = vpop.f32.mrb[45].mxu1 }
0x1199   :  { %v6245_v19 = vpop.f32.mrb[42].mxu1  ;;  %v6316_v52 = vpop.f32.mrb[32].mxu0 }
0x119a   :  { %v6418_v6 = vadd.f32 %v6396_v5, %v6245_v19  ;;  %v15084_v62 = vadd.f32 %v6404_v53, %v6316_v52  ;;  %v6247_v0 = vpop.f32.mrb[43].mxu1  ;;  %v6318_v40 = vpop.f32.mrb[33].mxu0 }
0x119b   :  { %v6419_v60 = vadd.f32 %v6400_v4, %v6247_v0  ;;  %v15086_v58 = vadd.f32 %v6408_v48, %v6318_v40  ;;  %v6905_v4 = vrot.slane %v14962_v27, 6 }
0x119c   :  { %13578 = vtanh.f32 %v15084_v62  ;;  %v10569_v53 = vmul.f32 -1.442695, %v6418_v6 }
0x119d   :  { %13580 = vtanh.f32 %v15086_v58  ;;  %v10570_v5 = vmul.f32 -1.442695, %v6419_v60 }
0x11a6   :  { %v13579_v37 = vpop.eup %13578 }
0x11a7   :  { %v13581_v57 = vpop.eup %13580  ;;  %6459 = vrot.lane.b32.xlu0 %v13579_v37, %s13924_s6 }
0x11a8   :  { %6461 = vrot.lane.b32.xlu1 %v13581_v57, %s13924_s6 }
0x11bd   :  { %v6387_v26 = vpop.f32.mrb[34].mxu0 }
0x11be   :  { %v6388_v51 = vadd.f32 %v6387_v26, %v6150_v49  ;;  %v6389_v25 = vpop.f32.mrb[35].mxu0  ;;  %v6704_v45 = vpop.f32.mrb[46].mxu1 }
0x11bf   :  { %v6706_v16 = vpop.f32.mrb[47].mxu1 }
0x11c0   :  { %v15093_v54 = vadd.f32 %v6412_v56, %v6388_v51  ;;  %v6856_v27 = vrot.slane %v6706_v16, 6 }
0x11e1   :  { %v6775_v46 = vpop.f32.mrb[36].mxu0 }
0x11e2   :  { %v6857_v31 = vrot.slane %v6775_v46, 6  ;;  %v6777_v1 = vpop.f32.mrb[37].mxu0  ;;  %v15095_v47 = vpop.f32.mrb[48].mxu1  ;;  %v6855_v46 = vrot.slane %v6704_v45, 6 }
0x11e3   :  { %v6858_v41 = vrot.slane %v6777_v1, 6  ;;  %v6848_v43 = vpop.f32.mrb[49].mxu1 }
0x11e4   :  { %v6867_v15 = vadd.f32 %v6857_v31, %v14236_v29  ;;  %v6866_v31 = vadd.f32 %v6856_v27, %v14223_v20  ;;  %v6865_v1 = vadd.f32 %v6855_v46, %v14221_v17 }
0x11e5   :  { %v15099_v14 = vadd.f32 %v6858_v41, %v14241_v32 }
0x11e6   :  { %v10584_v61 = vmul.f32 -1.442695, %v6867_v15  ;;  %13582 = vtanh.f32 %v6867_v15  ;;  %v10583_v41 = vmul.f32 -1.442695, %v6866_v31  ;;  %v10582_v43 = vmul.f32 -1.442695, %v6865_v1 }
0x11e7   :  { %13584 = vtanh.f32 %v15099_v14 }
0x11e8   :  { %13586 = vpow2.f32 %v10584_v61 }
0x11f0   :  { %v13583_v13 = vpop.eup %13582 }
0x11f1   :  { %v13585_v49 = vpop.eup %13584  ;;  %6912 = vrot.lane.b32.xlu0 %v13583_v13, %s13924_s6 }
0x11f2   :  { %v13587_v35 = vpop.eup %13586  ;;  %6914 = vrot.lane.b32.xlu1 %v13585_v49, %s13924_s6 }
0x11f3   :  { %v6885_v50 = vadd.f32 1.0, %v13587_v35 }
0x11f5   :  { %13588 = vrcp.f32 %v6885_v50 }
0x11f6   :  { %13590 = vpow2.f32 %v10570_v5 }
0x11f7   :  { %13592 = vpow2.f32 %v10569_v53 }
0x11ff   :  { %v13589_v48 = vpop.eup %13588 }
0x1200   :  { %v15105_v19 = vmul.f32 %v13589_v48, %v6905_v4  ;;  %v13591_v52 = vpop.eup %13590  ;;  %v10571_v48 = vmul.f32 -1.442695, %v15084_v62 }
0x1201   :  { %v13593_v0 = vpop.eup %13592  ;;  %v6430_v40 = vadd.f32 1.0, %v13591_v52 }
0x1202   :  { %v6429_v37 = vadd.f32 1.0, %v13593_v0 }
0x1203   :  { %13594 = vrcp.f32 %v6430_v40 }
0x1204   :  { %13596 = vrcp.f32 %v6429_v37 }
0x1205   :  { %13598 = vpow2.f32 %v10583_v41 }
0x1206   :  { %13600 = vpow2.f32 %v10582_v43  ;;  %v7036_v43 = vld [vmem:[#allocation8 + $0x8] sm:$0xff] }
0x120d   :  { %v13595_v56 = vpop.eup %13594 }
0x120e   :  { %v13597_v51 = vpop.eup %13596 }
0x120f   :  { %v13599_v15 = vpop.eup %13598 }
0x1210   :  { %v13601_v61 = vpop.eup %13600  ;;  %v6877_v13 = vadd.f32 1.0, %v13599_v15  ;;  %v7041_v15 = vld [vmem:[#allocation8 + $0x30] sm:$0xff] }
0x1211   :  { %v6876_v49 = vadd.f32 1.0, %v13601_v61  ;;  %v7035_v61 = vld [vmem:[#allocation8] sm:$0xff] }
0x1212   :  { %13602 = vrcp.f32 %v6877_v13  ;;  %v12410_v13 = vpack.c.bf16 %v7041_v15, %v7036_v43  ;;  %v7058_v43 = vld [vmem:[#allocation8 + $0xb8] sm:$0xff] }
0x1213   :  { %13604 = vrcp.f32 %v6876_v49  ;;  %v7040_v49 = vld [vmem:[#allocation8 + $0x28] sm:$0xff] }
0x1214   :  { %13606 = vpow2.f32 %v10571_v48  ;;  %12411 = vmatprep.subr.bf16.mxu0 %v12410_v13  ;;  %v7045_v48 = vld [vmem:[#allocation8 + $0x50] sm:$0xff] }
0x1215   :  { %v7057_v13 = vld [vmem:[#allocation8 + $0xb0] sm:$0xff] }
0x1219   :  { %v6460_v57 = vpop.permute.xlu0 %6459 }
0x121a   :  { %v6462_v26 = vpop.permute.xlu1 %6461 }
0x121b   :  { %v6463_v60 = vsel %vm869_vm7, %v6460_v57, %v6462_v26  ;;  %v6467_v6 = vmul.f32 %v13595_v56, %v6462_v26  ;;  %v6455_v57 = vmul.f32 %v13595_v56, %v14949_v38  ;;  %v6904_v38 = vrot.slane %v14959_v39, 6  ;;  %v7038_v39 = vld [vmem:[#allocation8 + $0x18] sm:$0xff] }
0x121c   :  { %v6466_v25 = vmul.f32 %v13597_v51, %v6463_v60  ;;  %v13603_v50 = vpop.eup %13602 }
0x121d   :  { %6472 = vrot.lane.b32.xlu1 %v6467_v6, %s13923_s17  ;;  %v13605_v53 = vpop.eup %13604  ;;  %v6908_v56 = vmul.f32 %v13603_v50, %v6904_v38 }
0x121e   :  { %6470 = vrot.lane.b32.xlu0 %v6466_v25, %s13923_s17  ;;  %v13607_v52 = vpop.eup %13606 }
0x121f   :  { %v6438_v0 = vadd.f32 1.0, %v13607_v52  ;;  %v7050_v52 = vld [vmem:[#allocation8 + $0x78] sm:$0xff] }
0x1221   :  { %13608 = vrcp.f32 %v6438_v0 }
0x122b   :  { %v13609_v40 = vpop.eup %13608 }
0x122c   :  { %v6456_v26 = vmul.f32 %v13609_v40, %v14951_v44  ;;  %v12416_v40 = vpack.c.bf16 %v7050_v52, %v7045_v48  ;;  %v7073_v48 = vld [vmem:[#allocation8 + $0x130] sm:$0xff] }
0x1263   :  { %v6913_v35 = vpop.permute.xlu0 %6912 }
0x1264   :  { %v6915_v5 = vpop.permute.xlu1 %6914 }
0x1265   :  { %v6916_v45 = vsel %vm869_vm7, %v6913_v35, %v6915_v5  ;;  %v6920_v16 = vmul.f32 %v13603_v50, %v6915_v5  ;;  %v7043_v35 = vld [vmem:[#allocation8 + $0x40] sm:$0xff]  ;;  %v12412_v50 = vpack.c.bf16 %v7040_v49, %v7035_v61  ;;  %v7062_v49 = vld [vmem:[#allocation8 + $0xd8] sm:$0xff] }
0x1266   :  { %v6919_v4 = vmul.f32 %v13605_v53, %v6916_v45  ;;  %v12448_v5 = vpack.c.bf16 %v7043_v35, %v7038_v39  ;;  %v7037_v53 = vld [vmem:[#allocation8 + $0x10] sm:$0xff]  ;;  %v7042_v45 = vld [vmem:[#allocation8 + $0x38] sm:$0xff]  ;;  %v7063_v61 = vld [vmem:[#allocation8 + $0xe0] sm:$0xff] }
0x1267   :  { %6925 = vrot.lane.b32.xlu1 %v6920_v16, %s13923_s17  ;;  %v7046_v16 = vld [vmem:[#allocation8 + $0x58] sm:$0xff]  ;;  %12413 = vmatpush1.bf16.msra.mxu0 %v12412_v50  ;;  %v12456_v35 = vpack.c.bf16 %v7063_v61, %v7058_v43  ;;  %v7088_v61 = vld [vmem:[#allocation8 + $0x1a8] sm:$0xff] }
0x1268   :  { %6923 = vrot.lane.b32.xlu0 %v6919_v4, %s13923_s17  ;;  %v12450_v4 = vpack.c.bf16 %v7042_v45, %v7037_v53  ;;  %12449 = vmatprep.subr.bf16.mxu1 %v12448_v5  ;;  %v7066_v50 = vld [vmem:[#allocation8 + $0xf8] sm:$0xff]  ;;  %v7071_v5 = vld [vmem:[#allocation8 + $0x120] sm:$0xff]  ;;  %v7065_v53 = vld [vmem:[#allocation8 + $0xf0] sm:$0xff]  ;;  %v12458_v45 = vpack.c.bf16 %v7062_v49, %v7057_v13  ;;  %v10572_v49 = vmul.f32 -1.442695, %v15086_v58 }
0x1269   :  { %v7086_v43 = vld [vmem:[#allocation8 + $0x198] sm:$0xff]  ;;  %v7093_v13 = vld [vmem:[#allocation8 + $0x1d0] sm:$0xff] }
0x126a   :  { %12451 = vmatpush1.bf16.msra.mxu1 %v12450_v4  ;;  %v7070_v4 = vld [vmem:[#allocation8 + $0x118] sm:$0xff] }
0x128f   :  { %v6473_v37 = vpop.permute.xlu1 %6472 }
0x1290   :  { %v6471_v51 = vpop.permute.xlu0 %6470 }
0x1291   :  { %v6474_v60 = vsel %vm577_vm0, %v6471_v51, %v6473_v37  ;;  %v15119_v6 = vadd.f32 %v6471_v51, %v6455_v57  ;;  %v7048_v37 = vld [vmem:[#allocation8 + $0x68] sm:$0xff]  ;;  %v7053_v57 = vld [vmem:[#allocation8 + $0x90] sm:$0xff] }
0x1292   :  { %v15121_v25 = vadd.f32 %v6474_v60, %v6456_v26  ;;  %v7047_v26 = vld [vmem:[#allocation8 + $0x60] sm:$0xff]  ;;  %v12452_v51 = vpack.c.bf16 %v7053_v57, %v7048_v37  ;;  %v7052_v60 = vld [vmem:[#allocation8 + $0x88] sm:$0xff] }
0x1293   :  { %13610 = vtanh.f32 %v15119_v6  ;;  %v7072_v37 = vld [vmem:[#allocation8 + $0x128] sm:$0xff] }
0x1294   :  { %13612 = vtanh.f32 %v15121_v25  ;;  %12453 = vmatprep.subr.bf16.mxu1 %v12452_v51  ;;  %v7076_v57 = vld [vmem:[#allocation8 + $0x148] sm:$0xff]  ;;  %v7078_v51 = vld [vmem:[#allocation8 + $0x158] sm:$0xff] }
0x129d   :  { %v13611_v62 = vpop.eup %13610 }
0x129e   :  { %v13613_v27 = vpop.eup %13612  ;;  %6483 = vrot.lane.b32.xlu0 %v13611_v62, %s13925_s19  ;;  %v7056_v62 = vld [vmem:[#allocation8 + $0xa8] sm:$0xff] }
0x129f   :  { %6485 = vrot.lane.b32.xlu1 %v13613_v27, %s13925_s19  ;;  %v7061_v27 = vld [vmem:[#allocation8 + $0xd0] sm:$0xff] }
0x12d9   :  { %v6926_v44 = vpop.permute.xlu1 %6925 }
0x12da   :  { %v6924_v46 = vpop.permute.xlu0 %6923 }
0x12db   :  { %v6927_v31 = vsel %vm577_vm0, %v6924_v46, %v6926_v44  ;;  %v15129_v1 = vadd.f32 %v6924_v46, %v6908_v56  ;;  %v12454_v44 = vpack.c.bf16 %v7052_v60, %v7047_v26  ;;  %v12418_v56 = vpack.c.bf16 %v7061_v27, %v7056_v62  ;;  %v7055_v46 = vld [vmem:[#allocation8 + $0xa0] sm:$0xff]  ;;  %v7081_v26 = vld [vmem:[#allocation8 + $0x170] sm:$0xff] }
0x12dc   :  { %v15132_v41 = vadd.f32 %v6927_v31, %v15105_v19  ;;  %v7051_v19 = vld [vmem:[#allocation8 + $0x80] sm:$0xff]  ;;  %v7060_v31 = vld [vmem:[#allocation8 + $0xc8] sm:$0xff]  ;;  %v12426_v27 = vpack.c.bf16 %v7081_v26, %v7076_v57 }
0x12dd   :  { %13614 = vtanh.f32 %v15129_v1  ;;  %v12414_v0 = vpack.c.bf16 %v7051_v19, %v7046_v16  ;;  %v12420_v39 = vpack.c.bf16 %v7060_v31, %v7055_v46  ;;  %12455 = vmatpush1.bf16.msra.mxu1 %v12454_v44  ;;  %v12422_v16 = vpack.c.bf16 %v7071_v5, %v7066_v50  ;;  %v7068_v19 = vld [vmem:[#allocation8 + $0x108] sm:$0xff]  ;;  %v7083_v60 = vld [vmem:[#allocation8 + $0x180] sm:$0xff]  ;;  %v7082_v31 = vld [vmem:[#allocation8 + $0x178] sm:$0xff] }
0x12de   :  { %13616 = vtanh.f32 %v15132_v41  ;;  %12457 = vmatprep.subr.bf16.mxu1 %v12456_v35  ;;  %v12460_v52 = vpack.c.bf16 %v7073_v48, %v7068_v19  ;;  %v7080_v44 = vld [vmem:[#allocation8 + $0x168] sm:$0xff]  ;;  %v12464_v46 = vpack.c.bf16 %v7083_v60, %v7078_v51  ;;  %v7085_v5 = vld [vmem:[#allocation8 + $0x190] sm:$0xff] }
0x12df   :  { %12415 = vmatprep.subr.bf16.mxu0 %v12414_v0  ;;  %v7067_v0 = vld [vmem:[#allocation8 + $0x100] sm:$0xff]  ;;  %v7092_v19 = vld [vmem:[#allocation8 + $0x1c8] sm:$0xff]  ;;  %13618 = vpow2.f32 %v10572_v49  ;;  %v7097_v60 = vld [vmem:[#allocation8 + $0x1f0] sm:$0xff] }
0x12e0   :  { %12417 = vmatpush1.bf16.msra.mxu0 %v12416_v40  ;;  %v12424_v40 = vpack.c.bf16 %v7070_v4, %v7065_v53  ;;  %v12462_v62 = vpack.c.bf16 %v7072_v37, %v7067_v0  ;;  %v7090_v53 = vld [vmem:[#allocation8 + $0x1b8] sm:$0xff]  ;;  %v12468_v4 = vpack.c.bf16 %v7093_v13, %v7088_v61  ;;  %v7096_v48 = vld [vmem:[#allocation8 + $0x1e8] sm:$0xff]  ;;  %v7103_v37 = vld [vmem:[#allocation8 + $0x220] sm:$0xff] }
0x12e1   :  { %12419 = vmatprep.subr.bf16.mxu0 %v12418_v56  ;;  %12459 = vmatpush1.bf16.msra.mxu1 %v12458_v45  ;;  %v7077_v56 = vld [vmem:[#allocation8 + $0x150] sm:$0xff]  ;;  %v7087_v45 = vld [vmem:[#allocation8 + $0x1a0] sm:$0xff]  ;;  %v7098_v0 = vld [vmem:[#allocation8 + $0x1f8] sm:$0xff]  ;;  %v12432_v58 = vpack.c.bf16 %v7090_v53, %v7085_v5 }
0x12e2   :  { %12461 = vmatprep.subr.bf16.mxu1 %v12460_v52  ;;  %v12466_v35 = vpack.c.bf16 %v7082_v31, %v7077_v56  ;;  %v7101_v52 = vld [vmem:[#allocation8 + $0x210] sm:$0xff]  ;;  %v12470_v57 = vpack.c.bf16 %v7092_v19, %v7087_v45  ;;  %v7100_v51 = vld [vmem:[#allocation8 + $0x208] sm:$0xff]  ;;  %v7110_v61 = vld [vmem:[#allocation8 + $0x258] sm:$0xff] }
0x12e3   :  { %v12434_v26 = vpack.c.bf16 %v7101_v52, %v7096_v48  ;;  %v7113_v56 = vld [vmem:[#allocation8 + $0x270] sm:$0xff]  ;;  %v7107_v13 = vld [vmem:[#allocation8 + $0x240] sm:$0xff]  ;;  %v7118_v5 = vld [vmem:[#allocation8 + $0x298] sm:$0xff] }
0x12e4   :  { %12421 = vmatpush1.bf16.msra.mxu0 %v12420_v39  ;;  %v7123_v53 = vld [vmem:[#allocation8 + $0x2c0] sm:$0xf]  ;;  %v7120_v48 = vld [vmem:[#allocation8 + $0x2a8] sm:$0xf] }
0x12e5   :  { %12423 = vmatprep.subr.bf16.mxu0 %v12422_v16  ;;  %12463 = vmatpush1.bf16.msra.mxu1 %v12462_v62  ;;  %v10573_v16 = vmul.f32 -1.442695, %v15093_v54  ;;  %v12472_v54 = vpack.c.bf16 %v7103_v37, %v7098_v0  ;;  %v7102_v62 = vld [vmem:[#allocation8 + $0x218] sm:$0xff]  ;;  %v7115_v19 = vld [vmem:[#allocation8 + $0x280] sm:$0xff]  ;;  %v12480_v0 = vpack.c.bf16 %v7123_v53, %v7118_v5 }
0x12e6   :  { %12465 = vmatprep.subr.bf16.mxu1 %v12464_v46  ;;  %v12474_v31 = vpack.c.bf16 %v7102_v62, %v7097_v60 }
0x12e7   :  { %v13615_v38 = vpop.eup %13614  ;;  %13620 = vpow2.f32 %v10573_v16 }
0x12e8   :  { %v13617_v15 = vpop.eup %13616  ;;  %6936 = vrot.lane.b32.xlu0 %v13615_v38, %s13925_s19  ;;  %v7075_v38 = vld [vmem:[#allocation8 + $0x140] sm:$0xff]  ;;  %12425 = vmatpush1.bf16.msra.mxu0 %v12424_v40 }
0x12e9   :  { %6938 = vrot.lane.b32.xlu1 %v13617_v15, %s13925_s19  ;;  %v7091_v15 = vld [vmem:[#allocation8 + $0x1c0] sm:$0xff]  ;;  %v12428_v39 = vpack.c.bf16 %v7080_v44, %v7075_v38  ;;  %12427 = vmatprep.subr.bf16.mxu0 %v12426_v27  ;;  %v7106_v27 = vld [vmem:[#allocation8 + $0x238] sm:$0xff]  ;;  %v7108_v44 = vld [vmem:[#allocation8 + $0x248] sm:$0xff]  ;;  %v13619_v52 = vpop.eup %13618 }
0x12ea   :  { %v12430_v50 = vpack.c.bf16 %v7091_v15, %v7086_v43  ;;  %12467 = vmatpush1.bf16.msra.mxu1 %v12466_v35  ;;  %v7095_v40 = vld [vmem:[#allocation8 + $0x1e0] sm:$0xff]  ;;  %v7105_v15 = vld [vmem:[#allocation8 + $0x230] sm:$0xff]  ;;  %v12476_v49 = vpack.c.bf16 %v7113_v56, %v7108_v44  ;;  %v7116_v35 = vld [vmem:[#allocation8 + $0x288] sm:$0xff] }
0x12eb   :  { %12469 = vmatprep.subr.bf16.mxu1 %v12468_v4  ;;  %v7111_v38 = vld [vmem:[#allocation8 + $0x260] sm:$0xff]  ;;  %v12436_v46 = vpack.c.bf16 %v7100_v51, %v7095_v40  ;;  %v12440_v45 = vpack.c.bf16 %v7110_v61, %v7105_v15  ;;  %v7117_v40 = vld [vmem:[#allocation8 + $0x290] sm:$0xff]  ;;  %v7122_v51 = vld [vmem:[#allocation8 + $0x2b8] sm:$0xf] }
0x12ec   :  { %12429 = vmatpush1.bf16.msra.mxu0 %v12428_v39  ;;  %v12438_v43 = vpack.c.bf16 %v7111_v38, %v7106_v27  ;;  %v7112_v39 = vld [vmem:[#allocation8 + $0x268] sm:$0xff]  ;;  %v12483_v60 = vpack.c.bf16 %v7122_v51, %v7117_v40  ;;  %v6953_v15 = vld [vmem:[#allocation6 + $0x40] sm:$0xff]  ;;  %v6958_v51 = vld [vmem:[#allocation6 + $0x68] sm:$0xff] }
0x12ed   :  { %12431 = vmatprep.subr.bf16.mxu0 %v12430_v50  ;;  %v7121_v50 = vld [vmem:[#allocation8 + $0x2b0] sm:$0xf]  ;;  %v12478_v16 = vpack.c.bf16 %v7112_v39, %v7107_v13  ;;  %v6859_v13 = vrot.slane %v15095_v47, 6  ;;  %v10585_v39 = vmul.f32 -1.442695, %v15099_v14  ;;  %v7039_v14 = vld [vmem:[#allocation8 + $0x20] sm:$0xff] }
0x12ee   :  { %12471 = vmatpush1.bf16.msra.mxu1 %v12470_v57  ;;  %v12442_v4 = vpack.c.bf16 %v7121_v50, %v7116_v35  ;;  %v6449_v57 = vadd.f32 1.0, %v13619_v52  ;;  %v6952_v40 = vld [vmem:[#allocation6 + $0x38] sm:$0xff] }
0x12ef   :  { %12473 = vmatprep.subr.bf16.mxu1 %v12472_v54 }
0x12f0   :  { %12433 = vmatpush1.bf16.msra.mxu0 %v12432_v58  ;;  %v12445_v58 = vpack.c.bf16 %v7120_v48, %v7115_v19  ;;  %13622 = vrcp.f32 %v6449_v57  ;;  %v7044_v57 = vld [vmem:[#allocation8 + $0x48] sm:$0xff] }
0x12f1   :  { %12435 = vmatprep.subr.bf16.mxu0 %v12434_v26  ;;  %v13621_v37 = vpop.eup %13620 }
0x12f2   :  { %12475 = vmatpush1.bf16.msra.mxu1 %v12474_v31  ;;  %v6450_v26 = vadd.f32 1.0, %v13621_v37 }
0x12f3   :  { %12477 = vmatprep.subr.bf16.mxu1 %v12476_v49  ;;  %v6869_v49 = vadd.f32 %v6859_v13, %v14244_v34  ;;  %v6957_v13 = vld [vmem:[#allocation6 + $0x60] sm:$0xff] }
0x12f4   :  { %12437 = vmatpush1.bf16.msra.mxu0 %v12436_v46  ;;  %13624 = vrcp.f32 %v6450_v26  ;;  %v6947_v26 = vld [vmem:[#allocation6 + $0x10] sm:$0xff] }
0x12f5   :  { %12439 = vmatprep.subr.bf16.mxu0 %v12438_v43  ;;  %v6948_v43 = vld [vmem:[#allocation6 + $0x18] sm:$0xff]  ;;  %v10586_v35 = vmul.f32 -1.442695, %v6869_v49  ;;  %13626 = vpow2.f32 %v10585_v39  ;;  %v6962_v49 = vld [vmem:[#allocation6 + $0x88] sm:$0xff] }
0x12f6   :  { %12479 = vmatpush1.bf16.msra.mxu1 %v12478_v16  ;;  %v12552_v61 = vpack.c.bf16 %v6953_v15, %v6948_v43  ;;  %v12554_v43 = vpack.c.bf16 %v6952_v40, %v6947_v26  ;;  %v6968_v39 = vld [vmem:[#allocation6 + $0xb8] sm:$0xff]  ;;  %v6982_v26 = vld [vmem:[#allocation6 + $0x128] sm:$0xff] }
0x12f7   :  { %12482 = vmatprep.subr.msk.bf16.mxu1 %vm14099_vm3, %v12480_v0  ;;  %13628 = vpow2.f32 %v10586_v35  ;;  %v6973_v35 = vld [vmem:[#allocation6 + $0xe0] sm:$0xff]  ;;  %v6988_v40 = vld [vmem:[#allocation6 + $0x158] sm:$0xff] }
0x12f8   :  { %12441 = vmatpush1.bf16.msra.mxu0 %v12440_v45 }
0x12f9   :  { %12444 = vmatprep.subr.msk.bf16.mxu0 %vm14099_vm3, %v12442_v4 }
0x12fa   :  { %12485 = vmatpush1.bf16.msk.msra.mxu1 %vm14099_vm3, %v12483_v60  ;;  %v13623_v54 = vpop.eup %13622  ;;  %v6963_v60 = vld [vmem:[#allocation6 + $0x90] sm:$0xff] }
0x12fb   :  { %12553 = vmatprep.subr.bf16.mxu1 %v12552_v61  ;;  %v12556_v61 = vpack.c.bf16 %v6963_v60, %v6958_v51  ;;  %v6993_v51 = vld [vmem:[#allocation6 + $0x180] sm:$0xff] }
0x12fc   :  { %12447 = vmatpush1.bf16.msk.msra.mxu0 %vm14099_vm3, %v12445_v58 }
0x12fd   :  { %12486 = vmatprep.subr.bf16.mxu0 %v13921_v8 }
0x12fe   :  { %v13625_v44 = vpop.eup %13624 }
0x12ff   :  { %v13627_v50 = vpop.eup %13626 }
0x1300   :  { %v6896_v53 = vadd.f32 1.0, %v13627_v50 }
0x1301   :  { %v13629_v5 = vpop.eup %13628 }
0x1302   :  { %v6897_v45 = vadd.f32 1.0, %v13629_v5  ;;  %13630 = vrcp.f32 %v6896_v53  ;;  %v7059_v5 = vld [vmem:[#allocation8 + $0xc0] sm:$0xff]  ;;  %v7064_v53 = vld [vmem:[#allocation8 + $0xe8] sm:$0xff] }
0x1304   :  { %13632 = vrcp.f32 %v6897_v45  ;;  %v12558_v45 = vpack.c.bf16 %v6962_v49, %v6957_v13  ;;  %v7003_v13 = vld [vmem:[#allocation6 + $0x1d0] sm:$0xff] }
0x130c   :  { %v13631_v16 = vpop.eup %13630 }
0x130e   :  { %v13633_v52 = vpop.eup %13632 }
0x1310   :  { %v6484_v62 = vpop.permute.xlu0 %6483 }
0x1311   :  { %v15149_v27 = vmul.f32 %v13623_v54, %v6484_v62  ;;  %v6486_v38 = vpop.permute.xlu1 %6485  ;;  %v12487_v54 = vpack.c.bf16 %v7044_v57, %v7039_v14  ;;  %v6977_v57 = vld [vmem:[#allocation6 + $0x100] sm:$0xff] }
0x1312   :  { %v6487_v56 = vsel %vm894_vm8, %v6484_v62, %v6486_v38 }
0x1313   :  { %v15152_v46 = vmul.f32 %v13625_v44, %v6487_v56  ;;  %7125 = vrot.lane.b32.xlu0 %v15149_v27, %s13926_s2  ;;  %v7049_v44 = vld [vmem:[#allocation8 + $0x70] sm:$0xff]  ;;  %v7054_v56 = vld [vmem:[#allocation8 + $0x98] sm:$0xff] }
0x1314   :  { %v12490_v50 = vpack.c.bf16 %v7054_v56, %v7049_v44  ;;  %v12568_v44 = vpack.c.bf16 %v6993_v51, %v6988_v40  ;;  %v6987_v56 = vld [vmem:[#allocation6 + $0x150] sm:$0xff]  ;;  %v7109_v40 = vld [vmem:[#allocation8 + $0x250] sm:$0xff]  ;;  %v7114_v51 = vld [vmem:[#allocation8 + $0x278] sm:$0xff] }
0x1315   :  { %v6494_v31 = vcombine.low %v15149_v27, %v15152_v46  ;;  %7127 = vrot.lane.b32.xlu1 %v15152_v46, %s13926_s2 }
0x135a   :  { %v6937_v4 = vpop.permute.xlu0 %6936 }
0x135b   :  { %v6943_v19 = vmul.f32 %v13631_v16, %v6937_v4  ;;  %v6939_v48 = vpop.permute.xlu1 %6938  ;;  %v12560_v16 = vpack.c.bf16 %v6973_v35, %v6968_v39  ;;  %v7089_v39 = vld [vmem:[#allocation8 + $0x1b0] sm:$0xff]  ;;  %v7094_v35 = vld [vmem:[#allocation8 + $0x1d8] sm:$0xff] }
0x135c   :  { %v6940_v47 = vsel %vm894_vm8, %v6937_v4, %v6939_v48  ;;  %v6967_v4 = vld [vmem:[#allocation6 + $0xb0] sm:$0xff]  ;;  %v6978_v48 = vld [vmem:[#allocation6 + $0x108] sm:$0xff] }
0x135d   :  { %v7362_v0 = vrot.slane %v6943_v19, 2  ;;  %v6944_v37 = vmul.f32 %v13633_v52, %v6940_v47  ;;  %v6972_v19 = vld [vmem:[#allocation6 + $0xd8] sm:$0xff]  ;;  %v6983_v52 = vld [vmem:[#allocation6 + $0x130] sm:$0xff]  ;;  %v12493_v47 = vpack.c.bf16 %v7064_v53, %v7059_v5  ;;  %v6997_v53 = vld [vmem:[#allocation6 + $0x1a0] sm:$0xff] }
0x135e   :  { %v12564_v14 = vpack.c.bf16 %v6983_v52, %v6978_v48  ;;  %v7099_v48 = vld [vmem:[#allocation8 + $0x200] sm:$0xff]  ;;  %v7104_v52 = vld [vmem:[#allocation8 + $0x228] sm:$0xff] }
0x135f   :  { %v7363_v58 = vrot.slane %v6944_v37, 2  ;;  %7364 = vrot.lane.b32.xlu0 %v7362_v0, %s13926_s2  ;;  %v7069_v0 = vld [vmem:[#allocation8 + $0x110] sm:$0xff]  ;;  %v7074_v37 = vld [vmem:[#allocation8 + $0x138] sm:$0xff] }
0x1360   :  { %v12496_v60 = vpack.c.bf16 %v7074_v37, %v7069_v0  ;;  %v7007_v37 = vld [vmem:[#allocation6 + $0x1f0] sm:$0xff] }
0x1361   :  { %7366 = vrot.lane.b32.xlu1 %v7363_v58, %s13926_s2  ;;  %v12562_v58 = vpack.c.bf16 %v6972_v19, %v6967_v4  ;;  %v7013_v4 = vld [vmem:[#allocation6 + $0x220] sm:$0xff]  ;;  %v12502_v19 = vpack.c.bf16 %v7094_v35, %v7089_v39  ;;  %v6951_v35 = vld [vmem:[#allocation6 + $0x30] sm:$0xff] }
0x1385   :  { %v7126_v62 = vpop.permute.xlu0 %7125 }
0x1387   :  { %v7128_v38 = vpop.permute.xlu1 %7127 }
0x1388   :  { %10589 = vmatprep.mubr.msk.f32.mxu0 %vm577_vm0, %v7128_v38  ;;  %10592 = vmatprep.mubr.msk.f32.mxu1 %vm577_vm0, %v7128_v38  ;;  %v15169_v15 = vsel %vm1325_vm9, %v7126_v62, %v7128_v38  ;;  %v7084_v62 = vld [vmem:[#allocation8 + $0x188] sm:$0xff] }
0x1389   :  { %7213 = vmatmul.mubr.f32.vlgmr.msra.gmra.mrb[38].mxu0 %v15169_v15  ;;  %7284 = vmatmul.mubr.f32.vlgmr.msra.gmra.mrb[50].mxu1 %v15169_v15 }
0x138a   :  { %12488 = vmatpush1.bf16.msra.mxu0 %v12487_v54  ;;  %10594 = vmatprep.mubr.msk.f32.mxu0 %vm577_vm0, %v7128_v38  ;;  %v7079_v54 = vld [vmem:[#allocation8 + $0x160] sm:$0xff]  ;;  %v12566_v38 = vpack.c.bf16 %v6982_v26, %v6977_v57  ;;  %v12505_v26 = vpack.c.bf16 %v7104_v52, %v7099_v48  ;;  %v6956_v52 = vld [vmem:[#allocation6 + $0x58] sm:$0xff] }
0x138b   :  { %12489 = vmatprep.subr.bf16.mxu0 %v13921_v8  ;;  %12555 = vmatpush1.bf16.msra.mxu1 %v12554_v43  ;;  %v6992_v43 = vld [vmem:[#allocation6 + $0x178] sm:$0xff]  ;;  %v12499_v49 = vpack.c.bf16 %v7084_v62, %v7079_v54  ;;  %v7023_v57 = vld [vmem:[#allocation6 + $0x270] sm:$0xff]  ;;  %v7017_v62 = vld [vmem:[#allocation6 + $0x240] sm:$0xff] }
0x138c   :  { %12557 = vmatprep.subr.bf16.mxu1 %v12556_v61  ;;  %v6998_v61 = vld [vmem:[#allocation6 + $0x1a8] sm:$0xff] }
0x138d   :  { %v12572_v5 = vpack.c.bf16 %v7003_v13, %v6998_v61  ;;  %v7119_v61 = vld [vmem:[#allocation8 + $0x2a0] sm:$0xff]  ;;  %v7124_v13 = vld [vmem:[#allocation8 + $0x2c8] sm:$0xf] }
0x138e   :  { %12491 = vmatpush1.bf16.msra.mxu0 %v12490_v50  ;;  %v12570_v50 = vpack.c.bf16 %v6992_v43, %v6987_v56  ;;  %v7033_v56 = vld [vmem:[#allocation6 + $0x2c0] sm:$0xf]  ;;  %v12508_v43 = vpack.c.bf16 %v7114_v51, %v7109_v40 }
0x138f   :  { %12492 = vmatprep.subr.bf16.mxu0 %v13921_v8  ;;  %12559 = vmatpush1.bf16.msra.mxu1 %v12558_v45  ;;  %v7002_v45 = vld [vmem:[#allocation6 + $0x1c8] sm:$0xff] }
0x1390   :  { %12561 = vmatprep.subr.bf16.mxu1 %v12560_v16  ;;  %v7008_v16 = vld [vmem:[#allocation6 + $0x1f8] sm:$0xff] }
0x1391   :  { %v12576_v0 = vpack.c.bf16 %v7013_v4, %v7008_v16  ;;  %v6945_v4 = vld [vmem:[#allocation6] sm:$0xff] }
0x1392   :  { %12494 = vmatpush1.bf16.msra.mxu0 %v12493_v47  ;;  %v12574_v47 = vpack.c.bf16 %v7002_v45, %v6997_v53  ;;  %v7032_v53 = vld [vmem:[#allocation6 + $0x2b8] sm:$0xf]  ;;  %v12511_v45 = vpack.c.bf16 %v7124_v13, %v7119_v61  ;;  %v6986_v13 = vld [vmem:[#allocation6 + $0x148] sm:$0xff] }
0x1393   :  { %12495 = vmatprep.subr.bf16.mxu0 %v13921_v8  ;;  %12563 = vmatpush1.bf16.msra.mxu1 %v12562_v58  ;;  %v7012_v58 = vld [vmem:[#allocation6 + $0x218] sm:$0xff] }
0x1394   :  { %12565 = vmatprep.subr.bf16.mxu1 %v12564_v14  ;;  %v7018_v14 = vld [vmem:[#allocation6 + $0x248] sm:$0xff]  ;;  %v6980_v61 = vld [vmem:[#allocation6 + $0x118] sm:$0xff] }
0x1395   :  { %v12580_v54 = vpack.c.bf16 %v7023_v57, %v7018_v14  ;;  %v6960_v14 = vld [vmem:[#allocation6 + $0x78] sm:$0xff]  ;;  %v6966_v57 = vld [vmem:[#allocation6 + $0xa8] sm:$0xff] }
0x1396   :  { %12497 = vmatpush1.bf16.msra.mxu0 %v12496_v60  ;;  %v12578_v60 = vpack.c.bf16 %v7012_v58, %v7007_v37  ;;  %v6955_v58 = vld [vmem:[#allocation6 + $0x50] sm:$0xff] }
0x1397   :  { %12498 = vmatprep.subr.bf16.mxu0 %v13921_v8  ;;  %12567 = vmatpush1.bf16.msra.mxu1 %v12566_v38  ;;  %v7022_v38 = vld [vmem:[#allocation6 + $0x268] sm:$0xff]  ;;  %v12520_v40 = vpack.c.bf16 %v6960_v14, %v6955_v58  ;;  %v7016_v14 = vld [vmem:[#allocation6 + $0x238] sm:$0xff] }
0x1398   :  { %12569 = vmatprep.subr.bf16.mxu1 %v12568_v44  ;;  %v7028_v44 = vld [vmem:[#allocation6 + $0x298] sm:$0xff]  ;;  %v12582_v39 = vpack.c.bf16 %v7022_v38, %v7017_v62  ;;  %v6981_v38 = vld [vmem:[#allocation6 + $0x120] sm:$0xff]  ;;  %v7010_v58 = vld [vmem:[#allocation6 + $0x208] sm:$0xff] }
0x1399   :  { %v6976_v62 = vld [vmem:[#allocation6 + $0xf8] sm:$0xff] }
0x139a   :  { %12500 = vmatpush1.bf16.msra.mxu0 %v12499_v49  ;;  %v6946_v49 = vld [vmem:[#allocation6 + $0x8] sm:$0xff] }
0x139b   :  { %12501 = vmatprep.subr.bf16.mxu0 %v13921_v8  ;;  %12571 = vmatpush1.bf16.msra.mxu1 %v12570_v50  ;;  %v12584_v50 = vpack.c.bf16 %v7033_v56, %v7028_v44  ;;  %v12514_v16 = vpack.c.bf16 %v6951_v35, %v6946_v49  ;;  %v12526_v56 = vpack.c.bf16 %v6981_v38, %v6976_v62  ;;  %v6991_v49 = vld [vmem:[#allocation6 + $0x170] sm:$0xff]  ;;  %v6985_v35 = vld [vmem:[#allocation6 + $0x140] sm:$0xff] }
0x139c   :  { %12573 = vmatprep.subr.bf16.mxu1 %v12572_v5  ;;  %v7027_v5 = vld [vmem:[#allocation6 + $0x290] sm:$0xff] }
0x139d   :  { %v12587_v48 = vpack.c.bf16 %v7032_v53, %v7027_v5  ;;  %v6996_v5 = vld [vmem:[#allocation6 + $0x198] sm:$0xff]  ;;  %v7001_v53 = vld [vmem:[#allocation6 + $0x1c0] sm:$0xff]  ;;  %v7031_v62 = vld [vmem:[#allocation6 + $0x2b0] sm:$0xf] }
0x139e   :  { %12503 = vmatpush1.bf16.msra.mxu0 %v12502_v19  ;;  %v6950_v19 = vld [vmem:[#allocation6 + $0x28] sm:$0xff] }
0x139f   :  { %12504 = vmatprep.subr.bf16.mxu0 %v13921_v8  ;;  %12575 = vmatpush1.bf16.msra.mxu1 %v12574_v47  ;;  %v6961_v47 = vld [vmem:[#allocation6 + $0x80] sm:$0xff] }
0x13a0   :  { %12577 = vmatprep.subr.bf16.mxu1 %v12576_v0  ;;  %v12516_v0 = vpack.c.bf16 %v6950_v19, %v6945_v4  ;;  %v12518_v37 = vpack.c.bf16 %v6961_v47, %v6956_v52  ;;  %v6995_v4 = vld [vmem:[#allocation6 + $0x190] sm:$0xff]  ;;  %v7000_v19 = vld [vmem:[#allocation6 + $0x1b8] sm:$0xff] }
0x13a1   :  { %v7011_v52 = vld [vmem:[#allocation6 + $0x210] sm:$0xff]  ;;  %v12536_v47 = vpack.c.bf16 %v7000_v19, %v6995_v4 }
0x13a2   :  { %12506 = vmatpush1.bf16.msra.mxu0 %v12505_v26  ;;  %v6971_v26 = vld [vmem:[#allocation6 + $0xd0] sm:$0xff] }
0x13a3   :  { %12507 = vmatprep.subr.bf16.mxu0 %v13921_v8  ;;  %12579 = vmatpush1.bf16.msra.mxu1 %v12578_v60  ;;  %v12522_v51 = vpack.c.bf16 %v6971_v26, %v6966_v57  ;;  %v6965_v60 = vld [vmem:[#allocation6 + $0xa0] sm:$0xff]  ;;  %v6959_v19 = vld [vmem:[#allocation6 + $0x70] sm:$0xff] }
0x13a4   :  { %12581 = vmatprep.subr.bf16.mxu1 %v12580_v54  ;;  %v6970_v54 = vld [vmem:[#allocation6 + $0xc8] sm:$0xff]  ;;  %v7021_v57 = vld [vmem:[#allocation6 + $0x260] sm:$0xff] }
0x13a5   :  { %v12524_v44 = vpack.c.bf16 %v6970_v54, %v6965_v60  ;;  %v7020_v60 = vld [vmem:[#allocation6 + $0x258] sm:$0xff]  ;;  %v7026_v54 = vld [vmem:[#allocation6 + $0x288] sm:$0xff] }
0x13a6   :  { %12509 = vmatpush1.bf16.msra.mxu0 %v12508_v43  ;;  %v6975_v43 = vld [vmem:[#allocation6 + $0xf0] sm:$0xff] }
0x13a7   :  { %12510 = vmatprep.subr.bf16.mxu0 %v13921_v8  ;;  %12583 = vmatpush1.bf16.msra.mxu1 %v12582_v39  ;;  %v12528_v39 = vpack.c.bf16 %v6980_v61, %v6975_v43  ;;  %v7030_v43 = vld [vmem:[#allocation6 + $0x2a8] sm:$0xf]  ;;  %v7742_v61 = vld [vmem:[#allocation3 + $0x8] sm:$0xff] }
0x13a8   :  { %12586 = vmatprep.subr.msk.bf16.mxu1 %vm14099_vm3, %v12584_v50  ;;  %v6990_v50 = vld [vmem:[#allocation6 + $0x168] sm:$0xff] }
0x13aa   :  { %12513 = vmatpush1.bf16.msk.msra.mxu0 %vm14099_vm3, %v12511_v45  ;;  %v12532_v45 = vpack.c.bf16 %v6990_v50, %v6985_v35  ;;  %v6954_v35 = vld [vmem:[#allocation6 + $0x48] sm:$0xff]  ;;  %v7741_v50 = vld [vmem:[#allocation3] sm:$0xff] }
0x13ab   :  { %12515 = vmatprep.subr.bf16.mxu0 %v12514_v16  ;;  %12589 = vmatpush1.bf16.msk.msra.mxu1 %vm14099_vm3, %v12587_v48  ;;  %v12534_v16 = vpack.c.bf16 %v7001_v53, %v6996_v5  ;;  %v7006_v48 = vld [vmem:[#allocation6 + $0x1e8] sm:$0xff]  ;;  %v7746_v5 = vld [vmem:[#allocation3 + $0x28] sm:$0xff] }
0x13ac   :  { %12590 = vmatprep.subr.bf16.mxu1 %v13921_v8  ;;  %v7752_v53 = vld [vmem:[#allocation3 + $0x58] sm:$0xff]  ;;  %v12620_v4 = vpack.c.bf16 %v7746_v5, %v7741_v50  ;;  %v7782_v5 = vld [vmem:[#allocation3 + $0x148] sm:$0xff] }
0x13ad   :  { %7355 = vmatmul.mubr.f32.vlgmr.msra.gmra.mrb[40].mxu0 %v15169_v15  ;;  %v12530_v15 = vpack.c.bf16 %v6991_v49, %v6986_v13  ;;  %v7747_v13 = vld [vmem:[#allocation3 + $0x30] sm:$0xff]  ;;  %v7776_v50 = vld [vmem:[#allocation3 + $0x118] sm:$0xff] }
0x13ae   :  { %12517 = vmatpush1.bf16.msra.mxu0 %v12516_v0  ;;  %v12538_v0 = vpack.c.bf16 %v7011_v52, %v7006_v48 }
0x13af   :  { %12519 = vmatprep.subr.bf16.mxu0 %v12518_v37  ;;  %v7005_v37 = vld [vmem:[#allocation6 + $0x1e0] sm:$0xff] }
0x13b0   :  { %v12540_v26 = vpack.c.bf16 %v7010_v58, %v7005_v37  ;;  %v7756_v37 = vld [vmem:[#allocation3 + $0x78] sm:$0xff] }
0x13b2   :  { %12521 = vmatpush1.bf16.msra.mxu0 %v12520_v40  ;;  %v12542_v40 = vpack.c.bf16 %v7021_v57, %v7016_v14  ;;  %v7762_v57 = vld [vmem:[#allocation3 + $0xa8] sm:$0xff] }
0x13b3   :  { %12523 = vmatprep.subr.bf16.mxu0 %v12522_v51  ;;  %v7015_v51 = vld [vmem:[#allocation6 + $0x230] sm:$0xff] }
0x13b4   :  { %v12544_v38 = vpack.c.bf16 %v7020_v60, %v7015_v51  ;;  %v6969_v60 = vld [vmem:[#allocation6 + $0xc0] sm:$0xff] }
0x13b6   :  { %12525 = vmatpush1.bf16.msra.mxu0 %v12524_v44  ;;  %v12546_v44 = vpack.c.bf16 %v7031_v62, %v7026_v54  ;;  %v6974_v62 = vld [vmem:[#allocation6 + $0xe8] sm:$0xff] }
0x13b7   :  { %12527 = vmatprep.subr.bf16.mxu0 %v12526_v56  ;;  %v7025_v56 = vld [vmem:[#allocation6 + $0x280] sm:$0xff] }
0x13b8   :  { %v12549_v49 = vpack.c.bf16 %v7030_v43, %v7025_v56  ;;  %v7772_v56 = vld [vmem:[#allocation3 + $0xf8] sm:$0xff]  ;;  %v7777_v43 = vld [vmem:[#allocation3 + $0x120] sm:$0xff] }
0x13ba   :  { %12529 = vmatpush1.bf16.msra.mxu0 %v12528_v39  ;;  %v12618_v39 = vpack.c.bf16 %v7747_v13, %v7742_v61  ;;  %v12597_v61 = vpack.c.bf16 %v6974_v62, %v6969_v60  ;;  %v7004_v60 = vld [vmem:[#allocation6 + $0x1d8] sm:$0xff]  ;;  %v7796_v62 = vld [vmem:[#allocation3 + $0x1b8] sm:$0xff] }
0x13bb   :  { %12531 = vmatprep.subr.bf16.mxu0 %v12530_v15  ;;  %v6949_v15 = vld [vmem:[#allocation6 + $0x20] sm:$0xff] }
0x13be   :  { %12533 = vmatpush1.bf16.msra.mxu0 %v12532_v45  ;;  %v7757_v45 = vld [vmem:[#allocation3 + $0x80] sm:$0xff] }
0x13bf   :  { %12535 = vmatprep.subr.bf16.mxu0 %v12534_v16  ;;  %v12591_v16 = vpack.c.bf16 %v6954_v35, %v6949_v15  ;;  %v12622_v14 = vpack.c.bf16 %v7757_v45, %v7752_v53  ;;  %v6984_v15 = vld [vmem:[#allocation6 + $0x138] sm:$0xff]  ;;  %v7771_v35 = vld [vmem:[#allocation3 + $0xf0] sm:$0xff] }
0x13c0   :  { %v7787_v53 = vld [vmem:[#allocation3 + $0x170] sm:$0xff] }
0x13c2   :  { %12537 = vmatpush1.bf16.msra.mxu0 %v12536_v47  ;;  %v6964_v47 = vld [vmem:[#allocation6 + $0x98] sm:$0xff] }
0x13c3   :  { %12539 = vmatprep.subr.bf16.mxu0 %v12538_v0  ;;  %v7751_v0 = vld [vmem:[#allocation3 + $0x50] sm:$0xff] }
0x13c4   :  { %v12624_v51 = vpack.c.bf16 %v7756_v37, %v7751_v0  ;;  %v7786_v0 = vld [vmem:[#allocation3 + $0x168] sm:$0xff]  ;;  %v7792_v37 = vld [vmem:[#allocation3 + $0x198] sm:$0xff] }
0x13c6   :  { %12541 = vmatpush1.bf16.msra.mxu0 %v12540_v26  ;;  %v7767_v26 = vld [vmem:[#allocation3 + $0xd0] sm:$0xff] }
0x13c7   :  { %12543 = vmatprep.subr.bf16.mxu0 %v12542_v40  ;;  %v12594_v40 = vpack.c.bf16 %v6964_v47, %v6959_v19  ;;  %v12626_v54 = vpack.c.bf16 %v7767_v26, %v7762_v57  ;;  %v12634_v19 = vpack.c.bf16 %v7787_v53, %v7782_v5  ;;  %v7781_v47 = vld [vmem:[#allocation3 + $0x140] sm:$0xff] }
0x13c8   :  { %v12636_v26 = vpack.c.bf16 %v7786_v0, %v7781_v47  ;;  %v7822_v47 = vld [vmem:[#allocation3 + $0x288] sm:$0xff]  ;;  %v7827_v0 = vld [vmem:[#allocation3 + $0x2b0] sm:$0xf] }
0x13ca   :  { %12545 = vmatpush1.bf16.msra.mxu0 %v12544_v38  ;;  %v7761_v38 = vld [vmem:[#allocation3 + $0xa0] sm:$0xff] }
0x13cb   :  { %12548 = vmatprep.subr.msk.bf16.mxu0 %vm14099_vm3, %v12546_v44  ;;  %v7766_v44 = vld [vmem:[#allocation3 + $0xc8] sm:$0xff] }
0x13cc   :  { %v12628_v13 = vpack.c.bf16 %v7766_v44, %v7761_v38  ;;  %v7802_v38 = vld [vmem:[#allocation3 + $0x1e8] sm:$0xff]  ;;  %v7807_v44 = vld [vmem:[#allocation3 + $0x210] sm:$0xff] }
0x13ce   :  { %12551 = vmatpush1.bf16.msk.msra.mxu0 %vm14099_vm3, %v12549_v49  ;;  %v6979_v49 = vld [vmem:[#allocation6 + $0x110] sm:$0xff] }
0x13cf   :  { %12619 = vmatprep.subr.bf16.mxu0 %v12618_v39  ;;  %v12630_v39 = vpack.c.bf16 %v7777_v43, %v7772_v56  ;;  %v12600_v45 = vpack.c.bf16 %v6984_v15, %v6979_v49  ;;  %v7014_v49 = vld [vmem:[#allocation6 + $0x228] sm:$0xff]  ;;  %v7806_v15 = vld [vmem:[#allocation3 + $0x208] sm:$0xff] }
0x13d1   :  { %v7365_v48 = vpop.permute.xlu0 %7364 }
0x13d3   :  { %v15194_v52 = vpop.permute.xlu1 %7366 }
0x13d4   :  { %10597 = vmatprep.mubr.msk.f32.mxu0 %vm577_vm0, %v15194_v52  ;;  %10600 = vmatprep.mubr.msk.f32.mxu1 %vm577_vm0, %v15194_v52  ;;  %v15202_v58 = vsel %vm1325_vm9, %v7365_v48, %v15194_v52  ;;  %v6994_v48 = vld [vmem:[#allocation6 + $0x188] sm:$0xff] }
0x13d5   :  { %7452 = vmatmul.mubr.f32.vlgmr.msra.gmra.mrb[38].mxu0 %v15202_v58  ;;  %7523 = vmatmul.mubr.f32.vlgmr.msra.gmra.mrb[50].mxu1 %v15202_v58 }
0x13d6   :  { %12592 = vmatpush1.bf16.msra.mxu1 %v12591_v16  ;;  %12621 = vmatpush1.bf16.msra.mxu0 %v12620_v4  ;;  %v12632_v16 = vpack.c.bf16 %v7776_v50, %v7771_v35  ;;  %v6989_v4 = vld [vmem:[#allocation6 + $0x160] sm:$0xff]  ;;  %v7812_v35 = vld [vmem:[#allocation3 + $0x238] sm:$0xff]  ;;  %v7817_v50 = vld [vmem:[#allocation3 + $0x260] sm:$0xff] }
0x13d7   :  { %10602 = vmatprep.mubr.msk.f32.mxu1 %vm577_vm0, %v15194_v52  ;;  %10610 = vmatprep.mubr.msk.f32.mxu0 %vm577_vm0, %v15194_v52  ;;  %v12603_v57 = vpack.c.bf16 %v6994_v48, %v6989_v4  ;;  %v7024_v4 = vld [vmem:[#allocation6 + $0x278] sm:$0xff]  ;;  %v7816_v48 = vld [vmem:[#allocation3 + $0x258] sm:$0xff] }
0x13d8   :  { %12593 = vmatprep.subr.bf16.mxu1 %v13921_v8  ;;  %12623 = vmatprep.subr.bf16.mxu0 %v12622_v14  ;;  %v7797_v14 = vld [vmem:[#allocation3 + $0x1c0] sm:$0xff] }
0x13da   :  { %12595 = vmatpush1.bf16.msra.mxu1 %v12594_v40  ;;  %12625 = vmatpush1.bf16.msra.mxu0 %v12624_v51  ;;  %v6999_v40 = vld [vmem:[#allocation6 + $0x1b0] sm:$0xff]  ;;  %v12638_v51 = vpack.c.bf16 %v7797_v14, %v7792_v37 }
0x13db   :  { %12596 = vmatprep.subr.bf16.mxu1 %v13921_v8  ;;  %12627 = vmatprep.subr.bf16.mxu0 %v12626_v54  ;;  %v7791_v54 = vld [vmem:[#allocation3 + $0x190] sm:$0xff]  ;;  %v12606_v56 = vpack.c.bf16 %v7004_v60, %v6999_v40  ;;  %v7034_v40 = vld [vmem:[#allocation6 + $0x2c8] sm:$0xf]  ;;  %v7826_v60 = vld [vmem:[#allocation3 + $0x2a8] sm:$0xf] }
0x13dc   :  { %v12640_v43 = vpack.c.bf16 %v7796_v62, %v7791_v54  ;;  %v7744_v54 = vld [vmem:[#allocation3 + $0x18] sm:$0xff]  ;;  %v7749_v62 = vld [vmem:[#allocation3 + $0x40] sm:$0xff] }
0x13de   :  { %12598 = vmatpush1.bf16.msra.mxu1 %v12597_v61  ;;  %12629 = vmatpush1.bf16.msra.mxu0 %v12628_v13  ;;  %v7009_v61 = vld [vmem:[#allocation6 + $0x200] sm:$0xff]  ;;  %v12642_v13 = vpack.c.bf16 %v7807_v44, %v7802_v38 }
0x13df   :  { %12599 = vmatprep.subr.bf16.mxu1 %v13921_v8  ;;  %12631 = vmatprep.subr.bf16.mxu0 %v12630_v39  ;;  %v7801_v39 = vld [vmem:[#allocation3 + $0x1e0] sm:$0xff]  ;;  %v12609_v5 = vpack.c.bf16 %v7014_v49, %v7009_v61  ;;  %v7748_v61 = vld [vmem:[#allocation3 + $0x38] sm:$0xff]  ;;  %v7750_v49 = vld [vmem:[#allocation3 + $0x48] sm:$0xff] }
0x13e0   :  { %v12644_v53 = vpack.c.bf16 %v7806_v15, %v7801_v39  ;;  %v7754_v39 = vld [vmem:[#allocation3 + $0x68] sm:$0xff]  ;;  %v7759_v15 = vld [vmem:[#allocation3 + $0x90] sm:$0xff] }
0x13e2   :  { %12601 = vmatpush1.bf16.msra.mxu1 %v12600_v45  ;;  %12633 = vmatpush1.bf16.msra.mxu0 %v12632_v16  ;;  %v7019_v45 = vld [vmem:[#allocation6 + $0x250] sm:$0xff]  ;;  %v12646_v16 = vpack.c.bf16 %v7817_v50, %v7812_v35 }
0x13e3   :  { %12602 = vmatprep.subr.bf16.mxu1 %v13921_v8  ;;  %12635 = vmatprep.subr.bf16.mxu0 %v12634_v19  ;;  %v7811_v19 = vld [vmem:[#allocation3 + $0x230] sm:$0xff]  ;;  %v12612_v37 = vpack.c.bf16 %v7024_v4, %v7019_v45  ;;  %v7760_v4 = vld [vmem:[#allocation3 + $0x98] sm:$0xff] }
0x13e4   :  { %v12648_v14 = vpack.c.bf16 %v7816_v48, %v7811_v19  ;;  %v7755_v45 = vld [vmem:[#allocation3 + $0x70] sm:$0xff]  ;;  %v7764_v19 = vld [vmem:[#allocation3 + $0xb8] sm:$0xff]  ;;  %v7769_v48 = vld [vmem:[#allocation3 + $0xe0] sm:$0xff] }
0x13e6   :  { %12604 = vmatpush1.bf16.msra.mxu1 %v12603_v57  ;;  %12637 = vmatpush1.bf16.msra.mxu0 %v12636_v26  ;;  %v7029_v57 = vld [vmem:[#allocation6 + $0x2a0] sm:$0xff]  ;;  %v12650_v26 = vpack.c.bf16 %v7827_v0, %v7822_v47  ;;  %v12698_v0 = vpack.c.bf16 %v7760_v4, %v7755_v45  ;;  %v7794_v45 = vld [vmem:[#allocation3 + $0x1a8] sm:$0xff] }
0x13e7   :  { %12605 = vmatprep.subr.bf16.mxu1 %v13921_v8  ;;  %12639 = vmatprep.subr.bf16.mxu0 %v12638_v51  ;;  %v7821_v51 = vld [vmem:[#allocation3 + $0x280] sm:$0xff]  ;;  %v12615_v38 = vpack.c.bf16 %v7034_v40, %v7029_v57  ;;  %v7768_v57 = vld [vmem:[#allocation3 + $0xd8] sm:$0xff]  ;;  %v7770_v40 = vld [vmem:[#allocation3 + $0xe8] sm:$0xff] }
0x13e8   :  { %v12653_v44 = vpack.c.bf16 %v7826_v60, %v7821_v51  ;;  %v7774_v51 = vld [vmem:[#allocation3 + $0x108] sm:$0xff]  ;;  %v7779_v60 = vld [vmem:[#allocation3 + $0x130] sm:$0xff] }
0x13ea   :  { %12607 = vmatpush1.bf16.msra.mxu1 %v12606_v56  ;;  %12641 = vmatpush1.bf16.msra.mxu0 %v12640_v43  ;;  %v12656_v56 = vpack.c.bf16 %v7749_v62, %v7744_v54  ;;  %v7743_v43 = vld [vmem:[#allocation3 + $0x10] sm:$0xff] }
0x13eb   :  { %12608 = vmatprep.subr.bf16.mxu1 %v13921_v8  ;;  %12643 = vmatprep.subr.bf16.mxu0 %v12642_v13  ;;  %v7745_v13 = vld [vmem:[#allocation3 + $0x20] sm:$0xff]  ;;  %v12658_v35 = vpack.c.bf16 %v7748_v61, %v7743_v43  ;;  %v7780_v43 = vld [vmem:[#allocation3 + $0x138] sm:$0xff] }
0x13ec   :  { %v12695_v50 = vpack.c.bf16 %v7750_v49, %v7745_v13  ;;  %v7784_v61 = vld [vmem:[#allocation3 + $0x158] sm:$0xff]  ;;  %v7789_v13 = vld [vmem:[#allocation3 + $0x180] sm:$0xff] }
0x13ee   :  { %12610 = vmatpush1.bf16.msra.mxu1 %v12609_v5  ;;  %12645 = vmatpush1.bf16.msra.mxu0 %v12644_v53  ;;  %v7753_v5 = vld [vmem:[#allocation3 + $0x60] sm:$0xff]  ;;  %v7758_v53 = vld [vmem:[#allocation3 + $0x88] sm:$0xff] }
0x13ef   :  { %12611 = vmatprep.subr.bf16.mxu1 %v13921_v8  ;;  %12647 = vmatprep.subr.bf16.mxu0 %v12646_v16  ;;  %v12660_v16 = vpack.c.bf16 %v7759_v15, %v7754_v39  ;;  %v12662_v47 = vpack.c.bf16 %v7758_v53, %v7753_v5  ;;  %v12672_v15 = vpack.c.bf16 %v7789_v13, %v7784_v61  ;;  %v7785_v5 = vld [vmem:[#allocation3 + $0x160] sm:$0xff]  ;;  %v7790_v53 = vld [vmem:[#allocation3 + $0x188] sm:$0xff] }
0x13f2   :  { %12613 = vmatpush1.bf16.msra.mxu1 %v12612_v37  ;;  %12649 = vmatpush1.bf16.msra.mxu0 %v12648_v14  ;;  %v12664_v37 = vpack.c.bf16 %v7769_v48, %v7764_v19  ;;  %v7763_v14 = vld [vmem:[#allocation3 + $0xb0] sm:$0xff]  ;;  %v12707_v19 = vpack.c.bf16 %v7790_v53, %v7785_v5  ;;  %v7829_v5 = vld [vmem:[#allocation3 + $0x2c0] sm:$0xf] }
0x13f3   :  { %12614 = vmatprep.subr.bf16.mxu1 %v13921_v8  ;;  %12652 = vmatprep.subr.msk.bf16.mxu0 %vm14099_vm3, %v12650_v26  ;;  %v7765_v26 = vld [vmem:[#allocation3 + $0xc0] sm:$0xff]  ;;  %v12666_v54 = vpack.c.bf16 %v7768_v57, %v7763_v14  ;;  %v7800_v14 = vld [vmem:[#allocation3 + $0x1d8] sm:$0xff] }
0x13f4   :  { %v12701_v62 = vpack.c.bf16 %v7770_v40, %v7765_v26  ;;  %v7804_v57 = vld [vmem:[#allocation3 + $0x1f8] sm:$0xff]  ;;  %v7809_v26 = vld [vmem:[#allocation3 + $0x220] sm:$0xff] }
0x13f6   :  { %12617 = vmatpush1.bf16.msk.msra.mxu1 %vm14099_vm3, %v12615_v38  ;;  %12655 = vmatpush1.bf16.msk.msra.mxu0 %vm14099_vm3, %v12653_v44  ;;  %v12668_v38 = vpack.c.bf16 %v7779_v60, %v7774_v51  ;;  %v7773_v44 = vld [vmem:[#allocation3 + $0x100] sm:$0xff]  ;;  %v12680_v60 = vpack.c.bf16 %v7809_v26, %v7804_v57 }
0x13f7   :  { %12657 = vmatprep.subr.bf16.mxu1 %v12656_v56  ;;  %12694 = vmatprep.subr.bf16.mxu0 %v13921_v8  ;;  %v7778_v56 = vld [vmem:[#allocation3 + $0x128] sm:$0xff]  ;;  %v7599_v26 = vld [vmem:[%s15862_s9] sm:$0x1f] }
0x13f8   :  { %v12670_v49 = vpack.c.bf16 %v7778_v56, %v7773_v44  ;;  %v7810_v44 = vld [vmem:[#allocation3 + $0x228] sm:$0xff] }
0x13f9   :  { %7594 = vmatmul.mubr.f32.vlgmr.msra.gmra.mrb[52].mxu1 %v15202_v58  ;;  %7911 = vmatmul.mubr.f32.vlgmr.msra.gmra.mrb[42].mxu0 %v15202_v58  ;;  %v7814_v56 = vld [vmem:[#allocation3 + $0x248] sm:$0xff] }
0x13fa   :  { %12659 = vmatpush1.bf16.msra.mxu1 %v12658_v35  ;;  %10613 = vmatprep.mubr.msk.f32.mxu1 %vm577_vm0, %v15194_v52  ;;  %v7783_v35 = vld [vmem:[#allocation3 + $0x150] sm:$0xff] }
0x13fb   :  { %12696 = vmatpush1.bf16.msra.mxu0 %v12695_v50  ;;  %10615 = vmatprep.mubr.msk.f32.mxu0 %vm577_vm0, %v15194_v52  ;;  %v7775_v52 = vld [vmem:[#allocation3 + $0x110] sm:$0xff]  ;;  %v7788_v50 = vld [vmem:[#allocation3 + $0x178] sm:$0xff] }
0x13fc   :  { %12661 = vmatprep.subr.bf16.mxu1 %v12660_v16  ;;  %12697 = vmatprep.subr.bf16.mxu0 %v13921_v8  ;;  %v12704_v39 = vpack.c.bf16 %v7780_v43, %v7775_v52  ;;  %v7799_v16 = vld [vmem:[#allocation3 + $0x1d0] sm:$0xff]  ;;  %v12674_v4 = vpack.c.bf16 %v7788_v50, %v7783_v35  ;;  %v7820_v35 = vld [vmem:[#allocation3 + $0x278] sm:$0xff] }
0x13fd   :  { %v12676_v48 = vpack.c.bf16 %v7799_v16, %v7794_v45  ;;  %v7819_v52 = vld [vmem:[#allocation3 + $0x270] sm:$0xff]  ;;  %v7824_v50 = vld [vmem:[#allocation3 + $0x298] sm:$0xff] }
0x13fe   :  { %12663 = vmatpush1.bf16.msra.mxu1 %v12662_v47  ;;  %v7793_v47 = vld [vmem:[#allocation3 + $0x1a0] sm:$0xff]  ;;  %v12684_v13 = vpack.c.bf16 %v7819_v52, %v7814_v56  ;;  %v12688_v16 = vpack.c.bf16 %v7829_v5, %v7824_v50 }
0x13ff   :  { %12699 = vmatpush1.bf16.msra.mxu0 %v12698_v0  ;;  %12665 = vmatprep.subr.bf16.mxu1 %v12664_v37  ;;  %v7798_v0 = vld [vmem:[#allocation3 + $0x1c8] sm:$0xff]  ;;  %v7795_v37 = vld [vmem:[#allocation3 + $0x1b0] sm:$0xff] }
0x1400   :  { %12700 = vmatprep.subr.bf16.mxu0 %v13921_v8  ;;  %v12678_v40 = vpack.c.bf16 %v7798_v0, %v7793_v47  ;;  %v12710_v51 = vpack.c.bf16 %v7800_v14, %v7795_v37  ;;  %v7830_v47 = vld [vmem:[#allocation3 + $0x2c8] sm:$0xf] }
0x1402   :  { %12667 = vmatpush1.bf16.msra.mxu1 %v12666_v54  ;;  %v7803_v54 = vld [vmem:[#allocation3 + $0x1f0] sm:$0xff] }
0x1403   :  { %12702 = vmatpush1.bf16.msra.mxu0 %v12701_v62  ;;  %12669 = vmatprep.subr.bf16.mxu1 %v12668_v38  ;;  %v7808_v62 = vld [vmem:[#allocation3 + $0x218] sm:$0xff]  ;;  %v7805_v38 = vld [vmem:[#allocation3 + $0x200] sm:$0xff] }
0x1404   :  { %12703 = vmatprep.subr.bf16.mxu0 %v13921_v8  ;;  %v12682_v43 = vpack.c.bf16 %v7808_v62, %v7803_v54  ;;  %v12713_v61 = vpack.c.bf16 %v7810_v44, %v7805_v38  ;;  %v7616_v54 = vrot.slane %v7599_v26, %v14229_v22 }
0x1406   :  { %12671 = vmatpush1.bf16.msra.mxu1 %v12670_v49  ;;  %v7813_v49 = vld [vmem:[#allocation3 + $0x240] sm:$0xff] }
0x1407   :  { %12705 = vmatpush1.bf16.msra.mxu0 %v12704_v39  ;;  %12673 = vmatprep.subr.bf16.mxu1 %v12672_v15  ;;  %v7818_v39 = vld [vmem:[#allocation3 + $0x268] sm:$0xff]  ;;  %v7815_v15 = vld [vmem:[#allocation3 + $0x250] sm:$0xff] }
0x1408   :  { %12706 = vmatprep.subr.bf16.mxu0 %v13921_v8  ;;  %v12686_v53 = vpack.c.bf16 %v7818_v39, %v7813_v49  ;;  %v12716_v45 = vpack.c.bf16 %v7820_v35, %v7815_v15  ;;  %v7620_v39 = vrot.slane %v7599_v26, %v14232_v23 }
0x140a   :  { %12675 = vmatpush1.bf16.msra.mxu1 %v12674_v4  ;;  %v7823_v4 = vld [vmem:[#allocation3 + $0x290] sm:$0xff] }
0x140b   :  { %12708 = vmatpush1.bf16.msra.mxu0 %v12707_v19  ;;  %12677 = vmatprep.subr.bf16.mxu1 %v12676_v48  ;;  %v7828_v19 = vld [vmem:[#allocation3 + $0x2b8] sm:$0xf]  ;;  %v7825_v48 = vld [vmem:[#allocation3 + $0x2a0] sm:$0xff] }
0x140c   :  { %12709 = vmatprep.subr.bf16.mxu0 %v13921_v8  ;;  %v12691_v0 = vpack.c.bf16 %v7828_v19, %v7823_v4  ;;  %v12719_v37 = vpack.c.bf16 %v7830_v47, %v7825_v48 }
0x140e   :  { %12679 = vmatpush1.bf16.msra.mxu1 %v12678_v40  ;;  %v7604_v40 = vrot.slane %v7599_v26, %v14211_v10 }
0x140f   :  { %12711 = vmatpush1.bf16.msra.mxu0 %v12710_v51  ;;  %12681 = vmatprep.subr.bf16.mxu1 %v12680_v60  ;;  %v7612_v51 = vrot.slane %v7599_v26, %v14226_v21  ;;  %v7608_v60 = vrot.slane %v7599_v26, %v14214_v11 }
0x1410   :  { %12712 = vmatprep.subr.bf16.mxu0 %v13921_v8 }
0x1412   :  { %12683 = vmatpush1.bf16.msra.mxu1 %v12682_v43 }
0x1413   :  { %12714 = vmatpush1.bf16.msra.mxu0 %v12713_v61  ;;  %12685 = vmatprep.subr.bf16.mxu1 %v12684_v13 }
0x1414   :  { %12715 = vmatprep.subr.bf16.mxu0 %v13921_v8 }
0x1416   :  { %12687 = vmatpush1.bf16.msra.mxu1 %v12686_v53 }
0x1417   :  { %12717 = vmatpush1.bf16.msra.mxu0 %v12716_v45  ;;  %12690 = vmatprep.subr.msk.bf16.mxu1 %vm14099_vm3, %v12688_v16 }
0x1418   :  { %12718 = vmatprep.subr.bf16.mxu0 %v13921_v8 }
0x141a   :  { %12693 = vmatpush1.bf16.msk.msra.mxu1 %vm14099_vm3, %v12691_v0 }
0x141b   :  { %12721 = vmatpush1.bf16.msk.msra.mxu0 %vm14099_vm3, %v12719_v37 }
0x141d   :  { %7982 = vmatmul.mubr.f32.vlgmr.msra.gmra.mrb[54].mxu1 %v15202_v58 }
0x141e   :  { %8053 = vmatmul.mubr.f32.vlgmr.msra.gmra.mrb[44].mxu0 %v15202_v58 }
0x1480   :  { %v7356_v14 = vpop.f32.mrb[40].mxu0 }
0x1481   :  { %v7358_v57 = vpop.f32.mrb[41].mxu0 }
0x14a8   :  { %v7453_v62 = vpop.f32.mrb[38].mxu0  ;;  %v7524_v38 = vpop.f32.mrb[50].mxu1 }
0x14a9   :  { %v7626_v44 = vadd.f32 %v7604_v40, %v7453_v62  ;;  %v15254_v56 = vadd.f32 %v7612_v51, %v7524_v38  ;;  %v7455_v58 = vpop.f32.mrb[39].mxu0  ;;  %v7526_v52 = vpop.f32.mrb[51].mxu1  ;;  %v8113_v38 = vrot.slane %v15132_v41, 6 }
0x14aa   :  { %v7627_v43 = vadd.f32 %v7608_v60, %v7455_v58  ;;  %v15256_v61 = vadd.f32 %v7616_v54, %v7526_v52 }
0x14ab   :  { %13634 = vtanh.f32 %v15254_v56  ;;  %v10603_v62 = vmul.f32 -1.442695, %v7626_v44 }
0x14ac   :  { %13636 = vtanh.f32 %v15256_v61  ;;  %v10604_v54 = vmul.f32 -1.442695, %v7627_v43 }
0x14b5   :  { %v13635_v13 = vpop.eup %13634 }
0x14b6   :  { %v13637_v49 = vpop.eup %13636  ;;  %7667 = vrot.lane.b32.xlu0 %v13635_v13, %s13924_s6 }
0x14b7   :  { %7669 = vrot.lane.b32.xlu1 %v13637_v49, %s13924_s6 }
0x14cc   :  { %v7595_v15 = vpop.f32.mrb[52].mxu1  ;;  %v7912_v35 = vpop.f32.mrb[42].mxu0 }
0x14cd   :  { %v7596_v50 = vadd.f32 %v7595_v15, %v7356_v14  ;;  %v7597_v5 = vpop.f32.mrb[53].mxu1  ;;  %v7914_v53 = vpop.f32.mrb[43].mxu0 }
0x14ce   :  { %v8064_v41 = vrot.slane %v7914_v53, 4 }
0x14cf   :  { %v15263_v45 = vadd.f32 %v7620_v39, %v7596_v50 }
0x14f0   :  { %v7983_v16 = vpop.f32.mrb[54].mxu1 }
0x14f1   :  { %v8065_v4 = vrot.slane %v7983_v16, 4  ;;  %v15265_v19 = vpop.f32.mrb[44].mxu0  ;;  %v7985_v48 = vpop.f32.mrb[55].mxu1 }
0x14f2   :  { %v8066_v47 = vrot.slane %v7985_v48, 4  ;;  %v8056_v0 = vpop.f32.mrb[45].mxu0 }
0x14f3   :  { %v8075_v37 = vadd.f32 %v8065_v4, %v14236_v29  ;;  %v8074_v0 = vadd.f32 %v8064_v41, %v14223_v20 }
0x14f4   :  { %v15269_v57 = vadd.f32 %v8066_v47, %v14241_v32  ;;  %v8063_v47 = vrot.slane %v7912_v35, 4 }
0x14f5   :  { %v10618_v26 = vmul.f32 -1.442695, %v8075_v37  ;;  %13638 = vtanh.f32 %v8075_v37 }
0x14f6   :  { %13640 = vtanh.f32 %v15269_v57  ;;  %v8073_v37 = vadd.f32 %v8063_v47, %v14221_v17 }
0x14f7   :  { %13642 = vpow2.f32 %v10618_v26  ;;  %v10617_v26 = vmul.f32 -1.442695, %v8074_v0 }
0x14ff   :  { %v13639_v14 = vpop.eup %13638 }
0x1500   :  { %v13641_v40 = vpop.eup %13640  ;;  %8120 = vrot.lane.b32.xlu0 %v13639_v14, %s13924_s6  ;;  %v10616_v14 = vmul.f32 -1.442695, %v8073_v37 }
0x1501   :  { %v13643_v51 = vpop.eup %13642  ;;  %8122 = vrot.lane.b32.xlu1 %v13641_v40, %s13924_s6 }
0x1502   :  { %v8093_v60 = vadd.f32 1.0, %v13643_v51 }
0x1504   :  { %13644 = vrcp.f32 %v8093_v60 }
0x1505   :  { %13646 = vpow2.f32 %v10604_v54 }
0x1506   :  { %13648 = vpow2.f32 %v10603_v62 }
0x150e   :  { %v13645_v58 = vpop.eup %13644 }
0x150f   :  { %v15275_v52 = vmul.f32 %v13645_v58, %v8113_v38  ;;  %v13647_v13 = vpop.eup %13646 }
0x1510   :  { %v13649_v49 = vpop.eup %13648  ;;  %v7638_v39 = vadd.f32 1.0, %v13647_v13 }
0x1511   :  { %v7637_v15 = vadd.f32 1.0, %v13649_v49 }
0x1512   :  { %13650 = vrcp.f32 %v7638_v39  ;;  %v10605_v39 = vmul.f32 -1.442695, %v15254_v56 }
0x1513   :  { %13652 = vrcp.f32 %v7637_v15 }
0x1514   :  { %13654 = vpow2.f32 %v10617_v26 }
0x1515   :  { %13656 = vpow2.f32 %v10616_v14 }
0x151c   :  { %v13651_v5 = vpop.eup %13650 }
0x151d   :  { %v13653_v4 = vpop.eup %13652 }
0x151e   :  { %v13655_v40 = vpop.eup %13654 }
0x151f   :  { %v13657_v51 = vpop.eup %13656  ;;  %v8085_v60 = vadd.f32 1.0, %v13655_v40 }
0x1520   :  { %v8084_v54 = vadd.f32 1.0, %v13657_v51 }
0x1521   :  { %13658 = vrcp.f32 %v8085_v60  ;;  %v8244_v60 = vld [vmem:[#allocation8 + $0x8] sm:$0xff] }
0x1522   :  { %13660 = vrcp.f32 %v8084_v54  ;;  %v8249_v54 = vld [vmem:[#allocation8 + $0x30] sm:$0xff] }
0x1523   :  { %13662 = vpow2.f32 %v10605_v39  ;;  %v8250_v39 = vld [vmem:[#allocation8 + $0x38] sm:$0xff] }
0x1528   :  { %v7668_v50 = vpop.permute.xlu0 %7667 }
0x1529   :  { %v7670_v16 = vpop.permute.xlu1 %7669 }
0x152a   :  { %v7671_v43 = vsel %vm869_vm7, %v7668_v50, %v7670_v16  ;;  %v7675_v44 = vmul.f32 %v13651_v5, %v7670_v16 }
0x152b   :  { %v7674_v48 = vmul.f32 %v13653_v4, %v7671_v43  ;;  %v13659_v38 = vpop.eup %13658  ;;  %v7663_v43 = vmul.f32 %v13651_v5, %v15119_v6  ;;  %v8112_v6 = vrot.slane %v15129_v1, 6  ;;  %v8246_v1 = vld [vmem:[#allocation8 + $0x18] sm:$0xff] }
0x152c   :  { %7680 = vrot.lane.b32.xlu1 %v7675_v44, %s13923_s17  ;;  %v13661_v13 = vpop.eup %13660 }
0x152d   :  { %7678 = vrot.lane.b32.xlu0 %v7674_v48, %s13923_s17  ;;  %v13663_v15 = vpop.eup %13662  ;;  %v8116_v5 = vmul.f32 %v13659_v38, %v8112_v6  ;;  %v8260_v6 = vld [vmem:[#allocation8 + $0x88] sm:$0xff] }
0x152e   :  { %v7646_v50 = vadd.f32 1.0, %v13663_v15  ;;  %v8254_v15 = vld [vmem:[#allocation8 + $0x58] sm:$0xff] }
0x1530   :  { %13664 = vrcp.f32 %v7646_v50 }
0x153a   :  { %v13665_v16 = vpop.eup %13664 }
0x153b   :  { %v7664_v44 = vmul.f32 %v13665_v16, %v15121_v25  ;;  %v8253_v16 = vld [vmem:[#allocation8 + $0x50] sm:$0xff] }
0x1572   :  { %v8121_v62 = vpop.permute.xlu0 %8120 }
0x1573   :  { %v8123_v58 = vpop.permute.xlu1 %8122 }
0x1574   :  { %v8124_v35 = vsel %vm869_vm7, %v8121_v62, %v8123_v58  ;;  %v8128_v53 = vmul.f32 %v13659_v38, %v8123_v58  ;;  %v8243_v62 = vld [vmem:[#allocation8] sm:$0xff]  ;;  %v12722_v58 = vpack.c.bf16 %v8249_v54, %v8244_v60 }
0x1575   :  { %v8127_v49 = vmul.f32 %v13661_v13, %v8124_v35  ;;  %v8248_v13 = vld [vmem:[#allocation8 + $0x28] sm:$0xff]  ;;  %v8251_v35 = vld [vmem:[#allocation8 + $0x40] sm:$0xff] }
0x1576   :  { %8133 = vrot.lane.b32.xlu1 %v8128_v53, %s13923_s17  ;;  %v12724_v38 = vpack.c.bf16 %v8248_v13, %v8243_v62  ;;  %v12760_v53 = vpack.c.bf16 %v8251_v35, %v8246_v1  ;;  %12723 = vmatprep.subr.bf16.mxu1 %v12722_v58  ;;  %v8263_v54 = vld [vmem:[#allocation8 + $0xa0] sm:$0xff]  ;;  %v8268_v62 = vld [vmem:[#allocation8 + $0xc8] sm:$0xff]  ;;  %v8266_v58 = vld [vmem:[#allocation8 + $0xb8] sm:$0xff] }
0x1577   :  { %8131 = vrot.lane.b32.xlu0 %v8127_v49, %s13923_s17  ;;  %v8245_v49 = vld [vmem:[#allocation8 + $0x10] sm:$0xff]  ;;  %v8271_v1 = vld [vmem:[#allocation8 + $0xe0] sm:$0xff] }
0x1578   :  { %v12762_v50 = vpack.c.bf16 %v8250_v39, %v8245_v49  ;;  %12725 = vmatpush1.bf16.msra.mxu1 %v12724_v38  ;;  %12761 = vmatprep.subr.bf16.mxu0 %v12760_v53  ;;  %v8265_v35 = vld [vmem:[#allocation8 + $0xb0] sm:$0xff]  ;;  %v8270_v38 = vld [vmem:[#allocation8 + $0xd8] sm:$0xff]  ;;  %v12732_v53 = vpack.c.bf16 %v8268_v62, %v8263_v54  ;;  %v12768_v49 = vpack.c.bf16 %v8271_v1, %v8266_v58  ;;  %v8288_v62 = vld [vmem:[#allocation8 + $0x168] sm:$0xff] }
0x1579   :  { %v8274_v39 = vld [vmem:[#allocation8 + $0xf8] sm:$0xff]  ;;  %v8285_v58 = vld [vmem:[#allocation8 + $0x150] sm:$0xff] }
0x157a   :  { %12763 = vmatpush1.bf16.msra.mxu0 %v12762_v50  ;;  %v8273_v50 = vld [vmem:[#allocation8 + $0xf0] sm:$0xff]  ;;  %v8290_v1 = vld [vmem:[#allocation8 + $0x178] sm:$0xff] }
0x159e   :  { %v7681_v4 = vpop.permute.xlu1 %7680 }
0x159f   :  { %v7679_v48 = vpop.permute.xlu0 %7678 }
0x15a0   :  { %v7682_v41 = vsel %vm577_vm0, %v7679_v48, %v7681_v4  ;;  %v15289_v47 = vadd.f32 %v7679_v48, %v7663_v43  ;;  %v8258_v4 = vld [vmem:[#allocation8 + $0x78] sm:$0xff]  ;;  %v8256_v48 = vld [vmem:[#allocation8 + $0x68] sm:$0xff] }
0x15a1   :  { %v15291_v0 = vadd.f32 %v7682_v41, %v7664_v44  ;;  %v12728_v44 = vpack.c.bf16 %v8258_v4, %v8253_v16  ;;  %v8261_v41 = vld [vmem:[#allocation8 + $0x90] sm:$0xff]  ;;  %v8278_v4 = vld [vmem:[#allocation8 + $0x118] sm:$0xff] }
0x15a2   :  { %13666 = vtanh.f32 %v15289_v47 }
0x15a3   :  { %13668 = vtanh.f32 %v15291_v0 }
0x15ac   :  { %v13667_v56 = vpop.eup %13666 }
0x15ad   :  { %v13669_v37 = vpop.eup %13668  ;;  %7691 = vrot.lane.b32.xlu0 %v13667_v56, %s13925_s19  ;;  %v8255_v56 = vld [vmem:[#allocation8 + $0x60] sm:$0xff] }
0x15ae   :  { %7693 = vrot.lane.b32.xlu1 %v13669_v37, %s13925_s19  ;;  %v12764_v37 = vpack.c.bf16 %v8261_v41, %v8256_v48  ;;  %v8281_v48 = vld [vmem:[#allocation8 + $0x130] sm:$0xff] }
0x15b0   :  { %12765 = vmatprep.subr.bf16.mxu0 %v12764_v37  ;;  %v8280_v37 = vld [vmem:[#allocation8 + $0x128] sm:$0xff] }
0x15e8   :  { %v8134_v25 = vpop.permute.xlu1 %8133 }
0x15e9   :  { %v8132_v26 = vpop.permute.xlu0 %8131 }
0x15ea   :  { %v8135_v14 = vsel %vm577_vm0, %v8132_v26, %v8134_v25  ;;  %v15299_v40 = vadd.f32 %v8132_v26, %v8116_v5  ;;  %v8264_v25 = vld [vmem:[#allocation8 + $0xa8] sm:$0xff]  ;;  %v8269_v5 = vld [vmem:[#allocation8 + $0xd0] sm:$0xff] }
0x15eb   :  { %v15302_v51 = vadd.f32 %v8135_v14, %v15275_v52  ;;  %v8259_v52 = vld [vmem:[#allocation8 + $0x80] sm:$0xff]  ;;  %v12766_v14 = vpack.c.bf16 %v8260_v6, %v8255_v56  ;;  %v12730_v60 = vpack.c.bf16 %v8269_v5, %v8264_v25  ;;  %v8284_v6 = vld [vmem:[#allocation8 + $0x148] sm:$0xff]  ;;  %v8289_v25 = vld [vmem:[#allocation8 + $0x170] sm:$0xff] }
0x15ec   :  { %13670 = vtanh.f32 %v15299_v40  ;;  %v12726_v43 = vpack.c.bf16 %v8259_v52, %v8254_v15  ;;  %v8279_v15 = vld [vmem:[#allocation8 + $0x120] sm:$0xff]  ;;  %v12770_v52 = vpack.c.bf16 %v8270_v38, %v8265_v35  ;;  %v8286_v5 = vld [vmem:[#allocation8 + $0x158] sm:$0xff] }
0x15ed   :  { %13672 = vtanh.f32 %v15302_v51  ;;  %12767 = vmatpush1.bf16.msra.mxu0 %v12766_v14  ;;  %v12734_v16 = vpack.c.bf16 %v8279_v15, %v8274_v39  ;;  %v8275_v56 = vld [vmem:[#allocation8 + $0x100] sm:$0xff]  ;;  %v12738_v14 = vpack.c.bf16 %v8289_v25, %v8284_v6  ;;  %v8294_v35 = vld [vmem:[#allocation8 + $0x198] sm:$0xff]  ;;  %v8301_v39 = vld [vmem:[#allocation8 + $0x1d0] sm:$0xff]  ;;  %v10606_v15 = vmul.f32 -1.442695, %v15256_v61 }
0x15ee   :  { %12727 = vmatprep.subr.bf16.mxu1 %v12726_v43  ;;  %v8276_v43 = vld [vmem:[#allocation8 + $0x108] sm:$0xff]  ;;  %12769 = vmatprep.subr.bf16.mxu0 %v12768_v49  ;;  %v12774_v54 = vpack.c.bf16 %v8280_v37, %v8275_v56  ;;  %v8299_v38 = vld [vmem:[#allocation8 + $0x1c0] sm:$0xff]  ;;  %v8309_v6 = vld [vmem:[#allocation8 + $0x210] sm:$0xff] }
0x15ef   :  { %12729 = vmatpush1.bf16.msra.mxu1 %v12728_v44  ;;  %v12772_v41 = vpack.c.bf16 %v8281_v48, %v8276_v43  ;;  %v12736_v44 = vpack.c.bf16 %v8278_v4, %v8273_v50  ;;  %v8296_v49 = vld [vmem:[#allocation8 + $0x1a8] sm:$0xff]  ;;  %v12778_v50 = vpack.c.bf16 %v8290_v1, %v8285_v58  ;;  %v8298_v4 = vld [vmem:[#allocation8 + $0x1b8] sm:$0xff]  ;;  %v8295_v43 = vld [vmem:[#allocation8 + $0x1a0] sm:$0xff]  ;;  %v10607_v48 = vmul.f32 -1.442695, %v15263_v45 }
0x15f0   :  { %12731 = vmatprep.subr.bf16.mxu1 %v12730_v60  ;;  %v8283_v60 = vld [vmem:[#allocation8 + $0x140] sm:$0xff]  ;;  %v8300_v56 = vld [vmem:[#allocation8 + $0x1c8] sm:$0xff]  ;;  %v8306_v25 = vld [vmem:[#allocation8 + $0x1f8] sm:$0xff]  ;;  %13674 = vpow2.f32 %v10606_v15 }
0x15f1   :  { %12771 = vmatpush1.bf16.msra.mxu0 %v12770_v52  ;;  %v12742_v52 = vpack.c.bf16 %v8299_v38, %v8294_v35  ;;  %v8304_v37 = vld [vmem:[#allocation8 + $0x1e8] sm:$0xff]  ;;  %13676 = vpow2.f32 %v10607_v48  ;;  %v8314_v58 = vld [vmem:[#allocation8 + $0x238] sm:$0xff]  ;;  %v8321_v35 = vld [vmem:[#allocation8 + $0x270] sm:$0xff] }
0x15f2   :  { %12773 = vmatprep.subr.bf16.mxu0 %v12772_v41  ;;  %v12780_v41 = vpack.c.bf16 %v8301_v39, %v8296_v49  ;;  %v8316_v1 = vld [vmem:[#allocation8 + $0x248] sm:$0xff]  ;;  %v8313_v15 = vld [vmem:[#allocation8 + $0x230] sm:$0xff]  ;;  %v8326_v48 = vld [vmem:[#allocation8 + $0x298] sm:$0xff] }
0x15f3   :  { %12733 = vmatpush1.bf16.msra.mxu1 %v12732_v53  ;;  %v12740_v53 = vpack.c.bf16 %v8288_v62, %v8283_v60  ;;  %v8305_v60 = vld [vmem:[#allocation8 + $0x1f0] sm:$0xff]  ;;  %v8310_v62 = vld [vmem:[#allocation8 + $0x218] sm:$0xff] }
0x15f4   :  { %12735 = vmatprep.subr.bf16.mxu1 %v12734_v16  ;;  %v8293_v16 = vld [vmem:[#allocation8 + $0x190] sm:$0xff]  ;;  %v12786_v49 = vpack.c.bf16 %v8310_v62, %v8305_v60  ;;  %v8330_v62 = vld [vmem:[#allocation8 + $0x2b8] sm:$0xf] }
0x15f5   :  { %12775 = vmatpush1.bf16.msra.mxu0 %v12774_v54  ;;  %v12744_v61 = vpack.c.bf16 %v8298_v4, %v8293_v16  ;;  %v8303_v54 = vld [vmem:[#allocation8 + $0x1e0] sm:$0xff]  ;;  %v8320_v16 = vld [vmem:[#allocation8 + $0x268] sm:$0xff] }
0x15f6   :  { %v13671_v26 = vpop.eup %13670  ;;  %v8324_v4 = vld [vmem:[#allocation8 + $0x288] sm:$0xff] }
0x15f7   :  { %v13673_v13 = vpop.eup %13672  ;;  %8144 = vrot.lane.b32.xlu0 %v13671_v26, %s13925_s19  ;;  %v8291_v26 = vld [vmem:[#allocation8 + $0x180] sm:$0xff]  ;;  %12737 = vmatpush1.bf16.msra.mxu1 %v12736_v44  ;;  %v12782_v44 = vpack.c.bf16 %v8300_v56, %v8295_v43  ;;  %v8329_v43 = vld [vmem:[#allocation8 + $0x2b0] sm:$0xf] }
0x15f8   :  { %8146 = vrot.lane.b32.xlu1 %v13673_v13, %s13925_s19  ;;  %v12776_v13 = vpack.c.bf16 %v8291_v26, %v8286_v5  ;;  %12739 = vmatprep.subr.bf16.mxu1 %v12738_v14  ;;  %v8311_v5 = vld [vmem:[#allocation8 + $0x220] sm:$0xff]  ;;  %v12746_v26 = vpack.c.bf16 %v8309_v6, %v8304_v37  ;;  %v8308_v14 = vld [vmem:[#allocation8 + $0x208] sm:$0xff]  ;;  %v12754_v6 = vpack.c.bf16 %v8329_v43, %v8324_v4  ;;  %v8067_v4 = vrot.slane %v15265_v19, 4 }
0x15f9   :  { %v12784_v45 = vpack.c.bf16 %v8311_v5, %v8306_v25  ;;  %v12748_v38 = vpack.c.bf16 %v8308_v14, %v8303_v54  ;;  %v8323_v25 = vld [vmem:[#allocation8 + $0x280] sm:$0xff]  ;;  %v8328_v5 = vld [vmem:[#allocation8 + $0x2a8] sm:$0xf] }
0x15fa   :  { %12777 = vmatprep.subr.bf16.mxu0 %v12776_v13  ;;  %v8319_v13 = vld [vmem:[#allocation8 + $0x260] sm:$0xff]  ;;  %v12757_v54 = vpack.c.bf16 %v8328_v5, %v8323_v25  ;;  %v8077_v43 = vadd.f32 %v8067_v4, %v14244_v34 }
0x15fb   :  { %12741 = vmatpush1.bf16.msra.mxu1 %v12740_v53  ;;  %12779 = vmatpush1.bf16.msra.mxu0 %v12778_v50  ;;  %v12750_v39 = vpack.c.bf16 %v8319_v13, %v8314_v58  ;;  %v8318_v53 = vld [vmem:[#allocation8 + $0x258] sm:$0xff]  ;;  %v8315_v50 = vld [vmem:[#allocation8 + $0x240] sm:$0xff] }
0x15fc   :  { %12743 = vmatprep.subr.bf16.mxu1 %v12742_v52  ;;  %12781 = vmatprep.subr.bf16.mxu0 %v12780_v41  ;;  %v12788_v52 = vpack.c.bf16 %v8321_v35, %v8316_v1  ;;  %v8331_v41 = vld [vmem:[#allocation8 + $0x2c0] sm:$0xf]  ;;  %v12752_v56 = vpack.c.bf16 %v8318_v53, %v8313_v15  ;;  %v12790_v37 = vpack.c.bf16 %v8320_v16, %v8315_v50  ;;  %v8156_v50 = vld [vmem:[#allocation6 + $0x18] sm:$0xff] }
0x15ff   :  { %12745 = vmatpush1.bf16.msra.mxu1 %v12744_v61  ;;  %12783 = vmatpush1.bf16.msra.mxu0 %v12782_v44  ;;  %v13675_v61 = vpop.eup %13674  ;;  %v12792_v44 = vpack.c.bf16 %v8331_v41, %v8326_v48  ;;  %v10619_v48 = vmul.f32 -1.442695, %v15269_v57  ;;  %v10620_v41 = vmul.f32 -1.442695, %v8077_v43  ;;  %v8247_v57 = vld [vmem:[#allocation8 + $0x20] sm:$0xff] }
0x1600   :  { %12747 = vmatprep.subr.bf16.mxu1 %v12746_v26  ;;  %12785 = vmatprep.subr.bf16.mxu0 %v12784_v45  ;;  %v13677_v26 = vpop.eup %13676  ;;  %v7657_v14 = vadd.f32 1.0, %v13675_v61  ;;  %v8325_v45 = vld [vmem:[#allocation8 + $0x290] sm:$0xff] }
0x1601   :  { %v7658_v60 = vadd.f32 1.0, %v13677_v26  ;;  %v12795_v58 = vpack.c.bf16 %v8330_v62, %v8325_v45  ;;  %v8252_v62 = vld [vmem:[#allocation8 + $0x48] sm:$0xff] }
0x1602   :  { %13678 = vrcp.f32 %v7657_v14 }
0x1603   :  { %12749 = vmatpush1.bf16.msra.mxu1 %v12748_v38  ;;  %12787 = vmatpush1.bf16.msra.mxu0 %v12786_v49  ;;  %13680 = vrcp.f32 %v7658_v60 }
0x1604   :  { %12751 = vmatprep.subr.bf16.mxu1 %v12750_v39  ;;  %12789 = vmatprep.subr.bf16.mxu0 %v12788_v52  ;;  %v8161_v52 = vld [vmem:[#allocation6 + $0x40] sm:$0xff]  ;;  %13682 = vpow2.f32 %v10619_v48 }
0x1605   :  { %v12864_v16 = vpack.c.bf16 %v8161_v52, %v8156_v50  ;;  %13684 = vpow2.f32 %v10620_v41  ;;  %v8257_v52 = vld [vmem:[#allocation8 + $0x70] sm:$0xff] }
0x1606   :  { %v8165_v41 = vld [vmem:[#allocation6 + $0x60] sm:$0xff] }
0x1607   :  { %12753 = vmatpush1.bf16.msra.mxu1 %v12752_v56  ;;  %12791 = vmatpush1.bf16.msra.mxu0 %v12790_v37 }
0x1608   :  { %12756 = vmatprep.subr.msk.bf16.mxu1 %vm14099_vm3, %v12754_v6  ;;  %12794 = vmatprep.subr.msk.bf16.mxu0 %vm14099_vm3, %v12792_v44 }
0x160b   :  { %12759 = vmatpush1.bf16.msk.msra.mxu1 %vm14099_vm3, %v12757_v54  ;;  %12797 = vmatpush1.bf16.msk.msra.mxu0 %vm14099_vm3, %v12795_v58  ;;  %v8155_v58 = vld [vmem:[#allocation6 + $0x10] sm:$0xff] }
0x160c   :  { %12798 = vmatprep.subr.bf16.mxu1 %v13921_v8  ;;  %v13679_v13 = vpop.eup %13678  ;;  %12865 = vmatprep.subr.bf16.mxu0 %v12864_v16  ;;  %v8262_v16 = vld [vmem:[#allocation8 + $0x98] sm:$0xff] }
0x160d   :  { %v13681_v49 = vpop.eup %13680 }
0x160e   :  { %v13683_v56 = vpop.eup %13682 }
0x160f   :  { %v13685_v37 = vpop.eup %13684  ;;  %v8104_v6 = vadd.f32 1.0, %v13683_v56  ;;  %v8170_v56 = vld [vmem:[#allocation6 + $0x88] sm:$0xff] }
0x1610   :  { %v8105_v25 = vadd.f32 1.0, %v13685_v37  ;;  %v8176_v37 = vld [vmem:[#allocation6 + $0xb8] sm:$0xff] }
0x1611   :  { %13686 = vrcp.f32 %v8104_v6  ;;  %v8181_v6 = vld [vmem:[#allocation6 + $0xe0] sm:$0xff] }
0x1612   :  { %13688 = vrcp.f32 %v8105_v25  ;;  %v12802_v25 = vpack.c.bf16 %v8262_v16, %v8257_v52  ;;  %v8287_v52 = vld [vmem:[#allocation8 + $0x160] sm:$0xff]  ;;  %v8292_v16 = vld [vmem:[#allocation8 + $0x188] sm:$0xff] }
0x161b   :  { %v13687_v5 = vpop.eup %13686 }
0x161c   :  { %v13689_v54 = vpop.eup %13688 }
0x161f   :  { %v7692_v1 = vpop.permute.xlu0 %7691 }
0x1620   :  { %v15319_v35 = vmul.f32 %v13679_v13, %v7692_v1  ;;  %v7694_v38 = vpop.permute.xlu1 %7693  ;;  %v8160_v13 = vld [vmem:[#allocation6 + $0x38] sm:$0xff] }
0x1621   :  { %v7695_v39 = vsel %vm894_vm8, %v7692_v1, %v7694_v38  ;;  %v8166_v1 = vld [vmem:[#allocation6 + $0x68] sm:$0xff]  ;;  %v8171_v38 = vld [vmem:[#allocation6 + $0x90] sm:$0xff]  ;;  %v12866_v4 = vpack.c.bf16 %v8160_v13, %v8155_v58 }
0x1622   :  { %v15322_v15 = vmul.f32 %v13681_v49, %v7695_v39  ;;  %8333 = vrot.lane.b32.xlu0 %v15319_v35, %s13926_s2  ;;  %v12799_v49 = vpack.c.bf16 %v8252_v62, %v8247_v57  ;;  %v12868_v48 = vpack.c.bf16 %v8171_v38, %v8166_v1  ;;  %v8277_v57 = vld [vmem:[#allocation8 + $0x110] sm:$0xff]  ;;  %v8282_v62 = vld [vmem:[#allocation8 + $0x138] sm:$0xff] }
0x1623   :  { %v8185_v1 = vld [vmem:[#allocation6 + $0x100] sm:$0xff]  ;;  %v8190_v38 = vld [vmem:[#allocation6 + $0x128] sm:$0xff] }
0x1624   :  { %v7702_v53 = vcombine.low %v15319_v35, %v15322_v15  ;;  %8335 = vrot.lane.b32.xlu1 %v15322_v15, %s13926_s2 }
0x1669   :  { %v8145_v61 = vpop.permute.xlu0 %8144 }
0x166a   :  { %v8151_v44 = vmul.f32 %v13687_v5, %v8145_v61  ;;  %v8147_v26 = vpop.permute.xlu1 %8146  ;;  %v8267_v5 = vld [vmem:[#allocation8 + $0xc0] sm:$0xff] }
0x166b   :  { %v8148_v19 = vsel %vm894_vm8, %v8145_v61, %v8147_v26  ;;  %v8272_v61 = vld [vmem:[#allocation8 + $0xe8] sm:$0xff]  ;;  %v12872_v26 = vpack.c.bf16 %v8181_v6, %v8176_v37  ;;  %v8206_v37 = vld [vmem:[#allocation6 + $0x1a8] sm:$0xff]  ;;  %v8211_v6 = vld [vmem:[#allocation6 + $0x1d0] sm:$0xff] }
0x166c   :  { %v8570_v14 = vrot.slane %v8151_v44, 4  ;;  %v8152_v60 = vmul.f32 %v13689_v54, %v8148_v19  ;;  %v12870_v44 = vpack.c.bf16 %v8170_v56, %v8165_v41  ;;  %v8175_v54 = vld [vmem:[#allocation6 + $0xb0] sm:$0xff]  ;;  %v8180_v19 = vld [vmem:[#allocation6 + $0xd8] sm:$0xff] }
0x166d   :  { %v12874_v58 = vpack.c.bf16 %v8180_v19, %v8175_v54  ;;  %v8195_v41 = vld [vmem:[#allocation6 + $0x150] sm:$0xff]  ;;  %v8200_v56 = vld [vmem:[#allocation6 + $0x178] sm:$0xff]  ;;  %v8205_v54 = vld [vmem:[#allocation6 + $0x1a0] sm:$0xff] }
0x166e   :  { %v8571_v45 = vrot.slane %v8152_v60, 4  ;;  %8572 = vrot.lane.b32.xlu0 %v8570_v14, %s13926_s2  ;;  %v8186_v14 = vld [vmem:[#allocation6 + $0x108] sm:$0xff]  ;;  %v8191_v60 = vld [vmem:[#allocation6 + $0x130] sm:$0xff] }
0x166f   :  { %v12876_v13 = vpack.c.bf16 %v8191_v60, %v8186_v14  ;;  %v8210_v19 = vld [vmem:[#allocation6 + $0x1c8] sm:$0xff]  ;;  %v8216_v14 = vld [vmem:[#allocation6 + $0x1f8] sm:$0xff]  ;;  %v8221_v60 = vld [vmem:[#allocation6 + $0x220] sm:$0xff] }
0x1670   :  { %8574 = vrot.lane.b32.xlu1 %v8571_v45, %s13926_s2  ;;  %v12805_v45 = vpack.c.bf16 %v8272_v61, %v8267_v5  ;;  %v8297_v5 = vld [vmem:[#allocation8 + $0x1b0] sm:$0xff]  ;;  %v8302_v61 = vld [vmem:[#allocation8 + $0x1d8] sm:$0xff] }
0x1694   :  { %v8334_v39 = vpop.permute.xlu0 %8333 }
0x1696   :  { %v8336_v50 = vpop.permute.xlu1 %8335 }
0x1697   :  { %10623 = vmatprep.mubr.msk.f32.mxu1 %vm577_vm0, %v8336_v50  ;;  %10626 = vmatprep.mubr.msk.f32.mxu0 %vm577_vm0, %v8336_v50  ;;  %v15339_v43 = vsel %vm1325_vm9, %v8334_v39, %v8336_v50  ;;  %v8201_v39 = vld [vmem:[#allocation6 + $0x180] sm:$0xff] }
0x1698   :  { %8421 = vmatmul.mubr.f32.vlgmr.msra.gmra.mrb[56].mxu1 %v15339_v43  ;;  %8492 = vmatmul.mubr.f32.vlgmr.msra.gmra.mrb[46].mxu0 %v15339_v43 }
0x1699   :  { %12800 = vmatpush1.bf16.msra.mxu1 %v12799_v49  ;;  %10628 = vmatprep.mubr.msk.f32.mxu1 %vm577_vm0, %v8336_v50  ;;  %v8196_v49 = vld [vmem:[#allocation6 + $0x158] sm:$0xff]  ;;  %v12808_v50 = vpack.c.bf16 %v8282_v62, %v8277_v57  ;;  %v8307_v57 = vld [vmem:[#allocation8 + $0x200] sm:$0xff] }
0x169a   :  { %12801 = vmatprep.subr.bf16.mxu1 %v13921_v8  ;;  %12867 = vmatpush1.bf16.msra.mxu0 %v12866_v4  ;;  %v12878_v4 = vpack.c.bf16 %v8190_v38, %v8185_v1  ;;  %v8312_v62 = vld [vmem:[#allocation8 + $0x228] sm:$0xff]  ;;  %v8215_v1 = vld [vmem:[#allocation6 + $0x1f0] sm:$0xff] }
0x169b   :  { %12869 = vmatprep.subr.bf16.mxu0 %v12868_v48  ;;  %v12880_v48 = vpack.c.bf16 %v8201_v39, %v8196_v49  ;;  %v8220_v38 = vld [vmem:[#allocation6 + $0x218] sm:$0xff]  ;;  %v8226_v49 = vld [vmem:[#allocation6 + $0x248] sm:$0xff]  ;;  %v8231_v39 = vld [vmem:[#allocation6 + $0x270] sm:$0xff] }
0x169d   :  { %12803 = vmatpush1.bf16.msra.mxu1 %v12802_v25  ;;  %v12811_v25 = vpack.c.bf16 %v8292_v16, %v8287_v52  ;;  %v8317_v52 = vld [vmem:[#allocation8 + $0x250] sm:$0xff]  ;;  %v8322_v16 = vld [vmem:[#allocation8 + $0x278] sm:$0xff] }
0x169e   :  { %12804 = vmatprep.subr.bf16.mxu1 %v13921_v8  ;;  %12871 = vmatpush1.bf16.msra.mxu0 %v12870_v44  ;;  %v12882_v44 = vpack.c.bf16 %v8200_v56, %v8195_v41  ;;  %v8225_v41 = vld [vmem:[#allocation6 + $0x240] sm:$0xff]  ;;  %v8230_v56 = vld [vmem:[#allocation6 + $0x268] sm:$0xff] }
0x169f   :  { %12873 = vmatprep.subr.bf16.mxu0 %v12872_v26  ;;  %v12884_v26 = vpack.c.bf16 %v8211_v6, %v8206_v37  ;;  %v8236_v37 = vld [vmem:[#allocation6 + $0x298] sm:$0xff]  ;;  %v8241_v6 = vld [vmem:[#allocation6 + $0x2c0] sm:$0xf] }
0x16a1   :  { %12806 = vmatpush1.bf16.msra.mxu1 %v12805_v45  ;;  %v12814_v45 = vpack.c.bf16 %v8302_v61, %v8297_v5  ;;  %v8327_v5 = vld [vmem:[#allocation8 + $0x2a0] sm:$0xff]  ;;  %v8332_v61 = vld [vmem:[#allocation8 + $0x2c8] sm:$0xf] }
0x16a2   :  { %12807 = vmatprep.subr.bf16.mxu1 %v13921_v8  ;;  %12875 = vmatpush1.bf16.msra.mxu0 %v12874_v58  ;;  %v12886_v58 = vpack.c.bf16 %v8210_v19, %v8205_v54  ;;  %v8159_v54 = vld [vmem:[#allocation6 + $0x30] sm:$0xff]  ;;  %v12896_v19 = vpack.c.bf16 %v8241_v6, %v8236_v37  ;;  %v8178_v37 = vld [vmem:[#allocation6 + $0xc8] sm:$0xff]  ;;  %v8184_v6 = vld [vmem:[#allocation6 + $0xf8] sm:$0xff] }
0x16a3   :  { %12877 = vmatprep.subr.bf16.mxu0 %v12876_v13  ;;  %v12888_v13 = vpack.c.bf16 %v8221_v60, %v8216_v14  ;;  %v8235_v14 = vld [vmem:[#allocation6 + $0x290] sm:$0xff]  ;;  %v8240_v60 = vld [vmem:[#allocation6 + $0x2b8] sm:$0xf] }
0x16a5   :  { %12809 = vmatpush1.bf16.msra.mxu1 %v12808_v50  ;;  %v12817_v50 = vpack.c.bf16 %v8312_v62, %v8307_v57  ;;  %v8153_v62 = vld [vmem:[#allocation6] sm:$0xff] }
0x16a6   :  { %12810 = vmatprep.subr.bf16.mxu1 %v13921_v8  ;;  %12879 = vmatpush1.bf16.msra.mxu0 %v12878_v4  ;;  %v12890_v4 = vpack.c.bf16 %v8220_v38, %v8215_v1  ;;  %v8164_v1 = vld [vmem:[#allocation6 + $0x58] sm:$0xff]  ;;  %v8169_v38 = vld [vmem:[#allocation6 + $0x80] sm:$0xff] }
0x16a7   :  { %12881 = vmatprep.subr.bf16.mxu0 %v12880_v48  ;;  %v12892_v48 = vpack.c.bf16 %v8231_v39, %v8226_v49  ;;  %v12830_v39 = vpack.c.bf16 %v8169_v38, %v8164_v1  ;;  %v8203_v1 = vld [vmem:[#allocation6 + $0x190] sm:$0xff]  ;;  %v8208_v38 = vld [vmem:[#allocation6 + $0x1b8] sm:$0xff] }
0x16a9   :  { %12812 = vmatpush1.bf16.msra.mxu1 %v12811_v25  ;;  %v12820_v25 = vpack.c.bf16 %v8322_v16, %v8317_v52  ;;  %v8168_v52 = vld [vmem:[#allocation6 + $0x78] sm:$0xff]  ;;  %v8174_v16 = vld [vmem:[#allocation6 + $0xa8] sm:$0xff] }
0x16aa   :  { %12813 = vmatprep.subr.bf16.mxu1 %v13921_v8  ;;  %12883 = vmatpush1.bf16.msra.mxu0 %v12882_v44  ;;  %v8154_v44 = vld [vmem:[#allocation6 + $0x8] sm:$0xff] }
0x16ab   :  { %12885 = vmatprep.subr.bf16.mxu0 %v12884_v26  ;;  %v12894_v26 = vpack.c.bf16 %v8230_v56, %v8225_v41  ;;  %v12826_v57 = vpack.c.bf16 %v8159_v54, %v8154_v44  ;;  %v8173_v56 = vld [vmem:[#allocation6 + $0xa0] sm:$0xff]  ;;  %v8183_v44 = vld [vmem:[#allocation6 + $0xf0] sm:$0xff]  ;;  %v8194_v54 = vld [vmem:[#allocation6 + $0x148] sm:$0xff] }
0x16ad   :  { %12815 = vmatpush1.bf16.msra.mxu1 %v12814_v45  ;;  %v12823_v45 = vpack.c.bf16 %v8332_v61, %v8327_v5  ;;  %v12836_v5 = vpack.c.bf16 %v8178_v37, %v8173_v56 }
0x16ae   :  { %12816 = vmatprep.subr.bf16.mxu1 %v13921_v8  ;;  %12887 = vmatpush1.bf16.msra.mxu0 %v12886_v58  ;;  %v8158_v58 = vld [vmem:[#allocation6 + $0x28] sm:$0xff] }
0x16af   :  { %12889 = vmatprep.subr.bf16.mxu0 %v12888_v13  ;;  %v12899_v13 = vpack.c.bf16 %v8240_v60, %v8235_v14  ;;  %v12828_v49 = vpack.c.bf16 %v8158_v58, %v8153_v62  ;;  %v8193_v60 = vld [vmem:[#allocation6 + $0x140] sm:$0xff] }
0x16b0   :  { %v8209_v62 = vld [vmem:[#allocation6 + $0x1c0] sm:$0xff] }
0x16b1   :  { %12818 = vmatpush1.bf16.msra.mxu1 %v12817_v50  ;;  %v8163_v50 = vld [vmem:[#allocation6 + $0x50] sm:$0xff] }
0x16b2   :  { %12819 = vmatprep.subr.bf16.mxu1 %v13921_v8  ;;  %12891 = vmatpush1.bf16.msra.mxu0 %v12890_v4  ;;  %v8179_v4 = vld [vmem:[#allocation6 + $0xd0] sm:$0xff] }
0x16b3   :  { %12893 = vmatprep.subr.bf16.mxu0 %v12892_v48  ;;  %v12832_v48 = vpack.c.bf16 %v8168_v52, %v8163_v50  ;;  %v12834_v41 = vpack.c.bf16 %v8179_v4, %v8174_v16  ;;  %v12848_v50 = vpack.c.bf16 %v8208_v38, %v8203_v1  ;;  %v8213_v16 = vld [vmem:[#allocation6 + $0x1e0] sm:$0xff]  ;;  %v8218_v4 = vld [vmem:[#allocation6 + $0x208] sm:$0xff]  ;;  %v8965_v38 = vld [vmem:[#allocation3 + $0x80] sm:$0xff] }
0x16b4   :  { %v12852_v56 = vpack.c.bf16 %v8218_v4, %v8213_v16  ;;  %v8960_v1 = vld [vmem:[#allocation3 + $0x58] sm:$0xff]  ;;  %v8172_v4 = vld [vmem:[#allocation6 + $0x98] sm:$0xff] }
0x16b5   :  { %12821 = vmatpush1.bf16.msra.mxu1 %v12820_v25  ;;  %v8189_v25 = vld [vmem:[#allocation6 + $0x120] sm:$0xff] }
0x16b6   :  { %12822 = vmatprep.subr.bf16.mxu1 %v13921_v8  ;;  %12895 = vmatpush1.bf16.msra.mxu0 %v12894_v26  ;;  %v12838_v61 = vpack.c.bf16 %v8189_v25, %v8184_v6  ;;  %v8188_v26 = vld [vmem:[#allocation6 + $0x118] sm:$0xff]  ;;  %v8223_v6 = vld [vmem:[#allocation6 + $0x230] sm:$0xff] }
0x16b7   :  { %12898 = vmatprep.subr.msk.bf16.mxu0 %vm14099_vm3, %v12896_v19  ;;  %v8199_v19 = vld [vmem:[#allocation6 + $0x170] sm:$0xff]  ;;  %v12840_v14 = vpack.c.bf16 %v8188_v26, %v8183_v44  ;;  %v8228_v25 = vld [vmem:[#allocation6 + $0x258] sm:$0xff] }
0x16b8   :  { %v12856_v44 = vpack.c.bf16 %v8228_v25, %v8223_v6  ;;  %v8970_v6 = vld [vmem:[#allocation3 + $0xa8] sm:$0xff]  ;;  %v8975_v25 = vld [vmem:[#allocation3 + $0xd0] sm:$0xff] }
0x16b9   :  { %12825 = vmatpush1.bf16.msk.msra.mxu1 %vm14099_vm3, %v12823_v45  ;;  %v8198_v45 = vld [vmem:[#allocation6 + $0x168] sm:$0xff] }
0x16ba   :  { %12827 = vmatprep.subr.bf16.mxu1 %v12826_v57  ;;  %12901 = vmatpush1.bf16.msk.msra.mxu0 %vm14099_vm3, %v12899_v13  ;;  %v8204_v57 = vld [vmem:[#allocation6 + $0x198] sm:$0xff]  ;;  %v12844_v58 = vpack.c.bf16 %v8198_v45, %v8193_v60 }
0x16bb   :  { %12902 = vmatprep.subr.bf16.mxu0 %v13921_v8  ;;  %v12846_v13 = vpack.c.bf16 %v8209_v62, %v8204_v57  ;;  %v8157_v57 = vld [vmem:[#allocation6 + $0x20] sm:$0xff]  ;;  %v8162_v62 = vld [vmem:[#allocation6 + $0x48] sm:$0xff] }
0x16bc   :  { %8563 = vmatmul.mubr.f32.vlgmr.msra.gmra.mrb[58].mxu1 %v15339_v43  ;;  %v12842_v43 = vpack.c.bf16 %v8199_v19, %v8194_v54  ;;  %v8233_v54 = vld [vmem:[#allocation6 + $0x280] sm:$0xff]  ;;  %v8238_v19 = vld [vmem:[#allocation6 + $0x2a8] sm:$0xf] }
0x16bd   :  { %12829 = vmatpush1.bf16.msra.mxu1 %v12828_v49  ;;  %v8214_v49 = vld [vmem:[#allocation6 + $0x1e8] sm:$0xff]  ;;  %v12861_v60 = vpack.c.bf16 %v8238_v19, %v8233_v54  ;;  %v8969_v19 = vld [vmem:[#allocation3 + $0xa0] sm:$0xff] }
0x16be   :  { %12831 = vmatprep.subr.bf16.mxu1 %v12830_v39  ;;  %v8219_v39 = vld [vmem:[#allocation6 + $0x210] sm:$0xff]  ;;  %v8182_v54 = vld [vmem:[#allocation6 + $0xe8] sm:$0xff] }
0x16bf   :  { %v12850_v52 = vpack.c.bf16 %v8219_v39, %v8214_v49  ;;  %v12903_v49 = vpack.c.bf16 %v8162_v62, %v8157_v57  ;;  %v8187_v62 = vld [vmem:[#allocation6 + $0x110] sm:$0xff] }
0x16c1   :  { %12833 = vmatpush1.bf16.msra.mxu1 %v12832_v48  ;;  %v8224_v48 = vld [vmem:[#allocation6 + $0x238] sm:$0xff] }
0x16c2   :  { %12835 = vmatprep.subr.bf16.mxu1 %v12834_v41  ;;  %v8229_v41 = vld [vmem:[#allocation6 + $0x260] sm:$0xff] }
0x16c3   :  { %v12854_v37 = vpack.c.bf16 %v8229_v41, %v8224_v48  ;;  %v8959_v48 = vld [vmem:[#allocation3 + $0x50] sm:$0xff]  ;;  %v8964_v41 = vld [vmem:[#allocation3 + $0x78] sm:$0xff] }
0x16c5   :  { %12837 = vmatpush1.bf16.msra.mxu1 %v12836_v5  ;;  %v8234_v5 = vld [vmem:[#allocation6 + $0x288] sm:$0xff] }
0x16c6   :  { %12839 = vmatprep.subr.bf16.mxu1 %v12838_v61  ;;  %v8239_v61 = vld [vmem:[#allocation6 + $0x2b0] sm:$0xf] }
0x16c7   :  { %v12858_v26 = vpack.c.bf16 %v8239_v61, %v8234_v5  ;;  %v12936_v61 = vpack.c.bf16 %v8964_v41, %v8959_v48  ;;  %v8202_v41 = vld [vmem:[#allocation6 + $0x188] sm:$0xff] }
0x16c9   :  { %12841 = vmatpush1.bf16.msra.mxu1 %v12840_v14  ;;  %v8950_v14 = vld [vmem:[#allocation3 + $0x8] sm:$0xff] }
0x16ca   :  { %12843 = vmatprep.subr.bf16.mxu1 %v12842_v43  ;;  %v8955_v43 = vld [vmem:[#allocation3 + $0x30] sm:$0xff] }
0x16cb   :  { %v12930_v45 = vpack.c.bf16 %v8955_v43, %v8950_v14  ;;  %v8974_v14 = vld [vmem:[#allocation3 + $0xc8] sm:$0xff]  ;;  %v8980_v43 = vld [vmem:[#allocation3 + $0xf8] sm:$0xff] }
0x16cc   :  { %v12940_v57 = vpack.c.bf16 %v8974_v14, %v8969_v19  ;;  %v8212_v19 = vld [vmem:[#allocation6 + $0x1d8] sm:$0xff]  ;;  %v8999_v14 = vld [vmem:[#allocation3 + $0x190] sm:$0xff] }
0x16cd   :  { %12845 = vmatpush1.bf16.msra.mxu1 %v12844_v58  ;;  %v8949_v58 = vld [vmem:[#allocation3] sm:$0xff] }
0x16ce   :  { %12847 = vmatprep.subr.bf16.mxu1 %v12846_v13  ;;  %v8954_v13 = vld [vmem:[#allocation3 + $0x28] sm:$0xff] }
0x16cf   :  { %v12932_v39 = vpack.c.bf16 %v8954_v13, %v8949_v58  ;;  %v8192_v13 = vld [vmem:[#allocation6 + $0x138] sm:$0xff] }
0x16d1   :  { %12849 = vmatpush1.bf16.msra.mxu1 %v12848_v50  ;;  %v8167_v50 = vld [vmem:[#allocation6 + $0x70] sm:$0xff] }
0x16d2   :  { %12851 = vmatprep.subr.bf16.mxu1 %v12850_v52  ;;  %v12906_v5 = vpack.c.bf16 %v8172_v4, %v8167_v50  ;;  %v12912_v50 = vpack.c.bf16 %v8192_v13, %v8187_v62  ;;  %v8197_v4 = vld [vmem:[#allocation6 + $0x160] sm:$0xff] }
0x16d5   :  { %12853 = vmatpush1.bf16.msra.mxu1 %v12852_v56 }
0x16d6   :  { %12855 = vmatprep.subr.bf16.mxu1 %v12854_v37  ;;  %v12934_v37 = vpack.c.bf16 %v8965_v38, %v8960_v1  ;;  %v8979_v1 = vld [vmem:[#allocation3 + $0xf0] sm:$0xff]  ;;  %v8984_v38 = vld [vmem:[#allocation3 + $0x118] sm:$0xff] }
0x16d9   :  { %12857 = vmatpush1.bf16.msra.mxu1 %v12856_v44  ;;  %v8177_v44 = vld [vmem:[#allocation6 + $0xc0] sm:$0xff] }
0x16da   :  { %12860 = vmatprep.subr.msk.bf16.mxu1 %vm14099_vm3, %v12858_v26  ;;  %v12938_v26 = vpack.c.bf16 %v8975_v25, %v8970_v6  ;;  %v8994_v6 = vld [vmem:[#allocation3 + $0x168] sm:$0xff]  ;;  %v9000_v25 = vld [vmem:[#allocation3 + $0x198] sm:$0xff] }
0x16dd   :  { %12863 = vmatpush1.bf16.msk.msra.mxu1 %vm14099_vm3, %v12861_v60  ;;  %v8985_v60 = vld [vmem:[#allocation3 + $0x120] sm:$0xff] }
0x16de   :  { %12931 = vmatprep.subr.bf16.mxu1 %v12930_v45  ;;  %v12909_v45 = vpack.c.bf16 %v8182_v54, %v8177_v44  ;;  %v12942_v58 = vpack.c.bf16 %v8985_v60, %v8980_v43  ;;  %v9004_v43 = vld [vmem:[#allocation3 + $0x1b8] sm:$0xff]  ;;  %v9010_v60 = vld [vmem:[#allocation3 + $0x1e8] sm:$0xff] }
0x16df   :  { %v12952_v62 = vpack.c.bf16 %v9004_v43, %v8999_v14  ;;  %v8242_v14 = vld [vmem:[#allocation6 + $0x2c8] sm:$0xf]  ;;  %v9029_v43 = vld [vmem:[#allocation3 + $0x280] sm:$0xff] }
0x16e0   :  { %v8573_v52 = vpop.permute.xlu0 %8572 }
0x16e2   :  { %v15364_v16 = vpop.permute.xlu1 %8574 }
0x16e3   :  { %10631 = vmatprep.mubr.msk.f32.mxu1 %vm577_vm0, %v15364_v16  ;;  %10634 = vmatprep.mubr.msk.f32.mxu0 %vm577_vm0, %v15364_v16  ;;  %v15372_v56 = vsel %vm1325_vm9, %v8573_v52, %v15364_v16  ;;  %v12944_v52 = vpack.c.bf16 %v8984_v38, %v8979_v1  ;;  %v8222_v1 = vld [vmem:[#allocation6 + $0x228] sm:$0xff]  ;;  %v9009_v38 = vld [vmem:[#allocation3 + $0x1e0] sm:$0xff] }
0x16e4   :  { %8660 = vmatmul.mubr.f32.vlgmr.msra.gmra.mrb[56].mxu1 %v15372_v56  ;;  %8731 = vmatmul.mubr.f32.vlgmr.msra.gmra.mrb[46].mxu0 %v15372_v56 }
0x16e5   :  { %12904 = vmatpush1.bf16.msra.mxu0 %v12903_v49  ;;  %12933 = vmatpush1.bf16.msra.mxu1 %v12932_v39  ;;  %v8990_v49 = vld [vmem:[#allocation3 + $0x148] sm:$0xff]  ;;  %v8995_v39 = vld [vmem:[#allocation3 + $0x170] sm:$0xff] }
0x16e6   :  { %10636 = vmatprep.mubr.msk.f32.mxu0 %vm577_vm0, %v15364_v16  ;;  %10644 = vmatprep.mubr.msk.f32.mxu1 %vm577_vm0, %v15364_v16  ;;  %v12946_v48 = vpack.c.bf16 %v8995_v39, %v8990_v49  ;;  %v9014_v49 = vld [vmem:[#allocation3 + $0x208] sm:$0xff]  ;;  %v9020_v39 = vld [vmem:[#allocation3 + $0x238] sm:$0xff] }
0x16e7   :  { %12905 = vmatprep.subr.bf16.mxu0 %v13921_v8  ;;  %12935 = vmatprep.subr.bf16.mxu1 %v12934_v37  ;;  %v8989_v37 = vld [vmem:[#allocation3 + $0x140] sm:$0xff] }
0x16e8   :  { %v12948_v44 = vpack.c.bf16 %v8994_v6, %v8989_v37  ;;  %v8232_v37 = vld [vmem:[#allocation6 + $0x278] sm:$0xff]  ;;  %v9019_v6 = vld [vmem:[#allocation3 + $0x230] sm:$0xff] }
0x16e9   :  { %12907 = vmatpush1.bf16.msra.mxu0 %v12906_v5  ;;  %12937 = vmatpush1.bf16.msra.mxu1 %v12936_v61  ;;  %v9005_v5 = vld [vmem:[#allocation3 + $0x1c0] sm:$0xff]  ;;  %v12915_v61 = vpack.c.bf16 %v8202_v41, %v8197_v4  ;;  %v12956_v4 = vpack.c.bf16 %v9014_v49, %v9009_v38  ;;  %v8956_v38 = vld [vmem:[#allocation3 + $0x38] sm:$0xff] }
0x16ea   :  { %12908 = vmatprep.subr.bf16.mxu0 %v13921_v8  ;;  %12939 = vmatprep.subr.bf16.mxu1 %v12938_v26  ;;  %v8207_v26 = vld [vmem:[#allocation6 + $0x1b0] sm:$0xff]  ;;  %v12950_v54 = vpack.c.bf16 %v9005_v5, %v9000_v25  ;;  %v9024_v25 = vld [vmem:[#allocation3 + $0x258] sm:$0xff]  ;;  %v9030_v5 = vld [vmem:[#allocation3 + $0x288] sm:$0xff] }
0x16eb   :  { %v8953_v49 = vld [vmem:[#allocation3 + $0x20] sm:$0xff] }
0x16ed   :  { %12910 = vmatpush1.bf16.msra.mxu0 %v12909_v45  ;;  %12941 = vmatpush1.bf16.msra.mxu1 %v12940_v57  ;;  %v9015_v45 = vld [vmem:[#allocation3 + $0x210] sm:$0xff]  ;;  %v12918_v57 = vpack.c.bf16 %v8212_v19, %v8207_v26  ;;  %v12960_v26 = vpack.c.bf16 %v9024_v25, %v9019_v6 }
0x16ee   :  { %12911 = vmatprep.subr.bf16.mxu0 %v13921_v8  ;;  %12943 = vmatprep.subr.bf16.mxu1 %v12942_v58  ;;  %v8217_v58 = vld [vmem:[#allocation6 + $0x200] sm:$0xff]  ;;  %v12954_v13 = vpack.c.bf16 %v9015_v45, %v9010_v60  ;;  %v9034_v60 = vld [vmem:[#allocation3 + $0x2a8] sm:$0xf]  ;;  %v8952_v45 = vld [vmem:[#allocation3 + $0x18] sm:$0xff] }
0x16ef   :  { %v8963_v6 = vld [vmem:[#allocation3 + $0x70] sm:$0xff] }
0x16f1   :  { %12913 = vmatpush1.bf16.msra.mxu0 %v12912_v50  ;;  %12945 = vmatpush1.bf16.msra.mxu1 %v12944_v52  ;;  %v9025_v50 = vld [vmem:[#allocation3 + $0x260] sm:$0xff]  ;;  %v12921_v52 = vpack.c.bf16 %v8222_v1, %v8217_v58  ;;  %v12965_v58 = vpack.c.bf16 %v9034_v60, %v9029_v43  ;;  %v8951_v1 = vld [vmem:[#allocation3 + $0x10] sm:$0xff]  ;;  %v8976_v43 = vld [vmem:[#allocation3 + $0xd8] sm:$0xff] }
0x16f2   :  { %12914 = vmatprep.subr.bf16.mxu0 %v13921_v8  ;;  %12947 = vmatprep.subr.bf16.mxu1 %v12946_v48  ;;  %v8227_v48 = vld [vmem:[#allocation6 + $0x250] sm:$0xff]  ;;  %v12958_v41 = vpack.c.bf16 %v9025_v50, %v9020_v39  ;;  %v8958_v39 = vld [vmem:[#allocation3 + $0x48] sm:$0xff] }
0x16f3   :  { %v8962_v50 = vld [vmem:[#allocation3 + $0x68] sm:$0xff]  ;;  %v8973_v60 = vld [vmem:[#allocation3 + $0xc0] sm:$0xff] }
0x16f5   :  { %12916 = vmatpush1.bf16.msra.mxu0 %v12915_v61  ;;  %12949 = vmatpush1.bf16.msra.mxu1 %v12948_v44  ;;  %v9035_v61 = vld [vmem:[#allocation3 + $0x2b0] sm:$0xf]  ;;  %v12924_v44 = vpack.c.bf16 %v8232_v37, %v8227_v48  ;;  %v13007_v48 = vpack.c.bf16 %v8958_v39, %v8953_v49  ;;  %v8966_v37 = vld [vmem:[#allocation3 + $0x88] sm:$0xff]  ;;  %v8988_v39 = vld [vmem:[#allocation3 + $0x138] sm:$0xff] }
0x16f6   :  { %12917 = vmatprep.subr.bf16.mxu0 %v13921_v8  ;;  %12951 = vmatprep.subr.bf16.mxu1 %v12950_v54  ;;  %v8237_v54 = vld [vmem:[#allocation6 + $0x2a0] sm:$0xff]  ;;  %v12962_v19 = vpack.c.bf16 %v9035_v61, %v9030_v5  ;;  %v8968_v5 = vld [vmem:[#allocation3 + $0x98] sm:$0xff]  ;;  %v8986_v49 = vld [vmem:[#allocation3 + $0x128] sm:$0xff] }
0x16f7   :  { %v8972_v61 = vld [vmem:[#allocation3 + $0xb8] sm:$0xff] }
0x16f9   :  { %12919 = vmatpush1.bf16.msra.mxu0 %v12918_v57  ;;  %12953 = vmatpush1.bf16.msra.mxu1 %v12952_v62  ;;  %v8957_v57 = vld [vmem:[#allocation3 + $0x40] sm:$0xff]  ;;  %v12927_v62 = vpack.c.bf16 %v8242_v14, %v8237_v54  ;;  %v13010_v54 = vpack.c.bf16 %v8968_v5, %v8963_v6  ;;  %v8971_v14 = vld [vmem:[#allocation3 + $0xb0] sm:$0xff]  ;;  %v8996_v6 = vld [vmem:[#allocation3 + $0x178] sm:$0xff] }
0x16fa   :  { %12920 = vmatprep.subr.bf16.mxu0 %v13921_v8  ;;  %12955 = vmatprep.subr.bf16.mxu1 %v12954_v13  ;;  %v12968_v13 = vpack.c.bf16 %v8957_v57, %v8952_v45  ;;  %v8978_v45 = vld [vmem:[#allocation3 + $0xe8] sm:$0xff] }
0x16fb   :  { %v8982_v57 = vld [vmem:[#allocation3 + $0x108] sm:$0xff] }
0x16fc   :  { %v8998_v5 = vld [vmem:[#allocation3 + $0x188] sm:$0xff] }
0x16fd   :  { %12922 = vmatpush1.bf16.msra.mxu0 %v12921_v52  ;;  %12957 = vmatpush1.bf16.msra.mxu1 %v12956_v4  ;;  %v8967_v52 = vld [vmem:[#allocation3 + $0x90] sm:$0xff]  ;;  %v12970_v4 = vpack.c.bf16 %v8956_v38, %v8951_v1  ;;  %v8981_v38 = vld [vmem:[#allocation3 + $0x100] sm:$0xff] }
0x16fe   :  { %12923 = vmatprep.subr.bf16.mxu0 %v13921_v8  ;;  %12959 = vmatprep.subr.bf16.mxu1 %v12958_v41  ;;  %v8961_v41 = vld [vmem:[#allocation3 + $0x60] sm:$0xff]  ;;  %v12972_v25 = vpack.c.bf16 %v8967_v52, %v8962_v50  ;;  %v8992_v50 = vld [vmem:[#allocation3 + $0x158] sm:$0xff] }
0x16ff   :  { %v8997_v52 = vld [vmem:[#allocation3 + $0x180] sm:$0xff] }
0x1701   :  { %12925 = vmatpush1.bf16.msra.mxu0 %v12924_v44  ;;  %12961 = vmatpush1.bf16.msra.mxu1 %v12960_v26  ;;  %v8977_v44 = vld [vmem:[#allocation3 + $0xe0] sm:$0xff]  ;;  %v12974_v26 = vpack.c.bf16 %v8966_v37, %v8961_v41  ;;  %v12984_v41 = vpack.c.bf16 %v8997_v52, %v8992_v50  ;;  %v8991_v37 = vld [vmem:[#allocation3 + $0x150] sm:$0xff]  ;;  %v9022_v50 = vld [vmem:[#allocation3 + $0x248] sm:$0xff] }
0x1702   :  { %12926 = vmatprep.subr.bf16.mxu0 %v13921_v8  ;;  %12964 = vmatprep.subr.msk.bf16.mxu1 %vm14099_vm3, %v12962_v19  ;;  %v12976_v19 = vpack.c.bf16 %v8977_v44, %v8972_v61  ;;  %v9002_v61 = vld [vmem:[#allocation3 + $0x1a8] sm:$0xff]  ;;  %v9007_v44 = vld [vmem:[#allocation3 + $0x1d0] sm:$0xff] }
0x1703   :  { %v9027_v52 = vld [vmem:[#allocation3 + $0x270] sm:$0xff] }
0x1705   :  { %12929 = vmatpush1.bf16.msk.msra.mxu0 %vm14099_vm3, %v12927_v62  ;;  %12967 = vmatpush1.bf16.msk.msra.mxu1 %vm14099_vm3, %v12965_v58  ;;  %v8987_v62 = vld [vmem:[#allocation3 + $0x130] sm:$0xff]  ;;  %v12978_v58 = vpack.c.bf16 %v8976_v43, %v8971_v14  ;;  %v9001_v14 = vld [vmem:[#allocation3 + $0x1a0] sm:$0xff]  ;;  %v9006_v43 = vld [vmem:[#allocation3 + $0x1c8] sm:$0xff] }
0x1706   :  { %12969 = vmatprep.subr.bf16.mxu0 %v12968_v13  ;;  %13006 = vmatprep.subr.bf16.mxu1 %v13921_v8  ;;  %v13013_v13 = vpack.c.bf16 %v8978_v45, %v8973_v60  ;;  %v12980_v1 = vpack.c.bf16 %v8987_v62, %v8982_v57  ;;  %v9003_v60 = vld [vmem:[#allocation3 + $0x1b0] sm:$0xff]  ;;  %v9008_v45 = vld [vmem:[#allocation3 + $0x1d8] sm:$0xff]  ;;  %v9017_v62 = vld [vmem:[#allocation3 + $0x220] sm:$0xff] }
0x1707   :  { %v9012_v57 = vld [vmem:[#allocation3 + $0x1f8] sm:$0xff] }
0x1708   :  { %8802 = vmatmul.mubr.f32.vlgmr.msra.gmra.mrb[48].mxu0 %v15372_v56  ;;  %9119 = vmatmul.mubr.f32.vlgmr.msra.gmra.mrb[60].mxu1 %v15372_v56 }
0x1709   :  { %12971 = vmatpush1.bf16.msra.mxu0 %v12970_v4  ;;  %10647 = vmatprep.mubr.msk.f32.mxu0 %vm577_vm0, %v15364_v16  ;;  %v12982_v4 = vpack.c.bf16 %v8986_v49, %v8981_v38  ;;  %v9011_v38 = vld [vmem:[#allocation3 + $0x1f0] sm:$0xff]  ;;  %v9016_v49 = vld [vmem:[#allocation3 + $0x218] sm:$0xff] }
0x170a   :  { %13008 = vmatpush1.bf16.msra.mxu1 %v13007_v48  ;;  %10649 = vmatprep.mubr.msk.f32.mxu1 %vm577_vm0, %v15364_v16  ;;  %v8983_v16 = vld [vmem:[#allocation3 + $0x110] sm:$0xff] }
0x170b   :  { %12973 = vmatprep.subr.bf16.mxu0 %v12972_v25  ;;  %13009 = vmatprep.subr.bf16.mxu1 %v13921_v8  ;;  %v13016_v48 = vpack.c.bf16 %v8988_v39, %v8983_v16  ;;  %v8993_v25 = vld [vmem:[#allocation3 + $0x160] sm:$0xff]  ;;  %v9018_v39 = vld [vmem:[#allocation3 + $0x228] sm:$0xff] }
0x170c   :  { %v9013_v16 = vld [vmem:[#allocation3 + $0x200] sm:$0xff] }
0x170d   :  { %12975 = vmatpush1.bf16.msra.mxu0 %v12974_v26  ;;  %v12986_v26 = vpack.c.bf16 %v8996_v6, %v8991_v37  ;;  %v9021_v37 = vld [vmem:[#allocation3 + $0x240] sm:$0xff]  ;;  %v9026_v6 = vld [vmem:[#allocation3 + $0x268] sm:$0xff] }
0x170e   :  { %13011 = vmatpush1.bf16.msra.mxu1 %v13010_v54  ;;  %12977 = vmatprep.subr.bf16.mxu0 %v12976_v19  ;;  %v13019_v54 = vpack.c.bf16 %v8998_v5, %v8993_v25  ;;  %v12988_v19 = vpack.c.bf16 %v9007_v44, %v9002_v61  ;;  %v9023_v25 = vld [vmem:[#allocation3 + $0x250] sm:$0xff]  ;;  %v9028_v5 = vld [vmem:[#allocation3 + $0x278] sm:$0xff]  ;;  %v9037_v44 = vld [vmem:[#allocation3 + $0x2c0] sm:$0xf] }
0x170f   :  { %13012 = vmatprep.subr.bf16.mxu1 %v13921_v8  ;;  %v9032_v61 = vld [vmem:[#allocation3 + $0x298] sm:$0xff] }
0x1711   :  { %12979 = vmatpush1.bf16.msra.mxu0 %v12978_v58  ;;  %v12990_v58 = vpack.c.bf16 %v9006_v43, %v9001_v14  ;;  %v9031_v14 = vld [vmem:[#allocation3 + $0x290] sm:$0xff]  ;;  %v9036_v43 = vld [vmem:[#allocation3 + $0x2b8] sm:$0xf] }
0x1712   :  { %13014 = vmatpush1.bf16.msra.mxu1 %v13013_v13  ;;  %12981 = vmatprep.subr.bf16.mxu0 %v12980_v1  ;;  %v13022_v13 = vpack.c.bf16 %v9008_v45, %v9003_v60  ;;  %v12992_v1 = vpack.c.bf16 %v9017_v62, %v9012_v57  ;;  %v9033_v60 = vld [vmem:[#allocation3 + $0x2a0] sm:$0xff]  ;;  %v9038_v45 = vld [vmem:[#allocation3 + $0x2c8] sm:$0xf]  ;;  %v13003_v57 = vpack.c.bf16 %v9036_v43, %v9031_v14 }
0x1713   :  { %13015 = vmatprep.subr.bf16.mxu1 %v13921_v8  ;;  %v13031_v62 = vpack.c.bf16 %v9038_v45, %v9033_v60 }
0x1715   :  { %12983 = vmatpush1.bf16.msra.mxu0 %v12982_v4  ;;  %v12994_v4 = vpack.c.bf16 %v9016_v49, %v9011_v38 }
0x1716   :  { %13017 = vmatpush1.bf16.msra.mxu1 %v13016_v48  ;;  %12985 = vmatprep.subr.bf16.mxu0 %v12984_v41  ;;  %v13025_v48 = vpack.c.bf16 %v9018_v39, %v9013_v16  ;;  %v12996_v41 = vpack.c.bf16 %v9027_v52, %v9022_v50 }
0x1717   :  { %13018 = vmatprep.subr.bf16.mxu1 %v13921_v8 }
0x1719   :  { %12987 = vmatpush1.bf16.msra.mxu0 %v12986_v26  ;;  %v12998_v26 = vpack.c.bf16 %v9026_v6, %v9021_v37 }
0x171a   :  { %13020 = vmatpush1.bf16.msra.mxu1 %v13019_v54  ;;  %12989 = vmatprep.subr.bf16.mxu0 %v12988_v19  ;;  %v13028_v54 = vpack.c.bf16 %v9028_v5, %v9023_v25  ;;  %v13000_v19 = vpack.c.bf16 %v9037_v44, %v9032_v61 }
0x171b   :  { %13021 = vmatprep.subr.bf16.mxu1 %v13921_v8 }
0x171d   :  { %12991 = vmatpush1.bf16.msra.mxu0 %v12990_v58 }
0x171e   :  { %13023 = vmatpush1.bf16.msra.mxu1 %v13022_v13  ;;  %12993 = vmatprep.subr.bf16.mxu0 %v12992_v1  ;;  %v8807_v1 = vld [vmem:[%s15862_s9] sm:$0x1f] }
0x171f   :  { %13024 = vmatprep.subr.bf16.mxu1 %v13921_v8  ;;  %v8812_v38 = vrot.slane %v8807_v1, %v14211_v10  ;;  %v8820_v49 = vrot.slane %v8807_v1, %v14226_v21  ;;  %v8816_v16 = vrot.slane %v8807_v1, %v14214_v11  ;;  %v8824_v39 = vrot.slane %v8807_v1, %v14229_v22 }
0x1720   :  { %v8828_v61 = vrot.slane %v8807_v1, %v14232_v23 }
0x1721   :  { %12995 = vmatpush1.bf16.msra.mxu0 %v12994_v4 }
0x1722   :  { %13026 = vmatpush1.bf16.msra.mxu1 %v13025_v48  ;;  %12997 = vmatprep.subr.bf16.mxu0 %v12996_v41 }
0x1723   :  { %13027 = vmatprep.subr.bf16.mxu1 %v13921_v8 }
0x1725   :  { %12999 = vmatpush1.bf16.msra.mxu0 %v12998_v26 }
0x1726   :  { %13029 = vmatpush1.bf16.msra.mxu1 %v13028_v54  ;;  %13002 = vmatprep.subr.msk.bf16.mxu0 %vm14099_vm3, %v13000_v19 }
0x1727   :  { %13030 = vmatprep.subr.bf16.mxu1 %v13921_v8 }
0x1729   :  { %13005 = vmatpush1.bf16.msk.msra.mxu0 %vm14099_vm3, %v13003_v57 }
0x172a   :  { %13033 = vmatpush1.bf16.msk.msra.mxu1 %vm14099_vm3, %v13031_v62 }
0x172c   :  { %9190 = vmatmul.mubr.f32.vlgmr.msra.gmra.mrb[50].mxu0 %v15372_v56 }
0x172d   :  { %9261 = vmatmul.mubr.f32.vlgmr.msra.gmra.mrb[62].mxu1 %v15372_v56 }
0x178f   :  { %v8564_v58 = vpop.f32.mrb[58].mxu1 }
0x1790   :  { %v8566_v13 = vpop.f32.mrb[59].mxu1 }
0x17b7   :  { %v8661_v50 = vpop.f32.mrb[56].mxu1  ;;  %v8732_v52 = vpop.f32.mrb[46].mxu0 }
0x17b8   :  { %v8834_v4 = vadd.f32 %v8812_v38, %v8661_v50  ;;  %v15424_v48 = vadd.f32 %v8820_v49, %v8732_v52  ;;  %v8663_v56 = vpop.f32.mrb[57].mxu1  ;;  %v8734_v41 = vpop.f32.mrb[47].mxu0 }
0x17b9   :  { %v8835_v37 = vadd.f32 %v8816_v16, %v8663_v56  ;;  %v15426_v6 = vadd.f32 %v8824_v39, %v8734_v41 }
0x17ba   :  { %13690 = vtanh.f32 %v15424_v48  ;;  %v10637_v41 = vmul.f32 -1.442695, %v8834_v4 }
0x17bb   :  { %13692 = vtanh.f32 %v15426_v6  ;;  %v10638_v56 = vmul.f32 -1.442695, %v8835_v37 }
0x17c4   :  { %v13691_v25 = vpop.eup %13690 }
0x17c5   :  { %v13693_v5 = vpop.eup %13692  ;;  %8875 = vrot.lane.b32.xlu0 %v13691_v25, %s13924_s6 }
0x17c6   :  { %8877 = vrot.lane.b32.xlu1 %v13693_v5, %s13924_s6 }
0x17db   :  { %v8803_v44 = vpop.f32.mrb[48].mxu0  ;;  %v9120_v26 = vpop.f32.mrb[60].mxu1 }
0x17dc   :  { %v8804_v54 = vadd.f32 %v8803_v44, %v8564_v58  ;;  %v8805_v19 = vpop.f32.mrb[49].mxu0  ;;  %v9122_v14 = vpop.f32.mrb[61].mxu1 }
0x17de   :  { %v15433_v43 = vadd.f32 %v8828_v61, %v8804_v54 }
0x17ff   :  { %v9191_v60 = vpop.f32.mrb[50].mxu0 }
0x1800   :  { %v9273_v45 = vrot.slane %v9191_v60, 2  ;;  %v15435_v57 = vpop.f32.mrb[62].mxu1  ;;  %v9193_v62 = vpop.f32.mrb[51].mxu0 }
0x1801   :  { %v9274_v13 = vrot.slane %v9193_v62, 2  ;;  %v9264_v38 = vpop.f32.mrb[63].mxu1 }
0x1802   :  { %v9283_v49 = vadd.f32 %v9273_v45, %v14236_v29  ;;  %v9321_v29 = vrot.slane %v15302_v51, 6  ;;  %v9272_v51 = vrot.slane %v9122_v14, 2  ;;  %v9271_v38 = vrot.slane %v9120_v26, 2 }
0x1803   :  { %v15439_v16 = vadd.f32 %v9274_v13, %v14241_v32 }
0x1804   :  { %v10652_v1 = vmul.f32 -1.442695, %v9283_v49  ;;  %13694 = vtanh.f32 %v9283_v49  ;;  %v9282_v49 = vadd.f32 %v9272_v51, %v14223_v20 }
0x1805   :  { %13696 = vtanh.f32 %v15439_v16 }
0x1806   :  { %13698 = vpow2.f32 %v10652_v1  ;;  %v9281_v1 = vadd.f32 %v9271_v38, %v14221_v17  ;;  %v10639_v17 = vmul.f32 -1.442695, %v15424_v48 }
0x180e   :  { %v13695_v58 = vpop.eup %13694 }
0x180f   :  { %v13697_v39 = vpop.eup %13696  ;;  %9328 = vrot.lane.b32.xlu0 %v13695_v58, %s13924_s6  ;;  %v10651_v58 = vmul.f32 -1.442695, %v9282_v49 }
0x1810   :  { %v13699_v50 = vpop.eup %13698  ;;  %9330 = vrot.lane.b32.xlu1 %v13697_v39, %s13924_s6  ;;  %v10650_v39 = vmul.f32 -1.442695, %v9281_v1 }
0x1811   :  { %v9301_v52 = vadd.f32 1.0, %v13699_v50 }
0x1813   :  { %13700 = vrcp.f32 %v9301_v52 }
0x1814   :  { %13702 = vpow2.f32 %v10638_v56 }
0x1815   :  { %13704 = vpow2.f32 %v10637_v41 }
0x181d   :  { %v13701_v32 = vpop.eup %13700 }
0x181e   :  { %v15445_v25 = vmul.f32 %v13701_v32, %v9321_v29  ;;  %v13703_v5 = vpop.eup %13702 }
0x181f   :  { %v13705_v61 = vpop.eup %13704  ;;  %v8846_v44 = vadd.f32 1.0, %v13703_v5 }
0x1820   :  { %v8845_v54 = vadd.f32 1.0, %v13705_v61 }
0x1821   :  { %13706 = vrcp.f32 %v8846_v44 }
0x1822   :  { %13708 = vrcp.f32 %v8845_v54 }
0x1823   :  { %13710 = vpow2.f32 %v10651_v58 }
0x1824   :  { %13712 = vpow2.f32 %v10650_v39 }
0x182b   :  { %v13707_v60 = vpop.eup %13706 }
0x182c   :  { %v13709_v62 = vpop.eup %13708 }
0x182d   :  { %v13711_v50 = vpop.eup %13710 }
0x182e   :  { %v13713_v52 = vpop.eup %13712  ;;  %v9293_v56 = vadd.f32 1.0, %v13711_v50 }
0x182f   :  { %v9292_v41 = vadd.f32 1.0, %v13713_v52 }
0x1830   :  { %13714 = vrcp.f32 %v9293_v56  ;;  %v9452_v56 = vld [vmem:[#allocation8 + $0x8] sm:$0xff] }
0x1831   :  { %13716 = vrcp.f32 %v9292_v41  ;;  %v9457_v41 = vld [vmem:[#allocation8 + $0x30] sm:$0xff] }
0x1832   :  { %13718 = vpow2.f32 %v10639_v17  ;;  %v9458_v17 = vld [vmem:[#allocation8 + $0x38] sm:$0xff] }
0x1837   :  { %v8876_v19 = vpop.permute.xlu0 %8875 }
0x1838   :  { %v8878_v45 = vpop.permute.xlu1 %8877 }
0x1839   :  { %v8879_v37 = vsel %vm869_vm7, %v8876_v19, %v8878_v45  ;;  %v8883_v4 = vmul.f32 %v13707_v60, %v8878_v45 }
0x183a   :  { %v8882_v13 = vmul.f32 %v13709_v62, %v8879_v37  ;;  %v13715_v32 = vpop.eup %13714  ;;  %v8871_v62 = vmul.f32 %v13707_v60, %v15289_v47  ;;  %v9320_v47 = vrot.slane %v15299_v40, 6  ;;  %v9451_v40 = vld [vmem:[#allocation8] sm:$0xff] }
0x183b   :  { %8888 = vrot.lane.b32.xlu1 %v8883_v4, %s13923_s17  ;;  %v13717_v61 = vpop.eup %13716 }
0x183c   :  { %8886 = vrot.lane.b32.xlu0 %v8882_v13, %s13923_s17  ;;  %v13719_v44 = vpop.eup %13718  ;;  %v9324_v60 = vmul.f32 %v13715_v32, %v9320_v47 }
0x183d   :  { %v8854_v54 = vadd.f32 1.0, %v13719_v44 }
0x183f   :  { %13720 = vrcp.f32 %v8854_v54  ;;  %v9467_v54 = vld [vmem:[#allocation8 + $0x80] sm:$0xff] }
0x1849   :  { %v13721_v19 = vpop.eup %13720 }
0x184a   :  { %v8872_v37 = vmul.f32 %v13721_v19, %v15291_v0  ;;  %v9461_v19 = vld [vmem:[#allocation8 + $0x50] sm:$0xff] }
0x1881   :  { %v9329_v29 = vpop.permute.xlu0 %9328 }
0x1882   :  { %v9331_v5 = vpop.permute.xlu1 %9330 }
0x1883   :  { %v9332_v26 = vsel %vm869_vm7, %v9329_v29, %v9331_v5  ;;  %v9336_v14 = vmul.f32 %v13715_v32, %v9331_v5  ;;  %v13034_v29 = vpack.c.bf16 %v9457_v41, %v9452_v56  ;;  %v9456_v32 = vld [vmem:[#allocation8 + $0x28] sm:$0xff]  ;;  %v9454_v5 = vld [vmem:[#allocation8 + $0x18] sm:$0xff] }
0x1884   :  { %v9335_v20 = vmul.f32 %v13717_v61, %v9332_v26  ;;  %v9459_v61 = vld [vmem:[#allocation8 + $0x40] sm:$0xff]  ;;  %v13036_v26 = vpack.c.bf16 %v9456_v32, %v9451_v40  ;;  %v9474_v32 = vld [vmem:[#allocation8 + $0xb8] sm:$0xff] }
0x1885   :  { %9341 = vrot.lane.b32.xlu1 %v9336_v14, %s13923_s17  ;;  %v13072_v14 = vpack.c.bf16 %v9459_v61, %v9454_v5  ;;  %13035 = vmatprep.subr.bf16.mxu0 %v13034_v29  ;;  %v9471_v40 = vld [vmem:[#allocation8 + $0xa0] sm:$0xff]  ;;  %v9476_v29 = vld [vmem:[#allocation8 + $0xc8] sm:$0xff]  ;;  %v9473_v61 = vld [vmem:[#allocation8 + $0xb0] sm:$0xff] }
0x1886   :  { %9339 = vrot.lane.b32.xlu0 %v9335_v20, %s13923_s17  ;;  %v9453_v20 = vld [vmem:[#allocation8 + $0x10] sm:$0xff]  ;;  %13037 = vmatpush1.bf16.msra.mxu0 %v13036_v26  ;;  %v9479_v5 = vld [vmem:[#allocation8 + $0xe0] sm:$0xff]  ;;  %v9478_v26 = vld [vmem:[#allocation8 + $0xd8] sm:$0xff] }
0x1887   :  { %v13074_v44 = vpack.c.bf16 %v9458_v17, %v9453_v20  ;;  %13073 = vmatprep.subr.bf16.mxu1 %v13072_v14  ;;  %v13044_v14 = vpack.c.bf16 %v9476_v29, %v9471_v40  ;;  %v13080_v20 = vpack.c.bf16 %v9479_v5, %v9474_v32  ;;  %v9482_v17 = vld [vmem:[#allocation8 + $0xf8] sm:$0xff]  ;;  %v9496_v40 = vld [vmem:[#allocation8 + $0x168] sm:$0xff]  ;;  %v9493_v29 = vld [vmem:[#allocation8 + $0x150] sm:$0xff]  ;;  %v10640_v32 = vmul.f32 -1.442695, %v15426_v6 }
0x1889   :  { %13075 = vmatpush1.bf16.msra.mxu1 %v13074_v44  ;;  %v9481_v44 = vld [vmem:[#allocation8 + $0xf0] sm:$0xff] }
0x18ad   :  { %v8889_v45 = vpop.permute.xlu1 %8888 }
0x18ae   :  { %v8887_v4 = vpop.permute.xlu0 %8886 }
0x18af   :  { %v8890_v13 = vsel %vm577_vm0, %v8887_v4, %v8889_v45  ;;  %v15459_v51 = vadd.f32 %v8887_v4, %v8871_v62  ;;  %v9466_v45 = vld [vmem:[#allocation8 + $0x78] sm:$0xff] }
0x18b0   :  { %v15461_v38 = vadd.f32 %v8890_v13, %v8872_v37  ;;  %v13040_v4 = vpack.c.bf16 %v9466_v45, %v9461_v19  ;;  %v9464_v13 = vld [vmem:[#allocation8 + $0x68] sm:$0xff]  ;;  %v9486_v45 = vld [vmem:[#allocation8 + $0x118] sm:$0xff] }
0x18b1   :  { %13722 = vtanh.f32 %v15459_v51 }
0x18b2   :  { %13724 = vtanh.f32 %v15461_v38 }
0x18bb   :  { %v13723_v48 = vpop.eup %13722 }
0x18bc   :  { %v13725_v49 = vpop.eup %13724  ;;  %8899 = vrot.lane.b32.xlu0 %v13723_v48, %s13925_s19  ;;  %v9469_v48 = vld [vmem:[#allocation8 + $0x90] sm:$0xff] }
0x18bd   :  { %8901 = vrot.lane.b32.xlu1 %v13725_v49, %s13925_s19  ;;  %v9463_v49 = vld [vmem:[#allocation8 + $0x60] sm:$0xff] }
0x18f7   :  { %v9342_v0 = vpop.permute.xlu1 %9341 }
0x18f8   :  { %v9340_v1 = vpop.permute.xlu0 %9339 }
0x18f9   :  { %v9343_v58 = vsel %vm577_vm0, %v9340_v1, %v9342_v0  ;;  %v15469_v39 = vadd.f32 %v9340_v1, %v9324_v60  ;;  %v13076_v0 = vpack.c.bf16 %v9469_v48, %v9464_v13  ;;  %v9468_v60 = vld [vmem:[#allocation8 + $0x88] sm:$0xff]  ;;  %v9483_v48 = vld [vmem:[#allocation8 + $0x100] sm:$0xff] }
0x18fa   :  { %v15472_v50 = vadd.f32 %v9343_v58, %v15445_v25  ;;  %v9462_v25 = vld [vmem:[#allocation8 + $0x58] sm:$0xff]  ;;  %v9472_v1 = vld [vmem:[#allocation8 + $0xa8] sm:$0xff]  ;;  %v9477_v58 = vld [vmem:[#allocation8 + $0xd0] sm:$0xff]  ;;  %v13078_v56 = vpack.c.bf16 %v9468_v60, %v9463_v49 }
0x18fb   :  { %13726 = vtanh.f32 %v15469_v39  ;;  %v13038_v37 = vpack.c.bf16 %v9467_v54, %v9462_v25  ;;  %v13042_v41 = vpack.c.bf16 %v9477_v58, %v9472_v1  ;;  %13077 = vmatprep.subr.bf16.mxu1 %v13076_v0  ;;  %v9487_v25 = vld [vmem:[#allocation8 + $0x120] sm:$0xff]  ;;  %v13082_v54 = vpack.c.bf16 %v9478_v26, %v9473_v61  ;;  %v9488_v49 = vld [vmem:[#allocation8 + $0x128] sm:$0xff]  ;;  %v9497_v0 = vld [vmem:[#allocation8 + $0x170] sm:$0xff] }
0x18fc   :  { %13728 = vtanh.f32 %v15472_v50  ;;  %v10306_v52 = vcombine.high %v15469_v39, %v15472_v50  ;;  %13079 = vmatpush1.bf16.msra.mxu1 %v13078_v56  ;;  %v13046_v19 = vpack.c.bf16 %v9487_v25, %v9482_v17  ;;  %v9494_v60 = vld [vmem:[#allocation8 + $0x158] sm:$0xff]  ;;  %v9499_v1 = vld [vmem:[#allocation8 + $0x180] sm:$0xff]  ;;  %v13086_v58 = vpack.c.bf16 %v9488_v49, %v9483_v48  ;;  %v9504_v17 = vld [vmem:[#allocation8 + $0x1a8] sm:$0xff] }
0x18fd   :  { %13039 = vmatprep.subr.bf16.mxu0 %v13038_v37  ;;  %v9489_v37 = vld [vmem:[#allocation8 + $0x130] sm:$0xff]  ;;  %13081 = vmatprep.subr.bf16.mxu1 %v13080_v20  ;;  %v13088_v5 = vpack.c.bf16 %v9499_v1, %v9494_v60  ;;  %v9498_v61 = vld [vmem:[#allocation8 + $0x178] sm:$0xff]  ;;  %v9507_v20 = vld [vmem:[#allocation8 + $0x1c0] sm:$0xff]  ;;  %13730 = vpow2.f32 %v10640_v32 }
0x18fe   :  { %13041 = vmatpush1.bf16.msra.mxu0 %v13040_v4  ;;  %v13048_v4 = vpack.c.bf16 %v9486_v45, %v9481_v44  ;;  %v9502_v26 = vld [vmem:[#allocation8 + $0x198] sm:$0xff]  ;;  %v9509_v25 = vld [vmem:[#allocation8 + $0x1d0] sm:$0xff]  ;;  %v9512_v48 = vld [vmem:[#allocation8 + $0x1e8] sm:$0xff] }
0x18ff   :  { %13043 = vmatprep.subr.bf16.mxu0 %v13042_v41  ;;  %v9491_v41 = vld [vmem:[#allocation8 + $0x140] sm:$0xff]  ;;  %v9501_v45 = vld [vmem:[#allocation8 + $0x190] sm:$0xff]  ;;  %v13092_v6 = vpack.c.bf16 %v9509_v25, %v9504_v17  ;;  %v10168_v50 = vld [vmem:[%s15863_s10 + $0x38] sm:$0xff] }
0x1900   :  { %13083 = vmatpush1.bf16.msra.mxu1 %v13082_v54  ;;  %v13052_v44 = vpack.c.bf16 %v9496_v40, %v9491_v41  ;;  %v13090_v54 = vpack.c.bf16 %v9498_v61, %v9493_v29  ;;  %v9517_v49 = vld [vmem:[#allocation8 + $0x210] sm:$0xff]  ;;  %v9511_v1 = vld [vmem:[#allocation8 + $0x1e0] sm:$0xff]  ;;  %v9518_v40 = vld [vmem:[#allocation8 + $0x218] sm:$0xff] }
0x1901   :  { %v13058_v60 = vpack.c.bf16 %v9517_v49, %v9512_v48  ;;  %v9522_v29 = vld [vmem:[#allocation8 + $0x238] sm:$0xff]  ;;  %v9527_v32 = vld [vmem:[#allocation8 + $0x260] sm:$0xff]  ;;  %v9529_v61 = vld [vmem:[#allocation8 + $0x270] sm:$0xff] }
0x1902   :  { %13045 = vmatpush1.bf16.msra.mxu0 %v13044_v14  ;;  %v10641_v14 = vmul.f32 -1.442695, %v15433_v43  ;;  %v13062_v17 = vpack.c.bf16 %v9527_v32, %v9522_v29  ;;  %v9521_v25 = vld [vmem:[#allocation8 + $0x230] sm:$0xff] }
0x1903   :  { %13047 = vmatprep.subr.bf16.mxu0 %v13046_v19  ;;  %v13054_v19 = vpack.c.bf16 %v9507_v20, %v9502_v26  ;;  %v10167_v39 = vld [vmem:[%s15863_s10 + $0x30] sm:$0xff] }
0x1904   :  { %13732 = vpow2.f32 %v10641_v14  ;;  %v9526_v14 = vld [vmem:[#allocation8 + $0x258] sm:$0xff] }
0x1905   :  { %v13727_v62 = vpop.eup %13726  ;;  %v13064_v48 = vpack.c.bf16 %v9526_v14, %v9521_v25 }
0x1906   :  { %v13729_v47 = vpop.eup %13728  ;;  %9352 = vrot.lane.b32.xlu0 %v13727_v62, %s13925_s19  ;;  %v9484_v62 = vld [vmem:[#allocation8 + $0x108] sm:$0xff]  ;;  %13049 = vmatpush1.bf16.msra.mxu0 %v13048_v4 }
0x1907   :  { %9354 = vrot.lane.b32.xlu1 %v13729_v47, %s13925_s19  ;;  %v13084_v13 = vpack.c.bf16 %v9489_v37, %v9484_v62  ;;  %v9492_v47 = vld [vmem:[#allocation8 + $0x148] sm:$0xff]  ;;  %v9506_v62 = vld [vmem:[#allocation8 + $0x1b8] sm:$0xff]  ;;  %v9503_v37 = vld [vmem:[#allocation8 + $0x1a0] sm:$0xff] }
0x1908   :  { %v13050_v56 = vpack.c.bf16 %v9497_v0, %v9492_v47  ;;  %v9514_v47 = vld [vmem:[#allocation8 + $0x1f8] sm:$0xff]  ;;  %v9519_v0 = vld [vmem:[#allocation8 + $0x220] sm:$0xff]  ;;  %v13056_v43 = vpack.c.bf16 %v9506_v62, %v9501_v45  ;;  %v9532_v45 = vld [vmem:[#allocation8 + $0x288] sm:$0xff] }
0x1909   :  { %13085 = vmatprep.subr.bf16.mxu1 %v13084_v13  ;;  %v9508_v13 = vld [vmem:[#allocation8 + $0x1c8] sm:$0xff]  ;;  %v13096_v41 = vpack.c.bf16 %v9519_v0, %v9514_v47  ;;  %v9537_v62 = vld [vmem:[#allocation8 + $0x2b0] sm:$0xf]  ;;  %v9531_v0 = vld [vmem:[#allocation8 + $0x280] sm:$0xff] }
0x190a   :  { %13087 = vmatpush1.bf16.msra.mxu1 %v13086_v58  ;;  %13051 = vmatprep.subr.bf16.mxu0 %v13050_v56  ;;  %v13094_v4 = vpack.c.bf16 %v9508_v13, %v9503_v37  ;;  %v9516_v58 = vld [vmem:[#allocation8 + $0x208] sm:$0xff]  ;;  %v9513_v56 = vld [vmem:[#allocation8 + $0x1f0] sm:$0xff]  ;;  %v9534_v37 = vld [vmem:[#allocation8 + $0x298] sm:$0xff]  ;;  %v13731_v13 = vpop.eup %13730  ;;  %v13066_v47 = vpack.c.bf16 %v9537_v62, %v9532_v45  ;;  %v9275_v45 = vrot.slane %v15435_v57, 2 }
0x190b   :  { %13089 = vmatprep.subr.bf16.mxu1 %v13088_v5  ;;  %13053 = vmatpush1.bf16.msra.mxu0 %v13052_v44  ;;  %v9524_v5 = vld [vmem:[#allocation8 + $0x248] sm:$0xff]  ;;  %v13060_v26 = vpack.c.bf16 %v9516_v58, %v9511_v1  ;;  %v13098_v20 = vpack.c.bf16 %v9518_v40, %v9513_v56  ;;  %v9523_v44 = vld [vmem:[#allocation8 + $0x240] sm:$0xff]  ;;  %v8865_v1 = vadd.f32 1.0, %v13731_v13  ;;  %v9538_v40 = vld [vmem:[#allocation8 + $0x2b8] sm:$0xf] }
0x190c   :  { %13055 = vmatprep.subr.bf16.mxu0 %v13054_v19  ;;  %v9528_v19 = vld [vmem:[#allocation8 + $0x268] sm:$0xff]  ;;  %v9285_v62 = vadd.f32 %v9275_v45, %v14244_v34 }
0x190d   :  { %v13102_v49 = vpack.c.bf16 %v9528_v19, %v9523_v44  ;;  %13734 = vrcp.f32 %v8865_v1  ;;  %v9364_v44 = vld [vmem:[#allocation6 + $0x18] sm:$0xff] }
0x190e   :  { %13091 = vmatpush1.bf16.msra.mxu1 %v13090_v54  ;;  %v13100_v54 = vpack.c.bf16 %v9529_v61, %v9524_v5 }
0x190f   :  { %13093 = vmatprep.subr.bf16.mxu1 %v13092_v6  ;;  %13057 = vmatpush1.bf16.msra.mxu0 %v13056_v43  ;;  %v9539_v6 = vld [vmem:[#allocation8 + $0x2c0] sm:$0xf]  ;;  %v9536_v43 = vld [vmem:[#allocation8 + $0x2a8] sm:$0xf] }
0x1910   :  { %13059 = vmatprep.subr.bf16.mxu0 %v13058_v60  ;;  %v13104_v60 = vpack.c.bf16 %v9539_v6, %v9534_v37  ;;  %v13069_v58 = vpack.c.bf16 %v9536_v43, %v9531_v0  ;;  %v10653_v37 = vmul.f32 -1.442695, %v15439_v16  ;;  %v10654_v6 = vmul.f32 -1.442695, %v9285_v62 }
0x1912   :  { %13095 = vmatpush1.bf16.msra.mxu1 %v13094_v4  ;;  %v13733_v4 = vpop.eup %13732 }
0x1913   :  { %13097 = vmatprep.subr.bf16.mxu1 %v13096_v41  ;;  %13061 = vmatpush1.bf16.msra.mxu0 %v13060_v26  ;;  %v8866_v56 = vadd.f32 1.0, %v13733_v4  ;;  %v9533_v41 = vld [vmem:[#allocation8 + $0x290] sm:$0xff] }
0x1914   :  { %13063 = vmatprep.subr.bf16.mxu0 %v13062_v17  ;;  %v13107_v29 = vpack.c.bf16 %v9538_v40, %v9533_v41  ;;  %v9455_v41 = vld [vmem:[#allocation8 + $0x20] sm:$0xff]  ;;  %v9460_v40 = vld [vmem:[#allocation8 + $0x48] sm:$0xff] }
0x1915   :  { %13736 = vrcp.f32 %v8866_v56 }
0x1916   :  { %13099 = vmatpush1.bf16.msra.mxu1 %v13098_v20  ;;  %13738 = vpow2.f32 %v10653_v37 }
0x1917   :  { %13101 = vmatprep.subr.bf16.mxu1 %v13100_v54  ;;  %13065 = vmatpush1.bf16.msra.mxu0 %v13064_v48  ;;  %v13735_v32 = vpop.eup %13734  ;;  %v9369_v54 = vld [vmem:[#allocation6 + $0x40] sm:$0xff]  ;;  %13740 = vpow2.f32 %v10654_v6 }
0x1918   :  { %13068 = vmatprep.subr.msk.bf16.mxu0 %vm14099_vm3, %v13066_v47  ;;  %v13176_v19 = vpack.c.bf16 %v9369_v54, %v9364_v44  ;;  %v9465_v54 = vld [vmem:[#allocation8 + $0x70] sm:$0xff] }
0x1919   :  { %v9373_v6 = vld [vmem:[#allocation6 + $0x60] sm:$0xff] }
0x191a   :  { %13103 = vmatpush1.bf16.msra.mxu1 %v13102_v49 }
0x191b   :  { %13106 = vmatprep.subr.msk.bf16.mxu1 %vm14099_vm3, %v13104_v60  ;;  %13071 = vmatpush1.bf16.msk.msra.mxu0 %vm14099_vm3, %v13069_v58 }
0x191c   :  { %13110 = vmatprep.subr.bf16.mxu0 %v13921_v8 }
0x191e   :  { %13109 = vmatpush1.bf16.msk.msra.mxu1 %vm14099_vm3, %v13107_v29  ;;  %v9363_v29 = vld [vmem:[#allocation6 + $0x10] sm:$0xff] }
0x191f   :  { %v13737_v20 = vpop.eup %13736  ;;  %13177 = vmatprep.subr.bf16.mxu1 %v13176_v19  ;;  %v9470_v19 = vld [vmem:[#allocation8 + $0x98] sm:$0xff] }
0x1920   :  { %v13739_v13 = vpop.eup %13738 }
0x1921   :  { %v13741_v48 = vpop.eup %13740  ;;  %v9312_v49 = vadd.f32 1.0, %v13739_v13  ;;  %v9378_v13 = vld [vmem:[#allocation6 + $0x88] sm:$0xff] }
0x1922   :  { %v9313_v47 = vadd.f32 1.0, %v13741_v48  ;;  %v9384_v48 = vld [vmem:[#allocation6 + $0xb8] sm:$0xff] }
0x1923   :  { %13742 = vrcp.f32 %v9312_v49  ;;  %v9389_v49 = vld [vmem:[#allocation6 + $0xe0] sm:$0xff] }
0x1924   :  { %13744 = vrcp.f32 %v9313_v47  ;;  %v13114_v47 = vpack.c.bf16 %v9470_v19, %v9465_v54  ;;  %v9409_v54 = vld [vmem:[#allocation6 + $0x180] sm:$0xff] }
0x192d   :  { %v13743_v0 = vpop.eup %13742 }
0x192e   :  { %v8900_v5 = vpop.permute.xlu0 %8899  ;;  %v13745_v1 = vpop.eup %13744 }
0x192f   :  { %v15491_v61 = vmul.f32 %v13735_v32, %v8900_v5  ;;  %v8902_v26 = vpop.permute.xlu1 %8901  ;;  %v9368_v32 = vld [vmem:[#allocation6 + $0x38] sm:$0xff] }
0x1930   :  { %v8903_v17 = vsel %vm894_vm8, %v8900_v5, %v8902_v26  ;;  %v9374_v5 = vld [vmem:[#allocation6 + $0x68] sm:$0xff]  ;;  %v9379_v26 = vld [vmem:[#allocation6 + $0x90] sm:$0xff]  ;;  %v13178_v45 = vpack.c.bf16 %v9368_v32, %v9363_v29  ;;  %v9485_v29 = vld [vmem:[#allocation8 + $0x110] sm:$0xff] }
0x1931   :  { %v15494_v25 = vmul.f32 %v13737_v20, %v8903_v17  ;;  %9541 = vrot.lane.b32.xlu0 %v15491_v61, %s13926_s2  ;;  %v13111_v20 = vpack.c.bf16 %v9460_v40, %v9455_v41  ;;  %v13180_v37 = vpack.c.bf16 %v9379_v26, %v9374_v5  ;;  %v9399_v41 = vld [vmem:[#allocation6 + $0x130] sm:$0xff]  ;;  %v9490_v32 = vld [vmem:[#allocation8 + $0x138] sm:$0xff] }
0x1932   :  { %v13120_v19 = vpack.c.bf16 %v9490_v32, %v9485_v29  ;;  %v9429_v29 = vld [vmem:[#allocation6 + $0x220] sm:$0xff] }
0x1933   :  { %v8910_v14 = vcombine.low %v15491_v61, %v15494_v25  ;;  %9543 = vrot.lane.b32.xlu1 %v15494_v25, %s13926_s2  ;;  %v13928_v61 = vmov 1983009808  }
0x1934   :  { %v10274_v25 = vunpack.c.l.s4 %v13928_v61  ;;  %v10177_v61 = vld [vmem:[%s15863_s10 + $0x80] sm:$0xff] }
0x1978   :  { %v9353_v43 = vpop.permute.xlu0 %9352 }
0x1979   :  { %v15505_v4 = vmul.f32 %v13743_v0, %v9353_v43  ;;  %v9355_v60 = vpop.permute.xlu1 %9354  ;;  %v9475_v0 = vld [vmem:[#allocation8 + $0xc0] sm:$0xff] }
0x197a   :  { %v9356_v57 = vsel %vm894_vm8, %v9353_v43, %v9355_v60  ;;  %v9480_v43 = vld [vmem:[#allocation8 + $0xe8] sm:$0xff]  ;;  %v13182_v60 = vpack.c.bf16 %v9378_v13, %v9373_v6 }
0x197b   :  { %v9778_v34 = vrot.slane %v15505_v4, 6  ;;  %v15509_v16 = vmul.f32 %v13745_v1, %v9356_v57  ;;  %v13184_v1 = vpack.c.bf16 %v9389_v49, %v9384_v48  ;;  %v9383_v57 = vld [vmem:[#allocation6 + $0xb0] sm:$0xff]  ;;  %v13117_v40 = vpack.c.bf16 %v9480_v43, %v9475_v0  ;;  %v9408_v49 = vld [vmem:[#allocation6 + $0x178] sm:$0xff] }
0x197c   :  { %v9403_v48 = vld [vmem:[#allocation6 + $0x150] sm:$0xff] }
0x197d   :  { %v9779_v58 = vrot.slane %v15509_v16, 6  ;;  %v10272_v56 = vcombine.high %v15505_v4, %v15509_v16  ;;  %9780 = vrot.lane.b32.xlu0 %v9778_v34, %s13926_s2  ;;  %v9388_v34 = vld [vmem:[#allocation6 + $0xd8] sm:$0xff]  ;;  %v9419_v0 = vld [vmem:[#allocation6 + $0x1d0] sm:$0xff]  ;;  %v10164_v4 = vld [vmem:[%s15863_s10 + $0x18] sm:$0xff] }
0x197e   :  { %v13186_v5 = vpack.c.bf16 %v9388_v34, %v9383_v57  ;;  %v13194_v57 = vpack.c.bf16 %v9408_v49, %v9403_v48 }
0x197f   :  { %9782 = vrot.lane.b32.xlu1 %v9779_v58, %s13926_s2  ;;  %v9394_v58 = vld [vmem:[#allocation6 + $0x108] sm:$0xff] }
0x1980   :  { %v13188_v26 = vpack.c.bf16 %v9399_v41, %v9394_v58  ;;  %v9413_v58 = vld [vmem:[#allocation6 + $0x1a0] sm:$0xff]  ;;  %v9418_v41 = vld [vmem:[#allocation6 + $0x1c8] sm:$0xff] }
0x19a3   :  { %v9542_v17 = vpop.permute.xlu0 %9541 }
0x19a5   :  { %v9544_v44 = vpop.permute.xlu1 %9543 }
0x19a6   :  { %10657 = vmatprep.mubr.msk.f32.mxu0 %vm577_vm0, %v9544_v44  ;;  %10660 = vmatprep.mubr.msk.f32.mxu1 %vm577_vm0, %v9544_v44  ;;  %v15519_v62 = vsel %vm1325_vm9, %v9542_v17, %v9544_v44  ;;  %v9398_v17 = vld [vmem:[#allocation6 + $0x128] sm:$0xff] }
0x19a7   :  { %9629 = vmatmul.mubr.f32.vlgmr.msra.gmra.mrb[52].mxu0 %v15519_v62  ;;  %9700 = vmatmul.mubr.f32.vlgmr.msra.gmra.mrb[64].mxu1 %v15519_v62 }
0x19a8   :  { %13112 = vmatpush1.bf16.msra.mxu0 %v13111_v20  ;;  %10662 = vmatprep.mubr.msk.f32.mxu0 %vm577_vm0, %v9544_v44  ;;  %v9393_v20 = vld [vmem:[#allocation6 + $0x100] sm:$0xff]  ;;  %v9404_v44 = vld [vmem:[#allocation6 + $0x158] sm:$0xff] }
0x19a9   :  { %13113 = vmatprep.subr.bf16.mxu0 %v13921_v8  ;;  %13179 = vmatpush1.bf16.msra.mxu1 %v13178_v45  ;;  %v9495_v45 = vld [vmem:[#allocation8 + $0x160] sm:$0xff]  ;;  %v13190_v6 = vpack.c.bf16 %v9398_v17, %v9393_v20  ;;  %v13192_v13 = vpack.c.bf16 %v9409_v54, %v9404_v44  ;;  %v13198_v20 = vpack.c.bf16 %v9418_v41, %v9413_v58  ;;  %v9428_v54 = vld [vmem:[#allocation6 + $0x218] sm:$0xff]  ;;  %v9362_v58 = vld [vmem:[#allocation6 + $0x8] sm:$0xff] }
0x19aa   :  { %13181 = vmatprep.subr.bf16.mxu1 %v13180_v37  ;;  %v9500_v37 = vld [vmem:[#allocation8 + $0x188] sm:$0xff]  ;;  %v9423_v44 = vld [vmem:[#allocation6 + $0x1f0] sm:$0xff] }
0x19ab   :  { %v13123_v43 = vpack.c.bf16 %v9500_v37, %v9495_v45  ;;  %v9439_v45 = vld [vmem:[#allocation6 + $0x270] sm:$0xff]  ;;  %v13202_v48 = vpack.c.bf16 %v9428_v54, %v9423_v44  ;;  %v9366_v44 = vld [vmem:[#allocation6 + $0x28] sm:$0xff] }
0x19ac   :  { %13115 = vmatpush1.bf16.msra.mxu0 %v13114_v47  ;;  %v9414_v47 = vld [vmem:[#allocation6 + $0x1a8] sm:$0xff] }
0x19ad   :  { %13116 = vmatprep.subr.bf16.mxu0 %v13921_v8  ;;  %13183 = vmatpush1.bf16.msra.mxu1 %v13182_v60  ;;  %v9505_v60 = vld [vmem:[#allocation8 + $0x1b0] sm:$0xff]  ;;  %v13196_v34 = vpack.c.bf16 %v9419_v0, %v9414_v47  ;;  %v9438_v0 = vld [vmem:[#allocation6 + $0x268] sm:$0xff] }
0x19ae   :  { %13185 = vmatprep.subr.bf16.mxu1 %v13184_v1  ;;  %v9510_v1 = vld [vmem:[#allocation8 + $0x1d8] sm:$0xff]  ;;  %v9433_v47 = vld [vmem:[#allocation6 + $0x240] sm:$0xff] }
0x19af   :  { %v13126_v32 = vpack.c.bf16 %v9510_v1, %v9505_v60  ;;  %v9449_v60 = vld [vmem:[#allocation6 + $0x2c0] sm:$0xf]  ;;  %v13206_v41 = vpack.c.bf16 %v9438_v0, %v9433_v47  ;;  %v9387_v47 = vld [vmem:[#allocation6 + $0xd0] sm:$0xff] }
0x19b0   :  { %13118 = vmatpush1.bf16.msra.mxu0 %v13117_v40  ;;  %v9424_v40 = vld [vmem:[#allocation6 + $0x1f8] sm:$0xff] }
0x19b1   :  { %13119 = vmatprep.subr.bf16.mxu0 %v13921_v8  ;;  %13187 = vmatpush1.bf16.msra.mxu1 %v13186_v5  ;;  %v9515_v5 = vld [vmem:[#allocation8 + $0x200] sm:$0xff]  ;;  %v13200_v17 = vpack.c.bf16 %v9429_v29, %v9424_v40 }
0x19b2   :  { %13189 = vmatprep.subr.bf16.mxu1 %v13188_v26  ;;  %v9520_v26 = vld [vmem:[#allocation8 + $0x228] sm:$0xff]  ;;  %v9367_v40 = vld [vmem:[#allocation6 + $0x30] sm:$0xff] }
0x19b3   :  { %v13129_v37 = vpack.c.bf16 %v9520_v26, %v9515_v5  ;;  %v9448_v5 = vld [vmem:[#allocation6 + $0x2b8] sm:$0xf] }
0x19b4   :  { %13121 = vmatpush1.bf16.msra.mxu0 %v13120_v19  ;;  %v9434_v19 = vld [vmem:[#allocation6 + $0x248] sm:$0xff] }
0x19b5   :  { %13122 = vmatprep.subr.bf16.mxu0 %v13921_v8  ;;  %13191 = vmatpush1.bf16.msra.mxu1 %v13190_v6  ;;  %v9525_v6 = vld [vmem:[#allocation8 + $0x250] sm:$0xff]  ;;  %v13204_v49 = vpack.c.bf16 %v9439_v45, %v9434_v19  ;;  %v9372_v19 = vld [vmem:[#allocation6 + $0x58] sm:$0xff] }
0x19b6   :  { %13193 = vmatprep.subr.bf16.mxu1 %v13192_v13  ;;  %v9530_v13 = vld [vmem:[#allocation8 + $0x278] sm:$0xff]  ;;  %v9377_v45 = vld [vmem:[#allocation6 + $0x80] sm:$0xff] }
0x19b7   :  { %v13132_v1 = vpack.c.bf16 %v9530_v13, %v9525_v6  ;;  %v13142_v6 = vpack.c.bf16 %v9377_v45, %v9372_v19  ;;  %v9371_v13 = vld [vmem:[#allocation6 + $0x50] sm:$0xff] }
0x19b8   :  { %13124 = vmatpush1.bf16.msra.mxu0 %v13123_v43  ;;  %v9444_v43 = vld [vmem:[#allocation6 + $0x298] sm:$0xff] }
0x19b9   :  { %13125 = vmatprep.subr.bf16.mxu0 %v13921_v8  ;;  %13195 = vmatpush1.bf16.msra.mxu1 %v13194_v57  ;;  %v9535_v57 = vld [vmem:[#allocation8 + $0x2a0] sm:$0xff]  ;;  %v13208_v29 = vpack.c.bf16 %v9449_v60, %v9444_v43  ;;  %v9381_v60 = vld [vmem:[#allocation6 + $0xa0] sm:$0xff] }
0x19ba   :  { %13197 = vmatprep.subr.bf16.mxu1 %v13196_v34  ;;  %v9540_v34 = vld [vmem:[#allocation8 + $0x2c8] sm:$0xf] }
0x19bb   :  { %v13135_v26 = vpack.c.bf16 %v9540_v34, %v9535_v57  ;;  %v9392_v57 = vld [vmem:[#allocation6 + $0xf8] sm:$0xff]  ;;  %v9397_v34 = vld [vmem:[#allocation6 + $0x120] sm:$0xff] }
0x19bc   :  { %13127 = vmatpush1.bf16.msra.mxu0 %v13126_v32  ;;  %v9443_v32 = vld [vmem:[#allocation6 + $0x290] sm:$0xff] }
0x19bd   :  { %13128 = vmatprep.subr.bf16.mxu0 %v13921_v8  ;;  %13199 = vmatpush1.bf16.msra.mxu1 %v13198_v20  ;;  %v13138_v20 = vpack.c.bf16 %v9367_v40, %v9362_v58  ;;  %v13211_v54 = vpack.c.bf16 %v9448_v5, %v9443_v32  ;;  %v9391_v40 = vld [vmem:[#allocation6 + $0xf0] sm:$0xff]  ;;  %v9402_v32 = vld [vmem:[#allocation6 + $0x148] sm:$0xff] }
0x19be   :  { %13201 = vmatprep.subr.bf16.mxu1 %v13200_v17  ;;  %v9361_v17 = vld [vmem:[#allocation6] sm:$0xff]  ;;  %v9407_v5 = vld [vmem:[#allocation6 + $0x170] sm:$0xff] }
0x19c0   :  { %13130 = vmatpush1.bf16.msra.mxu0 %v13129_v37  ;;  %v13140_v37 = vpack.c.bf16 %v9366_v44, %v9361_v17  ;;  %v9406_v17 = vld [vmem:[#allocation6 + $0x168] sm:$0xff]  ;;  %v9412_v44 = vld [vmem:[#allocation6 + $0x198] sm:$0xff] }
0x19c1   :  { %13131 = vmatprep.subr.bf16.mxu0 %v13921_v8  ;;  %13203 = vmatpush1.bf16.msra.mxu1 %v13202_v48  ;;  %v9376_v48 = vld [vmem:[#allocation6 + $0x78] sm:$0xff] }
0x19c2   :  { %13205 = vmatprep.subr.bf16.mxu1 %v13204_v49  ;;  %v9382_v49 = vld [vmem:[#allocation6 + $0xa8] sm:$0xff]  ;;  %v13144_v0 = vpack.c.bf16 %v9376_v48, %v9371_v13  ;;  %v9427_v48 = vld [vmem:[#allocation6 + $0x210] sm:$0xff] }
0x19c3   :  { %v13146_v43 = vpack.c.bf16 %v9387_v47, %v9382_v49  ;;  %v9422_v13 = vld [vmem:[#allocation6 + $0x1e8] sm:$0xff] }
0x19c4   :  { %13133 = vmatpush1.bf16.msra.mxu0 %v13132_v1  ;;  %v9386_v1 = vld [vmem:[#allocation6 + $0xc8] sm:$0xff]  ;;  %v13162_v47 = vpack.c.bf16 %v9427_v48, %v9422_v13 }
0x19c5   :  { %13134 = vmatprep.subr.bf16.mxu0 %v13921_v8  ;;  %13207 = vmatpush1.bf16.msra.mxu1 %v13206_v41  ;;  %v13148_v58 = vpack.c.bf16 %v9386_v1, %v9381_v60  ;;  %v13150_v41 = vpack.c.bf16 %v9397_v34, %v9392_v57  ;;  %v9432_v60 = vld [vmem:[#allocation6 + $0x238] sm:$0xff]  ;;  %v9437_v1 = vld [vmem:[#allocation6 + $0x260] sm:$0xff] }
0x19c6   :  { %13210 = vmatprep.subr.msk.bf16.mxu1 %vm14099_vm3, %v13208_v29  ;;  %v9396_v29 = vld [vmem:[#allocation6 + $0x118] sm:$0xff]  ;;  %v13166_v34 = vpack.c.bf16 %v9437_v1, %v9432_v60 }
0x19c7   :  { %v9400_v60 = vld [vmem:[#allocation6 + $0x138] sm:$0xff] }
0x19c8   :  { %13137 = vmatpush1.bf16.msk.msra.mxu0 %vm14099_vm3, %v13135_v26  ;;  %v13152_v26 = vpack.c.bf16 %v9396_v29, %v9391_v40  ;;  %v9442_v40 = vld [vmem:[#allocation6 + $0x288] sm:$0xff]  ;;  %v9447_v29 = vld [vmem:[#allocation6 + $0x2b0] sm:$0xf] }
0x19c9   :  { %13139 = vmatprep.subr.bf16.mxu0 %v13138_v20  ;;  %13213 = vmatpush1.bf16.msk.msra.mxu1 %vm14099_vm3, %v13211_v54  ;;  %v9401_v20 = vld [vmem:[#allocation6 + $0x140] sm:$0xff] }
0x19ca   :  { %13214 = vmatprep.subr.bf16.mxu1 %v13921_v8  ;;  %v9417_v54 = vld [vmem:[#allocation6 + $0x1c0] sm:$0xff]  ;;  %v13156_v19 = vpack.c.bf16 %v9406_v17, %v9401_v20 }
0x19cb   :  { %9771 = vmatmul.mubr.f32.vlgmr.msra.gmra.mrb[54].mxu0 %v15519_v62  ;;  %v13154_v62 = vpack.c.bf16 %v9407_v5, %v9402_v32  ;;  %v13158_v45 = vpack.c.bf16 %v9417_v54, %v9412_v44  ;;  %v13170_v5 = vpack.c.bf16 %v9447_v29, %v9442_v40  ;;  %v9365_v17 = vld [vmem:[#allocation6 + $0x20] sm:$0xff]  ;;  %v9370_v44 = vld [vmem:[#allocation6 + $0x48] sm:$0xff]  ;;  %v9420_v40 = vld [vmem:[#allocation6 + $0x1d8] sm:$0xff] }
0x19cc   :  { %13141 = vmatpush1.bf16.msra.mxu0 %v13140_v37  ;;  %v9411_v37 = vld [vmem:[#allocation6 + $0x190] sm:$0xff]  ;;  %v13215_v54 = vpack.c.bf16 %v9370_v44, %v9365_v17  ;;  %v9445_v44 = vld [vmem:[#allocation6 + $0x2a0] sm:$0xff] }
0x19cd   :  { %13143 = vmatprep.subr.bf16.mxu0 %v13142_v6  ;;  %v9416_v6 = vld [vmem:[#allocation6 + $0x1b8] sm:$0xff] }
0x19ce   :  { %v13160_v49 = vpack.c.bf16 %v9416_v6, %v9411_v37  ;;  %v9375_v37 = vld [vmem:[#allocation6 + $0x70] sm:$0xff]  ;;  %v9380_v6 = vld [vmem:[#allocation6 + $0x98] sm:$0xff] }
0x19cf   :  { %v13218_v48 = vpack.c.bf16 %v9380_v6, %v9375_v37  ;;  %v10015_v6 = vld [vmem:[%s15862_s9] sm:$0x1f] }
0x19d0   :  { %13145 = vmatpush1.bf16.msra.mxu0 %v13144_v0  ;;  %v9421_v0 = vld [vmem:[#allocation6 + $0x1e0] sm:$0xff] }
0x19d1   :  { %13147 = vmatprep.subr.bf16.mxu0 %v13146_v43  ;;  %v9426_v43 = vld [vmem:[#allocation6 + $0x208] sm:$0xff] }
0x19d2   :  { %v13164_v57 = vpack.c.bf16 %v9426_v43, %v9421_v0  ;;  %v9395_v43 = vld [vmem:[#allocation6 + $0x110] sm:$0xff] }
0x19d3   :  { %v13224_v1 = vpack.c.bf16 %v9400_v60, %v9395_v43 }
0x19d4   :  { %13149 = vmatpush1.bf16.msra.mxu0 %v13148_v58  ;;  %v9431_v58 = vld [vmem:[#allocation6 + $0x230] sm:$0xff] }
0x19d5   :  { %13151 = vmatprep.subr.bf16.mxu0 %v13150_v41  ;;  %v9436_v41 = vld [vmem:[#allocation6 + $0x258] sm:$0xff] }
0x19d6   :  { %v13168_v32 = vpack.c.bf16 %v9436_v41, %v9431_v58  ;;  %v9415_v41 = vld [vmem:[#allocation6 + $0x1b0] sm:$0xff] }
0x19d7   :  { %v13230_v29 = vpack.c.bf16 %v9420_v40, %v9415_v41 }
0x19d8   :  { %13153 = vmatpush1.bf16.msra.mxu0 %v13152_v26  ;;  %v9441_v26 = vld [vmem:[#allocation6 + $0x280] sm:$0xff] }
0x19d9   :  { %13155 = vmatprep.subr.bf16.mxu0 %v13154_v62  ;;  %v9446_v62 = vld [vmem:[#allocation6 + $0x2a8] sm:$0xf] }
0x19da   :  { %v13173_v20 = vpack.c.bf16 %v9446_v62, %v9441_v26  ;;  %v9435_v62 = vld [vmem:[#allocation6 + $0x250] sm:$0xff] }
0x19dc   :  { %13157 = vmatpush1.bf16.msra.mxu0 %v13156_v19 }
0x19dd   :  { %13159 = vmatprep.subr.bf16.mxu0 %v13158_v45 }
0x19e0   :  { %13161 = vmatpush1.bf16.msra.mxu0 %v13160_v49  ;;  %v9385_v49 = vld [vmem:[#allocation6 + $0xc0] sm:$0xff] }
0x19e1   :  { %13163 = vmatprep.subr.bf16.mxu0 %v13162_v47  ;;  %v9390_v47 = vld [vmem:[#allocation6 + $0xe8] sm:$0xff] }
0x19e2   :  { %v13221_v0 = vpack.c.bf16 %v9390_v47, %v9385_v49  ;;  %v10028_v49 = vrot.slane %v10015_v6, %v14226_v21  ;;  %v10024_v47 = vrot.slane %v10015_v6, %v14214_v11  ;;  %v10036_v11 = vrot.slane %v10015_v6, %v14232_v23 }
0x19e4   :  { %13165 = vmatpush1.bf16.msra.mxu0 %v13164_v57  ;;  %v9405_v57 = vld [vmem:[#allocation6 + $0x160] sm:$0xff] }
0x19e5   :  { %13167 = vmatprep.subr.bf16.mxu0 %v13166_v34  ;;  %v9410_v34 = vld [vmem:[#allocation6 + $0x188] sm:$0xff] }
0x19e6   :  { %v13227_v58 = vpack.c.bf16 %v9410_v34, %v9405_v57 }
0x19e8   :  { %13169 = vmatpush1.bf16.msra.mxu0 %v13168_v32  ;;  %v9425_v32 = vld [vmem:[#allocation6 + $0x200] sm:$0xff] }
0x19e9   :  { %13172 = vmatprep.subr.msk.bf16.mxu0 %vm14099_vm3, %v13170_v5  ;;  %v9430_v5 = vld [vmem:[#allocation6 + $0x228] sm:$0xff] }
0x19ea   :  { %v13233_v26 = vpack.c.bf16 %v9430_v5, %v9425_v32 }
0x19ec   :  { %13175 = vmatpush1.bf16.msk.msra.mxu0 %vm14099_vm3, %v13173_v20  ;;  %v9440_v20 = vld [vmem:[#allocation6 + $0x278] sm:$0xff] }
0x19ed   :  { %13242 = vmatprep.subr.bf16.mxu0 %v13921_v8  ;;  %v13236_v17 = vpack.c.bf16 %v9440_v20, %v9435_v62 }
0x19ef   :  { %v9781_v19 = vpop.permute.xlu0 %9780 }
0x19f1   :  { %v9783_v45 = vpop.permute.xlu1 %9782 }
0x19f2   :  { %10665 = vmatprep.mubr.msk.f32.mxu0 %vm577_vm0, %v9783_v45  ;;  %10668 = vmatprep.mubr.msk.f32.mxu1 %vm577_vm0, %v9783_v45  ;;  %v9784_v13 = vsel %vm1325_vm9, %v9781_v19, %v9783_v45 }
0x19f3   :  { %9868 = vmatmul.mubr.f32.vlgmr.msra.gmra.mrb[52].mxu0 %v9784_v13  ;;  %9939 = vmatmul.mubr.f32.vlgmr.msra.gmra.mrb[64].mxu1 %v9784_v13 }
0x19f4   :  { %13216 = vmatpush1.bf16.msra.mxu1 %v13215_v54  ;;  %10670 = vmatprep.mubr.msk.f32.mxu1 %vm577_vm0, %v9783_v45  ;;  %v9450_v54 = vld [vmem:[#allocation6 + $0x2c8] sm:$0xf] }
0x19f5   :  { %13217 = vmatprep.subr.bf16.mxu1 %v13921_v8  ;;  %v13239_v19 = vpack.c.bf16 %v9450_v54, %v9445_v44 }
0x19f8   :  { %13219 = vmatpush1.bf16.msra.mxu1 %v13218_v48  ;;  %v10020_v48 = vrot.slane %v10015_v6, %v14211_v10 }
0x19f9   :  { %13220 = vmatprep.subr.bf16.mxu1 %v13921_v8 }
0x19fc   :  { %13222 = vmatpush1.bf16.msra.mxu1 %v13221_v0  ;;  %v10032_v0 = vrot.slane %v10015_v6, %v14229_v22 }
0x19fd   :  { %13223 = vmatprep.subr.bf16.mxu1 %v13921_v8 }
0x1a00   :  { %13225 = vmatpush1.bf16.msra.mxu1 %v13224_v1 }
0x1a01   :  { %13226 = vmatprep.subr.bf16.mxu1 %v13921_v8 }
0x1a04   :  { %13228 = vmatpush1.bf16.msra.mxu1 %v13227_v58 }
0x1a05   :  { %13229 = vmatprep.subr.bf16.mxu1 %v13921_v8 }
0x1a08   :  { %13231 = vmatpush1.bf16.msra.mxu1 %v13230_v29 }
0x1a09   :  { %13232 = vmatprep.subr.bf16.mxu1 %v13921_v8 }
0x1a0c   :  { %13234 = vmatpush1.bf16.msra.mxu1 %v13233_v26 }
0x1a0d   :  { %13235 = vmatprep.subr.bf16.mxu1 %v13921_v8 }
0x1a10   :  { %13237 = vmatpush1.bf16.msra.mxu1 %v13236_v17 }
0x1a11   :  { %13238 = vmatprep.subr.bf16.mxu1 %v13921_v8 }
0x1a14   :  { %13241 = vmatpush1.bf16.msk.msra.mxu1 %vm14099_vm3, %v13239_v19 }
0x1a17   :  { %10010 = vmatmul.mubr.f32.vlgmr.msra.gmra.mrb[66].mxu1 %v9784_v13 }
0x1a9e   :  { %v9772_v45 = vpop.f32.mrb[54].mxu0 }
0x1a9f   :  { %v9774_v37 = vpop.f32.mrb[55].mxu0 }
0x1ac6   :  { %v9869_v43 = vpop.f32.mrb[52].mxu0  ;;  %v9940_v60 = vpop.f32.mrb[64].mxu1 }
0x1ac7   :  { %v10042_v1 = vadd.f32 %v10020_v48, %v9869_v43  ;;  %v10044_v57 = vadd.f32 %v10028_v49, %v9940_v60  ;;  %v9871_v34 = vpop.f32.mrb[53].mxu0  ;;  %v9942_v13 = vpop.f32.mrb[65].mxu1 }
0x1ac8   :  { %v10043_v58 = vadd.f32 %v10024_v47, %v9871_v34  ;;  %v15566_v41 = vadd.f32 %v10032_v0, %v9942_v13  ;;  %v13927_v34 = vmov 1966171168  }
0x1ac9   :  { %13746 = vtanh.f32 %v10044_v57  ;;  %v10671_v26 = vmul.f32 -1.442695, %v10042_v1  ;;  %v10673_v49 = vmul.f32 -1.442695, %v10044_v57  ;;  %v1678_v13 = vunpack.c.l.s4 %v13927_v34 }
0x1aca   :  { %13748 = vtanh.f32 %v15566_v41  ;;  %v10672_v5 = vmul.f32 -1.442695, %v10043_v58 }
0x1acb   :  { %v1679_v57 = vunpack.c.0.s8 %v1678_v13  ;;  %v10169_v13 = vld [vmem:[%s15863_s10 + $0x40] sm:$0xff] }
0x1acc   :  { %13750 = vpow2.f32 %v10672_v5 }
0x1acd   :  { %13752 = vpow2.f32 %v10671_v26 }
0x1ad3   :  { %v13747_v40 = vpop.eup %13746 }
0x1ad4   :  { %v13749_v10 = vpop.eup %13748  ;;  %10083 = vrot.lane.b32.xlu0 %v13747_v40, %s13924_s6 }
0x1ad5   :  { %10085 = vrot.lane.b32.xlu1 %v13749_v10, %s13924_s6 }
0x1ad6   :  { %v13751_v62 = vpop.eup %13750 }
0x1ad7   :  { %v13753_v20 = vpop.eup %13752  ;;  %v10054_v17 = vadd.f32 1.0, %v13751_v62 }
0x1ad8   :  { %v10053_v44 = vadd.f32 1.0, %v13753_v20 }
0x1ad9   :  { %13754 = vrcp.f32 %v10054_v17 }
0x1ada   :  { %13756 = vrcp.f32 %v10053_v44 }
0x1adb   :  { %13758 = vpow2.f32 %v10673_v49  ;;  %v10162_v49 = vld [vmem:[%s15863_s10 + $0x8] sm:$0xff] }
0x1ae3   :  { %v13755_v19 = vpop.eup %13754 }
0x1ae4   :  { %v13757_v48 = vpop.eup %13756  ;;  %v10079_v1 = vmul.f32 %v13755_v19, %v15459_v51  ;;  %v15589_v51 = vsub.s32 %v1679_v57, %v14208_v9  ;;  %v10172_v57 = vld [vmem:[%s15863_s10 + $0x58] sm:$0xff] }
0x1ae5   :  { %v13759_v47 = vpop.eup %13758 }
0x1ae6   :  { %v10062_v0 = vadd.f32 1.0, %v13759_v47  ;;  %v2894_v5 = vrot.slane %v2887_v55, %v15589_v51  ;;  %v4102_v62 = vrot.slane %v4095_v59, %v15589_v51  ;;  %v5310_v36 = vrot.slane %v5303_v2, %v15589_v51 }
0x1ae7   :  { %v7709_v28 = vrot.slane %v7702_v53, %v15589_v51  ;;  %v8917_v24 = vrot.slane %v8910_v14, %v15589_v51 }
0x1ae8   :  { %13760 = vrcp.f32 %v10062_v0  ;;  %v2901_v33 = vrot.slane %v2894_v5, %v15589_v51  ;;  %v4109_v63 = vrot.slane %v4102_v62, %v15589_v51  ;;  %v5317_v55 = vrot.slane %v5310_v36, %v15589_v51 }
0x1ae9   :  { %v2910_v59 = vcombine.high %v2894_v5, %v2894_v5  ;;  %v7716_v7 = vrot.slane %v7709_v28, %v15589_v51  ;;  %v8924_v2 = vrot.slane %v8917_v24, %v15589_v51  ;;  %v5326_v27 = vcombine.high %v5310_v36, %v5310_v36 }
0x1aea   :  { %v10011_v21 = vpop.f32.mrb[66].mxu1  ;;  %v7725_v15 = vcombine.high %v7709_v28, %v7709_v28 }
0x1aeb   :  { %v10012_v22 = vadd.f32 %v10011_v21, %v9772_v45  ;;  %v10013_v29 = vpop.f32.mrb[67].mxu1  ;;  %v2917_v46 = vrot.slane %v2910_v59, %v15589_v51  ;;  %v5333_v53 = vrot.slane %v5326_v27, %v15589_v51  ;;  %v10176_v59 = vld [vmem:[%s15863_s10 + $0x78] sm:$0xff] }
0x1aec   :  { %v7732_v44 = vrot.slane %v7725_v15, %v15589_v51 }
0x1aed   :  { %v15572_v32 = vadd.f32 %v10036_v11, %v10012_v22 }
0x1aef   :  { %v10675_v5 = vmul.f32 -1.442695, %v15572_v32 }
0x1af2   :  { %v13761_v43 = vpop.eup %13760 }
0x1af3   :  { %v10080_v58 = vmul.f32 %v13761_v43, %v15461_v38  ;;  %v1683_v38 = vrot.slane %v1676_v30, %v15589_v51  ;;  %v6501_v30 = vrot.slane %v6494_v31, %v15589_v51  ;;  %v4118_v31 = vcombine.high %v4102_v62, %v4102_v62  ;;  %v10165_v43 = vld [vmem:[%s15863_s10 + $0x20] sm:$0xff] }
0x1af5   :  { %v1690_v20 = vrot.slane %v1683_v38, %v15589_v51  ;;  %v6508_v42 = vrot.slane %v6501_v30, %v15589_v51  ;;  %v1702_v12 = vcombine.high %v1683_v38, %v1683_v38  ;;  %v6517_v14 = vcombine.high %v6501_v30, %v6501_v30  ;;  %v10174_v30 = vld [vmem:[%s15863_s10 + $0x68] sm:$0xff] }
0x1af6   :  { %v4125_v17 = vrot.slane %v4118_v31, %v15589_v51 }
0x1af7   :  { %v1709_v35 = vrot.slane %v1702_v12, %v15589_v51 }
0x1b46   :  { %v10084_v54 = vpop.permute.xlu0 %10083 }
0x1b47   :  { %v10086_v37 = vpop.permute.xlu1 %10085 }
0x1b48   :  { %v10087_v23 = vsel %vm869_vm7, %v10084_v54, %v10086_v37  ;;  %v10091_v45 = vmul.f32 %v13755_v19, %v10086_v37  ;;  %v10275_v54 = vunpack.c.0.s8 %v10274_v25  ;;  %v8933_v19 = vcombine.high %v8917_v24, %v8917_v24  ;;  %v10178_v25 = vld [vmem:[%s15863_s10 + $0x88] sm:$0xf] }
0x1b49   :  { %v10090_v6 = vmul.f32 %v13757_v48, %v10087_v23  ;;  %v6524_v37 = vrot.slane %v6517_v14, %v15589_v51 }
0x1b4a   :  { %10096 = vrot.lane.b32.xlu1 %v10091_v45, %s13923_s17  ;;  %v15647_v48 = vsub.s32 %v10275_v54, %v14208_v9  ;;  %v8940_v45 = vrot.slane %v8933_v19, %v15589_v51  ;;  %v10163_v9 = vld [vmem:[%s15863_s10 + $0x10] sm:$0xff] }
0x1b4b   :  { %10094 = vrot.lane.b32.xlu0 %v10090_v6, %s13923_s17  ;;  %v10161_v6 = vld [vmem:[%s15863_s10] sm:$0xff]  ;;  %v13246_v16 = vpack.c.bf16 %v10164_v4, %v10163_v9 }
0x1b4c   :  { %v10279_v23 = vrot.slane %v10272_v56, %v15647_v48  ;;  %v13243_v47 = vpack.c.bf16 %v10162_v49, %v10161_v6  ;;  %v10313_v56 = vrot.slane %v10306_v52, %v15647_v48  ;;  %v13252_v52 = vpack.c.bf16 %v10168_v50, %v10167_v39 }
0x1b4e   :  { %13244 = vmatpush1.bf16.msra.mxu0 %v13243_v47  ;;  %v10280_v0 = vcombine.high %v10279_v23, %v10279_v23  ;;  %v10314_v34 = vcombine.high %v10313_v56, %v10313_v56 }
0x1b4f   :  { %13245 = vmatprep.subr.bf16.mxu0 %v13921_v8 }
0x1b52   :  { %13247 = vmatpush1.bf16.msra.mxu0 %v13246_v16 }
0x1b53   :  { %13248 = vmatprep.subr.bf16.mxu0 %v13921_v8 }
0x1bbc   :  { %v10097_v60 = vpop.permute.xlu1 %10096 }
0x1bbd   :  { %v10095_v40 = vpop.permute.xlu0 %10094 }
0x1bbe   :  { %v10098_v10 = vsel %vm577_vm0, %v10095_v40, %v10097_v60  ;;  %v15580_v11 = vadd.f32 %v10095_v40, %v10079_v1  ;;  %v10166_v60 = vld [vmem:[%s15863_s10 + $0x28] sm:$0xff] }
0x1bbf   :  { %v15582_v21 = vadd.f32 %v10098_v10, %v10080_v58  ;;  %v13249_v1 = vpack.c.bf16 %v10166_v60, %v10165_v43  ;;  %v10170_v58 = vld [vmem:[%s15863_s10 + $0x48] sm:$0xff]  ;;  %v10171_v10 = vld [vmem:[%s15863_s10 + $0x50] sm:$0xff] }
0x1bc0   :  { %13762 = vtanh.f32 %v15580_v11  ;;  %v13255_v40 = vpack.c.bf16 %v10170_v58, %v10169_v13  ;;  %v13258_v38 = vpack.c.bf16 %v10172_v57, %v10171_v10 }
0x1bc1   :  { %13764 = vtanh.f32 %v15582_v21  ;;  %v10324_v22 = vcombine.low %v15580_v11, %v15582_v21  ;;  %13250 = vmatpush1.bf16.msra.mxu0 %v13249_v1 }
0x1bc2   :  { %13251 = vmatprep.subr.bf16.mxu0 %v13921_v8 }
0x1bc3   :  { %v10331_v13 = vrot.slane %v10324_v22, %v15647_v48 }
0x1bc5   :  { %13253 = vmatpush1.bf16.msra.mxu0 %v13252_v52 }
0x1bc6   :  { %13254 = vmatprep.subr.bf16.mxu0 %v13921_v8 }
0x1bc9   :  { %13256 = vmatpush1.bf16.msra.mxu0 %v13255_v40 }
0x1bca   :  { %v13763_v29 = vpop.eup %13762  ;;  %13257 = vmatprep.subr.bf16.mxu0 %v13921_v8 }
0x1bcb   :  { %v13765_v26 = vpop.eup %13764  ;;  %10107 = vrot.lane.b32.xlu0 %v13763_v29, %s13925_s19  ;;  %v10674_v29 = vmul.f32 -1.442695, %v15566_v41 }
0x1bcc   :  { %10109 = vrot.lane.b32.xlu1 %v13765_v26, %s13925_s19 }
0x1bcd   :  { %13259 = vmatpush1.bf16.msra.mxu0 %v13258_v38  ;;  %13766 = vpow2.f32 %v10674_v29 }
0x1bce   :  { %13260 = vmatprep.subr.bf16.mxu0 %v13921_v8  ;;  %13768 = vpow2.f32 %v10675_v5 }
0x1bcf   :  { %1691 = vrot.lane.b32.xlu0 %v1690_v20, %s13926_s2 }
0x1bd0   :  { %2902 = vrot.lane.b32.xlu1 %v2901_v33, %s13926_s2  ;;  %v10173_v33 = vld [vmem:[%s15863_s10 + $0x60] sm:$0xff] }
0x1bd3   :  { %4110 = vrot.lane.b32.xlu0 %v4109_v63, %s13926_s2  ;;  %v13261_v63 = vpack.c.bf16 %v10174_v30, %v10173_v33 }
0x1bd4   :  { %5318 = vrot.lane.b32.xlu1 %v5317_v55, %s13926_s2 }
0x1bd5   :  { %13262 = vmatpush1.bf16.msra.mxu0 %v13261_v63 }
0x1bd6   :  { %13263 = vmatprep.subr.bf16.mxu0 %v13921_v8 }
0x1bd7   :  { %6509 = vrot.lane.b32.xlu0 %v6508_v42, %s13926_s2  ;;  %v13767_v26 = vpop.eup %13766  ;;  %v10175_v42 = vld [vmem:[%s15863_s10 + $0x70] sm:$0xff]  ;;  %s13930_s10 = smov [#allocation10]  }
0x1bd8   :  { %7717 = vrot.lane.b32.xlu1 %v7716_v7, %s13926_s2  ;;  %v13769_v62 = vpop.eup %13768  ;;  %v10073_v20 = vadd.f32 1.0, %v13767_v26 }
0x1bd9   :  { %v10074_v36 = vadd.f32 1.0, %v13769_v62 }
0x1bda   :  { %13770 = vrcp.f32 %v10073_v20 }
0x1bdb   :  { %8925 = vrot.lane.b32.xlu0 %v8924_v2, %s13926_s2  ;;  %13772 = vrcp.f32 %v10074_v36  ;;  %v13264_v2 = vpack.c.bf16 %v10176_v59, %v10175_v42 }
0x1bdc   :  { %2918 = vrot.lane.b32.xlu1 %v2917_v46, %s13926_s2 }
0x1bdd   :  { %13265 = vmatpush1.bf16.msra.mxu0 %v13264_v2 }
0x1bde   :  { %13266 = vmatprep.subr.bf16.mxu0 %v13921_v8 }
0x1bdf   :  { %1710 = vrot.lane.b32.xlu0 %v1709_v35, %s13926_s2 }
0x1be0   :  { %5334 = vrot.lane.b32.xlu1 %v5333_v53, %s13926_s2 }
0x1be3   :  { %4126 = vrot.lane.b32.xlu0 %v4125_v17, %s13926_s2  ;;  %v13267_v17 = vpack.c.bf16 %v10178_v25, %v10177_v61 }
0x1be4   :  { %7733 = vrot.lane.b32.xlu1 %v7732_v44, %s13926_s2  ;;  %v13771_v28 = vpop.eup %13770 }
0x1be5   :  { %v13773_v55 = vpop.eup %13772  ;;  %13269 = vmatpush1.bf16.msk.msra.mxu0 %vm14099_vm3, %v13267_v17 }
0x1be7   :  { %6525 = vrot.lane.b32.xlu0 %v6524_v37, %s13926_s2 }
0x1beb   :  { %8941 = vrot.lane.b32.xlu0 %v8940_v45, %s13926_s2 }
0x1bef   :  { %10281 = vrot.lane.b32.xlu0 %v10280_v0, %s13926_s2 }
0x1bf3   :  { %10315 = vrot.lane.b32.xlu0 %v10314_v34, %s13929_s25 }
0x1c3d   :  { %v10108_v41 = vpop.permute.xlu0 %10107 }
0x1c3e   :  { %v10110_v32 = vpop.permute.xlu1 %10109  ;;  %v10114_v7 = vmul.f32 %v13771_v28, %v10108_v41 }
0x1c3f   :  { %v10111_v24 = vsel %vm894_vm8, %v10108_v41, %v10110_v32 }
0x1c40   :  { %v10115_v12 = vmul.f32 %v13773_v55, %v10111_v24 }
0x1c41   :  { %v1692_v27 = vpop.permute.xlu0 %1691 }
0x1c42   :  { %v10118_v31 = vcombine.low %v10114_v7, %v10115_v12  ;;  %v1693_v35 = vrot.slane %v1692_v27, 1  ;;  %v2903_v15 = vpop.permute.xlu1 %2902 }
0x1c43   :  { %v2904_v53 = vrot.slane %v2903_v15, 1 }
0x1c44   :  { %v10125_v18 = vrot.slane %v10118_v31, %v15589_v51  ;;  %v1694_v14 = vsel %vm1325_vm9, %v1692_v27, %v1693_v35  ;;  %v10296_v60 = vrot.slane %v10118_v31, %v15647_v48 }
0x1c45   :  { %1700 = vst.msk [vmem:[#allocation2] ss:$8 sm:$0x3] %vm15721_vm10, %v1694_v14  ;;  %v2905_v44 = vsel %vm1325_vm9, %v2903_v15, %v2904_v53  ;;  %v4111_v54 = vpop.permute.xlu0 %4110 }
0x1c46   :  { %v10141_v8 = vcombine.high %v10125_v18, %v10125_v18  ;;  %2908 = vst.msk [vmem:[#allocation2 + $0x1] ss:$8 sm:$0x3] %vm15721_vm10, %v2905_v44  ;;  %v4112_v19 = vrot.slane %v4111_v54, 1  ;;  %v5319_v37 = vpop.permute.xlu1 %5318  ;;  %v10132_v23 = vrot.slane %v10125_v18, %v15589_v51 }
0x1c47   :  { %v5320_v45 = vrot.slane %v5319_v37, 1 }
0x1c48   :  { %v4113_v6 = vsel %vm1325_vm9, %v4111_v54, %v4112_v19  ;;  %10133 = vrot.lane.b32.xlu1 %v10132_v23, %s13926_s2  ;;  %v10148_v16 = vrot.slane %v10141_v8, %v15589_v51 }
0x1c49   :  { %4116 = vst.msk [vmem:[#allocation2 + $0x2] ss:$8 sm:$0x3] %vm15721_vm10, %v4113_v6  ;;  %v5321_v49 = vsel %vm1325_vm9, %v5319_v37, %v5320_v45  ;;  %v6510_v9 = vpop.permute.xlu0 %6509 }
0x1c4a   :  { %5324 = vst.msk [vmem:[#allocation2 + $0x3] ss:$8 sm:$0x3] %vm15721_vm10, %v5321_v49  ;;  %v6511_v47 = vrot.slane %v6510_v9, 1  ;;  %v7718_v4 = vpop.permute.xlu1 %7717 }
0x1c4b   :  { %v7719_v3 = vrot.slane %v7718_v4, 1 }
0x1c4c   :  { %v6512_v56 = vsel %vm1325_vm9, %v6510_v9, %v6511_v47  ;;  %10149 = vrot.lane.b32.xlu1 %v10148_v16, %s13926_s2 }
0x1c4d   :  { %6515 = vst.msk [vmem:[#allocation2 + $0x4] ss:$8 sm:$0x3] %vm15721_vm10, %v6512_v56  ;;  %v7720_v0 = vsel %vm1325_vm9, %v7718_v4, %v7719_v3  ;;  %v8926_v43 = vpop.permute.xlu0 %8925 }
0x1c4e   :  { %7723 = vst.msk [vmem:[#allocation2 + $0x5] ss:$8 sm:$0x3] %vm15721_vm10, %v7720_v0  ;;  %v8927_v1 = vrot.slane %v8926_v43, 1  ;;  %v2919_v34 = vpop.permute.xlu1 %2918 }
0x1c4f   :  { %v2920_v39 = vrot.slane %v2919_v34, 1 }
0x1c50   :  { %v8928_v51 = vsel %vm1325_vm9, %v8926_v43, %v8927_v1  ;;  %10297 = vrot.lane.b32.xlu1 %v10296_v60, %s13926_s2  ;;  %s10356_s2 = sshll.u32 %s13930_s10, 4  ;;  %s10357_s2 = int_to_ptr.vmem [resolvable:$true] %s10356_s2 }
0x1c51   :  { %8931 = vst.msk [vmem:[#allocation2 + $0x6] ss:$8 sm:$0x3] %vm15721_vm10, %v8928_v51  ;;  %v2921_v50 = vsel %vm1325_vm9, %v2919_v34, %v2920_v39  ;;  %v1711_v52 = vpop.permute.xlu0 %1710  ;;  %s13840_s30 = scalar_lea.vmem %s10357_s2, 128  ;;  %p13845_p11 = scmp.lt.s32.totalorder %s10357_s2, %s10357_s2 }
0x1c52   :  { %2924 = vst.msk [vmem:[#allocation2 + $0x11] ss:$8 sm:$0x3] %vm15721_vm10, %v2921_v50  ;;  %v1712_v58 = vrot.slane %v1711_v52, 1  ;;  %v5335_v40 = vpop.permute.xlu1 %5334  ;;  %p13841_p10 = scmp.ne.s32.totalorder %s10357_s2, %s13840_s30  ;;  %p13846_p12 = scmp.lt.s32.totalorder %s13840_s30, %s13840_s30 }
0x1c53   :  { %v5336_v10 = vrot.slane %v5335_v40, 1 }
0x1c54   :  { %v1713_v57 = vsel %vm1325_vm9, %v1711_v52, %v1712_v58  ;;  %10332 = vrot.lane.b32.xlu1 %v10331_v13, %s13929_s25  ;;  %p13847_p13 = por %p13846_p12, %p13845_p11 }
0x1c55   :  { %1716 = vst.msk [vmem:[#allocation2 + $0x10] ss:$8 sm:$0x3] %vm15721_vm10, %v1713_v57  ;;  %v5337_v38 = vsel %vm1325_vm9, %v5335_v40, %v5336_v10  ;;  %v4127_v29 = vpop.permute.xlu0 %4126 }
0x1c56   :  { %5340 = vst.msk [vmem:[#allocation2 + $0x13] ss:$8 sm:$0x3] %vm15721_vm10, %v5337_v38  ;;  %v4128_v11 = vrot.slane %v4127_v29, 1  ;;  %v7734_v21 = vpop.permute.xlu1 %7733  ;;  %p13848_p0 = pnand %p13847_p13, %p13841_p10 }
0x1c57   :  { %v7735_v22 = vrot.slane %v7734_v21, 1 }
0x1c58   :  { %v4129_v48 = vsel %vm1325_vm9, %v4127_v29, %v4128_v11 }
0x1c59   :  { %4132 = vst.msk [vmem:[#allocation2 + $0x12] ss:$8 sm:$0x3] %vm15721_vm10, %v4129_v48  ;;  %v7736_v5 = vsel %vm1325_vm9, %v7734_v21, %v7735_v22  ;;  %v6526_v26 = vpop.permute.xlu0 %6525 }
0x1c5a   :  { %7739 = vst.msk [vmem:[#allocation2 + $0x15] ss:$8 sm:$0x3] %vm15721_vm10, %v7736_v5  ;;  %v6527_v62 = vrot.slane %v6526_v26, 1 }
0x1c5c   :  { %v6528_v20 = vsel %vm1325_vm9, %v6526_v26, %v6527_v62 }
0x1c5d   :  { %6531 = vst.msk [vmem:[#allocation2 + $0x14] ss:$8 sm:$0x3] %vm15721_vm10, %v6528_v20  ;;  %v8942_v36 = vpop.permute.xlu0 %8941 }
0x1c5e   :  { %v8943_v33 = vrot.slane %v8942_v36, 1 }
0x1c60   :  { %v8944_v30 = vsel %vm1325_vm9, %v8942_v36, %v8943_v33 }
0x1c61   :  { %8947 = vst.msk [vmem:[#allocation2 + $0x16] ss:$8 sm:$0x3] %vm15721_vm10, %v8944_v30  ;;  %v10282_v63 = vpop.permute.xlu0 %10281 }
0x1c62   :  { %v10283_v28 = vrot.slane %v10282_v63, 2 }
0x1c64   :  { %v10284_v32 = vsel %vm1325_vm9, %v10282_v63, %v10283_v28 }
0x1c65   :  { %10289 = vst.msk [vmem:[#allocation10] sm:$0xf] %vm15788_vm13, %v10284_v32  ;;  %v10316_v55 = vpop.permute.xlu0 %10315 }
0x1c66   :  { %v10317_v24 = vrot.slane %v10316_v55, 2 }
0x1c68   :  { %v10319_v42 = vsel %vm10318_vm14, %v10316_v55, %v10317_v24 }
0x1c69   :  { %10321 = vst.msk [vmem:[#allocation12] sm:$0xf] %vm15788_vm13, %v10319_v42 }
0x1cba   :  { %v10134_v59 = vpop.permute.xlu1 %10133 }
0x1cbb   :  { %v10135_v7 = vrot.slane %v10134_v59, 1 }
0x1cbd   :  { %v10136_v12 = vsel %vm1325_vm9, %v10134_v59, %v10135_v7 }
0x1cbe   :  { %10139 = vst.msk [vmem:[#allocation2 + $0x7] ss:$8 sm:$0x3] %vm15721_vm10, %v10136_v12  ;;  %v10150_v2 = vpop.permute.xlu1 %10149 }
0x1cbf   :  { %v10151_v27 = vrot.slane %v10150_v2, 1 }
0x1cc1   :  { %v10152_v31 = vsel %vm1325_vm9, %v10150_v2, %v10151_v27 }
0x1cc2   :  { %10155 = vst.msk [vmem:[#allocation2 + $0x17] ss:$8 sm:$0x3] %vm15721_vm10, %v10152_v31  ;;  %v10298_v35 = vpop.permute.xlu1 %10297 }
0x1cc3   :  { %v10299_v15 = vrot.slane %v10298_v35, 2 }
0x1cc5   :  { %v10300_v53 = vsel %vm1325_vm9, %v10298_v35, %v10299_v15  ;;  %v10158_v61 = vld [vmem:[#allocation2 + $0x8] sm:$0xff]  ;;  %v10157_v25 = vld [vmem:[#allocation2] sm:$0xff] }
0x1cc6   :  { %10303 = vst.msk [vmem:[#allocation10 + $0x4] sm:$0xf] %vm15788_vm13, %v10300_v53  ;;  %v10333_v18 = vpop.permute.xlu1 %10332  ;;  %10678 = vmatprep.mubr.msk.f32.mxu0 %vm577_vm0, %v10158_v61 }
0x1cc7   :  { %v10334_v14 = vrot.slane %v10333_v18, 2  ;;  %10260 = vmatmul.mubr.f32.vlgmr.msra.gmra.mrb[56].mxu0 %v10157_v25 }
0x1cc9   :  { %v10335_v17 = vsel %vm10318_vm14, %v10333_v18, %v10334_v14  ;;  %v10160_v44 = vld [vmem:[#allocation2 + $0x18] sm:$0xff]  ;;  %v10159_v54 = vld [vmem:[#allocation2 + $0x10] sm:$0xff] }
0x1cca   :  { %10338 = vst.msk [vmem:[#allocation12 + $0x4] sm:$0xf] %vm15788_vm13, %v10335_v17  ;;  %10679 = vmatprep.mubr.msk.f32.mxu0 %vm577_vm0, %v10160_v44 }
0x1ccb   :  { %10265 = vmatmul.mubr.f32.gmra.mrb[58].mxu0 %v10159_v54 }
0x1ccc   :  { %13851 = shalt.err (!%p13848_p0)
}
0x1ccd   :  { %s13852_s8 = scalar_lea.hbm %s15866_s13, 128 }
0x1cce   :  { %p13853_p1 = scmp.ne.s32.totalorder %s15866_s13, %s13852_s8  ;;  %p13856_p2 = scmp.lt.u32.totalorder %s13852_s8, %s15866_s13 }
0x1cd0   :  { %p13858_p3 = pnand %p13856_p2, %p13853_p1 }
0x1cd2   :  { %13861 = shalt.err (!%p13858_p3)
}
0x1cd3   :  { %s13931_s29 = smov 64   ;;  %s13932_s0 = smov 4  }
0x1cd4   :  { %10362 = dma.vmem_to_hbm [thread:$0]  %s10357_s2, 128, %s15866_s13, [#allocation11], %s13931_s29, %s13931_s29, %s13932_s0  }
0x1cd5   :  { %s13933_s4 = smov [#allocation12]  }
0x1cd6   :  { %s10368_s9 = sshll.u32 %s13933_s4, 4  ;;  %s10369_s9 = int_to_ptr.vmem [resolvable:$true] %s10368_s9 }
0x1cd7   :  { %s13862_s17 = scalar_lea.vmem %s10369_s9, 128  ;;  %p13867_p5 = scmp.lt.s32.totalorder %s10369_s9, %s10369_s9 }
0x1cd8   :  { %p13863_p4 = scmp.ne.s32.totalorder %s10369_s9, %s13862_s17  ;;  %p13868_p6 = scmp.lt.s32.totalorder %s13862_s17, %s13862_s17 }
0x1cda   :  { %p13869_p7 = por %p13868_p6, %p13867_p5 }
0x1cdc   :  { %p13870_p8 = pnand %p13869_p7, %p13863_p4 }
0x1cde   :  { %13873 = shalt.err (!%p13870_p8)
}
0x1cdf   :  { %s13874_s19 = scalar_lea.hbm %s15867_s14, 128 }
0x1ce0   :  { %p13875_p9 = scmp.ne.s32.totalorder %s15867_s14, %s13874_s19  ;;  %p13878_p10 = scmp.lt.u32.totalorder %s13874_s19, %s15867_s14 }
0x1ce2   :  { %p13880_p11 = pnand %p13878_p10, %p13875_p9 }
0x1ce4   :  { %13883 = shalt.err (!%p13880_p11)
}
0x1ce5   :  { %10374 = dma.vmem_to_hbm [thread:$0]  %s10369_s9, 128, %s15867_s14, [#allocation11], %s13931_s29, %s13931_s29, %s13932_s0  }
0x1ce6   :  { %v10676_v46 = vld [vmem:[%s15864_s11] ss:$0 sm:$0xff]  ;;  %s13934_s10 = smov [#allocation9]  }
0x1ce7   :  { %s10344_s2 = sshll.u32 %s13934_s10, 4  ;;  %s10345_s2 = int_to_ptr.vmem [resolvable:$true] %s10344_s2 }
0x1ce8   :  { %s13884_s30 = scalar_lea.vmem %s10345_s2, 256  ;;  %p13889_p13 = scmp.lt.s32.totalorder %s10345_s2, %s10345_s2 }
0x1ce9   :  { %p13885_p12 = scmp.ne.s32.totalorder %s10345_s2, %s13884_s30  ;;  %p13890_p0 = scmp.lt.s32.totalorder %s13884_s30, %s13884_s30 }
0x1ceb   :  { %p13891_p1 = por %p13890_p0, %p13889_p13 }
0x1ced   :  { %p13892_p2 = pnand %p13891_p1, %p13885_p12 }
0x1d9a   :  { %v10261_v8 = vpop.f32.mrb[56].mxu0 }
0x1d9b   :  { %v10262_v19 = vadd.f32 %v10676_v46, %v10261_v8  ;;  %v10263_v37 = vpop.f32.mrb[57].mxu0 }
0x1d9d   :  { %10270 = vst.msk [vmem:[#allocation9] sm:$0xff] %vm107_vm4, %v10262_v19 }
0x1d9e   :  { %v10266_v23 = vpop.f32.mrb[58].mxu0 }
0x1d9f   :  { %v10267_v45 = vadd.f32 %v10676_v46, %v10266_v23  ;;  %v10268_v6 = vpop.f32.mrb[59].mxu0 }
0x1da1   :  { %10271 = vst.msk [vmem:[#allocation9 + $0x8] sm:$0xff] %vm107_vm4, %v10267_v45 }
0x1da2   :  { %13895 = shalt.err (!%p13892_p2)
}
0x1da3   :  { %s13896_s23 = scalar_lea.hbm %s15865_s12, 256 }
0x1da4   :  { %p13897_p3 = scmp.ne.s32.totalorder %s15865_s12, %s13896_s23  ;;  %p13900_p4 = scmp.lt.u32.totalorder %s13896_s23, %s15865_s12 }
0x1da6   :  { %p13902_p5 = pnand %p13900_p4, %p13897_p3 }
0x1da8   :  { %13905 = shalt.err (!%p13902_p5)
}
0x1da9   :  { %s13935_s24 = smov 128   ;;  %s13936_s28 = smov 8  }
0x1daa   :  { %10350 = dma.vmem_to_hbm [thread:$0]  %s10345_s2, 256, %s15865_s12, [#allocation5], %s13935_s24, %s13935_s24, %s13936_s28  }
0x1dab   :  { %13910 = dma.done.wait [#allocation5], 256  }
0x1dac   :  { %13911 = vsyncadd [#allocation5], 4294967040 }
0x1dad   :  { %13912 = dma.done.wait [#allocation11], 256  }
0x1dae   :  { %13913 = vsyncadd [#allocation11], 4294967040 }
0x1daf   :  { %10384 = vsyncpa [#allocation4], 1 }
0x1db0   :  { %10385 = vsyncpa [#allocation7], 1 }
0x1db1   :  { %10386 = vsyncpa [#allocation5], 1 }
0x1db2   :  { %10387 = vsyncpa [#allocation11], 1 }

</bundles_post_ra>
